<compile_context>
chip_gen: v5e
topology: v5e:2x2
jax: 0.10.0
libtpu: 0.0.40
codegen_flags: <defaults>
</compile_context>

<pallas_src>
import jax
import jax.numpy as jnp
import numpy as np
from jax.experimental import pallas as pl
from jax.experimental.pallas import tpu as pltpu


def _round_up(x, m):
    return ((x + m - 1) // m) * m


def _lstm_fc_chunk_kernel(x_ref, len_ref, wih_ref, whh_ref, b_ref, wfc_ref,
                          bfc_ref, out_ref, h_scr, c_scr, xg_scr, ho_scr):
    """One (batch-chunk, time-chunk) grid step of LSTM + FC.

    x_ref   : (Bb, Tt, D)   bf16  input chunk (batch-first)
    len_ref : (Bb, 1)       i32   sequence lengths
    wih_ref : (D, 4Hp)      bf16  W_ih^T (gate order i,f,g,o; each gate padded to Hp)
    whh_ref : (Hp, 4Hp)     bf16  W_hh^T
    b_ref   : (1, 4Hp)      f32   b_ih + b_hh (padded)
    wfc_ref : (Hp, Ep)      bf16  W_fc^T (padded)
    bfc_ref : (1, Ep)       f32
    out_ref : (Bb, Tt, Ep)  f32   output chunk (batch-first)
    h_scr   : (Bb, Hp)      f32   hidden state (persists across time chunks)
    c_scr   : (Bb, Hp)      f32   cell state   (persists across time chunks)
    xg_scr  : (Tt, Bb, 4Hp) f32   hoisted input-projection gates (time-major)
    ho_scr  : (Tt, Bb, Hp)  bf16  raw hidden outputs of this chunk (time-major)
    """
    Bb, Tt, D = x_ref.shape
    Hp = whh_ref.shape[0]
    Ep = wfc_ref.shape[1]
    t_chunk = pl.program_id(1)

    # Recurrent-state reset at the start of every batch chunk.  NOTE: relies on
    # the time axis being the innermost (fastest-varying) grid axis with
    # sequential per-core iteration (row-major grid order) -- do not reorder.
    @pl.when(t_chunk == 0)
    def _():
        h_scr[...] = jnp.zeros_like(h_scr)
        c_scr[...] = jnp.zeros_like(c_scr)

    # ---- Hoisted input projection: one (Tt*Bb, D) @ (D, 4Hp) bf16 MXU matmul
    # per chunk (bias folded in), stored time-major so the per-step read is a
    # dense (Bb, 4Hp) slab.
    x_tm = jnp.transpose(x_ref[...], (1, 0, 2)).reshape(Tt * Bb, D)
    xg = jnp.dot(x_tm, wih_ref[...], preferred_element_type=jnp.float32)
    xg_scr[...] = (xg + b_ref[...]).reshape(Tt, Bb, 4 * Hp)

    lens = len_ref[...]                      # (Bb, 1) int32
    t0 = t_chunk * Tt                        # global time offset of this chunk

    # ---- Serial recurrence: h/c are loop carries (VMEM touched once per chunk);
    # per step only a (Bb, Hp) @ (Hp, 4Hp) bf16 matmul + f32 gate math.
    def step(t, carry):
        h, c = carry
        gates = xg_scr[t] + jnp.dot(h.astype(jnp.bfloat16), whh_ref[...],
                                    preferred_element_type=jnp.float32)
        i_g = jax.nn.sigmoid(gates[:, 0 * Hp:1 * Hp])
        f_g = jax.nn.sigmoid(gates[:, 1 * Hp:2 * Hp])
        g_g = jnp.tanh(gates[:, 2 * Hp:3 * Hp])
        o_g = jax.nn.sigmoid(gates[:, 3 * Hp:4 * Hp])
        c_new = f_g * c + i_g * g_g
        h_new = o_g * jnp.tanh(c_new)
        # Store the *raw* hidden output; the output-path padding mask is applied
        # chunk-wide after the FC (cheaper than a per-step select here).
        ho_scr[t] = h_new.astype(ho_scr.dtype)
        # packed-sequence semantics: state only advances on valid timesteps.
        valid = (t0 + t) < lens              # (Bb, 1) -> broadcasts over Hp
        return jnp.where(valid, h_new, h), jnp.where(valid, c_new, c)

    h_f, c_f = jax.lax.fori_loop(0, Tt, step, (h_scr[...], c_scr[...]), unroll=8)
    h_scr[...] = h_f
    c_scr[...] = c_f

    # ---- Hoisted FC: one (Tt*Bb, Hp) @ (Hp, Ep) bf16 MXU matmul per chunk.
    y = jnp.dot(ho_scr[...].reshape(Tt * Bb, Hp), wfc_ref[...],
                preferred_element_type=jnp.float32) + bfc_ref[...]
    y = y.reshape(Tt, Bb, Ep)
    # pad_packed_sequence zeroes padded LSTM outputs -> fc output == bias there.
    t_ids = t0 + jax.lax.broadcasted_iota(jnp.int32, (Tt, Bb, 1), 0)
    valid = t_ids < lens[None, :, :]
    y = jnp.where(valid, y, bfc_ref[...][None, :, :])
    # One transpose per chunk back to batch-first + a single lane-dense store.
    out_ref[...] = jnp.transpose(y, (1, 0, 2)).astype(out_ref.dtype)


def _pick_batch_block(B):
    """Divisor of B, multiple of 8, <= B//2 when B >= 16 so the 'parallel'
    batch axis can actually split across both v7x TensorCores."""
    if B < 16:
        return B
    for cand in range(min(64, B // 2), 7, -1):
        if cand % 8 == 0 and B % cand == 0:
            return cand
    return B


def acoustic_encoder_forward(inputs, input_lengths, params, *, time_chunk=None):
    """inputs: (B, L, input_dim); input_lengths: (B,) ints (host/concrete).

    Returns (B, t_max, encoding_dim) f32 with t_max = max(input_lengths).
    Like the PyTorch module, t_max is derived from concrete lengths, so
    `input_lengths` must not be a traced value (cannot be jitted over).
    """
    w_ih, w_hh, b_ih, b_hh, w_fc, b_fc = params
    B, L, D = inputs.shape
    H = w_hh.shape[1]
    E = w_fc.shape[0]
    Hp = _round_up(H, 128)      # lane-aligned gate slices
    Ep = _round_up(E, 128)      # lane-dense output store

    t_max = int(np.max(np.asarray(input_lengths)))   # host-side, like PyTorch

    # --- VMEM budget (generation-aware; v7x only has 64 MiB per TensorCore).
    vmem_limit = 48 * 1024 * 1024
    try:
        cap = int(pltpu.get_tpu_info().vmem_capacity_bytes)
        vmem_limit = int(min(96 * 1024 * 1024,
                             max(32 * 1024 * 1024, cap - 16 * 1024 * 1024)))
    except Exception:
        pass

    # --- tile selection (Tt multiple of 8, Bb a multiple-of-8 divisor of B).
    Bb = _pick_batch_block(B)
    if time_chunk is None:
        time_chunk = min(32, _round_up(t_max, 8))
    Tt = min(64, max(8, _round_up(int(time_chunk), 8)))

    def _vmem_est(bb, tt):
        stream = 2 * (bb * tt * D * 2 + bb * tt * Ep * 4)          # x/out double-buffered
        weights = ((D * 4 * Hp + Hp * 4 * Hp + Hp * Ep) * 2        # bf16 weights
                   + (4 * Hp + Ep) * 4 + bb * 4)                   # f32 biases + lens
        scratch = 2 * bb * Hp * 4 + tt * bb * 4 * Hp * 4 + tt * bb * Hp * 2
        return stream + 2 * weights + scratch                      # weights worst-case 2x

    budget = int(0.80 * vmem_limit)
    while Tt > 8 and _vmem_est(Bb, Tt) > budget:
        Tt -= 8
    while Bb >= 16 and (Bb // 2) % 8 == 0 and _vmem_est(Bb, Tt) > budget:
        Bb //= 2
    n_b = B // Bb
    T_pad = _round_up(t_max, Tt)
    n_t = T_pad // Tt

    # --- weight prep: pad each gate from H to Hp (and E to Ep), transpose once,
    # cast matmul operands to bf16 (accumulation stays f32 in-kernel).  Zero
    # padding keeps padded hidden/encoding units identically zero end-to-end.
    f32 = jnp.float32
    w_ih = jnp.asarray(w_ih, f32)                       # (4H, D)
    w_hh = jnp.asarray(w_hh, f32)                       # (4H, H)
    b_sum = jnp.asarray(b_ih, f32) + jnp.asarray(b_hh, f32)
    w_fc = jnp.asarray(w_fc, f32)                       # (E, H)
    b_fc = jnp.asarray(b_fc, f32)                       # (E,)

    def _pad_gate_rows(w):                              # (4H, X) -> (4Hp, X)
        w4 = w.reshape(4, H, w.shape[-1])
        return jnp.pad(w4, ((0, 0), (0, Hp - H), (0, 0))).reshape(4 * Hp, w.shape[-1])

    wih_t = _pad_gate_rows(w_ih).T.astype(jnp.bfloat16)                        # (D, 4Hp)
    whh_t = jnp.pad(_pad_gate_rows(w_hh),
                    ((0, 0), (0, Hp - H))).T.astype(jnp.bfloat16)              # (Hp, 4Hp)
    bias = jnp.pad(b_sum.reshape(4, H), ((0, 0), (0, Hp - H))).reshape(1, 4 * Hp)
    wfc_t = jnp.pad(w_fc, ((0, Ep - E), (0, Hp - H))).T.astype(jnp.bfloat16)   # (Hp, Ep)
    bfc = jnp.pad(b_fc, (0, Ep - E)).reshape(1, Ep)
    lens = jnp.asarray(input_lengths, jnp.int32).reshape(B, 1)

    # Batch-first bf16 input of exactly T_pad timesteps (crop / zero-pad time);
    # bf16 streaming halves the dominant HBM input traffic (esp. v5e).
    x = inputs.astype(jnp.bfloat16)
    if L >= T_pad:
        x = x[:, :T_pad, :]
    else:
        x = jnp.pad(x, ((0, 0), (0, T_pad - L), (0, 0)))

    flops = 2 * B * T_pad * (D * 4 * Hp + Hp * 4 * Hp + Hp * Ep)
    transc = 5 * B * T_pad * Hp
    bytes_accessed = (B * T_pad * D * 2 + B * T_pad * Ep * 4
                      + (D * 4 * Hp + Hp * 4 * Hp + Hp * Ep) * 2
                      + (4 * Hp + Ep) * 4 + B * 4)

    def _weight_spec(shape, single):
        if single:
            # constant-index resident block: one buffer is enough.
            return pl.BlockSpec(shape, lambda b, t: (0, 0),
                                pipeline_mode=pl.Buffered(1))
        return pl.BlockSpec(shape, lambda b, t: (0, 0))

    def _run(single_buffer_weights):
        in_specs = [
            pl.BlockSpec((Bb, Tt, D), lambda b, t: (b, t, 0)),     # x (streamed)
            pl.BlockSpec((Bb, 1), lambda b, t: (b, 0)),            # lengths
            _weight_spec((D, 4 * Hp), single_buffer_weights),      # W_ih^T
            _weight_spec((Hp, 4 * Hp), single_buffer_weights),     # W_hh^T
            _weight_spec((1, 4 * Hp), single_buffer_weights),      # bias
            _weight_spec((Hp, Ep), single_buffer_weights),         # W_fc^T
            _weight_spec((1, Ep), single_buffer_weights),          # fc bias
        ]
        out_spec = pl.BlockSpec((Bb, Tt, Ep), lambda b, t: (b, t, 0))
        scratch = [
            pltpu.VMEM((Bb, Hp), jnp.float32),             # h state
            pltpu.VMEM((Bb, Hp), jnp.float32),             # c state
            pltpu.VMEM((Tt, Bb, 4 * Hp), jnp.float32),     # hoisted input gates
            pltpu.VMEM((Tt, Bb, Hp), jnp.bfloat16),        # raw hidden outputs
        ]
        return pl.pallas_call(
            _lstm_fc_chunk_kernel,
            out_shape=jax.ShapeDtypeStruct((B, T_pad, Ep), jnp.float32),
            grid_spec=pltpu.PrefetchScalarGridSpec(
                num_scalar_prefetch=0,
                grid=(n_b, n_t),
                in_specs=in_specs,
                out_specs=out_spec,
                scratch_shapes=scratch,
            ),
            compiler_params=pltpu.CompilerParams(
                dimension_semantics=("parallel", "arbitrary"),
                vmem_limit_bytes=int(vmem_limit),
            ),
            cost_estimate=pl.CostEstimate(
                flops=int(flops),
                transcendentals=int(transc),
                bytes_accessed=int(bytes_accessed),
            ),
        )(x, lens, wih_t, whh_t, bias, wfc_t, bfc)

    try:
        out = jax.block_until_ready(_run(single_buffer_weights=True))
    except Exception:
        # pl.Buffered(1) unsupported on this jax version -> default double-buffer.
        out = _run(single_buffer_weights=False)

    # Crop time padding and the lane-padding of E (no-op when already exact).
    return out[:, :t_max, :E]


def _reference_forward(inputs, input_lengths, params):
    """Pure-JAX f32 reference mirroring the PyTorch packed-LSTM + fc semantics."""
    w_ih, w_hh, b_ih, b_hh, w_fc, b_fc = params
    B, L, D = inputs.shape
    H = w_hh.shape[1]
    t_max = int(np.max(np.asarray(input_lengths)))
    lens = jnp.asarray(input_lengths, jnp.int32)

    h = jnp.zeros((B, H), jnp.float32)
    c = jnp.zeros((B, H), jnp.float32)
    outs = []
    for t in range(t_max):
        x_t = inputs[:, t, :].astype(jnp.float32)
        gates = x_t @ w_ih.T + b_ih + h @ w_hh.T + b_hh
        i_g = jax.nn.sigmoid(gates[:, 0 * H:1 * H])
        f_g = jax.nn.sigmoid(gates[:, 1 * H:2 * H])
        g_g = jnp.tanh(gates[:, 2 * H:3 * H])
        o_g = jax.nn.sigmoid(gates[:, 3 * H:4 * H])
        c_new = f_g * c + i_g * g_g
        h_new = o_g * jnp.tanh(c_new)
        valid = (t < lens)[:, None]
        h = jnp.where(valid, h_new, h)
        c = jnp.where(valid, c_new, c)
        outs.append(jnp.where(valid, h_new, 0.0))
    lstm_out = jnp.stack(outs, axis=1)                 # (B, t_max, H)
    return lstm_out @ w_fc.T + b_fc[None, None, :]


if __name__ == "__main__":
    # Small shapes consistent with the module's forward.
    B, L = 2, 8
    INPUT_DIM, HIDDEN_DIM, ENCODING_DIM = 16, 32, 24

    key = jax.random.PRNGKey(0)
    k_x, k1, k2, k3, k4, k5, k6 = jax.random.split(key, 7)

    inputs = jax.random.normal(k_x, (B, L, INPUT_DIM), jnp.float32)

    # Deterministic synthetic parameters (PyTorch LSTM/Linear shapes).
    s = 0.1
    w_ih = s * jax.random.normal(k1, (4 * HIDDEN_DIM, INPUT_DIM), jnp.float32)
    w_hh = s * jax.random.normal(k2, (4 * HIDDEN_DIM, HIDDEN_DIM), jnp.float32)
    b_ih = s * jax.random.normal(k3, (4 * HIDDEN_DIM,), jnp.float32)
    b_hh = s * jax.random.normal(k4, (4 * HIDDEN_DIM,), jnp.float32)
    w_fc = s * jax.random.normal(k5, (ENCODING_DIM, HIDDEN_DIM), jnp.float32)
    b_fc = s * jax.random.normal(k6, (ENCODING_DIM,), jnp.float32)
    params = (w_ih, w_hh, b_ih, b_hh, w_fc, b_fc)

    # Case 1: full-length + shorter sequence; Case 2: t_max < L (exercises the
    # time padding/cropping path).  bf16 MXU operands -> loosened tolerance.
    for input_lengths in (np.array([8, 5], dtype=np.int32),
                          np.array([7, 3], dtype=np.int32)):
        logits = jax.block_until_ready(
            acoustic_encoder_forward(inputs, input_lengths, params))
        expected = jax.block_until_ready(
            _reference_forward(inputs, input_lengths, params))
        t_max = int(input_lengths.max())
        assert logits.shape == (B, t_max, ENCODING_DIM), logits.shape
        np.testing.assert_allclose(np.asarray(logits), np.asarray(expected),
                                   rtol=3e-2, atol=3e-2)

    print("KERNEL_OK")
</pallas_src>

<mosaic_0001>
module attributes {stable_mosaic.version = 11 : i64} {
  func.func @_lstm_fc_chunk_kernel(%arg0: i32, %arg1: i32, %arg2: memref<2x8x16xbf16, #tpu.memory_space<vmem>>, %arg3: memref<2x1xi32, #tpu.memory_space<vmem>>, %arg4: memref<16x512xbf16, #tpu.memory_space<vmem>>, %arg5: memref<128x512xbf16, #tpu.memory_space<vmem>>, %arg6: memref<1x512xf32, #tpu.memory_space<vmem>>, %arg7: memref<128x128xbf16, #tpu.memory_space<vmem>>, %arg8: memref<1x128xf32, #tpu.memory_space<vmem>>, %arg9: memref<2x8x128xf32, #tpu.memory_space<vmem>>, %arg10: memref<2x128xf32, #tpu.memory_space<vmem>>, %arg11: memref<2x128xf32, #tpu.memory_space<vmem>>, %arg12: memref<8x2x512xf32, #tpu.memory_space<vmem>>, %arg13: memref<8x2x128xbf16, #tpu.memory_space<vmem>>) attributes {dimension_semantics = [#tpu.dimension_semantics<parallel>, #tpu.dimension_semantics<arbitrary>], iteration_bounds = array<i64: 1, 1>, scalar_prefetch = 0 : i64, scratch_operands = 4 : i64, tpu.core_type = #tpu.core_type<tc>, window_params = [{transform_indices = @transform_0, window_bounds = array<i64: 2, 8, 16>}, {transform_indices = @transform_1, window_bounds = array<i64: 2, 1>}, {pipeline_mode = #tpu.pipeline_mode<synchronous>, transform_indices = @transform_2, window_bounds = array<i64: 16, 512>}, {pipeline_mode = #tpu.pipeline_mode<synchronous>, transform_indices = @transform_3, window_bounds = array<i64: 128, 512>}, {pipeline_mode = #tpu.pipeline_mode<synchronous>, transform_indices = @transform_4, window_bounds = array<i64: 1, 512>}, {pipeline_mode = #tpu.pipeline_mode<synchronous>, transform_indices = @transform_5, window_bounds = array<i64: 128, 128>}, {pipeline_mode = #tpu.pipeline_mode<synchronous>, transform_indices = @transform_6, window_bounds = array<i64: 1, 128>}, {transform_indices = @transform_7, window_bounds = array<i64: 2, 8, 128>}]} {
    %c0_i32 = arith.constant 0 : i32
    %0 = arith.cmpi eq, %arg1, %c0_i32 : i32
    %1 = arith.extui %0 : i1 to i32
    %c0_i32_0 = arith.constant 0 : i32
    %2 = arith.cmpi ne, %1, %c0_i32_0 : i32
    scf.if %2 {
      %cst_115 = arith.constant 0.000000e+00 : f32
      %410 = vector.broadcast %cst_115 : f32 to vector<2x128xf32>
      %c0_116 = arith.constant 0 : index
      %c0_117 = arith.constant 0 : index
      %411 = vector.load %arg10[%c0_116, %c0_117] : memref<2x128xf32, #tpu.memory_space<vmem>>, vector<2x128xf32>
      tpu.vector_store %arg10[%c0_116, %c0_117], %410 {strides = array<i32>} : memref<2x128xf32, #tpu.memory_space<vmem>>, vector<2x128xf32>,
      %cst_118 = arith.constant 0.000000e+00 : f32
      %412 = vector.broadcast %cst_118 : f32 to vector<2x128xf32>
      %c0_119 = arith.constant 0 : index
      %c0_120 = arith.constant 0 : index
      %413 = vector.load %arg11[%c0_119, %c0_120] : memref<2x128xf32, #tpu.memory_space<vmem>>, vector<2x128xf32>
      tpu.vector_store %arg11[%c0_119, %c0_120], %412 {strides = array<i32>} : memref<2x128xf32, #tpu.memory_space<vmem>>, vector<2x128xf32>,
    } else {
    }
    %c0 = arith.constant 0 : index
    %c0_1 = arith.constant 0 : index
    %c0_2 = arith.constant 0 : index
    %3 = vector.load %arg2[%c0, %c0_1, %c0_2] : memref<2x8x16xbf16, #tpu.memory_space<vmem>>, vector<2x8x16xbf16>
    %4 = tpu.transpose %3, [1, 0, 2] : vector<2x8x16xbf16> -> vector<8x2x16xbf16>
    %5 = vector.shape_cast %4 : vector<8x2x16xbf16> to vector<16x16xbf16>
    %c0_3 = arith.constant 0 : index
    %c0_4 = arith.constant 0 : index
    %6 = vector.load %arg4[%c0_3, %c0_4] : memref<16x512xbf16, #tpu.memory_space<vmem>>, vector<16x512xbf16>
    %cst = arith.constant dense<0.000000e+00> : vector<16x512xf32>
    %7 = tpu.matmul %5, %6, %cst {dimension_numbers = #tpu.dot_dimension_numbers<[1], [0], [0], [1], [0, 0, 1, 1], [], []>} : vector<16x16xbf16>, vector<16x512xbf16>, vector<16x512xf32> -> vector<16x512xf32>
    %c0_5 = arith.constant 0 : index
    %c0_6 = arith.constant 0 : index
    %8 = vector.load %arg6[%c0_5, %c0_6] : memref<1x512xf32, #tpu.memory_space<vmem>>, vector<1x512xf32>
    %9 = vector.broadcast %8 : vector<1x512xf32> to vector<16x512xf32>
    %10 = arith.addf %7, %9 : vector<16x512xf32>
    %11 = vector.shape_cast %10 : vector<16x512xf32> to vector<8x2x512xf32>
    %c0_7 = arith.constant 0 : index
    %c0_8 = arith.constant 0 : index
    %c0_9 = arith.constant 0 : index
    %12 = vector.load %arg12[%c0_7, %c0_8, %c0_9] : memref<8x2x512xf32, #tpu.memory_space<vmem>>, vector<8x2x512xf32>
    tpu.vector_store %arg12[%c0_7, %c0_8, %c0_9], %11 {strides = array<i32>} : memref<8x2x512xf32, #tpu.memory_space<vmem>>, vector<8x2x512xf32>,
    %c0_10 = arith.constant 0 : index
    %c0_11 = arith.constant 0 : index
    %13 = vector.load %arg3[%c0_10, %c0_11] : memref<2x1xi32, #tpu.memory_space<vmem>>, vector<2x1xi32>
    %c8_i32 = arith.constant 8 : i32
    %14 = arith.muli %arg1, %c8_i32 : i32
    %c0_12 = arith.constant 0 : index
    %c0_13 = arith.constant 0 : index
    %15 = vector.load %arg10[%c0_12, %c0_13] : memref<2x128xf32, #tpu.memory_space<vmem>>, vector<2x128xf32>
    %c0_14 = arith.constant 0 : index
    %c0_15 = arith.constant 0 : index
    %16 = vector.load %arg11[%c0_14, %c0_15] : memref<2x128xf32, #tpu.memory_space<vmem>>, vector<2x128xf32>
    %c0_i32_16 = arith.constant 0 : i32
    %17 = arith.index_cast %c0_i32_16 : i32 to index
    %c0_17 = arith.constant 0 : index
    %c0_18 = arith.constant 0 : index
    %18 = vector.load %arg12[%17, %c0_17, %c0_18] : memref<8x2x512xf32, #tpu.memory_space<vmem>>, vector<1x2x512xf32>
    %19 = vector.shape_cast %18 : vector<1x2x512xf32> to vector<2x512xf32>
    %20 = arith.truncf %15 : vector<2x128xf32> to vector<2x128xbf16>
    %c0_19 = arith.constant 0 : index
    %c0_20 = arith.constant 0 : index
    %21 = vector.load %arg5[%c0_19, %c0_20] : memref<128x512xbf16, #tpu.memory_space<vmem>>, vector<128x512xbf16>
    %cst_21 = arith.constant dense<0.000000e+00> : vector<2x512xf32>
    %22 = tpu.matmul %20, %21, %cst_21 {dimension_numbers = #tpu.dot_dimension_numbers<[1], [0], [0], [1], [0, 0, 1, 1], [], []>} : vector<2x128xbf16>, vector<128x512xbf16>, vector<2x512xf32> -> vector<2x512xf32>
    %23 = arith.addf %19, %22 : vector<2x512xf32>
    %24 = vector.extract_strided_slice %23 {offsets = [0, 0], sizes = [2, 128], strides = [1, 1]} : vector<2x512xf32> to vector<2x128xf32>
    %25 = arith.negf %24 : vector<2x128xf32>
    %26 = math.exp %25 : vector<2x128xf32>
    %cst_22 = arith.constant 1.000000e+00 : f32
    %27 = vector.broadcast %cst_22 : f32 to vector<2x128xf32>
    %28 = arith.addf %27, %26 : vector<2x128xf32>
    %29 = arith.divf %27, %28 : vector<2x128xf32>
    %30 = vector.extract_strided_slice %23 {offsets = [0, 128], sizes = [2, 128], strides = [1, 1]} : vector<2x512xf32> to vector<2x128xf32>
    %31 = arith.negf %30 : vector<2x128xf32>
    %32 = math.exp %31 : vector<2x128xf32>
    %cst_23 = arith.constant 1.000000e+00 : f32
    %33 = vector.broadcast %cst_23 : f32 to vector<2x128xf32>
    %34 = arith.addf %33, %32 : vector<2x128xf32>
    %35 = arith.divf %33, %34 : vector<2x128xf32>
    %36 = vector.extract_strided_slice %23 {offsets = [0, 256], sizes = [2, 128], strides = [1, 1]} : vector<2x512xf32> to vector<2x128xf32>
    %37 = math.tanh %36 : vector<2x128xf32>
    %38 = vector.extract_strided_slice %23 {offsets = [0, 384], sizes = [2, 128], strides = [1, 1]} : vector<2x512xf32> to vector<2x128xf32>
    %39 = arith.negf %38 : vector<2x128xf32>
    %40 = math.exp %39 : vector<2x128xf32>
    %cst_24 = arith.constant 1.000000e+00 : f32
    %41 = vector.broadcast %cst_24 : f32 to vector<2x128xf32>
    %42 = arith.addf %41, %40 : vector<2x128xf32>
    %43 = arith.divf %41, %42 : vector<2x128xf32>
    %44 = arith.mulf %35, %16 : vector<2x128xf32>
    %45 = arith.mulf %29, %37 : vector<2x128xf32>
    %46 = arith.addf %44, %45 : vector<2x128xf32>
    %47 = math.tanh %46 : vector<2x128xf32>
    %48 = arith.mulf %43, %47 : vector<2x128xf32>
    %49 = arith.truncf %48 : vector<2x128xf32> to vector<2x128xbf16>
    %50 = arith.index_cast %c0_i32_16 : i32 to index
    %c0_25 = arith.constant 0 : index
    %c0_26 = arith.constant 0 : index
    %51 = vector.load %arg13[%50, %c0_25, %c0_26] : memref<8x2x128xbf16, #tpu.memory_space<vmem>>, vector<1x2x128xbf16>
    %52 = vector.shape_cast %51 : vector<1x2x128xbf16> to vector<2x128xbf16>
    %53 = vector.shape_cast %49 : vector<2x128xbf16> to vector<1x2x128xbf16>
    tpu.vector_store %arg13[%50, %c0_25, %c0_26], %53 {strides = array<i32>} : memref<8x2x128xbf16, #tpu.memory_space<vmem>>, vector<1x2x128xbf16>,
    %54 = arith.addi %14, %c0_i32_16 : i32
    %55 = vector.broadcast %54 : i32 to vector<2x1xi32>
    %56 = arith.cmpi slt, %55, %13 : vector<2x1xi32>
    %57 = vector.shape_cast %56 : vector<2x1xi1> to vector<2x1xi1>
    %58 = vector.broadcast %57 : vector<2x1xi1> to vector<2x128xi1>
    %59 = arith.select %58, %48, %15 : vector<2x128xi1>, vector<2x128xf32>
    %60 = vector.shape_cast %56 : vector<2x1xi1> to vector<2x1xi1>
    %61 = vector.broadcast %60 : vector<2x1xi1> to vector<2x128xi1>
    %62 = arith.select %61, %46, %16 : vector<2x128xi1>, vector<2x128xf32>
    %c1_i32 = arith.constant 1 : i32
    %63 = arith.index_cast %c1_i32 : i32 to index
    %c0_27 = arith.constant 0 : index
    %c0_28 = arith.constant 0 : index
    %64 = vector.load %arg12[%63, %c0_27, %c0_28] : memref<8x2x512xf32, #tpu.memory_space<vmem>>, vector<1x2x512xf32>
    %65 = vector.shape_cast %64 : vector<1x2x512xf32> to vector<2x512xf32>
    %66 = arith.truncf %59 : vector<2x128xf32> to vector<2x128xbf16>
    %c0_29 = arith.constant 0 : index
    %c0_30 = arith.constant 0 : index
    %67 = vector.load %arg5[%c0_29, %c0_30] : memref<128x512xbf16, #tpu.memory_space<vmem>>, vector<128x512xbf16>
    %cst_31 = arith.constant dense<0.000000e+00> : vector<2x512xf32>
    %68 = tpu.matmul %66, %67, %cst_31 {dimension_numbers = #tpu.dot_dimension_numbers<[1], [0], [0], [1], [0, 0, 1, 1], [], []>} : vector<2x128xbf16>, vector<128x512xbf16>, vector<2x512xf32> -> vector<2x512xf32>
    %69 = arith.addf %65, %68 : vector<2x512xf32>
    %70 = vector.extract_strided_slice %69 {offsets = [0, 0], sizes = [2, 128], strides = [1, 1]} : vector<2x512xf32> to vector<2x128xf32>
    %71 = arith.negf %70 : vector<2x128xf32>
    %72 = math.exp %71 : vector<2x128xf32>
    %cst_32 = arith.constant 1.000000e+00 : f32
    %73 = vector.broadcast %cst_32 : f32 to vector<2x128xf32>
    %74 = arith.addf %73, %72 : vector<2x128xf32>
    %75 = arith.divf %73, %74 : vector<2x128xf32>
    %76 = vector.extract_strided_slice %69 {offsets = [0, 128], sizes = [2, 128], strides = [1, 1]} : vector<2x512xf32> to vector<2x128xf32>
    %77 = arith.negf %76 : vector<2x128xf32>
    %78 = math.exp %77 : vector<2x128xf32>
    %cst_33 = arith.constant 1.000000e+00 : f32
    %79 = vector.broadcast %cst_33 : f32 to vector<2x128xf32>
    %80 = arith.addf %79, %78 : vector<2x128xf32>
    %81 = arith.divf %79, %80 : vector<2x128xf32>
    %82 = vector.extract_strided_slice %69 {offsets = [0, 256], sizes = [2, 128], strides = [1, 1]} : vector<2x512xf32> to vector<2x128xf32>
    %83 = math.tanh %82 : vector<2x128xf32>
    %84 = vector.extract_strided_slice %69 {offsets = [0, 384], sizes = [2, 128], strides = [1, 1]} : vector<2x512xf32> to vector<2x128xf32>
    %85 = arith.negf %84 : vector<2x128xf32>
    %86 = math.exp %85 : vector<2x128xf32>
    %cst_34 = arith.constant 1.000000e+00 : f32
    %87 = vector.broadcast %cst_34 : f32 to vector<2x128xf32>
    %88 = arith.addf %87, %86 : vector<2x128xf32>
    %89 = arith.divf %87, %88 : vector<2x128xf32>
    %90 = arith.mulf %81, %62 : vector<2x128xf32>
    %91 = arith.mulf %75, %83 : vector<2x128xf32>
    %92 = arith.addf %90, %91 : vector<2x128xf32>
    %93 = math.tanh %92 : vector<2x128xf32>
    %94 = arith.mulf %89, %93 : vector<2x128xf32>
    %95 = arith.truncf %94 : vector<2x128xf32> to vector<2x128xbf16>
    %96 = arith.index_cast %c1_i32 : i32 to index
    %c0_35 = arith.constant 0 : index
    %c0_36 = arith.constant 0 : index
    %97 = vector.load %arg13[%96, %c0_35, %c0_36] : memref<8x2x128xbf16, #tpu.memory_space<vmem>>, vector<1x2x128xbf16>
    %98 = vector.shape_cast %97 : vector<1x2x128xbf16> to vector<2x128xbf16>
    %99 = vector.shape_cast %95 : vector<2x128xbf16> to vector<1x2x128xbf16>
    tpu.vector_store %arg13[%96, %c0_35, %c0_36], %99 {strides = array<i32>} : memref<8x2x128xbf16, #tpu.memory_space<vmem>>, vector<1x2x128xbf16>,
    %100 = arith.addi %14, %c1_i32 : i32
    %101 = vector.broadcast %100 : i32 to vector<2x1xi32>
    %102 = arith.cmpi slt, %101, %13 : vector<2x1xi32>
    %103 = vector.shape_cast %102 : vector<2x1xi1> to vector<2x1xi1>
    %104 = vector.broadcast %103 : vector<2x1xi1> to vector<2x128xi1>
    %105 = arith.select %104, %94, %59 : vector<2x128xi1>, vector<2x128xf32>
    %106 = vector.shape_cast %102 : vector<2x1xi1> to vector<2x1xi1>
    %107 = vector.broadcast %106 : vector<2x1xi1> to vector<2x128xi1>
    %108 = arith.select %107, %92, %62 : vector<2x128xi1>, vector<2x128xf32>
    %c2_i32 = arith.constant 2 : i32
    %109 = arith.index_cast %c2_i32 : i32 to index
    %c0_37 = arith.constant 0 : index
    %c0_38 = arith.constant 0 : index
    %110 = vector.load %arg12[%109, %c0_37, %c0_38] : memref<8x2x512xf32, #tpu.memory_space<vmem>>, vector<1x2x512xf32>
    %111 = vector.shape_cast %110 : vector<1x2x512xf32> to vector<2x512xf32>
    %112 = arith.truncf %105 : vector<2x128xf32> to vector<2x128xbf16>
    %c0_39 = arith.constant 0 : index
    %c0_40 = arith.constant 0 : index
    %113 = vector.load %arg5[%c0_39, %c0_40] : memref<128x512xbf16, #tpu.memory_space<vmem>>, vector<128x512xbf16>
    %cst_41 = arith.constant dense<0.000000e+00> : vector<2x512xf32>
    %114 = tpu.matmul %112, %113, %cst_41 {dimension_numbers = #tpu.dot_dimension_numbers<[1], [0], [0], [1], [0, 0, 1, 1], [], []>} : vector<2x128xbf16>, vector<128x512xbf16>, vector<2x512xf32> -> vector<2x512xf32>
    %115 = arith.addf %111, %114 : vector<2x512xf32>
    %116 = vector.extract_strided_slice %115 {offsets = [0, 0], sizes = [2, 128], strides = [1, 1]} : vector<2x512xf32> to vector<2x128xf32>
    %117 = arith.negf %116 : vector<2x128xf32>
    %118 = math.exp %117 : vector<2x128xf32>
    %cst_42 = arith.constant 1.000000e+00 : f32
    %119 = vector.broadcast %cst_42 : f32 to vector<2x128xf32>
    %120 = arith.addf %119, %118 : vector<2x128xf32>
    %121 = arith.divf %119, %120 : vector<2x128xf32>
    %122 = vector.extract_strided_slice %115 {offsets = [0, 128], sizes = [2, 128], strides = [1, 1]} : vector<2x512xf32> to vector<2x128xf32>
    %123 = arith.negf %122 : vector<2x128xf32>
    %124 = math.exp %123 : vector<2x128xf32>
    %cst_43 = arith.constant 1.000000e+00 : f32
    %125 = vector.broadcast %cst_43 : f32 to vector<2x128xf32>
    %126 = arith.addf %125, %124 : vector<2x128xf32>
    %127 = arith.divf %125, %126 : vector<2x128xf32>
    %128 = vector.extract_strided_slice %115 {offsets = [0, 256], sizes = [2, 128], strides = [1, 1]} : vector<2x512xf32> to vector<2x128xf32>
    %129 = math.tanh %128 : vector<2x128xf32>
    %130 = vector.extract_strided_slice %115 {offsets = [0, 384], sizes = [2, 128], strides = [1, 1]} : vector<2x512xf32> to vector<2x128xf32>
    %131 = arith.negf %130 : vector<2x128xf32>
    %132 = math.exp %131 : vector<2x128xf32>
    %cst_44 = arith.constant 1.000000e+00 : f32
    %133 = vector.broadcast %cst_44 : f32 to vector<2x128xf32>
    %134 = arith.addf %133, %132 : vector<2x128xf32>
    %135 = arith.divf %133, %134 : vector<2x128xf32>
    %136 = arith.mulf %127, %108 : vector<2x128xf32>
    %137 = arith.mulf %121, %129 : vector<2x128xf32>
    %138 = arith.addf %136, %137 : vector<2x128xf32>
    %139 = math.tanh %138 : vector<2x128xf32>
    %140 = arith.mulf %135, %139 : vector<2x128xf32>
    %141 = arith.truncf %140 : vector<2x128xf32> to vector<2x128xbf16>
    %142 = arith.index_cast %c2_i32 : i32 to index
    %c0_45 = arith.constant 0 : index
    %c0_46 = arith.constant 0 : index
    %143 = vector.load %arg13[%142, %c0_45, %c0_46] : memref<8x2x128xbf16, #tpu.memory_space<vmem>>, vector<1x2x128xbf16>
    %144 = vector.shape_cast %143 : vector<1x2x128xbf16> to vector<2x128xbf16>
    %145 = vector.shape_cast %141 : vector<2x128xbf16> to vector<1x2x128xbf16>
    tpu.vector_store %arg13[%142, %c0_45, %c0_46], %145 {strides = array<i32>} : memref<8x2x128xbf16, #tpu.memory_space<vmem>>, vector<1x2x128xbf16>,
    %146 = arith.addi %14, %c2_i32 : i32
    %147 = vector.broadcast %146 : i32 to vector<2x1xi32>
    %148 = arith.cmpi slt, %147, %13 : vector<2x1xi32>
    %149 = vector.shape_cast %148 : vector<2x1xi1> to vector<2x1xi1>
    %150 = vector.broadcast %149 : vector<2x1xi1> to vector<2x128xi1>
    %151 = arith.select %150, %140, %105 : vector<2x128xi1>, vector<2x128xf32>
    %152 = vector.shape_cast %148 : vector<2x1xi1> to vector<2x1xi1>
    %153 = vector.broadcast %152 : vector<2x1xi1> to vector<2x128xi1>
    %154 = arith.select %153, %138, %108 : vector<2x128xi1>, vector<2x128xf32>
    %c3_i32 = arith.constant 3 : i32
    %155 = arith.index_cast %c3_i32 : i32 to index
    %c0_47 = arith.constant 0 : index
    %c0_48 = arith.constant 0 : index
    %156 = vector.load %arg12[%155, %c0_47, %c0_48] : memref<8x2x512xf32, #tpu.memory_space<vmem>>, vector<1x2x512xf32>
    %157 = vector.shape_cast %156 : vector<1x2x512xf32> to vector<2x512xf32>
    %158 = arith.truncf %151 : vector<2x128xf32> to vector<2x128xbf16>
    %c0_49 = arith.constant 0 : index
    %c0_50 = arith.constant 0 : index
    %159 = vector.load %arg5[%c0_49, %c0_50] : memref<128x512xbf16, #tpu.memory_space<vmem>>, vector<128x512xbf16>
    %cst_51 = arith.constant dense<0.000000e+00> : vector<2x512xf32>
    %160 = tpu.matmul %158, %159, %cst_51 {dimension_numbers = #tpu.dot_dimension_numbers<[1], [0], [0], [1], [0, 0, 1, 1], [], []>} : vector<2x128xbf16>, vector<128x512xbf16>, vector<2x512xf32> -> vector<2x512xf32>
    %161 = arith.addf %157, %160 : vector<2x512xf32>
    %162 = vector.extract_strided_slice %161 {offsets = [0, 0], sizes = [2, 128], strides = [1, 1]} : vector<2x512xf32> to vector<2x128xf32>
    %163 = arith.negf %162 : vector<2x128xf32>
    %164 = math.exp %163 : vector<2x128xf32>
    %cst_52 = arith.constant 1.000000e+00 : f32
    %165 = vector.broadcast %cst_52 : f32 to vector<2x128xf32>
    %166 = arith.addf %165, %164 : vector<2x128xf32>
    %167 = arith.divf %165, %166 : vector<2x128xf32>
    %168 = vector.extract_strided_slice %161 {offsets = [0, 128], sizes = [2, 128], strides = [1, 1]} : vector<2x512xf32> to vector<2x128xf32>
    %169 = arith.negf %168 : vector<2x128xf32>
    %170 = math.exp %169 : vector<2x128xf32>
    %cst_53 = arith.constant 1.000000e+00 : f32
    %171 = vector.broadcast %cst_53 : f32 to vector<2x128xf32>
    %172 = arith.addf %171, %170 : vector<2x128xf32>
    %173 = arith.divf %171, %172 : vector<2x128xf32>
    %174 = vector.extract_strided_slice %161 {offsets = [0, 256], sizes = [2, 128], strides = [1, 1]} : vector<2x512xf32> to vector<2x128xf32>
    %175 = math.tanh %174 : vector<2x128xf32>
    %176 = vector.extract_strided_slice %161 {offsets = [0, 384], sizes = [2, 128], strides = [1, 1]} : vector<2x512xf32> to vector<2x128xf32>
    %177 = arith.negf %176 : vector<2x128xf32>
    %178 = math.exp %177 : vector<2x128xf32>
    %cst_54 = arith.constant 1.000000e+00 : f32
    %179 = vector.broadcast %cst_54 : f32 to vector<2x128xf32>
    %180 = arith.addf %179, %178 : vector<2x128xf32>
    %181 = arith.divf %179, %180 : vector<2x128xf32>
    %182 = arith.mulf %173, %154 : vector<2x128xf32>
    %183 = arith.mulf %167, %175 : vector<2x128xf32>
    %184 = arith.addf %182, %183 : vector<2x128xf32>
    %185 = math.tanh %184 : vector<2x128xf32>
    %186 = arith.mulf %181, %185 : vector<2x128xf32>
    %187 = arith.truncf %186 : vector<2x128xf32> to vector<2x128xbf16>
    %188 = arith.index_cast %c3_i32 : i32 to index
    %c0_55 = arith.constant 0 : index
    %c0_56 = arith.constant 0 : index
    %189 = vector.load %arg13[%188, %c0_55, %c0_56] : memref<8x2x128xbf16, #tpu.memory_space<vmem>>, vector<1x2x128xbf16>
    %190 = vector.shape_cast %189 : vector<1x2x128xbf16> to vector<2x128xbf16>
    %191 = vector.shape_cast %187 : vector<2x128xbf16> to vector<1x2x128xbf16>
    tpu.vector_store %arg13[%188, %c0_55, %c0_56], %191 {strides = array<i32>} : memref<8x2x128xbf16, #tpu.memory_space<vmem>>, vector<1x2x128xbf16>,
    %192 = arith.addi %14, %c3_i32 : i32
    %193 = vector.broadcast %192 : i32 to vector<2x1xi32>
    %194 = arith.cmpi slt, %193, %13 : vector<2x1xi32>
    %195 = vector.shape_cast %194 : vector<2x1xi1> to vector<2x1xi1>
    %196 = vector.broadcast %195 : vector<2x1xi1> to vector<2x128xi1>
    %197 = arith.select %196, %186, %151 : vector<2x128xi1>, vector<2x128xf32>
    %198 = vector.shape_cast %194 : vector<2x1xi1> to vector<2x1xi1>
    %199 = vector.broadcast %198 : vector<2x1xi1> to vector<2x128xi1>
    %200 = arith.select %199, %184, %154 : vector<2x128xi1>, vector<2x128xf32>
    %c4_i32 = arith.constant 4 : i32
    %201 = arith.index_cast %c4_i32 : i32 to index
    %c0_57 = arith.constant 0 : index
    %c0_58 = arith.constant 0 : index
    %202 = vector.load %arg12[%201, %c0_57, %c0_58] : memref<8x2x512xf32, #tpu.memory_space<vmem>>, vector<1x2x512xf32>
    %203 = vector.shape_cast %202 : vector<1x2x512xf32> to vector<2x512xf32>
    %204 = arith.truncf %197 : vector<2x128xf32> to vector<2x128xbf16>
    %c0_59 = arith.constant 0 : index
    %c0_60 = arith.constant 0 : index
    %205 = vector.load %arg5[%c0_59, %c0_60] : memref<128x512xbf16, #tpu.memory_space<vmem>>, vector<128x512xbf16>
    %cst_61 = arith.constant dense<0.000000e+00> : vector<2x512xf32>
    %206 = tpu.matmul %204, %205, %cst_61 {dimension_numbers = #tpu.dot_dimension_numbers<[1], [0], [0], [1], [0, 0, 1, 1], [], []>} : vector<2x128xbf16>, vector<128x512xbf16>, vector<2x512xf32> -> vector<2x512xf32>
    %207 = arith.addf %203, %206 : vector<2x512xf32>
    %208 = vector.extract_strided_slice %207 {offsets = [0, 0], sizes = [2, 128], strides = [1, 1]} : vector<2x512xf32> to vector<2x128xf32>
    %209 = arith.negf %208 : vector<2x128xf32>
    %210 = math.exp %209 : vector<2x128xf32>
    %cst_62 = arith.constant 1.000000e+00 : f32
    %211 = vector.broadcast %cst_62 : f32 to vector<2x128xf32>
    %212 = arith.addf %211, %210 : vector<2x128xf32>
    %213 = arith.divf %211, %212 : vector<2x128xf32>
    %214 = vector.extract_strided_slice %207 {offsets = [0, 128], sizes = [2, 128], strides = [1, 1]} : vector<2x512xf32> to vector<2x128xf32>
    %215 = arith.negf %214 : vector<2x128xf32>
    %216 = math.exp %215 : vector<2x128xf32>
    %cst_63 = arith.constant 1.000000e+00 : f32
    %217 = vector.broadcast %cst_63 : f32 to vector<2x128xf32>
    %218 = arith.addf %217, %216 : vector<2x128xf32>
    %219 = arith.divf %217, %218 : vector<2x128xf32>
    %220 = vector.extract_strided_slice %207 {offsets = [0, 256], sizes = [2, 128], strides = [1, 1]} : vector<2x512xf32> to vector<2x128xf32>
    %221 = math.tanh %220 : vector<2x128xf32>
    %222 = vector.extract_strided_slice %207 {offsets = [0, 384], sizes = [2, 128], strides = [1, 1]} : vector<2x512xf32> to vector<2x128xf32>
    %223 = arith.negf %222 : vector<2x128xf32>
    %224 = math.exp %223 : vector<2x128xf32>
    %cst_64 = arith.constant 1.000000e+00 : f32
    %225 = vector.broadcast %cst_64 : f32 to vector<2x128xf32>
    %226 = arith.addf %225, %224 : vector<2x128xf32>
    %227 = arith.divf %225, %226 : vector<2x128xf32>
    %228 = arith.mulf %219, %200 : vector<2x128xf32>
    %229 = arith.mulf %213, %221 : vector<2x128xf32>
    %230 = arith.addf %228, %229 : vector<2x128xf32>
    %231 = math.tanh %230 : vector<2x128xf32>
    %232 = arith.mulf %227, %231 : vector<2x128xf32>
    %233 = arith.truncf %232 : vector<2x128xf32> to vector<2x128xbf16>
    %234 = arith.index_cast %c4_i32 : i32 to index
    %c0_65 = arith.constant 0 : index
    %c0_66 = arith.constant 0 : index
    %235 = vector.load %arg13[%234, %c0_65, %c0_66] : memref<8x2x128xbf16, #tpu.memory_space<vmem>>, vector<1x2x128xbf16>
    %236 = vector.shape_cast %235 : vector<1x2x128xbf16> to vector<2x128xbf16>
    %237 = vector.shape_cast %233 : vector<2x128xbf16> to vector<1x2x128xbf16>
    tpu.vector_store %arg13[%234, %c0_65, %c0_66], %237 {strides = array<i32>} : memref<8x2x128xbf16, #tpu.memory_space<vmem>>, vector<1x2x128xbf16>,
    %238 = arith.addi %14, %c4_i32 : i32
    %239 = vector.broadcast %238 : i32 to vector<2x1xi32>
    %240 = arith.cmpi slt, %239, %13 : vector<2x1xi32>
    %241 = vector.shape_cast %240 : vector<2x1xi1> to vector<2x1xi1>
    %242 = vector.broadcast %241 : vector<2x1xi1> to vector<2x128xi1>
    %243 = arith.select %242, %232, %197 : vector<2x128xi1>, vector<2x128xf32>
    %244 = vector.shape_cast %240 : vector<2x1xi1> to vector<2x1xi1>
    %245 = vector.broadcast %244 : vector<2x1xi1> to vector<2x128xi1>
    %246 = arith.select %245, %230, %200 : vector<2x128xi1>, vector<2x128xf32>
    %c5_i32 = arith.constant 5 : i32
    %247 = arith.index_cast %c5_i32 : i32 to index
    %c0_67 = arith.constant 0 : index
    %c0_68 = arith.constant 0 : index
    %248 = vector.load %arg12[%247, %c0_67, %c0_68] : memref<8x2x512xf32, #tpu.memory_space<vmem>>, vector<1x2x512xf32>
    %249 = vector.shape_cast %248 : vector<1x2x512xf32> to vector<2x512xf32>
    %250 = arith.truncf %243 : vector<2x128xf32> to vector<2x128xbf16>
    %c0_69 = arith.constant 0 : index
    %c0_70 = arith.constant 0 : index
    %251 = vector.load %arg5[%c0_69, %c0_70] : memref<128x512xbf16, #tpu.memory_space<vmem>>, vector<128x512xbf16>
    %cst_71 = arith.constant dense<0.000000e+00> : vector<2x512xf32>
    %252 = tpu.matmul %250, %251, %cst_71 {dimension_numbers = #tpu.dot_dimension_numbers<[1], [0], [0], [1], [0, 0, 1, 1], [], []>} : vector<2x128xbf16>, vector<128x512xbf16>, vector<2x512xf32> -> vector<2x512xf32>
    %253 = arith.addf %249, %252 : vector<2x512xf32>
    %254 = vector.extract_strided_slice %253 {offsets = [0, 0], sizes = [2, 128], strides = [1, 1]} : vector<2x512xf32> to vector<2x128xf32>
    %255 = arith.negf %254 : vector<2x128xf32>
    %256 = math.exp %255 : vector<2x128xf32>
    %cst_72 = arith.constant 1.000000e+00 : f32
    %257 = vector.broadcast %cst_72 : f32 to vector<2x128xf32>
    %258 = arith.addf %257, %256 : vector<2x128xf32>
    %259 = arith.divf %257, %258 : vector<2x128xf32>
    %260 = vector.extract_strided_slice %253 {offsets = [0, 128], sizes = [2, 128], strides = [1, 1]} : vector<2x512xf32> to vector<2x128xf32>
    %261 = arith.negf %260 : vector<2x128xf32>
    %262 = math.exp %261 : vector<2x128xf32>
    %cst_73 = arith.constant 1.000000e+00 : f32
    %263 = vector.broadcast %cst_73 : f32 to vector<2x128xf32>
    %264 = arith.addf %263, %262 : vector<2x128xf32>
    %265 = arith.divf %263, %264 : vector<2x128xf32>
    %266 = vector.extract_strided_slice %253 {offsets = [0, 256], sizes = [2, 128], strides = [1, 1]} : vector<2x512xf32> to vector<2x128xf32>
    %267 = math.tanh %266 : vector<2x128xf32>
    %268 = vector.extract_strided_slice %253 {offsets = [0, 384], sizes = [2, 128], strides = [1, 1]} : vector<2x512xf32> to vector<2x128xf32>
    %269 = arith.negf %268 : vector<2x128xf32>
    %270 = math.exp %269 : vector<2x128xf32>
    %cst_74 = arith.constant 1.000000e+00 : f32
    %271 = vector.broadcast %cst_74 : f32 to vector<2x128xf32>
    %272 = arith.addf %271, %270 : vector<2x128xf32>
    %273 = arith.divf %271, %272 : vector<2x128xf32>
    %274 = arith.mulf %265, %246 : vector<2x128xf32>
    %275 = arith.mulf %259, %267 : vector<2x128xf32>
    %276 = arith.addf %274, %275 : vector<2x128xf32>
    %277 = math.tanh %276 : vector<2x128xf32>
    %278 = arith.mulf %273, %277 : vector<2x128xf32>
    %279 = arith.truncf %278 : vector<2x128xf32> to vector<2x128xbf16>
    %280 = arith.index_cast %c5_i32 : i32 to index
    %c0_75 = arith.constant 0 : index
    %c0_76 = arith.constant 0 : index
    %281 = vector.load %arg13[%280, %c0_75, %c0_76] : memref<8x2x128xbf16, #tpu.memory_space<vmem>>, vector<1x2x128xbf16>
    %282 = vector.shape_cast %281 : vector<1x2x128xbf16> to vector<2x128xbf16>
    %283 = vector.shape_cast %279 : vector<2x128xbf16> to vector<1x2x128xbf16>
    tpu.vector_store %arg13[%280, %c0_75, %c0_76], %283 {strides = array<i32>} : memref<8x2x128xbf16, #tpu.memory_space<vmem>>, vector<1x2x128xbf16>,
    %284 = arith.addi %14, %c5_i32 : i32
    %285 = vector.broadcast %284 : i32 to vector<2x1xi32>
    %286 = arith.cmpi slt, %285, %13 : vector<2x1xi32>
    %287 = vector.shape_cast %286 : vector<2x1xi1> to vector<2x1xi1>
    %288 = vector.broadcast %287 : vector<2x1xi1> to vector<2x128xi1>
    %289 = arith.select %288, %278, %243 : vector<2x128xi1>, vector<2x128xf32>
    %290 = vector.shape_cast %286 : vector<2x1xi1> to vector<2x1xi1>
    %291 = vector.broadcast %290 : vector<2x1xi1> to vector<2x128xi1>
    %292 = arith.select %291, %276, %246 : vector<2x128xi1>, vector<2x128xf32>
    %c6_i32 = arith.constant 6 : i32
    %293 = arith.index_cast %c6_i32 : i32 to index
    %c0_77 = arith.constant 0 : index
    %c0_78 = arith.constant 0 : index
    %294 = vector.load %arg12[%293, %c0_77, %c0_78] : memref<8x2x512xf32, #tpu.memory_space<vmem>>, vector<1x2x512xf32>
    %295 = vector.shape_cast %294 : vector<1x2x512xf32> to vector<2x512xf32>
    %296 = arith.truncf %289 : vector<2x128xf32> to vector<2x128xbf16>
    %c0_79 = arith.constant 0 : index
    %c0_80 = arith.constant 0 : index
    %297 = vector.load %arg5[%c0_79, %c0_80] : memref<128x512xbf16, #tpu.memory_space<vmem>>, vector<128x512xbf16>
    %cst_81 = arith.constant dense<0.000000e+00> : vector<2x512xf32>
    %298 = tpu.matmul %296, %297, %cst_81 {dimension_numbers = #tpu.dot_dimension_numbers<[1], [0], [0], [1], [0, 0, 1, 1], [], []>} : vector<2x128xbf16>, vector<128x512xbf16>, vector<2x512xf32> -> vector<2x512xf32>
    %299 = arith.addf %295, %298 : vector<2x512xf32>
    %300 = vector.extract_strided_slice %299 {offsets = [0, 0], sizes = [2, 128], strides = [1, 1]} : vector<2x512xf32> to vector<2x128xf32>
    %301 = arith.negf %300 : vector<2x128xf32>
    %302 = math.exp %301 : vector<2x128xf32>
    %cst_82 = arith.constant 1.000000e+00 : f32
    %303 = vector.broadcast %cst_82 : f32 to vector<2x128xf32>
    %304 = arith.addf %303, %302 : vector<2x128xf32>
    %305 = arith.divf %303, %304 : vector<2x128xf32>
    %306 = vector.extract_strided_slice %299 {offsets = [0, 128], sizes = [2, 128], strides = [1, 1]} : vector<2x512xf32> to vector<2x128xf32>
    %307 = arith.negf %306 : vector<2x128xf32>
    %308 = math.exp %307 : vector<2x128xf32>
    %cst_83 = arith.constant 1.000000e+00 : f32
    %309 = vector.broadcast %cst_83 : f32 to vector<2x128xf32>
    %310 = arith.addf %309, %308 : vector<2x128xf32>
    %311 = arith.divf %309, %310 : vector<2x128xf32>
    %312 = vector.extract_strided_slice %299 {offsets = [0, 256], sizes = [2, 128], strides = [1, 1]} : vector<2x512xf32> to vector<2x128xf32>
    %313 = math.tanh %312 : vector<2x128xf32>
    %314 = vector.extract_strided_slice %299 {offsets = [0, 384], sizes = [2, 128], strides = [1, 1]} : vector<2x512xf32> to vector<2x128xf32>
    %315 = arith.negf %314 : vector<2x128xf32>
    %316 = math.exp %315 : vector<2x128xf32>
    %cst_84 = arith.constant 1.000000e+00 : f32
    %317 = vector.broadcast %cst_84 : f32 to vector<2x128xf32>
    %318 = arith.addf %317, %316 : vector<2x128xf32>
    %319 = arith.divf %317, %318 : vector<2x128xf32>
    %320 = arith.mulf %311, %292 : vector<2x128xf32>
    %321 = arith.mulf %305, %313 : vector<2x128xf32>
    %322 = arith.addf %320, %321 : vector<2x128xf32>
    %323 = math.tanh %322 : vector<2x128xf32>
    %324 = arith.mulf %319, %323 : vector<2x128xf32>
    %325 = arith.truncf %324 : vector<2x128xf32> to vector<2x128xbf16>
    %326 = arith.index_cast %c6_i32 : i32 to index
    %c0_85 = arith.constant 0 : index
    %c0_86 = arith.constant 0 : index
    %327 = vector.load %arg13[%326, %c0_85, %c0_86] : memref<8x2x128xbf16, #tpu.memory_space<vmem>>, vector<1x2x128xbf16>
    %328 = vector.shape_cast %327 : vector<1x2x128xbf16> to vector<2x128xbf16>
    %329 = vector.shape_cast %325 : vector<2x128xbf16> to vector<1x2x128xbf16>
    tpu.vector_store %arg13[%326, %c0_85, %c0_86], %329 {strides = array<i32>} : memref<8x2x128xbf16, #tpu.memory_space<vmem>>, vector<1x2x128xbf16>,
    %330 = arith.addi %14, %c6_i32 : i32
    %331 = vector.broadcast %330 : i32 to vector<2x1xi32>
    %332 = arith.cmpi slt, %331, %13 : vector<2x1xi32>
    %333 = vector.shape_cast %332 : vector<2x1xi1> to vector<2x1xi1>
    %334 = vector.broadcast %333 : vector<2x1xi1> to vector<2x128xi1>
    %335 = arith.select %334, %324, %289 : vector<2x128xi1>, vector<2x128xf32>
    %336 = vector.shape_cast %332 : vector<2x1xi1> to vector<2x1xi1>
    %337 = vector.broadcast %336 : vector<2x1xi1> to vector<2x128xi1>
    %338 = arith.select %337, %322, %292 : vector<2x128xi1>, vector<2x128xf32>
    %c7_i32 = arith.constant 7 : i32
    %339 = arith.index_cast %c7_i32 : i32 to index
    %c0_87 = arith.constant 0 : index
    %c0_88 = arith.constant 0 : index
    %340 = vector.load %arg12[%339, %c0_87, %c0_88] : memref<8x2x512xf32, #tpu.memory_space<vmem>>, vector<1x2x512xf32>
    %341 = vector.shape_cast %340 : vector<1x2x512xf32> to vector<2x512xf32>
    %342 = arith.truncf %335 : vector<2x128xf32> to vector<2x128xbf16>
    %c0_89 = arith.constant 0 : index
    %c0_90 = arith.constant 0 : index
    %343 = vector.load %arg5[%c0_89, %c0_90] : memref<128x512xbf16, #tpu.memory_space<vmem>>, vector<128x512xbf16>
    %cst_91 = arith.constant dense<0.000000e+00> : vector<2x512xf32>
    %344 = tpu.matmul %342, %343, %cst_91 {dimension_numbers = #tpu.dot_dimension_numbers<[1], [0], [0], [1], [0, 0, 1, 1], [], []>} : vector<2x128xbf16>, vector<128x512xbf16>, vector<2x512xf32> -> vector<2x512xf32>
    %345 = arith.addf %341, %344 : vector<2x512xf32>
    %346 = vector.extract_strided_slice %345 {offsets = [0, 0], sizes = [2, 128], strides = [1, 1]} : vector<2x512xf32> to vector<2x128xf32>
    %347 = arith.negf %346 : vector<2x128xf32>
    %348 = math.exp %347 : vector<2x128xf32>
    %cst_92 = arith.constant 1.000000e+00 : f32
    %349 = vector.broadcast %cst_92 : f32 to vector<2x128xf32>
    %350 = arith.addf %349, %348 : vector<2x128xf32>
    %351 = arith.divf %349, %350 : vector<2x128xf32>
    %352 = vector.extract_strided_slice %345 {offsets = [0, 128], sizes = [2, 128], strides = [1, 1]} : vector<2x512xf32> to vector<2x128xf32>
    %353 = arith.negf %352 : vector<2x128xf32>
    %354 = math.exp %353 : vector<2x128xf32>
    %cst_93 = arith.constant 1.000000e+00 : f32
    %355 = vector.broadcast %cst_93 : f32 to vector<2x128xf32>
    %356 = arith.addf %355, %354 : vector<2x128xf32>
    %357 = arith.divf %355, %356 : vector<2x128xf32>
    %358 = vector.extract_strided_slice %345 {offsets = [0, 256], sizes = [2, 128], strides = [1, 1]} : vector<2x512xf32> to vector<2x128xf32>
    %359 = math.tanh %358 : vector<2x128xf32>
    %360 = vector.extract_strided_slice %345 {offsets = [0, 384], sizes = [2, 128], strides = [1, 1]} : vector<2x512xf32> to vector<2x128xf32>
    %361 = arith.negf %360 : vector<2x128xf32>
    %362 = math.exp %361 : vector<2x128xf32>
    %cst_94 = arith.constant 1.000000e+00 : f32
    %363 = vector.broadcast %cst_94 : f32 to vector<2x128xf32>
    %364 = arith.addf %363, %362 : vector<2x128xf32>
    %365 = arith.divf %363, %364 : vector<2x128xf32>
    %366 = arith.mulf %357, %338 : vector<2x128xf32>
    %367 = arith.mulf %351, %359 : vector<2x128xf32>
    %368 = arith.addf %366, %367 : vector<2x128xf32>
    %369 = math.tanh %368 : vector<2x128xf32>
    %370 = arith.mulf %365, %369 : vector<2x128xf32>
    %371 = arith.truncf %370 : vector<2x128xf32> to vector<2x128xbf16>
    %372 = arith.index_cast %c7_i32 : i32 to index
    %c0_95 = arith.constant 0 : index
    %c0_96 = arith.constant 0 : index
    %373 = vector.load %arg13[%372, %c0_95, %c0_96] : memref<8x2x128xbf16, #tpu.memory_space<vmem>>, vector<1x2x128xbf16>
    %374 = vector.shape_cast %373 : vector<1x2x128xbf16> to vector<2x128xbf16>
    %375 = vector.shape_cast %371 : vector<2x128xbf16> to vector<1x2x128xbf16>
    tpu.vector_store %arg13[%372, %c0_95, %c0_96], %375 {strides = array<i32>} : memref<8x2x128xbf16, #tpu.memory_space<vmem>>, vector<1x2x128xbf16>,
    %376 = arith.addi %14, %c7_i32 : i32
    %377 = vector.broadcast %376 : i32 to vector<2x1xi32>
    %378 = arith.cmpi slt, %377, %13 : vector<2x1xi32>
    %379 = vector.shape_cast %378 : vector<2x1xi1> to vector<2x1xi1>
    %380 = vector.broadcast %379 : vector<2x1xi1> to vector<2x128xi1>
    %381 = arith.select %380, %370, %335 : vector<2x128xi1>, vector<2x128xf32>
    %382 = vector.shape_cast %378 : vector<2x1xi1> to vector<2x1xi1>
    %383 = vector.broadcast %382 : vector<2x1xi1> to vector<2x128xi1>
    %384 = arith.select %383, %368, %338 : vector<2x128xi1>, vector<2x128xf32>
    %c8_i32_97 = arith.constant 8 : i32
    %c0_98 = arith.constant 0 : index
    %c0_99 = arith.constant 0 : index
    %385 = vector.load %arg10[%c0_98, %c0_99] : memref<2x128xf32, #tpu.memory_space<vmem>>, vector<2x128xf32>
    tpu.vector_store %arg10[%c0_98, %c0_99], %381 {strides = array<i32>} : memref<2x128xf32, #tpu.memory_space<vmem>>, vector<2x128xf32>,
    %c0_100 = arith.constant 0 : index
    %c0_101 = arith.constant 0 : index
    %386 = vector.load %arg11[%c0_100, %c0_101] : memref<2x128xf32, #tpu.memory_space<vmem>>, vector<2x128xf32>
    tpu.vector_store %arg11[%c0_100, %c0_101], %384 {strides = array<i32>} : memref<2x128xf32, #tpu.memory_space<vmem>>, vector<2x128xf32>,
    %c0_102 = arith.constant 0 : index
    %c0_103 = arith.constant 0 : index
    %c0_104 = arith.constant 0 : index
    %387 = vector.load %arg13[%c0_102, %c0_103, %c0_104] : memref<8x2x128xbf16, #tpu.memory_space<vmem>>, vector<8x2x128xbf16>
    %388 = vector.shape_cast %387 : vector<8x2x128xbf16> to vector<16x128xbf16>
    %c0_105 = arith.constant 0 : index
    %c0_106 = arith.constant 0 : index
    %389 = vector.load %arg7[%c0_105, %c0_106] : memref<128x128xbf16, #tpu.memory_space<vmem>>, vector<128x128xbf16>
    %cst_107 = arith.constant dense<0.000000e+00> : vector<16x128xf32>
    %390 = tpu.matmul %388, %389, %cst_107 {dimension_numbers = #tpu.dot_dimension_numbers<[1], [0], [0], [1], [0, 0, 1, 1], [], []>} : vector<16x128xbf16>, vector<128x128xbf16>, vector<16x128xf32> -> vector<16x128xf32>
    %c0_108 = arith.constant 0 : index
    %c0_109 = arith.constant 0 : index
    %391 = vector.load %arg8[%c0_108, %c0_109] : memref<1x128xf32, #tpu.memory_space<vmem>>, vector<1x128xf32>
    %392 = vector.broadcast %391 : vector<1x128xf32> to vector<16x128xf32>
    %393 = arith.addf %390, %392 : vector<16x128xf32>
    %394 = vector.shape_cast %393 : vector<16x128xf32> to vector<8x2x128xf32>
    %395 = tpu.iota {dimensions = array<i32: 0>} : vector<8x2x1xi32>
    %396 = vector.broadcast %14 : i32 to vector<8x2x1xi32>
    %397 = arith.addi %396, %395 : vector<8x2x1xi32>
    %398 = vector.shape_cast %13 : vector<2x1xi32> to vector<1x2x1xi32>
    %399 = vector.broadcast %398 : vector<1x2x1xi32> to vector<8x2x1xi32>
    %400 = arith.cmpi slt, %397, %399 : vector<8x2x1xi32>
    %c0_110 = arith.constant 0 : index
    %c0_111 = arith.constant 0 : index
    %401 = vector.load %arg8[%c0_110, %c0_111] : memref<1x128xf32, #tpu.memory_space<vmem>>, vector<1x128xf32>
    %402 = vector.shape_cast %401 : vector<1x128xf32> to vector<1x1x128xf32>
    %403 = vector.shape_cast %400 : vector<8x2x1xi1> to vector<8x2x1xi1>
    %404 = vector.broadcast %403 : vector<8x2x1xi1> to vector<8x2x128xi1>
    %405 = vector.shape_cast %402 : vector<1x1x128xf32> to vector<1x1x128xf32>
    %406 = vector.broadcast %405 : vector<1x1x128xf32> to vector<8x2x128xf32>
    %407 = arith.select %404, %394, %406 : vector<8x2x128xi1>, vector<8x2x128xf32>
    %408 = tpu.transpose %407, [1, 0, 2] : vector<8x2x128xf32> -> vector<2x8x128xf32>
    %c0_112 = arith.constant 0 : index
    %c0_113 = arith.constant 0 : index
    %c0_114 = arith.constant 0 : index
    %409 = vector.load %arg9[%c0_112, %c0_113, %c0_114] : memref<2x8x128xf32, #tpu.memory_space<vmem>>, vector<2x8x128xf32>
    tpu.vector_store %arg9[%c0_112, %c0_113, %c0_114], %408 {strides = array<i32>} : memref<2x8x128xf32, #tpu.memory_space<vmem>>, vector<2x8x128xf32>,
    return
  }
  func.func @transform_0(%arg0: i32, %arg1: i32) -> (i32, i32, i32) {
    %c0_i32 = arith.constant 0 : i32
    %c0_i32_0 = arith.constant 0 : i32
    return %arg0, %arg1, %c0_i32 : i32, i32, i32
  }
  func.func @transform_1(%arg0: i32, %arg1: i32) -> (i32, i32) {
    %c0_i32 = arith.constant 0 : i32
    %c0_i32_0 = arith.constant 0 : i32
    return %arg0, %c0_i32 : i32, i32
  }
  func.func @transform_2(%arg0: i32, %arg1: i32) -> (i32, i32) {
    %c0_i32 = arith.constant 0 : i32
    %c0_i32_0 = arith.constant 0 : i32
    %c0_i32_1 = arith.constant 0 : i32
    return %c0_i32, %c0_i32_0 : i32, i32
  }
  func.func @transform_3(%arg0: i32, %arg1: i32) -> (i32, i32) {
    %c0_i32 = arith.constant 0 : i32
    %c0_i32_0 = arith.constant 0 : i32
    %c0_i32_1 = arith.constant 0 : i32
    return %c0_i32, %c0_i32_0 : i32, i32
  }
  func.func @transform_4(%arg0: i32, %arg1: i32) -> (i32, i32) {
    %c0_i32 = arith.constant 0 : i32
    %c0_i32_0 = arith.constant 0 : i32
    %c0_i32_1 = arith.constant 0 : i32
    return %c0_i32, %c0_i32_0 : i32, i32
  }
  func.func @transform_5(%arg0: i32, %arg1: i32) -> (i32, i32) {
    %c0_i32 = arith.constant 0 : i32
    %c0_i32_0 = arith.constant 0 : i32
    %c0_i32_1 = arith.constant 0 : i32
    return %c0_i32, %c0_i32_0 : i32, i32
  }
  func.func @transform_6(%arg0: i32, %arg1: i32) -> (i32, i32) {
    %c0_i32 = arith.constant 0 : i32
    %c0_i32_0 = arith.constant 0 : i32
    %c0_i32_1 = arith.constant 0 : i32
    return %c0_i32, %c0_i32_0 : i32, i32
  }
  func.func @transform_7(%arg0: i32, %arg1: i32) -> (i32, i32, i32) {
    %c0_i32 = arith.constant 0 : i32
    %c0_i32_0 = arith.constant 0 : i32
    return %arg0, %arg1, %c0_i32 : i32, i32, i32
  }
}

module attributes {stable_mosaic.version = 11 : i64} {
  func.func @_lstm_fc_chunk_kernel(%arg0: i32, %arg1: i32, %arg2: memref<2x8x16xbf16, #tpu.memory_space<vmem>>, %arg3: memref<2x1xi32, #tpu.memory_space<vmem>>, %arg4: memref<16x512xbf16, #tpu.memory_space<vmem>>, %arg5: memref<128x512xbf16, #tpu.memory_space<vmem>>, %arg6: memref<1x512xf32, #tpu.memory_space<vmem>>, %arg7: memref<128x128xbf16, #tpu.memory_space<vmem>>, %arg8: memref<1x128xf32, #tpu.memory_space<vmem>>, %arg9: memref<2x8x128xf32, #tpu.memory_space<vmem>>, %arg10: memref<2x128xf32, #tpu.memory_space<vmem>>, %arg11: memref<2x128xf32, #tpu.memory_space<vmem>>, %arg12: memref<8x2x512xf32, #tpu.memory_space<vmem>>, %arg13: memref<8x2x128xbf16, #tpu.memory_space<vmem>>) attributes {dimension_semantics = [#tpu.dimension_semantics<parallel>, #tpu.dimension_semantics<arbitrary>], iteration_bounds = array<i64: 1, 1>, scalar_prefetch = 0 : i64, scratch_operands = 4 : i64, tpu.core_type = #tpu.core_type<tc>, window_params = [{transform_indices = @transform_0, window_bounds = array<i64: 2, 8, 16>}, {transform_indices = @transform_1, window_bounds = array<i64: 2, 1>}, {pipeline_mode = #tpu.pipeline_mode<synchronous>, transform_indices = @transform_2, window_bounds = array<i64: 16, 512>}, {pipeline_mode = #tpu.pipeline_mode<synchronous>, transform_indices = @transform_3, window_bounds = array<i64: 128, 512>}, {pipeline_mode = #tpu.pipeline_mode<synchronous>, transform_indices = @transform_4, window_bounds = array<i64: 1, 512>}, {pipeline_mode = #tpu.pipeline_mode<synchronous>, transform_indices = @transform_5, window_bounds = array<i64: 128, 128>}, {pipeline_mode = #tpu.pipeline_mode<synchronous>, transform_indices = @transform_6, window_bounds = array<i64: 1, 128>}, {transform_indices = @transform_7, window_bounds = array<i64: 2, 8, 128>}]} {
    %c0_i32 = arith.constant 0 : i32
    %0 = arith.cmpi eq, %arg1, %c0_i32 : i32
    %1 = arith.extui %0 : i1 to i32
    %c0_i32_0 = arith.constant 0 : i32
    %2 = arith.cmpi ne, %1, %c0_i32_0 : i32
    scf.if %2 {
      %cst_115 = arith.constant 0.000000e+00 : f32
      %410 = vector.broadcast %cst_115 : f32 to vector<2x128xf32>
      %c0_116 = arith.constant 0 : index
      %c0_117 = arith.constant 0 : index
      %411 = vector.load %arg10[%c0_116, %c0_117] : memref<2x128xf32, #tpu.memory_space<vmem>>, vector<2x128xf32>
      tpu.vector_store %arg10[%c0_116, %c0_117], %410 {strides = array<i32>} : memref<2x128xf32, #tpu.memory_space<vmem>>, vector<2x128xf32>,
      %cst_118 = arith.constant 0.000000e+00 : f32
      %412 = vector.broadcast %cst_118 : f32 to vector<2x128xf32>
      %c0_119 = arith.constant 0 : index
      %c0_120 = arith.constant 0 : index
      %413 = vector.load %arg11[%c0_119, %c0_120] : memref<2x128xf32, #tpu.memory_space<vmem>>, vector<2x128xf32>
      tpu.vector_store %arg11[%c0_119, %c0_120], %412 {strides = array<i32>} : memref<2x128xf32, #tpu.memory_space<vmem>>, vector<2x128xf32>,
    } else {
    }
    %c0 = arith.constant 0 : index
    %c0_1 = arith.constant 0 : index
    %c0_2 = arith.constant 0 : index
    %3 = vector.load %arg2[%c0, %c0_1, %c0_2] : memref<2x8x16xbf16, #tpu.memory_space<vmem>>, vector<2x8x16xbf16>
    %4 = tpu.transpose %3, [1, 0, 2] : vector<2x8x16xbf16> -> vector<8x2x16xbf16>
    %5 = vector.shape_cast %4 : vector<8x2x16xbf16> to vector<16x16xbf16>
    %c0_3 = arith.constant 0 : index
    %c0_4 = arith.constant 0 : index
    %6 = vector.load %arg4[%c0_3, %c0_4] : memref<16x512xbf16, #tpu.memory_space<vmem>>, vector<16x512xbf16>
    %cst = arith.constant dense<0.000000e+00> : vector<16x512xf32>
    %7 = tpu.matmul %5, %6, %cst {dimension_numbers = #tpu.dot_dimension_numbers<[1], [0], [0], [1], [0, 0, 1, 1], [], []>} : vector<16x16xbf16>, vector<16x512xbf16>, vector<16x512xf32> -> vector<16x512xf32>
    %c0_5 = arith.constant 0 : index
    %c0_6 = arith.constant 0 : index
    %8 = vector.load %arg6[%c0_5, %c0_6] : memref<1x512xf32, #tpu.memory_space<vmem>>, vector<1x512xf32>
    %9 = vector.broadcast %8 : vector<1x512xf32> to vector<16x512xf32>
    %10 = arith.addf %7, %9 : vector<16x512xf32>
    %11 = vector.shape_cast %10 : vector<16x512xf32> to vector<8x2x512xf32>
    %c0_7 = arith.constant 0 : index
    %c0_8 = arith.constant 0 : index
    %c0_9 = arith.constant 0 : index
    %12 = vector.load %arg12[%c0_7, %c0_8, %c0_9] : memref<8x2x512xf32, #tpu.memory_space<vmem>>, vector<8x2x512xf32>
    tpu.vector_store %arg12[%c0_7, %c0_8, %c0_9], %11 {strides = array<i32>} : memref<8x2x512xf32, #tpu.memory_space<vmem>>, vector<8x2x512xf32>,
    %c0_10 = arith.constant 0 : index
    %c0_11 = arith.constant 0 : index
    %13 = vector.load %arg3[%c0_10, %c0_11] : memref<2x1xi32, #tpu.memory_space<vmem>>, vector<2x1xi32>
    %c8_i32 = arith.constant 8 : i32
    %14 = arith.muli %arg1, %c8_i32 : i32
    %c0_12 = arith.constant 0 : index
    %c0_13 = arith.constant 0 : index
    %15 = vector.load %arg10[%c0_12, %c0_13] : memref<2x128xf32, #tpu.memory_space<vmem>>, vector<2x128xf32>
    %c0_14 = arith.constant 0 : index
    %c0_15 = arith.constant 0 : index
    %16 = vector.load %arg11[%c0_14, %c0_15] : memref<2x128xf32, #tpu.memory_space<vmem>>, vector<2x128xf32>
    %c0_i32_16 = arith.constant 0 : i32
    %17 = arith.index_cast %c0_i32_16 : i32 to index
    %c0_17 = arith.constant 0 : index
    %c0_18 = arith.constant 0 : index
    %18 = vector.load %arg12[%17, %c0_17, %c0_18] : memref<8x2x512xf32, #tpu.memory_space<vmem>>, vector<1x2x512xf32>
    %19 = vector.shape_cast %18 : vector<1x2x512xf32> to vector<2x512xf32>
    %20 = arith.truncf %15 : vector<2x128xf32> to vector<2x128xbf16>
    %c0_19 = arith.constant 0 : index
    %c0_20 = arith.constant 0 : index
    %21 = vector.load %arg5[%c0_19, %c0_20] : memref<128x512xbf16, #tpu.memory_space<vmem>>, vector<128x512xbf16>
    %cst_21 = arith.constant dense<0.000000e+00> : vector<2x512xf32>
    %22 = tpu.matmul %20, %21, %cst_21 {dimension_numbers = #tpu.dot_dimension_numbers<[1], [0], [0], [1], [0, 0, 1, 1], [], []>} : vector<2x128xbf16>, vector<128x512xbf16>, vector<2x512xf32> -> vector<2x512xf32>
    %23 = arith.addf %19, %22 : vector<2x512xf32>
    %24 = vector.extract_strided_slice %23 {offsets = [0, 0], sizes = [2, 128], strides = [1, 1]} : vector<2x512xf32> to vector<2x128xf32>
    %25 = arith.negf %24 : vector<2x128xf32>
    %26 = math.exp %25 : vector<2x128xf32>
    %cst_22 = arith.constant 1.000000e+00 : f32
    %27 = vector.broadcast %cst_22 : f32 to vector<2x128xf32>
    %28 = arith.addf %27, %26 : vector<2x128xf32>
    %29 = arith.divf %27, %28 : vector<2x128xf32>
    %30 = vector.extract_strided_slice %23 {offsets = [0, 128], sizes = [2, 128], strides = [1, 1]} : vector<2x512xf32> to vector<2x128xf32>
    %31 = arith.negf %30 : vector<2x128xf32>
    %32 = math.exp %31 : vector<2x128xf32>
    %cst_23 = arith.constant 1.000000e+00 : f32
    %33 = vector.broadcast %cst_23 : f32 to vector<2x128xf32>
    %34 = arith.addf %33, %32 : vector<2x128xf32>
    %35 = arith.divf %33, %34 : vector<2x128xf32>
    %36 = vector.extract_strided_slice %23 {offsets = [0, 256], sizes = [2, 128], strides = [1, 1]} : vector<2x512xf32> to vector<2x128xf32>
    %37 = math.tanh %36 : vector<2x128xf32>
    %38 = vector.extract_strided_slice %23 {offsets = [0, 384], sizes = [2, 128], strides = [1, 1]} : vector<2x512xf32> to vector<2x128xf32>
    %39 = arith.negf %38 : vector<2x128xf32>
    %40 = math.exp %39 : vector<2x128xf32>
    %cst_24 = arith.constant 1.000000e+00 : f32
    %41 = vector.broadcast %cst_24 : f32 to vector<2x128xf32>
    %42 = arith.addf %41, %40 : vector<2x128xf32>
    %43 = arith.divf %41, %42 : vector<2x128xf32>
    %44 = arith.mulf %35, %16 : vector<2x128xf32>
    %45 = arith.mulf %29, %37 : vector<2x128xf32>
    %46 = arith.addf %44, %45 : vector<2x128xf32>
    %47 = math.tanh %46 : vector<2x128xf32>
    %48 = arith.mulf %43, %47 : vector<2x128xf32>
    %49 = arith.truncf %48 : vector<2x128xf32> to vector<2x128xbf16>
    %50 = arith.index_cast %c0_i32_16 : i32 to index
    %c0_25 = arith.constant 0 : index
    %c0_26 = arith.constant 0 : index
    %51 = vector.load %arg13[%50, %c0_25, %c0_26] : memref<8x2x128xbf16, #tpu.memory_space<vmem>>, vector<1x2x128xbf16>
    %52 = vector.shape_cast %51 : vector<1x2x128xbf16> to vector<2x128xbf16>
    %53 = vector.shape_cast %49 : vector<2x128xbf16> to vector<1x2x128xbf16>
    tpu.vector_store %arg13[%50, %c0_25, %c0_26], %53 {strides = array<i32>} : memref<8x2x128xbf16, #tpu.memory_space<vmem>>, vector<1x2x128xbf16>,
    %54 = arith.addi %14, %c0_i32_16 : i32
    %55 = vector.broadcast %54 : i32 to vector<2x1xi32>
    %56 = arith.cmpi slt, %55, %13 : vector<2x1xi32>
    %57 = vector.shape_cast %56 : vector<2x1xi1> to vector<2x1xi1>
    %58 = vector.broadcast %57 : vector<2x1xi1> to vector<2x128xi1>
    %59 = arith.select %58, %48, %15 : vector<2x128xi1>, vector<2x128xf32>
    %60 = vector.shape_cast %56 : vector<2x1xi1> to vector<2x1xi1>
    %61 = vector.broadcast %60 : vector<2x1xi1> to vector<2x128xi1>
    %62 = arith.select %61, %46, %16 : vector<2x128xi1>, vector<2x128xf32>
    %c1_i32 = arith.constant 1 : i32
    %63 = arith.index_cast %c1_i32 : i32 to index
    %c0_27 = arith.constant 0 : index
    %c0_28 = arith.constant 0 : index
    %64 = vector.load %arg12[%63, %c0_27, %c0_28] : memref<8x2x512xf32, #tpu.memory_space<vmem>>, vector<1x2x512xf32>
    %65 = vector.shape_cast %64 : vector<1x2x512xf32> to vector<2x512xf32>
    %66 = arith.truncf %59 : vector<2x128xf32> to vector<2x128xbf16>
    %c0_29 = arith.constant 0 : index
    %c0_30 = arith.constant 0 : index
    %67 = vector.load %arg5[%c0_29, %c0_30] : memref<128x512xbf16, #tpu.memory_space<vmem>>, vector<128x512xbf16>
    %cst_31 = arith.constant dense<0.000000e+00> : vector<2x512xf32>
    %68 = tpu.matmul %66, %67, %cst_31 {dimension_numbers = #tpu.dot_dimension_numbers<[1], [0], [0], [1], [0, 0, 1, 1], [], []>} : vector<2x128xbf16>, vector<128x512xbf16>, vector<2x512xf32> -> vector<2x512xf32>
    %69 = arith.addf %65, %68 : vector<2x512xf32>
    %70 = vector.extract_strided_slice %69 {offsets = [0, 0], sizes = [2, 128], strides = [1, 1]} : vector<2x512xf32> to vector<2x128xf32>
    %71 = arith.negf %70 : vector<2x128xf32>
    %72 = math.exp %71 : vector<2x128xf32>
    %cst_32 = arith.constant 1.000000e+00 : f32
    %73 = vector.broadcast %cst_32 : f32 to vector<2x128xf32>
    %74 = arith.addf %73, %72 : vector<2x128xf32>
    %75 = arith.divf %73, %74 : vector<2x128xf32>
    %76 = vector.extract_strided_slice %69 {offsets = [0, 128], sizes = [2, 128], strides = [1, 1]} : vector<2x512xf32> to vector<2x128xf32>
    %77 = arith.negf %76 : vector<2x128xf32>
    %78 = math.exp %77 : vector<2x128xf32>
    %cst_33 = arith.constant 1.000000e+00 : f32
    %79 = vector.broadcast %cst_33 : f32 to vector<2x128xf32>
    %80 = arith.addf %79, %78 : vector<2x128xf32>
    %81 = arith.divf %79, %80 : vector<2x128xf32>
    %82 = vector.extract_strided_slice %69 {offsets = [0, 256], sizes = [2, 128], strides = [1, 1]} : vector<2x512xf32> to vector<2x128xf32>
    %83 = math.tanh %82 : vector<2x128xf32>
    %84 = vector.extract_strided_slice %69 {offsets = [0, 384], sizes = [2, 128], strides = [1, 1]} : vector<2x512xf32> to vector<2x128xf32>
    %85 = arith.negf %84 : vector<2x128xf32>
    %86 = math.exp %85 : vector<2x128xf32>
    %cst_34 = arith.constant 1.000000e+00 : f32
    %87 = vector.broadcast %cst_34 : f32 to vector<2x128xf32>
    %88 = arith.addf %87, %86 : vector<2x128xf32>
    %89 = arith.divf %87, %88 : vector<2x128xf32>
    %90 = arith.mulf %81, %62 : vector<2x128xf32>
    %91 = arith.mulf %75, %83 : vector<2x128xf32>
    %92 = arith.addf %90, %91 : vector<2x128xf32>
    %93 = math.tanh %92 : vector<2x128xf32>
    %94 = arith.mulf %89, %93 : vector<2x128xf32>
    %95 = arith.truncf %94 : vector<2x128xf32> to vector<2x128xbf16>
    %96 = arith.index_cast %c1_i32 : i32 to index
    %c0_35 = arith.constant 0 : index
    %c0_36 = arith.constant 0 : index
    %97 = vector.load %arg13[%96, %c0_35, %c0_36] : memref<8x2x128xbf16, #tpu.memory_space<vmem>>, vector<1x2x128xbf16>
    %98 = vector.shape_cast %97 : vector<1x2x128xbf16> to vector<2x128xbf16>
    %99 = vector.shape_cast %95 : vector<2x128xbf16> to vector<1x2x128xbf16>
    tpu.vector_store %arg13[%96, %c0_35, %c0_36], %99 {strides = array<i32>} : memref<8x2x128xbf16, #tpu.memory_space<vmem>>, vector<1x2x128xbf16>,
    %100 = arith.addi %14, %c1_i32 : i32
    %101 = vector.broadcast %100 : i32 to vector<2x1xi32>
    %102 = arith.cmpi slt, %101, %13 : vector<2x1xi32>
    %103 = vector.shape_cast %102 : vector<2x1xi1> to vector<2x1xi1>
    %104 = vector.broadcast %103 : vector<2x1xi1> to vector<2x128xi1>
    %105 = arith.select %104, %94, %59 : vector<2x128xi1>, vector<2x128xf32>
    %106 = vector.shape_cast %102 : vector<2x1xi1> to vector<2x1xi1>
    %107 = vector.broadcast %106 : vector<2x1xi1> to vector<2x128xi1>
    %108 = arith.select %107, %92, %62 : vector<2x128xi1>, vector<2x128xf32>
    %c2_i32 = arith.constant 2 : i32
    %109 = arith.index_cast %c2_i32 : i32 to index
    %c0_37 = arith.constant 0 : index
    %c0_38 = arith.constant 0 : index
    %110 = vector.load %arg12[%109, %c0_37, %c0_38] : memref<8x2x512xf32, #tpu.memory_space<vmem>>, vector<1x2x512xf32>
    %111 = vector.shape_cast %110 : vector<1x2x512xf32> to vector<2x512xf32>
    %112 = arith.truncf %105 : vector<2x128xf32> to vector<2x128xbf16>
    %c0_39 = arith.constant 0 : index
    %c0_40 = arith.constant 0 : index
    %113 = vector.load %arg5[%c0_39, %c0_40] : memref<128x512xbf16, #tpu.memory_space<vmem>>, vector<128x512xbf16>
    %cst_41 = arith.constant dense<0.000000e+00> : vector<2x512xf32>
    %114 = tpu.matmul %112, %113, %cst_41 {dimension_numbers = #tpu.dot_dimension_numbers<[1], [0], [0], [1], [0, 0, 1, 1], [], []>} : vector<2x128xbf16>, vector<128x512xbf16>, vector<2x512xf32> -> vector<2x512xf32>
    %115 = arith.addf %111, %114 : vector<2x512xf32>
    %116 = vector.extract_strided_slice %115 {offsets = [0, 0], sizes = [2, 128], strides = [1, 1]} : vector<2x512xf32> to vector<2x128xf32>
    %117 = arith.negf %116 : vector<2x128xf32>
    %118 = math.exp %117 : vector<2x128xf32>
    %cst_42 = arith.constant 1.000000e+00 : f32
    %119 = vector.broadcast %cst_42 : f32 to vector<2x128xf32>
    %120 = arith.addf %119, %118 : vector<2x128xf32>
    %121 = arith.divf %119, %120 : vector<2x128xf32>
    %122 = vector.extract_strided_slice %115 {offsets = [0, 128], sizes = [2, 128], strides = [1, 1]} : vector<2x512xf32> to vector<2x128xf32>
    %123 = arith.negf %122 : vector<2x128xf32>
    %124 = math.exp %123 : vector<2x128xf32>
    %cst_43 = arith.constant 1.000000e+00 : f32
    %125 = vector.broadcast %cst_43 : f32 to vector<2x128xf32>
    %126 = arith.addf %125, %124 : vector<2x128xf32>
    %127 = arith.divf %125, %126 : vector<2x128xf32>
    %128 = vector.extract_strided_slice %115 {offsets = [0, 256], sizes = [2, 128], strides = [1, 1]} : vector<2x512xf32> to vector<2x128xf32>
    %129 = math.tanh %128 : vector<2x128xf32>
    %130 = vector.extract_strided_slice %115 {offsets = [0, 384], sizes = [2, 128], strides = [1, 1]} : vector<2x512xf32> to vector<2x128xf32>
    %131 = arith.negf %130 : vector<2x128xf32>
    %132 = math.exp %131 : vector<2x128xf32>
    %cst_44 = arith.constant 1.000000e+00 : f32
    %133 = vector.broadcast %cst_44 : f32 to vector<2x128xf32>
    %134 = arith.addf %133, %132 : vector<2x128xf32>
    %135 = arith.divf %133, %134 : vector<2x128xf32>
    %136 = arith.mulf %127, %108 : vector<2x128xf32>
    %137 = arith.mulf %121, %129 : vector<2x128xf32>
    %138 = arith.addf %136, %137 : vector<2x128xf32>
    %139 = math.tanh %138 : vector<2x128xf32>
    %140 = arith.mulf %135, %139 : vector<2x128xf32>
    %141 = arith.truncf %140 : vector<2x128xf32> to vector<2x128xbf16>
    %142 = arith.index_cast %c2_i32 : i32 to index
    %c0_45 = arith.constant 0 : index
    %c0_46 = arith.constant 0 : index
    %143 = vector.load %arg13[%142, %c0_45, %c0_46] : memref<8x2x128xbf16, #tpu.memory_space<vmem>>, vector<1x2x128xbf16>
    %144 = vector.shape_cast %143 : vector<1x2x128xbf16> to vector<2x128xbf16>
    %145 = vector.shape_cast %141 : vector<2x128xbf16> to vector<1x2x128xbf16>
    tpu.vector_store %arg13[%142, %c0_45, %c0_46], %145 {strides = array<i32>} : memref<8x2x128xbf16, #tpu.memory_space<vmem>>, vector<1x2x128xbf16>,
    %146 = arith.addi %14, %c2_i32 : i32
    %147 = vector.broadcast %146 : i32 to vector<2x1xi32>
    %148 = arith.cmpi slt, %147, %13 : vector<2x1xi32>
    %149 = vector.shape_cast %148 : vector<2x1xi1> to vector<2x1xi1>
    %150 = vector.broadcast %149 : vector<2x1xi1> to vector<2x128xi1>
    %151 = arith.select %150, %140, %105 : vector<2x128xi1>, vector<2x128xf32>
    %152 = vector.shape_cast %148 : vector<2x1xi1> to vector<2x1xi1>
    %153 = vector.broadcast %152 : vector<2x1xi1> to vector<2x128xi1>
    %154 = arith.select %153, %138, %108 : vector<2x128xi1>, vector<2x128xf32>
    %c3_i32 = arith.constant 3 : i32
    %155 = arith.index_cast %c3_i32 : i32 to index
    %c0_47 = arith.constant 0 : index
    %c0_48 = arith.constant 0 : index
    %156 = vector.load %arg12[%155, %c0_47, %c0_48] : memref<8x2x512xf32, #tpu.memory_space<vmem>>, vector<1x2x512xf32>
    %157 = vector.shape_cast %156 : vector<1x2x512xf32> to vector<2x512xf32>
    %158 = arith.truncf %151 : vector<2x128xf32> to vector<2x128xbf16>
    %c0_49 = arith.constant 0 : index
    %c0_50 = arith.constant 0 : index
    %159 = vector.load %arg5[%c0_49, %c0_50] : memref<128x512xbf16, #tpu.memory_space<vmem>>, vector<128x512xbf16>
    %cst_51 = arith.constant dense<0.000000e+00> : vector<2x512xf32>
    %160 = tpu.matmul %158, %159, %cst_51 {dimension_numbers = #tpu.dot_dimension_numbers<[1], [0], [0], [1], [0, 0, 1, 1], [], []>} : vector<2x128xbf16>, vector<128x512xbf16>, vector<2x512xf32> -> vector<2x512xf32>
    %161 = arith.addf %157, %160 : vector<2x512xf32>
    %162 = vector.extract_strided_slice %161 {offsets = [0, 0], sizes = [2, 128], strides = [1, 1]} : vector<2x512xf32> to vector<2x128xf32>
    %163 = arith.negf %162 : vector<2x128xf32>
    %164 = math.exp %163 : vector<2x128xf32>
    %cst_52 = arith.constant 1.000000e+00 : f32
    %165 = vector.broadcast %cst_52 : f32 to vector<2x128xf32>
    %166 = arith.addf %165, %164 : vector<2x128xf32>
    %167 = arith.divf %165, %166 : vector<2x128xf32>
    %168 = vector.extract_strided_slice %161 {offsets = [0, 128], sizes = [2, 128], strides = [1, 1]} : vector<2x512xf32> to vector<2x128xf32>
    %169 = arith.negf %168 : vector<2x128xf32>
    %170 = math.exp %169 : vector<2x128xf32>
    %cst_53 = arith.constant 1.000000e+00 : f32
    %171 = vector.broadcast %cst_53 : f32 to vector<2x128xf32>
    %172 = arith.addf %171, %170 : vector<2x128xf32>
    %173 = arith.divf %171, %172 : vector<2x128xf32>
    %174 = vector.extract_strided_slice %161 {offsets = [0, 256], sizes = [2, 128], strides = [1, 1]} : vector<2x512xf32> to vector<2x128xf32>
    %175 = math.tanh %174 : vector<2x128xf32>
    %176 = vector.extract_strided_slice %161 {offsets = [0, 384], sizes = [2, 128], strides = [1, 1]} : vector<2x512xf32> to vector<2x128xf32>
    %177 = arith.negf %176 : vector<2x128xf32>
    %178 = math.exp %177 : vector<2x128xf32>
    %cst_54 = arith.constant 1.000000e+00 : f32
    %179 = vector.broadcast %cst_54 : f32 to vector<2x128xf32>
    %180 = arith.addf %179, %178 : vector<2x128xf32>
    %181 = arith.divf %179, %180 : vector<2x128xf32>
    %182 = arith.mulf %173, %154 : vector<2x128xf32>
    %183 = arith.mulf %167, %175 : vector<2x128xf32>
    %184 = arith.addf %182, %183 : vector<2x128xf32>
    %185 = math.tanh %184 : vector<2x128xf32>
    %186 = arith.mulf %181, %185 : vector<2x128xf32>
    %187 = arith.truncf %186 : vector<2x128xf32> to vector<2x128xbf16>
    %188 = arith.index_cast %c3_i32 : i32 to index
    %c0_55 = arith.constant 0 : index
    %c0_56 = arith.constant 0 : index
    %189 = vector.load %arg13[%188, %c0_55, %c0_56] : memref<8x2x128xbf16, #tpu.memory_space<vmem>>, vector<1x2x128xbf16>
    %190 = vector.shape_cast %189 : vector<1x2x128xbf16> to vector<2x128xbf16>
    %191 = vector.shape_cast %187 : vector<2x128xbf16> to vector<1x2x128xbf16>
    tpu.vector_store %arg13[%188, %c0_55, %c0_56], %191 {strides = array<i32>} : memref<8x2x128xbf16, #tpu.memory_space<vmem>>, vector<1x2x128xbf16>,
    %192 = arith.addi %14, %c3_i32 : i32
    %193 = vector.broadcast %192 : i32 to vector<2x1xi32>
    %194 = arith.cmpi slt, %193, %13 : vector<2x1xi32>
    %195 = vector.shape_cast %194 : vector<2x1xi1> to vector<2x1xi1>
    %196 = vector.broadcast %195 : vector<2x1xi1> to vector<2x128xi1>
    %197 = arith.select %196, %186, %151 : vector<2x128xi1>, vector<2x128xf32>
    %198 = vector.shape_cast %194 : vector<2x1xi1> to vector<2x1xi1>
    %199 = vector.broadcast %198 : vector<2x1xi1> to vector<2x128xi1>
    %200 = arith.select %199, %184, %154 : vector<2x128xi1>, vector<2x128xf32>
    %c4_i32 = arith.constant 4 : i32
    %201 = arith.index_cast %c4_i32 : i32 to index
    %c0_57 = arith.constant 0 : index
    %c0_58 = arith.constant 0 : index
    %202 = vector.load %arg12[%201, %c0_57, %c0_58] : memref<8x2x512xf32, #tpu.memory_space<vmem>>, vector<1x2x512xf32>
    %203 = vector.shape_cast %202 : vector<1x2x512xf32> to vector<2x512xf32>
    %204 = arith.truncf %197 : vector<2x128xf32> to vector<2x128xbf16>
    %c0_59 = arith.constant 0 : index
    %c0_60 = arith.constant 0 : index
    %205 = vector.load %arg5[%c0_59, %c0_60] : memref<128x512xbf16, #tpu.memory_space<vmem>>, vector<128x512xbf16>
    %cst_61 = arith.constant dense<0.000000e+00> : vector<2x512xf32>
    %206 = tpu.matmul %204, %205, %cst_61 {dimension_numbers = #tpu.dot_dimension_numbers<[1], [0], [0], [1], [0, 0, 1, 1], [], []>} : vector<2x128xbf16>, vector<128x512xbf16>, vector<2x512xf32> -> vector<2x512xf32>
    %207 = arith.addf %203, %206 : vector<2x512xf32>
    %208 = vector.extract_strided_slice %207 {offsets = [0, 0], sizes = [2, 128], strides = [1, 1]} : vector<2x512xf32> to vector<2x128xf32>
    %209 = arith.negf %208 : vector<2x128xf32>
    %210 = math.exp %209 : vector<2x128xf32>
    %cst_62 = arith.constant 1.000000e+00 : f32
    %211 = vector.broadcast %cst_62 : f32 to vector<2x128xf32>
    %212 = arith.addf %211, %210 : vector<2x128xf32>
    %213 = arith.divf %211, %212 : vector<2x128xf32>
    %214 = vector.extract_strided_slice %207 {offsets = [0, 128], sizes = [2, 128], strides = [1, 1]} : vector<2x512xf32> to vector<2x128xf32>
    %215 = arith.negf %214 : vector<2x128xf32>
    %216 = math.exp %215 : vector<2x128xf32>
    %cst_63 = arith.constant 1.000000e+00 : f32
    %217 = vector.broadcast %cst_63 : f32 to vector<2x128xf32>
    %218 = arith.addf %217, %216 : vector<2x128xf32>
    %219 = arith.divf %217, %218 : vector<2x128xf32>
    %220 = vector.extract_strided_slice %207 {offsets = [0, 256], sizes = [2, 128], strides = [1, 1]} : vector<2x512xf32> to vector<2x128xf32>
    %221 = math.tanh %220 : vector<2x128xf32>
    %222 = vector.extract_strided_slice %207 {offsets = [0, 384], sizes = [2, 128], strides = [1, 1]} : vector<2x512xf32> to vector<2x128xf32>
    %223 = arith.negf %222 : vector<2x128xf32>
    %224 = math.exp %223 : vector<2x128xf32>
    %cst_64 = arith.constant 1.000000e+00 : f32
    %225 = vector.broadcast %cst_64 : f32 to vector<2x128xf32>
    %226 = arith.addf %225, %224 : vector<2x128xf32>
    %227 = arith.divf %225, %226 : vector<2x128xf32>
    %228 = arith.mulf %219, %200 : vector<2x128xf32>
    %229 = arith.mulf %213, %221 : vector<2x128xf32>
    %230 = arith.addf %228, %229 : vector<2x128xf32>
    %231 = math.tanh %230 : vector<2x128xf32>
    %232 = arith.mulf %227, %231 : vector<2x128xf32>
    %233 = arith.truncf %232 : vector<2x128xf32> to vector<2x128xbf16>
    %234 = arith.index_cast %c4_i32 : i32 to index
    %c0_65 = arith.constant 0 : index
    %c0_66 = arith.constant 0 : index
    %235 = vector.load %arg13[%234, %c0_65, %c0_66] : memref<8x2x128xbf16, #tpu.memory_space<vmem>>, vector<1x2x128xbf16>
    %236 = vector.shape_cast %235 : vector<1x2x128xbf16> to vector<2x128xbf16>
    %237 = vector.shape_cast %233 : vector<2x128xbf16> to vector<1x2x128xbf16>
    tpu.vector_store %arg13[%234, %c0_65, %c0_66], %237 {strides = array<i32>} : memref<8x2x128xbf16, #tpu.memory_space<vmem>>, vector<1x2x128xbf16>,
    %238 = arith.addi %14, %c4_i32 : i32
    %239 = vector.broadcast %238 : i32 to vector<2x1xi32>
    %240 = arith.cmpi slt, %239, %13 : vector<2x1xi32>
    %241 = vector.shape_cast %240 : vector<2x1xi1> to vector<2x1xi1>
    %242 = vector.broadcast %241 : vector<2x1xi1> to vector<2x128xi1>
    %243 = arith.select %242, %232, %197 : vector<2x128xi1>, vector<2x128xf32>
    %244 = vector.shape_cast %240 : vector<2x1xi1> to vector<2x1xi1>
    %245 = vector.broadcast %244 : vector<2x1xi1> to vector<2x128xi1>
    %246 = arith.select %245, %230, %200 : vector<2x128xi1>, vector<2x128xf32>
    %c5_i32 = arith.constant 5 : i32
    %247 = arith.index_cast %c5_i32 : i32 to index
    %c0_67 = arith.constant 0 : index
    %c0_68 = arith.constant 0 : index
    %248 = vector.load %arg12[%247, %c0_67, %c0_68] : memref<8x2x512xf32, #tpu.memory_space<vmem>>, vector<1x2x512xf32>
    %249 = vector.shape_cast %248 : vector<1x2x512xf32> to vector<2x512xf32>
    %250 = arith.truncf %243 : vector<2x128xf32> to vector<2x128xbf16>
    %c0_69 = arith.constant 0 : index
    %c0_70 = arith.constant 0 : index
    %251 = vector.load %arg5[%c0_69, %c0_70] : memref<128x512xbf16, #tpu.memory_space<vmem>>, vector<128x512xbf16>
    %cst_71 = arith.constant dense<0.000000e+00> : vector<2x512xf32>
    %252 = tpu.matmul %250, %251, %cst_71 {dimension_numbers = #tpu.dot_dimension_numbers<[1], [0], [0], [1], [0, 0, 1, 1], [], []>} : vector<2x128xbf16>, vector<128x512xbf16>, vector<2x512xf32> -> vector<2x512xf32>
    %253 = arith.addf %249, %252 : vector<2x512xf32>
    %254 = vector.extract_strided_slice %253 {offsets = [0, 0], sizes = [2, 128], strides = [1, 1]} : vector<2x512xf32> to vector<2x128xf32>
    %255 = arith.negf %254 : vector<2x128xf32>
    %256 = math.exp %255 : vector<2x128xf32>
    %cst_72 = arith.constant 1.000000e+00 : f32
    %257 = vector.broadcast %cst_72 : f32 to vector<2x128xf32>
    %258 = arith.addf %257, %256 : vector<2x128xf32>
    %259 = arith.divf %257, %258 : vector<2x128xf32>
    %260 = vector.extract_strided_slice %253 {offsets = [0, 128], sizes = [2, 128], strides = [1, 1]} : vector<2x512xf32> to vector<2x128xf32>
    %261 = arith.negf %260 : vector<2x128xf32>
    %262 = math.exp %261 : vector<2x128xf32>
    %cst_73 = arith.constant 1.000000e+00 : f32
    %263 = vector.broadcast %cst_73 : f32 to vector<2x128xf32>
    %264 = arith.addf %263, %262 : vector<2x128xf32>
    %265 = arith.divf %263, %264 : vector<2x128xf32>
    %266 = vector.extract_strided_slice %253 {offsets = [0, 256], sizes = [2, 128], strides = [1, 1]} : vector<2x512xf32> to vector<2x128xf32>
    %267 = math.tanh %266 : vector<2x128xf32>
    %268 = vector.extract_strided_slice %253 {offsets = [0, 384], sizes = [2, 128], strides = [1, 1]} : vector<2x512xf32> to vector<2x128xf32>
    %269 = arith.negf %268 : vector<2x128xf32>
    %270 = math.exp %269 : vector<2x128xf32>
    %cst_74 = arith.constant 1.000000e+00 : f32
    %271 = vector.broadcast %cst_74 : f32 to vector<2x128xf32>
    %272 = arith.addf %271, %270 : vector<2x128xf32>
    %273 = arith.divf %271, %272 : vector<2x128xf32>
    %274 = arith.mulf %265, %246 : vector<2x128xf32>
    %275 = arith.mulf %259, %267 : vector<2x128xf32>
    %276 = arith.addf %274, %275 : vector<2x128xf32>
    %277 = math.tanh %276 : vector<2x128xf32>
    %278 = arith.mulf %273, %277 : vector<2x128xf32>
    %279 = arith.truncf %278 : vector<2x128xf32> to vector<2x128xbf16>
    %280 = arith.index_cast %c5_i32 : i32 to index
    %c0_75 = arith.constant 0 : index
    %c0_76 = arith.constant 0 : index
    %281 = vector.load %arg13[%280, %c0_75, %c0_76] : memref<8x2x128xbf16, #tpu.memory_space<vmem>>, vector<1x2x128xbf16>
    %282 = vector.shape_cast %281 : vector<1x2x128xbf16> to vector<2x128xbf16>
    %283 = vector.shape_cast %279 : vector<2x128xbf16> to vector<1x2x128xbf16>
    tpu.vector_store %arg13[%280, %c0_75, %c0_76], %283 {strides = array<i32>} : memref<8x2x128xbf16, #tpu.memory_space<vmem>>, vector<1x2x128xbf16>,
    %284 = arith.addi %14, %c5_i32 : i32
    %285 = vector.broadcast %284 : i32 to vector<2x1xi32>
    %286 = arith.cmpi slt, %285, %13 : vector<2x1xi32>
    %287 = vector.shape_cast %286 : vector<2x1xi1> to vector<2x1xi1>
    %288 = vector.broadcast %287 : vector<2x1xi1> to vector<2x128xi1>
    %289 = arith.select %288, %278, %243 : vector<2x128xi1>, vector<2x128xf32>
    %290 = vector.shape_cast %286 : vector<2x1xi1> to vector<2x1xi1>
    %291 = vector.broadcast %290 : vector<2x1xi1> to vector<2x128xi1>
    %292 = arith.select %291, %276, %246 : vector<2x128xi1>, vector<2x128xf32>
    %c6_i32 = arith.constant 6 : i32
    %293 = arith.index_cast %c6_i32 : i32 to index
    %c0_77 = arith.constant 0 : index
    %c0_78 = arith.constant 0 : index
    %294 = vector.load %arg12[%293, %c0_77, %c0_78] : memref<8x2x512xf32, #tpu.memory_space<vmem>>, vector<1x2x512xf32>
    %295 = vector.shape_cast %294 : vector<1x2x512xf32> to vector<2x512xf32>
    %296 = arith.truncf %289 : vector<2x128xf32> to vector<2x128xbf16>
    %c0_79 = arith.constant 0 : index
    %c0_80 = arith.constant 0 : index
    %297 = vector.load %arg5[%c0_79, %c0_80] : memref<128x512xbf16, #tpu.memory_space<vmem>>, vector<128x512xbf16>
    %cst_81 = arith.constant dense<0.000000e+00> : vector<2x512xf32>
    %298 = tpu.matmul %296, %297, %cst_81 {dimension_numbers = #tpu.dot_dimension_numbers<[1], [0], [0], [1], [0, 0, 1, 1], [], []>} : vector<2x128xbf16>, vector<128x512xbf16>, vector<2x512xf32> -> vector<2x512xf32>
    %299 = arith.addf %295, %298 : vector<2x512xf32>
    %300 = vector.extract_strided_slice %299 {offsets = [0, 0], sizes = [2, 128], strides = [1, 1]} : vector<2x512xf32> to vector<2x128xf32>
    %301 = arith.negf %300 : vector<2x128xf32>
    %302 = math.exp %301 : vector<2x128xf32>
    %cst_82 = arith.constant 1.000000e+00 : f32
    %303 = vector.broadcast %cst_82 : f32 to vector<2x128xf32>
    %304 = arith.addf %303, %302 : vector<2x128xf32>
    %305 = arith.divf %303, %304 : vector<2x128xf32>
    %306 = vector.extract_strided_slice %299 {offsets = [0, 128], sizes = [2, 128], strides = [1, 1]} : vector<2x512xf32> to vector<2x128xf32>
    %307 = arith.negf %306 : vector<2x128xf32>
    %308 = math.exp %307 : vector<2x128xf32>
    %cst_83 = arith.constant 1.000000e+00 : f32
    %309 = vector.broadcast %cst_83 : f32 to vector<2x128xf32>
    %310 = arith.addf %309, %308 : vector<2x128xf32>
    %311 = arith.divf %309, %310 : vector<2x128xf32>
    %312 = vector.extract_strided_slice %299 {offsets = [0, 256], sizes = [2, 128], strides = [1, 1]} : vector<2x512xf32> to vector<2x128xf32>
    %313 = math.tanh %312 : vector<2x128xf32>
    %314 = vector.extract_strided_slice %299 {offsets = [0, 384], sizes = [2, 128], strides = [1, 1]} : vector<2x512xf32> to vector<2x128xf32>
    %315 = arith.negf %314 : vector<2x128xf32>
    %316 = math.exp %315 : vector<2x128xf32>
    %cst_84 = arith.constant 1.000000e+00 : f32
    %317 = vector.broadcast %cst_84 : f32 to vector<2x128xf32>
    %318 = arith.addf %317, %316 : vector<2x128xf32>
    %319 = arith.divf %317, %318 : vector<2x128xf32>
    %320 = arith.mulf %311, %292 : vector<2x128xf32>
    %321 = arith.mulf %305, %313 : vector<2x128xf32>
    %322 = arith.addf %320, %321 : vector<2x128xf32>
    %323 = math.tanh %322 : vector<2x128xf32>
    %324 = arith.mulf %319, %323 : vector<2x128xf32>
    %325 = arith.truncf %324 : vector<2x128xf32> to vector<2x128xbf16>
    %326 = arith.index_cast %c6_i32 : i32 to index
    %c0_85 = arith.constant 0 : index
    %c0_86 = arith.constant 0 : index
    %327 = vector.load %arg13[%326, %c0_85, %c0_86] : memref<8x2x128xbf16, #tpu.memory_space<vmem>>, vector<1x2x128xbf16>
    %328 = vector.shape_cast %327 : vector<1x2x128xbf16> to vector<2x128xbf16>
    %329 = vector.shape_cast %325 : vector<2x128xbf16> to vector<1x2x128xbf16>
    tpu.vector_store %arg13[%326, %c0_85, %c0_86], %329 {strides = array<i32>} : memref<8x2x128xbf16, #tpu.memory_space<vmem>>, vector<1x2x128xbf16>,
    %330 = arith.addi %14, %c6_i32 : i32
    %331 = vector.broadcast %330 : i32 to vector<2x1xi32>
    %332 = arith.cmpi slt, %331, %13 : vector<2x1xi32>
    %333 = vector.shape_cast %332 : vector<2x1xi1> to vector<2x1xi1>
    %334 = vector.broadcast %333 : vector<2x1xi1> to vector<2x128xi1>
    %335 = arith.select %334, %324, %289 : vector<2x128xi1>, vector<2x128xf32>
    %336 = vector.shape_cast %332 : vector<2x1xi1> to vector<2x1xi1>
    %337 = vector.broadcast %336 : vector<2x1xi1> to vector<2x128xi1>
    %338 = arith.select %337, %322, %292 : vector<2x128xi1>, vector<2x128xf32>
    %c7_i32 = arith.constant 7 : i32
    %339 = arith.index_cast %c7_i32 : i32 to index
    %c0_87 = arith.constant 0 : index
    %c0_88 = arith.constant 0 : index
    %340 = vector.load %arg12[%339, %c0_87, %c0_88] : memref<8x2x512xf32, #tpu.memory_space<vmem>>, vector<1x2x512xf32>
    %341 = vector.shape_cast %340 : vector<1x2x512xf32> to vector<2x512xf32>
    %342 = arith.truncf %335 : vector<2x128xf32> to vector<2x128xbf16>
    %c0_89 = arith.constant 0 : index
    %c0_90 = arith.constant 0 : index
    %343 = vector.load %arg5[%c0_89, %c0_90] : memref<128x512xbf16, #tpu.memory_space<vmem>>, vector<128x512xbf16>
    %cst_91 = arith.constant dense<0.000000e+00> : vector<2x512xf32>
    %344 = tpu.matmul %342, %343, %cst_91 {dimension_numbers = #tpu.dot_dimension_numbers<[1], [0], [0], [1], [0, 0, 1, 1], [], []>} : vector<2x128xbf16>, vector<128x512xbf16>, vector<2x512xf32> -> vector<2x512xf32>
    %345 = arith.addf %341, %344 : vector<2x512xf32>
    %346 = vector.extract_strided_slice %345 {offsets = [0, 0], sizes = [2, 128], strides = [1, 1]} : vector<2x512xf32> to vector<2x128xf32>
    %347 = arith.negf %346 : vector<2x128xf32>
    %348 = math.exp %347 : vector<2x128xf32>
    %cst_92 = arith.constant 1.000000e+00 : f32
    %349 = vector.broadcast %cst_92 : f32 to vector<2x128xf32>
    %350 = arith.addf %349, %348 : vector<2x128xf32>
    %351 = arith.divf %349, %350 : vector<2x128xf32>
    %352 = vector.extract_strided_slice %345 {offsets = [0, 128], sizes = [2, 128], strides = [1, 1]} : vector<2x512xf32> to vector<2x128xf32>
    %353 = arith.negf %352 : vector<2x128xf32>
    %354 = math.exp %353 : vector<2x128xf32>
    %cst_93 = arith.constant 1.000000e+00 : f32
    %355 = vector.broadcast %cst_93 : f32 to vector<2x128xf32>
    %356 = arith.addf %355, %354 : vector<2x128xf32>
    %357 = arith.divf %355, %356 : vector<2x128xf32>
    %358 = vector.extract_strided_slice %345 {offsets = [0, 256], sizes = [2, 128], strides = [1, 1]} : vector<2x512xf32> to vector<2x128xf32>
    %359 = math.tanh %358 : vector<2x128xf32>
    %360 = vector.extract_strided_slice %345 {offsets = [0, 384], sizes = [2, 128], strides = [1, 1]} : vector<2x512xf32> to vector<2x128xf32>
    %361 = arith.negf %360 : vector<2x128xf32>
    %362 = math.exp %361 : vector<2x128xf32>
    %cst_94 = arith.constant 1.000000e+00 : f32
    %363 = vector.broadcast %cst_94 : f32 to vector<2x128xf32>
    %364 = arith.addf %363, %362 : vector<2x128xf32>
    %365 = arith.divf %363, %364 : vector<2x128xf32>
    %366 = arith.mulf %357, %338 : vector<2x128xf32>
    %367 = arith.mulf %351, %359 : vector<2x128xf32>
    %368 = arith.addf %366, %367 : vector<2x128xf32>
    %369 = math.tanh %368 : vector<2x128xf32>
    %370 = arith.mulf %365, %369 : vector<2x128xf32>
    %371 = arith.truncf %370 : vector<2x128xf32> to vector<2x128xbf16>
    %372 = arith.index_cast %c7_i32 : i32 to index
    %c0_95 = arith.constant 0 : index
    %c0_96 = arith.constant 0 : index
    %373 = vector.load %arg13[%372, %c0_95, %c0_96] : memref<8x2x128xbf16, #tpu.memory_space<vmem>>, vector<1x2x128xbf16>
    %374 = vector.shape_cast %373 : vector<1x2x128xbf16> to vector<2x128xbf16>
    %375 = vector.shape_cast %371 : vector<2x128xbf16> to vector<1x2x128xbf16>
    tpu.vector_store %arg13[%372, %c0_95, %c0_96], %375 {strides = array<i32>} : memref<8x2x128xbf16, #tpu.memory_space<vmem>>, vector<1x2x128xbf16>,
    %376 = arith.addi %14, %c7_i32 : i32
    %377 = vector.broadcast %376 : i32 to vector<2x1xi32>
    %378 = arith.cmpi slt, %377, %13 : vector<2x1xi32>
    %379 = vector.shape_cast %378 : vector<2x1xi1> to vector<2x1xi1>
    %380 = vector.broadcast %379 : vector<2x1xi1> to vector<2x128xi1>
    %381 = arith.select %380, %370, %335 : vector<2x128xi1>, vector<2x128xf32>
    %382 = vector.shape_cast %378 : vector<2x1xi1> to vector<2x1xi1>
    %383 = vector.broadcast %382 : vector<2x1xi1> to vector<2x128xi1>
    %384 = arith.select %383, %368, %338 : vector<2x128xi1>, vector<2x128xf32>
    %c8_i32_97 = arith.constant 8 : i32
    %c0_98 = arith.constant 0 : index
    %c0_99 = arith.constant 0 : index
    %385 = vector.load %arg10[%c0_98, %c0_99] : memref<2x128xf32, #tpu.memory_space<vmem>>, vector<2x128xf32>
    tpu.vector_store %arg10[%c0_98, %c0_99], %381 {strides = array<i32>} : memref<2x128xf32, #tpu.memory_space<vmem>>, vector<2x128xf32>,
    %c0_100 = arith.constant 0 : index
    %c0_101 = arith.constant 0 : index
    %386 = vector.load %arg11[%c0_100, %c0_101] : memref<2x128xf32, #tpu.memory_space<vmem>>, vector<2x128xf32>
    tpu.vector_store %arg11[%c0_100, %c0_101], %384 {strides = array<i32>} : memref<2x128xf32, #tpu.memory_space<vmem>>, vector<2x128xf32>,
    %c0_102 = arith.constant 0 : index
    %c0_103 = arith.constant 0 : index
    %c0_104 = arith.constant 0 : index
    %387 = vector.load %arg13[%c0_102, %c0_103, %c0_104] : memref<8x2x128xbf16, #tpu.memory_space<vmem>>, vector<8x2x128xbf16>
    %388 = vector.shape_cast %387 : vector<8x2x128xbf16> to vector<16x128xbf16>
    %c0_105 = arith.constant 0 : index
    %c0_106 = arith.constant 0 : index
    %389 = vector.load %arg7[%c0_105, %c0_106] : memref<128x128xbf16, #tpu.memory_space<vmem>>, vector<128x128xbf16>
    %cst_107 = arith.constant dense<0.000000e+00> : vector<16x128xf32>
    %390 = tpu.matmul %388, %389, %cst_107 {dimension_numbers = #tpu.dot_dimension_numbers<[1], [0], [0], [1], [0, 0, 1, 1], [], []>} : vector<16x128xbf16>, vector<128x128xbf16>, vector<16x128xf32> -> vector<16x128xf32>
    %c0_108 = arith.constant 0 : index
    %c0_109 = arith.constant 0 : index
    %391 = vector.load %arg8[%c0_108, %c0_109] : memref<1x128xf32, #tpu.memory_space<vmem>>, vector<1x128xf32>
    %392 = vector.broadcast %391 : vector<1x128xf32> to vector<16x128xf32>
    %393 = arith.addf %390, %392 : vector<16x128xf32>
    %394 = vector.shape_cast %393 : vector<16x128xf32> to vector<8x2x128xf32>
    %395 = tpu.iota {dimensions = array<i32: 0>} : vector<8x2x1xi32>
    %396 = vector.broadcast %14 : i32 to vector<8x2x1xi32>
    %397 = arith.addi %396, %395 : vector<8x2x1xi32>
    %398 = vector.shape_cast %13 : vector<2x1xi32> to vector<1x2x1xi32>
    %399 = vector.broadcast %398 : vector<1x2x1xi32> to vector<8x2x1xi32>
    %400 = arith.cmpi slt, %397, %399 : vector<8x2x1xi32>
    %c0_110 = arith.constant 0 : index
    %c0_111 = arith.constant 0 : index
    %401 = vector.load %arg8[%c0_110, %c0_111] : memref<1x128xf32, #tpu.memory_space<vmem>>, vector<1x128xf32>
    %402 = vector.shape_cast %401 : vector<1x128xf32> to vector<1x1x128xf32>
    %403 = vector.shape_cast %400 : vector<8x2x1xi1> to vector<8x2x1xi1>
    %404 = vector.broadcast %403 : vector<8x2x1xi1> to vector<8x2x128xi1>
    %405 = vector.shape_cast %402 : vector<1x1x128xf32> to vector<1x1x128xf32>
    %406 = vector.broadcast %405 : vector<1x1x128xf32> to vector<8x2x128xf32>
    %407 = arith.select %404, %394, %406 : vector<8x2x128xi1>, vector<8x2x128xf32>
    %408 = tpu.transpose %407, [1, 0, 2] : vector<8x2x128xf32> -> vector<2x8x128xf32>
    %c0_112 = arith.constant 0 : index
    %c0_113 = arith.constant 0 : index
    %c0_114 = arith.constant 0 : index
    %409 = vector.load %arg9[%c0_112, %c0_113, %c0_114] : memref<2x8x128xf32, #tpu.memory_space<vmem>>, vector<2x8x128xf32>
    tpu.vector_store %arg9[%c0_112, %c0_113, %c0_114], %408 {strides = array<i32>} : memref<2x8x128xf32, #tpu.memory_space<vmem>>, vector<2x8x128xf32>,
    return
  }
  func.func @transform_0(%arg0: i32, %arg1: i32) -> (i32, i32, i32) {
    %c0_i32 = arith.constant 0 : i32
    %c0_i32_0 = arith.constant 0 : i32
    return %arg0, %arg1, %c0_i32 : i32, i32, i32
  }
  func.func @transform_1(%arg0: i32, %arg1: i32) -> (i32, i32) {
    %c0_i32 = arith.constant 0 : i32
    %c0_i32_0 = arith.constant 0 : i32
    return %arg0, %c0_i32 : i32, i32
  }
  func.func @transform_2(%arg0: i32, %arg1: i32) -> (i32, i32) {
    %c0_i32 = arith.constant 0 : i32
    %c0_i32_0 = arith.constant 0 : i32
    %c0_i32_1 = arith.constant 0 : i32
    return %c0_i32, %c0_i32_0 : i32, i32
  }
  func.func @transform_3(%arg0: i32, %arg1: i32) -> (i32, i32) {
    %c0_i32 = arith.constant 0 : i32
    %c0_i32_0 = arith.constant 0 : i32
    %c0_i32_1 = arith.constant 0 : i32
    return %c0_i32, %c0_i32_0 : i32, i32
  }
  func.func @transform_4(%arg0: i32, %arg1: i32) -> (i32, i32) {
    %c0_i32 = arith.constant 0 : i32
    %c0_i32_0 = arith.constant 0 : i32
    %c0_i32_1 = arith.constant 0 : i32
    return %c0_i32, %c0_i32_0 : i32, i32
  }
  func.func @transform_5(%arg0: i32, %arg1: i32) -> (i32, i32) {
    %c0_i32 = arith.constant 0 : i32
    %c0_i32_0 = arith.constant 0 : i32
    %c0_i32_1 = arith.constant 0 : i32
    return %c0_i32, %c0_i32_0 : i32, i32
  }
  func.func @transform_6(%arg0: i32, %arg1: i32) -> (i32, i32) {
    %c0_i32 = arith.constant 0 : i32
    %c0_i32_0 = arith.constant 0 : i32
    %c0_i32_1 = arith.constant 0 : i32
    return %c0_i32, %c0_i32_0 : i32, i32
  }
  func.func @transform_7(%arg0: i32, %arg1: i32) -> (i32, i32, i32) {
    %c0_i32 = arith.constant 0 : i32
    %c0_i32_0 = arith.constant 0 : i32
    return %arg0, %arg1, %c0_i32 : i32, i32, i32
  }
}

</mosaic_0001>

<bundles_post_ra>
// kernel: tpu_custom_call.1
= control target key start
LH: loop header
LB: loop body
LE: loop exit
PB: predicated region body
PF: predicated region fallthrough
CT: control target
= control target key end

     0   :  { %12 = vsyncpa [#allocation7], 0  ;;  %s5411_s0 = inlined_call_operand.hbm [shape: bf16[2,8,16], index: 0, kind: input, shape index: {}]   ;;  %s5412_s1 = inlined_call_operand.vmem [shape: s32[2,1], index: 1, kind: input, shape index: {}]   ;;  %s5413_s2 = inlined_call_operand.hbm [shape: bf16[16,512], index: 2, kind: input, shape index: {}]   ;;  %s5414_s3 = inlined_call_operand.hbm [shape: bf16[128,512], index: 3, kind: input, shape index: {}]   ;;  %s5415_s4 = inlined_call_operand.vmem [shape: f32[1,512], index: 4, kind: input, shape index: {}]   ;;  %s5416_s5 = inlined_call_operand.hbm [shape: bf16[128,128], index: 5, kind: input, shape index: {}]   ;;  %s5417_s6 = inlined_call_operand.vmem [shape: f32[1,128], index: 6, kind: input, shape index: {}]   ;;  %s5418_s7 = inlined_call_operand.hbm [shape: f32[2,8,128], index: 7, kind: output, shape index: {}]  }
   0x1   :  { %13 = vsyncpa [#allocation10], 0 }
   0x2   :  { %14 = vsyncpa [#allocation13], 0  ;;  %s35_s26 = sshll.u32 %s5413_s2, 4  ;;  %s36_s26 = int_to_ptr.hbm [resolvable:$true] %s35_s26 }
   0x3   :  { %15 = vsyncpa [#allocation8], 0  ;;  %s4975_s27 = smov [#allocation9]   ;;  %s20_s8 = sshll.u32 %s5411_s0, 4  ;;  %s21_s8 = int_to_ptr.hbm [resolvable:$true] %s20_s8 }
   0x4   :  { %s37_s28 = sshll.u32 %s4975_s27, 4  ;;  %s4976_s9 = smov 256   ;;  %s38_s28 = int_to_ptr.vmem [resolvable:$true] %s37_s28 }
   0x5   :  { %s4977_s10 = smov 16   ;;  %s4978_s11 = smov [#allocation6]  }
   0x6   :  { %43 = dma.hbm_to_vmem [thread:$0]  %s36_s26, 512, %s38_s28, [#allocation10], %s4976_s9, %s4976_s9, %s4977_s10  }
   0x7   :  { %s22_s12 = sshll.u32 %s4978_s11, 4  ;;  %s4979_s13 = smov 64   ;;  %s23_s12 = int_to_ptr.vmem [resolvable:$true] %s22_s12 }
   0x8   :  { %s4980_s14 = smov 4   ;;  %s48_s16 = sshll.u32 %s5414_s3, 4  ;;  %s49_s16 = int_to_ptr.hbm [resolvable:$true] %s48_s16 }
   0x9   :  { %28 = dma.hbm_to_vmem [thread:$0]  %s21_s8, 128, %s23_s12, [#allocation7], %s4979_s13, %s4979_s13, %s4980_s14  }
   0xa   :  { %s4981_s17 = smov [#allocation11]   ;;  %s63_s20 = sshll.u32 %s5416_s5, 4  ;;  %s64_s20 = int_to_ptr.hbm [resolvable:$true] %s63_s20 }
   0xb   :  { %s50_s18 = sshll.u32 %s4981_s17, 4  ;;  %s4982_s21 = smov [#allocation12]   ;;  %s51_s18 = int_to_ptr.vmem [resolvable:$true] %s50_s18 }
   0xc   :  { %56 = dma.hbm_to_vmem [thread:$0]  %s49_s16, 4096, %s51_s18, [#allocation10], %s4976_s9, %s4976_s9, %s4977_s10  }
   0xd   :  { %s65_s22 = sshll.u32 %s4982_s21, 4  ;;  %s66_s22 = int_to_ptr.vmem [resolvable:$true] %s65_s22 }
   0xe   :  { %71 = dma.hbm_to_vmem [thread:$0]  %s64_s20, 1024, %s66_s22, [#allocation13], %s4979_s13, %s4979_s13, %s4980_s14  }
   0xf   :  { %4967 = dma.done.wait [#allocation7], 128  }
  0x10   :  { %4968 = vsyncadd [#allocation7], 4294967168 }
  0x11   :  { %4969 = dma.done.wait [#allocation10], 4608  }
  0x12   :  { %4970 = vsyncadd [#allocation10], 4294962688 }
  0x13   :  { %4971 = dma.done.wait [#allocation13], 1024  }
  0x14   :  { %4972 = vsyncadd [#allocation13], 4294966272  ;;  %v3326_v0 = vld [vmem:[#allocation9 + $0x8] sm:$0xf]  ;;  %v4434_v1 = vld [vmem:[#allocation9 + $0x14] sm:$0xf0] }
  0x15   :  { %v4432_v2 = vld [vmem:[#allocation9 + $0xc] sm:$0xf]  ;;  %v3327_v3 = vor.u32 %v4434_v1, %v3326_v0  ;;  %v3328_v4 = vld [vmem:[#allocation9 + $0x18] sm:$0xf0]  ;;  %v3458_v5 = vld [vmem:[#allocation11 + $0xe8] sm:$0xf] }
  0x16   :  { %v4466_v6 = vld [vmem:[#allocation11 + $0xf4] sm:$0xf0]  ;;  %v3331_v7 = vor.u32 %v4432_v2, %v3328_v4  ;;  %v4464_v9 = vld [vmem:[#allocation11 + $0xec] sm:$0xf]  ;;  %v3460_v10 = vld [vmem:[#allocation11 + $0xf8] sm:$0xf0] }
  0x17   :  { %v3459_v8 = vor.u32 %v4466_v6, %v3458_v5  ;;  %v3442_v11 = vld [vmem:[#allocation11 + $0xc8] sm:$0xf]  ;;  %240 = vmatpush.bf16.msra.mxu2 %v3327_v3  ;;  %v3463_v12 = vor.u32 %v4464_v9, %v3460_v10  ;;  %v4462_v13 = vld [vmem:[#allocation11 + $0xd4] sm:$0xf0]  ;;  %v4460_v14 = vld [vmem:[#allocation11 + $0xcc] sm:$0xf] }
  0x18   :  { %v3444_v15 = vld [vmem:[#allocation11 + $0xd8] sm:$0xf0]  ;;  %254 = vmatpush.bf16.msra.mxu3 %v3331_v7  ;;  %v3443_v16 = vor.u32 %v4462_v13, %v3442_v11  ;;  %v3450_v17 = vld [vmem:[#allocation11 + $0xe0] sm:$0xf]  ;;  %v4465_v18 = vld [vmem:[#allocation11 + $0xec] sm:$0xf0] }
  0x19   :  { %v3426_v19 = vld [vmem:[#allocation11 + $0xa8] sm:$0xf]  ;;  %v4983_v20 = vmov 1983009808   ;;  %v3447_v22 = vor.u32 %v4460_v14, %v3444_v15  ;;  %v3451_v23 = vor.u32 %v4465_v18, %v3450_v17  ;;  %v4458_v24 = vld [vmem:[#allocation11 + $0xb4] sm:$0xf0] }
  0x1a   :  { %v107_v21 = vunpack.c.l.s4 %v4983_v20  ;;  %v4456_v25 = vld [vmem:[#allocation11 + $0xac] sm:$0xf]  ;;  %v3428_v26 = vld [vmem:[#allocation11 + $0xb8] sm:$0xf0]  ;;  %v3318_v27 = vld [vmem:[#allocation9] sm:$0xf]  ;;  %v3427_v35 = vor.u32 %v4458_v24, %v3426_v19 }
  0x1b   :  { %551 = vmatpush.bf16.msrb.mxu2 %v3459_v8  ;;  %v4433_v28 = vld [vmem:[#allocation9 + $0xc] sm:$0xf0]  ;;  %v3434_v29 = vld [vmem:[#allocation11 + $0xc0] sm:$0xf]  ;;  %v4984_v30 = vmov 1934713408   ;;  %525 = vmatpush.bf16.msra.mxu0 %v3451_v23  ;;  %v3431_v41 = vor.u32 %v4456_v25, %v3428_v26 }
  0x1c   :  { %564 = vmatpush.bf16.msrb.mxu3 %v3463_v12  ;;  %v114_v31 = vunpack.c.l.s4 %v4984_v30  ;;  %v3319_v32 = vor.u32 %v4433_v28, %v3318_v27  ;;  %v4461_v33 = vld [vmem:[#allocation11 + $0xcc] sm:$0xf0]  ;;  %v3410_v34 = vld [vmem:[#allocation11 + $0x88] sm:$0xf]  ;;  %v4454_v37 = vld [vmem:[#allocation11 + $0x94] sm:$0xf0]  ;;  %v5042_v40 = vunpack.c.0.s8 %v107_v21 }
  0x1d   :  { %v3435_v36 = vor.u32 %v4461_v33, %v3434_v29  ;;  %v4452_v38 = vld [vmem:[#allocation11 + $0x8c] sm:$0xf]  ;;  %v97_v39 = vld [vmem:[#allocation6] sm:$0xf]  ;;  %v98_v42 = vld [vmem:[#allocation6 + $0x4] sm:$0xf]  ;;  %v3411_v53 = vor.u32 %v4454_v37, %v3410_v34 }
  0x1e   :  { %212 = vmatpush.bf16.msra.mxu1 %v3319_v32  ;;  %v102_v43 = vshrl.u32 %v97_v39, 16  ;;  %v4431_v44 = vld [vmem:[#allocation9 + $0x4] sm:$0xf]  ;;  %v3412_v45 = vld [vmem:[#allocation11 + $0x98] sm:$0xf0]  ;;  %v101_v46 = vpack.i.b16 %v98_v42, %v97_v39  ;;  %v103_v47 = vshrl.u32 %v98_v42, 16  ;;  %v5044_v48 = vunpack.c.0.s8 %v114_v31 }
  0x1f   :  { %552 = vmatpush.bf16.msrb.mxu2 %v3443_v16  ;;  %v3320_v49 = vld [vmem:[#allocation9 + $0x10] sm:$0xf0]  ;;  %526 = vmatpush.bf16.msra.mxu0 %v3435_v36  ;;  %v3418_v51 = vld [vmem:[#allocation11 + $0xa0] sm:$0xf]  ;;  %v4457_v52 = vld [vmem:[#allocation11 + $0xac] sm:$0xf0]  ;;  %v3415_v59 = vor.u32 %v4452_v38, %v3412_v45 }
  0x20   :  { %565 = vmatpush.bf16.msrb.mxu3 %v3447_v22  ;;  %v3323_v50 = vor.u32 %v4431_v44, %v3320_v49  ;;  %v104_v54 = vpack.i.b16 %v103_v47, %v102_v43  ;;  %v109_v55 = vperm.slane %v101_v46, %v5042_v40  ;;  %v3419_v56 = vor.u32 %v4457_v52, %v3418_v51  ;;  %v3394_v57 = vld [vmem:[#allocation11 + $0x68] sm:$0xf]  ;;  %v4450_v58 = vld [vmem:[#allocation11 + $0x74] sm:$0xf0]  ;;  %v4448_v60 = vld [vmem:[#allocation11 + $0x6c] sm:$0xf] }
  0x21   :  { %vm111_vm0 = vcmask 1047556   ;;  %v3396_v61 = vld [vmem:[#allocation11 + $0x78] sm:$0xf0]  ;;  %v3402_v1 = vld [vmem:[#allocation11 + $0x80] sm:$0xf]  ;;  %v3395_v3 = vor.u32 %v4450_v58, %v3394_v57  ;;  %v4985_v45 = vmov 0.0  }
  0x22   :  { %226 = vmatpush.bf16.msrb.mxu1 %v3323_v50  ;;  %v110_v62 = vrot.slane %v109_v55, 4  ;;  %v116_v63 = vperm.slane %v109_v55, %v5044_v48  ;;  %v129_v0 = vperm.slane %v104_v54, %v5042_v40  ;;  %v4453_v2 = vld [vmem:[#allocation11 + $0x8c] sm:$0xf0]  ;;  %v3378_v5 = vld [vmem:[#allocation11 + $0x48] sm:$0xf]  ;;  %v3399_v11 = vor.u32 %v4448_v60, %v3396_v61  ;;  %s3301_s30 = sshll.u32 %s5418_s7, 4  ;;  %s3302_s30 = int_to_ptr.hbm [resolvable:$true] %s3301_s30 }
  0x23   :  { %553 = vmatpush.bf16.msrb.mxu2 %v3427_v35  ;;  %527 = vmatpush.bf16.msra.mxu0 %v3419_v56  ;;  %v3403_v4 = vor.u32 %v4453_v2, %v3402_v1  ;;  %v4446_v12 = vld [vmem:[#allocation11 + $0x54] sm:$0xf0]  ;;  %v4444_v13 = vld [vmem:[#allocation11 + $0x4c] sm:$0xf]  ;;  %v3380_v14 = vld [vmem:[#allocation11 + $0x58] sm:$0xf0] }
  0x24   :  { %566 = vmatpush.bf16.msrb.mxu3 %v3431_v41  ;;  %v112_v6 = vsel %vm111_vm0, 0, %v110_v62  ;;  %v121_v7 = vrot.slane %v116_v63, 4  ;;  %v130_v8 = vrot.slane %v129_v0, 4  ;;  %v135_v9 = vperm.slane %v129_v0, %v5044_v48  ;;  %159 = vst [vmem:[#allocation1] ss:$9 sm:$0xff] %v116_v63  ;;  %s4988_s8 = smov 128  }
  0x25   :  { %v120_v10 = vperm.slane %v112_v6, %v5044_v48  ;;  %v3386_v20 = vld [vmem:[#allocation11 + $0x60] sm:$0xf]  ;;  %v3379_v22 = vor.u32 %v4446_v12, %v3378_v5  ;;  %v4449_v23 = vld [vmem:[#allocation11 + $0x6c] sm:$0xf0]  ;;  %v3383_v26 = vor.u32 %v4444_v13, %v3380_v14  ;;  %v3362_v28 = vld [vmem:[#allocation11 + $0x28] sm:$0xf] }
  0x26   :  { %v122_v15 = vsel %vm111_vm0, 0, %v121_v7  ;;  %v131_v16 = vsel %vm111_vm0, 0, %v130_v8  ;;  %v140_v17 = vrot.slane %v135_v9, 4  ;;  %162 = vst [vmem:[#allocation1 + $0x1] ss:$9 sm:$0xff] %v135_v9  ;;  %v3387_v27 = vor.u32 %v4449_v23, %v3386_v20  ;;  %s4989_s9 = smov 8  }
  0x27   :  { %554 = vmatpush.bf16.msrb.mxu2 %v3411_v53  ;;  %v123_v18 = vrot.slane %v120_v10, 4  ;;  %v139_v19 = vperm.slane %v131_v16, %v5044_v48  ;;  %165 = vst [vmem:[#allocation1 + $0x2] ss:$9 sm:$0xff] %v122_v15  ;;  %528 = vmatpush.bf16.msra.mxu0 %v3403_v4  ;;  %v4442_v29 = vld [vmem:[#allocation11 + $0x34] sm:$0xf0]  ;;  %vm202_vm1 = vcmask 130048  }
  0x28   :  { %567 = vmatpush.bf16.msrb.mxu3 %v3415_v59  ;;  %v141_v21 = vsel %vm111_vm0, 0, %v140_v17  ;;  %171 = vst [vmem:[#allocation1 + $0x4] ss:$9 sm:$0xff] %v120_v10  ;;  %v4440_v30 = vld [vmem:[#allocation11 + $0x2c] sm:$0xf]  ;;  %v3363_v33 = vor.u32 %v4442_v29, %v3362_v28  ;;  %v4986_v62 = vmov 0  }
  0x29   :  { %v124_v24 = vsel %vm111_vm0, 0, %v123_v18  ;;  %v142_v25 = vrot.slane %v139_v19, 4  ;;  %168 = vst [vmem:[#allocation1 + $0x3] ss:$9 sm:$0xff] %v141_v21  ;;  %v3364_v32 = vld [vmem:[#allocation11 + $0x38] sm:$0xf0]  ;;  %4714 = vset.pattern.permute.xlu0 %v4986_v62  ;;  %4715 = vset.pattern.permute.xlu1 %v4986_v62 }
  0x2a   :  { %174 = vst [vmem:[#allocation1 + $0x5] ss:$9 sm:$0xff] %v139_v19  ;;  %v4463_v34 = vld [vmem:[#allocation11 + $0xe4] sm:$0xf]  ;;  %v3367_v35 = vor.u32 %v4440_v30, %v3364_v32  ;;  %v3370_v36 = vld [vmem:[#allocation11 + $0x40] sm:$0xf]  ;;  %4716 = vset.pattern.permute.xlu2 %v4986_v62 }
  0x2b   :  { %555 = vmatpush.bf16.msrb.mxu2 %v3395_v3  ;;  %v143_v31 = vsel %vm111_vm0, 0, %v142_v25  ;;  %177 = vst [vmem:[#allocation1 + $0x6] ss:$9 sm:$0xff] %v124_v24  ;;  %529 = vmatpush.bf16.msra.mxu0 %v3387_v27  ;;  %v4445_v37 = vld [vmem:[#allocation11 + $0x4c] sm:$0xf0]  ;;  %vm275_vm5 = vcmask 1041408  }
  0x2c   :  { %568 = vmatpush.bf16.msrb.mxu3 %v3399_v11  ;;  %180 = vst [vmem:[#allocation1 + $0x7] ss:$9 sm:$0xff] %v143_v31  ;;  %v3452_v38 = vld [vmem:[#allocation11 + $0xf0] sm:$0xf0]  ;;  %v3371_v39 = vor.u32 %v4445_v37, %v3370_v36  ;;  %v3346_v41 = vld [vmem:[#allocation11 + $0x8] sm:$0xf] }
  0x2d   :  { %v4438_v42 = vld [vmem:[#allocation11 + $0x14] sm:$0xf0]  ;;  %v4436_v43 = vld [vmem:[#allocation11 + $0xc] sm:$0xf]  ;;  %v3348_v44 = vld [vmem:[#allocation11 + $0x18] sm:$0xf0]  ;;  %v3455_v49 = vor.u32 %v4463_v34, %v3452_v38 }
  0x2e   :  { %95 = vst [vmem:[#allocation2] sm:$0x3] %v4985_v45  ;;  %v3354_v46 = vld [vmem:[#allocation11 + $0x20] sm:$0xf]  ;;  %v4441_v47 = vld [vmem:[#allocation11 + $0x2c] sm:$0xf0]  ;;  %v3347_v52 = vor.u32 %v4438_v42, %v3346_v41  ;;  %v3351_v53 = vor.u32 %v4436_v43, %v3348_v44 }
  0x2f   :  { %556 = vmatpush.bf16.msrb.mxu2 %v3379_v22  ;;  %530 = vmatpush.bf16.msra.mxu0 %v3371_v39  ;;  %96 = vst [vmem:[#allocation3] sm:$0x3] %v4985_v45  ;;  %v4459_v50 = vld [vmem:[#allocation11 + $0xc4] sm:$0xf]  ;;  %v3436_v51 = vld [vmem:[#allocation11 + $0xd0] sm:$0xf0]  ;;  %v3355_v55 = vor.u32 %v4441_v47, %v3354_v46 }
  0x30   :  { %569 = vmatpush.bf16.msrb.mxu3 %v3383_v26  ;;  %v3338_v56 = vld [vmem:[#allocation11] sm:$0xf]  ;;  %v4437_v57 = vld [vmem:[#allocation11 + $0xc] sm:$0xf0]  ;;  %v5063_v58 = vld [vmem:[%s5412_s1] sm:$0x3]  ;;  %v3439_v59 = vor.u32 %v4459_v50, %v3436_v51 }
  0x31   :  { %vm3467_vm2 = vcmp.gt.s32.totalorder %v5063_v58, 0  ;;  %v4455_v60 = vld [vmem:[#allocation11 + $0xa4] sm:$0xf]  ;;  %v3420_v61 = vld [vmem:[#allocation11 + $0xb0] sm:$0xf0]  ;;  %v3339_v0 = vor.u32 %v4437_v57, %v3338_v56  ;;  %vm3599_vm3 = vcmp.gt.s32.totalorder %v5063_v58, 1 }
  0x32   :  { %v663_v63 = vsel %vm3467_vm2, 1, %v4986_v62  ;;  %v3423_v1 = vor.u32 %v4455_v60, %v3420_v61  ;;  %v4451_v3 = vld [vmem:[#allocation11 + $0x84] sm:$0xf]  ;;  %v3404_v4 = vld [vmem:[#allocation11 + $0x90] sm:$0xf0]  ;;  %v1005_v7 = vsel %vm3599_vm3, 1, %v4986_v62 }
  0x33   :  { %557 = vmatpush.bf16.msrb.mxu2 %v3363_v33  ;;  %v181_v54 = vld [vmem:[#allocation1] sm:$0xff]  ;;  %531 = vmatpush.bf16.msra.mxu0 %v3355_v55  ;;  %v3407_v6 = vor.u32 %v4451_v3, %v3404_v4  ;;  %v3388_v9 = vld [vmem:[#allocation11 + $0x70] sm:$0xf0]  ;;  %vm4259_vm4 = vcmp.gt.s32.totalorder %v5063_v58, 6  ;;  %vm281_vm6 = vcmask 1043458   ;;  %vm283_vm7 = vcmask 1045504  }
  0x34   :  { %570 = vmatpush.bf16.msrb.mxu3 %v3367_v35  ;;  %3332 = vmatmul.msk.bf16.vlgmr.msra.gmra.mxu1 %vm202_vm1, %v181_v54  ;;  %v4447_v8 = vld [vmem:[#allocation11 + $0x64] sm:$0xf]  ;;  %v3372_v12 = vld [vmem:[#allocation11 + $0x50] sm:$0xf0]  ;;  %v2715_v14 = vsel %vm4259_vm4, 1, %v4986_v62  ;;  %vm277_vm8 = vcmask 1045508  }
  0x35   :  { %3334 = vmatmul.msk.bf16.vlgmr.msra.gmra.mxu2 %vm202_vm1, %v181_v54  ;;  %538 = vmatpush.bf16.msra.mxu1 %v3455_v49  ;;  %v5070_v2 = vld [vmem:[#allocation2] sm:$0x3]  ;;  %v3391_v10 = vor.u32 %v4447_v8, %v3388_v9  ;;  %v4443_v11 = vld [vmem:[#allocation11 + $0x44] sm:$0xf]  ;;  %v3356_v16 = vld [vmem:[#allocation11 + $0x30] sm:$0xf0] }
  0x36   :  { %3335 = vmatmul.msk.bf16.vlgmr.msra.gmra.mxu3 %vm202_vm1, %v181_v54  ;;  %665 = vperm.xlu0 %4714, %v663_v63   ;;  %v332_v5 = vpack.c.bf16 %v5070_v2, %v5070_v2  ;;  %v3375_v13 = vor.u32 %v4443_v11, %v3372_v12  ;;  %v4439_v15 = vld [vmem:[#allocation11 + $0x24] sm:$0xf]  ;;  %v3340_v19 = vld [vmem:[#allocation11 + $0x10] sm:$0xf0]  ;;  %vm279_vm9 = vcmask 1043456   ;;  %vm285_vm10 = vcmask 1045506  }
  0x37   :  { %558 = vmatpush.bf16.msrb.mxu2 %v3347_v52  ;;  %532 = vmatpush.bf16.msra.mxu0 %v3339_v0  ;;  %v3359_v17 = vor.u32 %v4439_v15, %v3356_v16  ;;  %v4435_v18 = vld [vmem:[#allocation11 + $0x4] sm:$0xf]  ;;  %v3582_v60 = vld [vmem:[#allocation11 + $0xe0] sm:$0xf]  ;;  %v4497_v61 = vld [vmem:[#allocation11 + $0xec] sm:$0xf0] }
  0x38   :  { %571 = vmatpush.bf16.msrb.mxu3 %v3351_v53  ;;  %v3343_v20 = vor.u32 %v4435_v18, %v3340_v19  ;;  %v148_v22 = vld [vmem:[%s5415_s4] sm:$0xf]  ;;  %v3583_v0 = vor.u32 %v4497_v61, %v3582_v60  ;;  %v3584_v3 = vld [vmem:[#allocation11 + $0xf0] sm:$0xf0]  ;;  %v3590_v4 = vld [vmem:[#allocation11 + $0xe8] sm:$0xf] }
  0x39   :  { %539 = vmatpush.bf16.msra.mxu1 %v3439_v59  ;;  %v152_v23 = vperm.slane %v148_v22, 2  ;;  %v153_v24 = vperm.slane %v148_v22, 3  ;;  %v150_v26 = vperm.slane %v148_v22, 0  ;;  %v151_v38 = vperm.slane %v148_v22, 1  ;;  %v4498_v9 = vld [vmem:[#allocation11 + $0xf4] sm:$0xf0] }
  0x3a   :  { %533 = vmatmul.bf16.vlgmr.msra.gmra.mxu0 %v332_v5  ;;  %v4493_v18 = vld [vmem:[#allocation11 + $0xcc] sm:$0xf0]  ;;  %v4491_v19 = vld [vmem:[#allocation11 + $0xc4] sm:$0xf]  ;;  %v3574_v22 = vld [vmem:[#allocation11 + $0xc8] sm:$0xf] }
  0x3b   :  { %865 = vmatpush.bf16.msrb.mxu0 %v3583_v0  ;;  %v3560_v0 = vld [vmem:[#allocation11 + $0xb8] sm:$0xf0] }
  0x3d   :  { %540 = vmatpush.bf16.msra.mxu1 %v3423_v1  ;;  %v4495_v1 = vld [vmem:[#allocation11 + $0xe4] sm:$0xf] }
  0x3e   :  { %1007 = vperm.xlu0 %4714, %v1005_v7   ;;  %v3587_v8 = vor.u32 %v4495_v1, %v3584_v3 }
  0x41   :  { %541 = vmatpush.bf16.msra.mxu1 %v3407_v6 }
  0x44   :  { %3333 = vmatmul.msk.bf16.vlgmr.msrb.gmra.mxu1 %vm202_vm1, %v181_v54 }
  0x45   :  { %559 = vmatmul.bf16.vlgmr.msrb.gmra.mxu2 %v332_v5  ;;  %542 = vmatpush.bf16.msra.mxu1 %v3391_v10  ;;  %v4496_v10 = vld [vmem:[#allocation11 + $0xec] sm:$0xf] }
  0x46   :  { %572 = vmatmul.bf16.vlgmr.msrb.gmra.mxu3 %v332_v5  ;;  %2717 = vperm.xlu0 %4714, %v2715_v14  }
  0x49   :  { %543 = vmatpush.bf16.msra.mxu1 %v3375_v13  ;;  %v3591_v13 = vor.u32 %v4498_v9, %v3590_v4  ;;  %v4485_v9 = vld [vmem:[#allocation11 + $0x8c] sm:$0xf0] }
  0x4b   :  { %891 = vmatpush.bf16.msra.mxu2 %v3591_v13  ;;  %v3536_v13 = vld [vmem:[#allocation11 + $0x90] sm:$0xf0] }
  0x4d   :  { %544 = vmatpush.bf16.msra.mxu1 %v3359_v17  ;;  %v3566_v17 = vld [vmem:[#allocation11 + $0xc0] sm:$0xf] }
  0x4e   :  { %3217 = vperm.xlu0 %4714, %v1005_v7  }
  0x51   :  { %545 = vmatpush.bf16.msra.mxu1 %v3343_v20  ;;  %v3567_v20 = vor.u32 %v4493_v18, %v3566_v17 }
  0x53   :  { %866 = vmatpush.bf16.msrb.mxu0 %v3567_v20  ;;  %v3518_v20 = vld [vmem:[#allocation11 + $0x60] sm:$0xf] }
  0x54   :  { %546 = vmatmul.bf16.vlgmr.msra.gmra.mxu1 %v332_v5 }
  0x55   :  { %878 = vmatpush.bf16.msrb.mxu1 %v3587_v8  ;;  %v3534_v8 = vld [vmem:[#allocation11 + $0x80] sm:$0xf] }
  0x56   :  { %3232 = vperm.xlu0 %4714, %v2715_v14   ;;  %v3592_v14 = vld [vmem:[#allocation11 + $0xf8] sm:$0xf0] }
  0x57   :  { %v3595_v16 = vor.u32 %v4496_v10, %v3592_v14  ;;  %v3535_v10 = vor.u32 %v4485_v9, %v3534_v8  ;;  %v4474_v8 = vld [vmem:[#allocation11 + $0x34] sm:$0xf0] }
  0x59   :  { %904 = vmatpush.bf16.msra.mxu3 %v3595_v16  ;;  %v3544_v16 = vld [vmem:[#allocation11 + $0x98] sm:$0xf0] }
  0xb1   :  { %v214_v21 = vpop.f32.mrf.mxu1 }
  0xb2   :  { %v5100_v50 = vadd.f32 %v214_v21, %v150_v26  ;;  %v3568_v21 = vld [vmem:[#allocation11 + $0xd0] sm:$0xf0] }
  0xb7   :  { %v5089_v34 = vpop.f32.mrf.mxu0 }
  0xb8   :  { %v242_v25 = vpop.f32.mrf.mxu2 }
  0xb9   :  { %v243_v27 = vadd.f32 %v242_v25, %v152_v23  ;;  %v256_v28 = vpop.f32.mrf.mxu3  ;;  %v216_v29 = vpop.f32.mrf.mxu1  ;;  %v3571_v25 = vor.u32 %v4491_v19, %v3568_v21  ;;  %v4481_v21 = vld [vmem:[#allocation11 + $0x6c] sm:$0xf0] }
  0xba   :  { %v257_v30 = vadd.f32 %v256_v28, %v153_v24  ;;  %v5083_v31 = vadd.f32 %v216_v29, %v150_v26  ;;  %v3576_v28 = vld [vmem:[#allocation11 + $0xd8] sm:$0xf0] }
  0xbb   :  { %v5085_v32 = vrot.slane %v243_v27, 4  ;;  %v4492_v27 = vld [vmem:[#allocation11 + $0xcc] sm:$0xf]  ;;  %879 = vmatpush.bf16.msrb.mxu1 %v3571_v25  ;;  %v4482_v25 = vld [vmem:[#allocation11 + $0x74] sm:$0xf0] }
  0xbc   :  { %v5087_v33 = vrot.slane %v257_v30, 2 }
  0xbe   :  { %v284_v35 = vsel %vm283_vm7, %v5087_v33, %v5085_v32  ;;  %v289_v36 = vsel %vm275_vm5, %v5085_v32, %v5087_v33  ;;  %v293_v37 = vsel %vm281_vm6, %v5085_v32, %v5087_v33 }
  0xbf   :  { %v536_v49 = vpop.f32.mrf.mxu0 }
  0xc0   :  { %v244_v39 = vpop.f32.mrf.mxu2  ;;  %v4490_v49 = vld [vmem:[#allocation11 + $0xb4] sm:$0xf0] }
  0xc1   :  { %v245_v41 = vadd.f32 %v244_v39, %v152_v23  ;;  %v258_v42 = vpop.f32.mrf.mxu3  ;;  %v228_v43 = vpop.f32.mrf.mxu1  ;;  %v4494_v23 = vld [vmem:[#allocation11 + $0xd4] sm:$0xf0] }
  0xc2   :  { %v259_v44 = vadd.f32 %v258_v42, %v153_v24  ;;  %v229_v45 = vadd.f32 %v228_v43, %v151_v38  ;;  %v3575_v26 = vor.u32 %v4494_v23, %v3574_v22  ;;  %v4489_v42 = vld [vmem:[#allocation11 + $0xac] sm:$0xf0]  ;;  %v4487_v43 = vld [vmem:[#allocation11 + $0xa4] sm:$0xf]  ;;  %v3520_v23 = vld [vmem:[#allocation11 + $0x70] sm:$0xf0] }
  0xc3   :  { %v273_v46 = vrot.slane %v245_v41, 4  ;;  %v3550_v41 = vld [vmem:[#allocation11 + $0xa0] sm:$0xf]  ;;  %v4479_v22 = vld [vmem:[#allocation11 + $0x64] sm:$0xf] }
  0xc4   :  { %v274_v47 = vrot.slane %v259_v44, 2  ;;  %v5102_v51 = vrot.slane %v229_v45, 6  ;;  %892 = vmatpush.bf16.msra.mxu2 %v3575_v26  ;;  %v3551_v45 = vor.u32 %v4489_v42, %v3550_v41  ;;  %v3502_v42 = vld [vmem:[#allocation11 + $0x40] sm:$0xf] }
  0xc6   :  { %v297_v52 = vsel %vm277_vm8, %v273_v46, %v274_v47  ;;  %v300_v53 = vsel %vm283_vm7, %v274_v47, %v273_v46  ;;  %v304_v54 = vsel %vm275_vm5, %v273_v46, %v274_v47  ;;  %v5108_v55 = vsel %vm281_vm6, %v273_v46, %v274_v47  ;;  %v3552_v46 = vld [vmem:[#allocation11 + $0xb0] sm:$0xf0]  ;;  %v3558_v47 = vld [vmem:[#allocation11 + $0xa8] sm:$0xf]  ;;  %867 = vmatpush.bf16.msrb.mxu0 %v3551_v45 }
  0xc7   :  { %v282_v56 = vsel %vm281_vm6, %v5100_v50, %v5102_v51  ;;  %v288_v57 = vsel %vm277_vm8, %v5100_v50, %v5102_v51  ;;  %v292_v59 = vsel %vm283_vm7, %v5102_v51, %v5100_v50  ;;  %v3555_v60 = vor.u32 %v4487_v43, %v3552_v46  ;;  %v4477_v43 = vld [vmem:[#allocation11 + $0x4c] sm:$0xf0]  ;;  %v3504_v46 = vld [vmem:[#allocation11 + $0x50] sm:$0xf0] }
  0xc8   :  { %v5119_v63 = vpop.f32.mrf.mxu2  ;;  %v5122_v5 = vsel %vm285_vm10, %v282_v56, %v284_v35  ;;  %v5125_v6 = vsel %vm279_vm9, %v289_v36, %v288_v57  ;;  %v5128_v11 = vsel %vm285_vm10, %v293_v37, %v292_v59  ;;  %v3579_v35 = vor.u32 %v4492_v27, %v3576_v28 }
  0xc9   :  { %v573_v7 = vpop.f32.mrf.mxu3  ;;  %v230_v12 = vpop.f32.mrf.mxu1  ;;  %v582_v29 = vrot.slane %v5119_v63, 4  ;;  %v3559_v61 = vor.u32 %v4490_v49, %v3558_v47  ;;  %v4488_v63 = vld [vmem:[#allocation11 + $0xac] sm:$0xf]  ;;  %880 = vmatpush.bf16.msrb.mxu1 %v3555_v60  ;;  %v3503_v45 = vor.u32 %v4477_v43, %v3502_v42  ;;  %v3510_v47 = vld [vmem:[#allocation11 + $0x48] sm:$0xf] }
  0xca   :  { %v231_v15 = vadd.f32 %v230_v12, %v151_v38  ;;  %v583_v30 = vrot.slane %v573_v7, 2  ;;  %905 = vmatpush.bf16.msra.mxu3 %v3579_v35  ;;  %v3563_v3 = vor.u32 %v4488_v63, %v3560_v0  ;;  %v4483_v12 = vld [vmem:[#allocation11 + $0x84] sm:$0xf]  ;;  %868 = vmatpush.bf16.msrb.mxu0 %v3535_v10  ;;  %v4478_v49 = vld [vmem:[#allocation11 + $0x54] sm:$0xf0] }
  0xcb   :  { %893 = vmatpush.bf16.msra.mxu2 %v3559_v61  ;;  %v3511_v60 = vor.u32 %v4478_v49, %v3510_v47  ;;  %v4476_v61 = vld [vmem:[#allocation11 + $0x4c] sm:$0xf]  ;;  %v3512_v63 = vld [vmem:[#allocation11 + $0x58] sm:$0xf0] }
  0xcc   :  { %v272_v24 = vrot.slane %v231_v15, 6  ;;  %v4484_v15 = vld [vmem:[#allocation11 + $0x8c] sm:$0xf]  ;;  %v3515_v0 = vor.u32 %v4476_v61, %v3512_v63 }
  0xcd   :  { %v3547_v18 = vor.u32 %v4484_v15, %v3544_v16  ;;  %v5173_v63 = vld [vmem:[#allocation3] sm:$0x3] }
  0xce   :  { %v296_v36 = vsel %vm275_vm5, %v5083_v31, %v272_v24  ;;  %v299_v37 = vsel %vm281_vm6, %v5083_v31, %v272_v24  ;;  %v303_v38 = vsel %vm277_vm8, %v5083_v31, %v272_v24  ;;  %v307_v39 = vsel %vm283_vm7, %v272_v24, %v5083_v31  ;;  %906 = vmatpush.bf16.msra.mxu3 %v3563_v3  ;;  %v3526_v24 = vld [vmem:[#allocation11 + $0x68] sm:$0xf]  ;;  %v4473_v3 = vld [vmem:[#allocation11 + $0x2c] sm:$0xf0] }
  0xcf   :  { %v5140_v56 = vsel %vm279_vm9, %v296_v36, %v297_v52  ;;  %v5143_v57 = vsel %vm285_vm10, %v299_v37, %v300_v53  ;;  %v5146_v59 = vsel %vm279_vm9, %v304_v54, %v303_v38  ;;  %v5150_v4 = vsel %vm285_vm10, %v5108_v55, %v307_v39  ;;  %v3542_v55 = vld [vmem:[#allocation11 + $0x88] sm:$0xf]  ;;  %v4480_v36 = vld [vmem:[#allocation11 + $0x6c] sm:$0xf]  ;;  %v3528_v37 = vld [vmem:[#allocation11 + $0x78] sm:$0xf0] }
  0xd0   :  { %v562_v44 = vpop.f32.mrf.mxu2  ;;  %v278_v52 = vsel %vm277_vm8, %v5085_v32, %v5087_v33  ;;  %v276_v53 = vsel %vm275_vm5, %v5100_v50, %v5102_v51  ;;  %v585_v54 = vsel %vm277_vm8, %v582_v29, %v583_v30  ;;  %v3539_v32 = vor.u32 %v4483_v12, %v3536_v13  ;;  %v4486_v33 = vld [vmem:[#allocation11 + $0x94] sm:$0xf0]  ;;  %v4472_v13 = vld [vmem:[#allocation11 + $0x2c] sm:$0xf] }
  0xd1   :  { %v575_v31 = vpop.f32.mrf.mxu3  ;;  %v547_v1 = vpop.f32.mrf.mxu1  ;;  %v280_v50 = vsel %vm279_vm9, %v276_v53, %v278_v52  ;;  %v3543_v17 = vor.u32 %v4486_v33, %v3542_v55  ;;  %v3523_v30 = vor.u32 %v4479_v22, %v3520_v23  ;;  %v3527_v35 = vor.u32 %v4482_v25, %v3526_v24  ;;  %v4475_v44 = vld [vmem:[#allocation11 + $0x44] sm:$0xf]  ;;  %v3496_v55 = vld [vmem:[#allocation11 + $0x38] sm:$0xf0]  ;;  %v4470_v22 = vld [vmem:[#allocation11 + $0x14] sm:$0xf0] }
  0xd2   :  { %v581_v7 = vrot.slane %v547_v1, 6  ;;  %881 = vmatpush.bf16.msrb.mxu1 %v3539_v32  ;;  %907 = vmatpush.bf16.msra.mxu3 %v3547_v18  ;;  %v3531_v41 = vor.u32 %v4480_v36, %v3528_v37  ;;  %v3507_v31 = vor.u32 %v4475_v44, %v3504_v46  ;;  %v3486_v1 = vld [vmem:[#allocation11 + $0x20] sm:$0xf]  ;;  %v4471_v52 = vld [vmem:[#allocation11 + $0x24] sm:$0xf]  ;;  %v3499_v32 = vor.u32 %v4472_v13, %v3496_v55 }
  0xd3   :  { %894 = vmatpush.bf16.msra.mxu2 %v3543_v17  ;;  %v3487_v53 = vor.u32 %v4473_v3, %v3486_v1  ;;  %v4469_v17 = vld [vmem:[#allocation11 + $0xc] sm:$0xf0]  ;;  %v4467_v18 = vld [vmem:[#allocation11 + $0x4] sm:$0xf]  ;;  %v3480_v23 = vld [vmem:[#allocation11 + $0x18] sm:$0xf0] }
  0xd4   :  { %v584_v14 = vsel %vm275_vm5, %v5089_v34, %v581_v7  ;;  %v3519_v34 = vor.u32 %v4481_v21, %v3518_v20  ;;  %v3494_v7 = vld [vmem:[#allocation11 + $0x28] sm:$0xf]  ;;  %v3472_v20 = vld [vmem:[#allocation11 + $0x10] sm:$0xf0] }
  0xd5   :  { %v586_v51 = vsel %vm279_vm9, %v584_v14, %v585_v54  ;;  %v3488_v54 = vld [vmem:[#allocation11 + $0x30] sm:$0xf0]  ;;  %v3495_v12 = vor.u32 %v4474_v8, %v3494_v7  ;;  %v3478_v21 = vld [vmem:[#allocation11 + $0x8] sm:$0xf]  ;;  %v3475_v25 = vor.u32 %v4467_v18, %v3472_v20  ;;  %v3714_v20 = vld [vmem:[#allocation11 + $0xe0] sm:$0xf] }
  0xd6   :  { %v5163_v19 = vadd.f32 %v586_v51, %v280_v50  ;;  %869 = vmatpush.bf16.msrb.mxu0 %v3519_v34  ;;  %882 = vmatpush.bf16.msrb.mxu1 %v3523_v30  ;;  %v3491_v10 = vor.u32 %v4471_v52, %v3488_v54  ;;  %v3470_v51 = vld [vmem:[#allocation11] sm:$0xf]  ;;  %v4468_v34 = vld [vmem:[#allocation11 + $0xc] sm:$0xf] }
  0xd7   :  { %895 = vmatpush.bf16.msra.mxu2 %v3527_v35  ;;  %908 = vmatpush.bf16.msra.mxu3 %v3531_v41  ;;  %v3471_v24 = vor.u32 %v4469_v17, %v3470_v51 }
  0xd8   :  { %v3464_v26 = vmul.f32 -1.442695, %v5163_v19  ;;  %v609_v27 = vrot.slane %v5163_v19, 2  ;;  %v633_v28 = vrot.slane %v5163_v19, 6  ;;  %v630_v35 = vrot.slane %v5163_v19, 4 }
  0xd9   :  { %v549_v29 = vpop.f32.mrf.mxu1 }
  0xda   :  { %4718 = vpow2.f32 %v3464_v26  ;;  %v3465_v38 = vmul.f32 -1.442695, %v609_v27  ;;  %v3466_v39 = vmul.f32 -1.442695, %v633_v28  ;;  %870 = vmatpush.bf16.msrb.mxu0 %v3503_v45  ;;  %883 = vmatpush.bf16.msrb.mxu1 %v3507_v31  ;;  %v3479_v27 = vor.u32 %v4470_v22, %v3478_v21  ;;  %v4529_v21 = vld [vmem:[#allocation11 + $0xec] sm:$0xf0] }
  0xdb   :  { %896 = vmatpush.bf16.msra.mxu2 %v3511_v60  ;;  %909 = vmatpush.bf16.msra.mxu3 %v3515_v0  ;;  %v3483_v28 = vor.u32 %v4468_v34, %v3480_v23  ;;  %v4527_v22 = vld [vmem:[#allocation11 + $0xe4] sm:$0xf]  ;;  %v3715_v34 = vor.u32 %v4529_v21, %v3714_v20  ;;  %v3716_v23 = vld [vmem:[#allocation11 + $0xf0] sm:$0xf0] }
  0xdc   :  { %4720 = vpow2.f32 %v3465_v38  ;;  %v4515_v20 = vld [vmem:[#allocation11 + $0x84] sm:$0xf]  ;;  %v3668_v21 = vld [vmem:[#allocation11 + $0x90] sm:$0xf0] }
  0xdd   :  { %4722 = vpow2.f32 %v3466_v39 }
  0xde   :  { %871 = vmatpush.bf16.msrb.mxu0 %v3487_v53  ;;  %884 = vmatpush.bf16.msrb.mxu1 %v3491_v10 }
  0xdf   :  { %897 = vmatpush.bf16.msra.mxu2 %v3495_v12  ;;  %910 = vmatpush.bf16.msra.mxu3 %v3499_v32 }
  0xe0   :  { %v4719_v9 = vpop.eup %4718 }
  0xe1   :  { %v592_v14 = vadd.f32 1.0, %v4719_v9 }
  0xe2   :  { %v4721_v33 = vpop.eup %4720  ;;  %872 = vmatpush.bf16.msrb.mxu0 %v3471_v24  ;;  %885 = vmatpush.bf16.msrb.mxu1 %v3475_v25  ;;  %v3722_v24 = vld [vmem:[#allocation11 + $0xe8] sm:$0xf]  ;;  %v4530_v25 = vld [vmem:[#allocation11 + $0xf4] sm:$0xf0] }
  0xe3   :  { %v4723_v15 = vpop.eup %4722  ;;  %4724 = vrcp.f32 %v592_v14  ;;  %v614_v16 = vadd.f32 1.0, %v4721_v33  ;;  %898 = vmatpush.bf16.msra.mxu2 %v3479_v27  ;;  %911 = vmatpush.bf16.msra.mxu3 %v3483_v28  ;;  %v604_v39 = vand.u32 2147483648, %v592_v14  ;;  %v602_v43 = vand.u32 2147483647, %v592_v14  ;;  %v4528_v27 = vld [vmem:[#allocation11 + $0xec] sm:$0xf] }
  0xe4   :  { %v5168_v50 = vadd.f32 1.0, %v4723_v15  ;;  %vm598_vm12 = vweird.f32 %v592_v14  ;;  %v5182_v15 = vpop.permute.xlu0 %665  ;;  %v3724_v28 = vld [vmem:[#allocation11 + $0xf8] sm:$0xf0] }
  0xe5   :  { %4726 = vrcp.f32 %v614_v16  ;;  %v626_v45 = vand.u32 2147483648, %v614_v16  ;;  %v624_v49 = vand.u32 2147483647, %v614_v16  ;;  %v605_v19 = vor.u32 1.1754944e-38, %v604_v39 }
  0xe6   :  { %4728 = vrcp.f32 %v5168_v50  ;;  %vm603_vm15 = vcmp.eq.f32.partialorder %v602_v43, 8.507059e+37  ;;  %vm620_vm1 = vweird.f32 %v614_v16  ;;  %v650_v12 = vand.u32 2147483648, %v5168_v50  ;;  %1207 = vmatpush.bf16.msra.mxu0 %v3715_v34 }
  0xe7   :  { %4730 = vtanh.f32 %v630_v35  ;;  %v627_v1 = vor.u32 1.1754944e-38, %v626_v45  ;;  %vm625_vm3 = vcmp.eq.f32.partialorder %v624_v49, 8.507059e+37  ;;  %vm644_vm6 = vweird.f32 %v5168_v50  ;;  %v4524_v45 = vld [vmem:[#allocation11 + $0xcc] sm:$0xf] }
  0xe8   :  { %v648_v13 = vand.u32 2147483647, %v5168_v50 }
  0xe9   :  { %v4725_v26 = vpop.eup %4724 }
  0xea   :  { %v594_v29 = vmul.f32 %v4725_v26, %v592_v14  ;;  %vm599_vm11 = vweird.f32 %v4725_v26  ;;  %v651_v14 = vor.u32 1.1754944e-38, %v650_v12  ;;  %vm649_vm10 = vcmp.eq.f32.partialorder %v648_v13, 8.507059e+37 }
  0xeb   :  { %v4727_v30 = vpop.eup %4726  ;;  %vm600_vm14 = vmor %vm598_vm12, %vm599_vm11  ;;  %vm667_vm11 = vcmp.eq.s32.totalorder %v5182_v15, 1  ;;  %v287_v12 = vrot.slane %v5122_v5, 2  ;;  %vm3731_vm12 = vcmp.gt.s32.totalorder %v5063_v58, 2 }
  0xec   :  { %v4729_v36 = vpop.eup %4728  ;;  %v595_v37 = vsub.f32 1.0, %v594_v29  ;;  %v616_v38 = vmul.f32 %v4727_v30, %v614_v16  ;;  %vm621_vm13 = vweird.f32 %v4727_v30  ;;  %v3727_v29 = vor.u32 %v4528_v27, %v3724_v28 }
  0xed   :  { %v640_v41 = vmul.f32 %v4729_v36, %v5168_v50  ;;  %vm622_vm2 = vmor %vm620_vm1, %vm621_vm13  ;;  %v4731_v52 = vpop.eup %4730  ;;  %vm645_vm4 = vweird.f32 %v4729_v36  ;;  %vm3995_vm13 = vcmp.gt.s32.totalorder %v5063_v58, 4 }
  0xee   :  { %v596_v42 = vmul.f32 %v4725_v26, %v595_v37  ;;  %v617_v44 = vsub.f32 1.0, %v616_v38  ;;  %vm646_vm7 = vmor %vm644_vm6, %vm645_vm4  ;;  %v4525_v37 = vld [vmem:[#allocation11 + $0xcc] sm:$0xf0]  ;;  %v4523_v38 = vld [vmem:[#allocation11 + $0xc4] sm:$0xf]  ;;  %1246 = vmatpush.bf16.msrb.mxu3 %v3727_v29 }
  0xef   :  { %v641_v31 = vsub.f32 1.0, %v640_v41  ;;  %v3700_v41 = vld [vmem:[#allocation11 + $0xd0] sm:$0xf0]  ;;  %v3650_v29 = vld [vmem:[#allocation11 + $0x60] sm:$0xf] }
  0xf0   :  { %v597_v46 = vadd.f32 %v4725_v26, %v596_v42  ;;  %v618_v47 = vmul.f32 %v4727_v30, %v617_v44  ;;  %v3706_v42 = vld [vmem:[#allocation11 + $0xc8] sm:$0xf]  ;;  %v3703_v43 = vor.u32 %v4523_v38, %v3700_v41  ;;  %v4526_v44 = vld [vmem:[#allocation11 + $0xd4] sm:$0xf0] }
  0xf1   :  { %v642_v54 = vmul.f32 %v4729_v36, %v641_v31  ;;  %v4521_v31 = vld [vmem:[#allocation11 + $0xac] sm:$0xf0]  ;;  %v4514_v41 = vld [vmem:[#allocation11 + $0x74] sm:$0xf0] }
  0xf2   :  { %v601_v60 = vsel %vm600_vm14, %v4725_v26, %v597_v46  ;;  %v619_v61 = vadd.f32 %v4727_v30, %v618_v47  ;;  %v3719_v26 = vor.u32 %v4527_v22, %v3716_v23  ;;  %v3708_v46 = vld [vmem:[#allocation11 + $0xd8] sm:$0xf0]  ;;  %v3707_v47 = vor.u32 %v4526_v44, %v3706_v42  ;;  %v3674_v22 = vld [vmem:[#allocation11 + $0x88] sm:$0xf]  ;;  %v4512_v44 = vld [vmem:[#allocation11 + $0x6c] sm:$0xf] }
  0xf3   :  { %v606_v0 = vsel %vm603_vm15, %v605_v19, %v601_v60  ;;  %v643_v10 = vadd.f32 %v4729_v36, %v642_v54  ;;  %v3711_v49 = vor.u32 %v4524_v45, %v3708_v46  ;;  %v3682_v19 = vld [vmem:[#allocation11 + $0xa0] sm:$0xf]  ;;  %v4519_v60 = vld [vmem:[#allocation11 + $0xa4] sm:$0xf]  ;;  %v3671_v23 = vor.u32 %v4515_v20, %v3668_v21  ;;  %v3660_v45 = vld [vmem:[#allocation11 + $0x78] sm:$0xf0] }
  0xf4   :  { %v623_v3 = vsel %vm622_vm2, %v4727_v30, %v619_v61  ;;  %v655_v8 = vmul.f32 %v4731_v52, %v606_v0  ;;  %1220 = vmatpush.bf16.msra.mxu1 %v3719_v26  ;;  %v3683_v61 = vor.u32 %v4521_v31, %v3682_v19  ;;  %v3684_v0 = vld [vmem:[#allocation11 + $0xb0] sm:$0xf0]  ;;  %v3676_v26 = vld [vmem:[#allocation11 + $0x98] sm:$0xf0]  ;;  %v3634_v46 = vld [vmem:[#allocation11 + $0x40] sm:$0xf] }
  0xf5   :  { %v628_v53 = vsel %vm625_vm3, %v627_v1, %v623_v3  ;;  %v647_v55 = vsel %vm646_vm7, %v4729_v36, %v643_v10  ;;  %v3698_v36 = vld [vmem:[#allocation11 + $0xc0] sm:$0xf]  ;;  %1247 = vmatpush.bf16.msrb.mxu3 %v3711_v49  ;;  %v3690_v1 = vld [vmem:[#allocation11 + $0xa8] sm:$0xf]  ;;  %v4522_v3 = vld [vmem:[#allocation11 + $0xb4] sm:$0xf0] }
  0xf6   :  { %v654_v7 = vmul.f32 %v628_v53, %v5173_v63  ;;  %v652_v33 = vsel %vm649_vm10, %v651_v14, %v647_v55  ;;  %v3699_v39 = vor.u32 %v4525_v37, %v3698_v36  ;;  %v3687_v53 = vor.u32 %v4519_v60, %v3684_v0  ;;  %v4511_v36 = vld [vmem:[#allocation11 + $0x64] sm:$0xf]  ;;  %v4509_v0 = vld [vmem:[#allocation11 + $0x4c] sm:$0xf0]  ;;  %v4506_v20 = vld [vmem:[#allocation11 + $0x34] sm:$0xf0] }
  0xf7   :  { %v3691_v54 = vor.u32 %v4522_v3, %v3690_v1  ;;  %v4507_v1 = vld [vmem:[#allocation11 + $0x44] sm:$0xf]  ;;  %v3636_v3 = vld [vmem:[#allocation11 + $0x50] sm:$0xf0]  ;;  %vm3863_vm14 = vcmp.gt.s32.totalorder %v5063_v58, 3 }
  0xf8   :  { %v5176_v9 = vadd.f32 %v655_v8, %v654_v7  ;;  %1208 = vmatpush.bf16.msra.mxu0 %v3699_v39  ;;  %1221 = vmatpush.bf16.msra.mxu1 %v3703_v43  ;;  %v4520_v7 = vld [vmem:[#allocation11 + $0xac] sm:$0xf]  ;;  %v3692_v8 = vld [vmem:[#allocation11 + $0xb8] sm:$0xf0]  ;;  %v3652_v39 = vld [vmem:[#allocation11 + $0x70] sm:$0xf0] }
  0xf9   :  { %v3695_v55 = vor.u32 %v4520_v7, %v3692_v8  ;;  %v3655_v42 = vor.u32 %v4511_v36, %v3652_v39  ;;  %v3642_v7 = vld [vmem:[#allocation11 + $0x48] sm:$0xf]  ;;  %v3639_v8 = vor.u32 %v4507_v1, %v3636_v3  ;;  %v3612_v39 = vld [vmem:[#allocation11 + $0x18] sm:$0xf0] }
  0xfa   :  { %4732 = vtanh.f32 %v5176_v9 }
  0xfb   :  { %1248 = vmatpush.bf16.msrb.mxu3 %v3695_v55 }
  0xfc   :  { %1209 = vmatpush.bf16.msra.mxu0 %v3683_v61  ;;  %1222 = vmatpush.bf16.msra.mxu1 %v3687_v53  ;;  %v3663_v61 = vor.u32 %v4512_v44, %v3660_v45 }
 0x100   :  { %v4733_v32 = vpop.eup %4732  ;;  %1223 = vmatpush.bf16.msra.mxu1 %v3671_v23 }
 0x101   :  { %v658_v16 = vmul.f32 %v4733_v32, %v652_v33 }
 0x103   :  { %v659_v51 = vpack.c.bf16 %v658_v16, %v658_v16  ;;  %v5188_v17 = vsel %vm667_vm11, %v658_v16, %v5070_v2  ;;  %v3723_v2 = vor.u32 %v4530_v25, %v3722_v24  ;;  %v4518_v24 = vld [vmem:[#allocation11 + $0x94] sm:$0xf0]  ;;  %v4516_v25 = vld [vmem:[#allocation11 + $0x8c] sm:$0xf] }
 0x104   :  { %v672_v50 = vpack.c.bf16 %v5188_v17, %v5188_v17  ;;  %v3675_v27 = vor.u32 %v4518_v24, %v3674_v22  ;;  %v3679_v28 = vor.u32 %v4516_v25, %v3676_v26  ;;  %1224 = vmatpush.bf16.msra.mxu1 %v3655_v42  ;;  %v4504_v22 = vld [vmem:[#allocation11 + $0x2c] sm:$0xf]  ;;  %v4501_v25 = vld [vmem:[#allocation11 + $0xc] sm:$0xf0]  ;;  %v4499_v26 = vld [vmem:[#allocation11 + $0x4] sm:$0xf] }
 0x105   :  { %660 = vst [vmem:[#allocation5] sm:$0x1] %v659_v51  ;;  %1233 = vmatpush.bf16.msrb.mxu2 %v3723_v2  ;;  %v3666_v51 = vld [vmem:[#allocation11 + $0x80] sm:$0xf] }
 0x106   :  { %873 = vmatmul.bf16.vlgmr.msrb.gmra.mxu0 %v672_v50  ;;  %886 = vmatmul.bf16.vlgmr.msrb.gmra.mxu1 %v672_v50 }
 0x107   :  { %899 = vmatmul.bf16.vlgmr.msra.gmra.mxu2 %v672_v50  ;;  %912 = vmatmul.bf16.vlgmr.msra.gmra.mxu3 %v672_v50  ;;  %v4517_v50 = vld [vmem:[#allocation11 + $0x8c] sm:$0xf0] }
 0x108   :  { %1249 = vmatpush.bf16.msrb.mxu3 %v3679_v28  ;;  %1225 = vmatpush.bf16.msra.mxu1 %v3639_v8  ;;  %v3610_v28 = vld [vmem:[#allocation11 + $0x8] sm:$0xf] }
 0x109   :  { %1234 = vmatpush.bf16.msrb.mxu2 %v3707_v47 }
 0x10c   :  { %v3066_v18 = vld [vmem:[#allocation5] sm:$0x1]  ;;  %1250 = vmatpush.bf16.msrb.mxu3 %v3663_v61 }
 0x10d   :  { %3095 = vst [vmem:[#allocation1] ss:$9 sm:$0xff] %v3066_v18  ;;  %1235 = vmatpush.bf16.msrb.mxu2 %v3691_v54  ;;  %v3667_v18 = vor.u32 %v4517_v50, %v3666_v51  ;;  %v3635_v54 = vor.u32 %v4509_v0, %v3634_v46  ;;  %v3620_v50 = vld [vmem:[#allocation11 + $0x30] sm:$0xf0] }
 0x10f   :  { %1210 = vmatpush.bf16.msra.mxu0 %v3667_v18  ;;  %v3626_v18 = vld [vmem:[#allocation11 + $0x28] sm:$0xf] }
 0x110   :  { %v3627_v23 = vor.u32 %v4506_v20, %v3626_v18  ;;  %v669_v20 = vsel %vm667_vm11, %v5176_v9, %v5173_v63 }
 0x111   :  { %1236 = vmatpush.bf16.msrb.mxu2 %v3675_v27 }
 0x183   :  { %v874_v30 = vpop.f32.mrf.mxu0  ;;  %v887_v35 = vpop.f32.mrf.mxu1 }
 0x184   :  { %v921_v52 = vrot.slane %v887_v35, 6  ;;  %v4513_v35 = vld [vmem:[#allocation11 + $0x6c] sm:$0xf0] }
 0x185   :  { %v3651_v38 = vor.u32 %v4513_v35, %v3650_v29  ;;  %v4502_v29 = vld [vmem:[#allocation11 + $0x14] sm:$0xf0]  ;;  %v4500_v35 = vld [vmem:[#allocation11 + $0xc] sm:$0xf] }
 0x186   :  { %v924_v34 = vsel %vm275_vm5, %v874_v30, %v921_v52  ;;  %v3658_v30 = vld [vmem:[#allocation11 + $0x68] sm:$0xf]  ;;  %v3615_v44 = vor.u32 %v4500_v35, %v3612_v39 }
 0x187   :  { %v3659_v43 = vor.u32 %v4514_v41, %v3658_v30  ;;  %1211 = vmatpush.bf16.msra.mxu0 %v3651_v38 }
 0x189   :  { %1237 = vmatpush.bf16.msrb.mxu2 %v3659_v43  ;;  %v3611_v43 = vor.u32 %v4502_v29, %v3610_v28 }
 0x18a   :  { %v900_v10 = vpop.f32.mrf.mxu2  ;;  %v913_v13 = vpop.f32.mrf.mxu3 }
 0x18b   :  { %v922_v14 = vrot.slane %v900_v10, 4  ;;  %v923_v32 = vrot.slane %v913_v13, 2  ;;  %v876_v33 = vpop.f32.mrf.mxu0  ;;  %v889_v16 = vpop.f32.mrf.mxu1  ;;  %v4510_v10 = vld [vmem:[#allocation11 + $0x54] sm:$0xf0]  ;;  %v3644_v13 = vld [vmem:[#allocation11 + $0x58] sm:$0xf0]  ;;  %1212 = vmatpush.bf16.msra.mxu0 %v3635_v54 }
 0x18c   :  { %v3643_v55 = vor.u32 %v4510_v10, %v3642_v7  ;;  %v4505_v33 = vld [vmem:[#allocation11 + $0x2c] sm:$0xf0]  ;;  %v4503_v16 = vld [vmem:[#allocation11 + $0x24] sm:$0xf]  ;;  %v1689_v10 = vsel %vm3863_vm14, 1, %v4986_v62 }
 0x18d   :  { %v925_v5 = vsel %vm277_vm8, %v922_v14, %v923_v32  ;;  %v3618_v32 = vld [vmem:[#allocation11 + $0x20] sm:$0xf]  ;;  %v3623_v21 = vor.u32 %v4503_v16, %v3620_v50 }
 0x18e   :  { %v926_v2 = vsel %vm279_vm9, %v924_v34, %v925_v5  ;;  %v3619_v51 = vor.u32 %v4505_v33, %v3618_v32  ;;  %v3628_v34 = vld [vmem:[#allocation11 + $0x38] sm:$0xf0]  ;;  %v3602_v5 = vld [vmem:[#allocation11] sm:$0xf]  ;;  %1238 = vmatpush.bf16.msrb.mxu2 %v3643_v55 }
 0x18f   :  { %v5196_v37 = vadd.f32 %v926_v2, %v287_v12  ;;  %v4508_v12 = vld [vmem:[#allocation11 + $0x4c] sm:$0xf]  ;;  %v3631_v24 = vor.u32 %v4504_v22, %v3628_v34  ;;  %v3604_v2 = vld [vmem:[#allocation11 + $0x10] sm:$0xf0]  ;;  %v3603_v38 = vor.u32 %v4501_v25, %v3602_v5  ;;  %1226 = vmatpush.bf16.msra.mxu1 %v3623_v21 }
 0x190   :  { %v3647_v14 = vor.u32 %v4508_v12, %v3644_v13  ;;  %1213 = vmatpush.bf16.msra.mxu0 %v3619_v51  ;;  %v3607_v41 = vor.u32 %v4499_v26, %v3604_v2 }
 0x191   :  { %v3596_v47 = vmul.f32 -1.442695, %v5196_v37  ;;  %v949_v49 = vrot.slane %v5196_v37, 2  ;;  %v973_v19 = vrot.slane %v5196_v37, 6  ;;  %v970_v0 = vrot.slane %v5196_v37, 4 }
 0x192   :  { %v902_v31 = vpop.f32.mrf.mxu2  ;;  %v915_v60 = vpop.f32.mrf.mxu3  ;;  %1251 = vmatpush.bf16.msrb.mxu3 %v3647_v14  ;;  %1239 = vmatpush.bf16.msrb.mxu2 %v3627_v23 }
 0x193   :  { %4734 = vpow2.f32 %v3596_v47  ;;  %v3597_v52 = vmul.f32 -1.442695, %v949_v49  ;;  %v3598_v53 = vmul.f32 -1.442695, %v973_v19  ;;  %1227 = vmatpush.bf16.msra.mxu1 %v3607_v41  ;;  %v5206_v49 = vsel %vm3731_vm12, 1, %v4986_v62  ;;  %v1008_v23 = vpop.permute.xlu0 %1007 }
 0x194   :  { %1214 = vmatpush.bf16.msra.mxu0 %v3603_v38  ;;  %1349 = vperm.xlu1 %4715, %v5206_v49   ;;  %v5211_v31 = vsel %vm3995_vm13, 1, %v4986_v62  ;;  %vm1009_vm12 = vcmp.eq.s32.totalorder %v1008_v23, 1  ;;  %v3846_v41 = vld [vmem:[#allocation11 + $0xe0] sm:$0xf]  ;;  %v291_v23 = vrot.slane %v5125_v6, 4 }
 0x195   :  { %4736 = vpow2.f32 %v3597_v52  ;;  %2033 = vperm.xlu2 %4716, %v5211_v31  }
 0x196   :  { %4738 = vpow2.f32 %v3598_v53  ;;  %1252 = vmatpush.bf16.msrb.mxu3 %v3631_v24  ;;  %1240 = vmatpush.bf16.msrb.mxu2 %v3611_v43  ;;  %v4559_v43 = vld [vmem:[#allocation11 + $0xe4] sm:$0xf] }
 0x199   :  { %v4735_v27 = vpop.eup %4734 }
 0x19a   :  { %v932_v36 = vadd.f32 1.0, %v4735_v27  ;;  %1253 = vmatpush.bf16.msrb.mxu3 %v3615_v44 }
 0x19b   :  { %v4737_v30 = vpop.eup %4736 }
 0x19c   :  { %v4739_v42 = vpop.eup %4738  ;;  %4740 = vrcp.f32 %v932_v36  ;;  %v954_v45 = vadd.f32 1.0, %v4737_v30  ;;  %v944_v53 = vand.u32 2147483648, %v932_v36  ;;  %v942_v7 = vand.u32 2147483647, %v932_v36  ;;  %1691 = vperm.xlu1 %4715, %v1689_v10  }
 0x19d   :  { %v5201_v46 = vadd.f32 1.0, %v4739_v42  ;;  %vm938_vm1 = vweird.f32 %v932_v36  ;;  %v4561_v42 = vld [vmem:[#allocation11 + $0xec] sm:$0xf0] }
 0x19e   :  { %4742 = vrcp.f32 %v954_v45  ;;  %v966_v13 = vand.u32 2147483648, %v954_v45  ;;  %v964_v58 = vand.u32 2147483647, %v954_v45  ;;  %v945_v14 = vor.u32 1.1754944e-38, %v944_v53 }
 0x19f   :  { %4744 = vrcp.f32 %v5201_v46  ;;  %vm943_vm4 = vcmp.eq.f32.partialorder %v942_v7, 8.507059e+37  ;;  %vm960_vm6 = vweird.f32 %v954_v45  ;;  %v990_v26 = vand.u32 2147483648, %v5201_v46  ;;  %v3838_v7 = vld [vmem:[#allocation11 + $0xc8] sm:$0xf] }
 0x1a0   :  { %4746 = vtanh.f32 %v970_v0  ;;  %v967_v51 = vor.u32 1.1754944e-38, %v966_v13  ;;  %vm965_vm10 = vcmp.eq.f32.partialorder %v964_v58, 8.507059e+37  ;;  %vm984_vm14 = vweird.f32 %v5201_v46  ;;  %v3840_v13 = vld [vmem:[#allocation11 + $0xd8] sm:$0xf0] }
 0x1a1   :  { %v988_v63 = vand.u32 2147483647, %v5201_v46  ;;  %v991_v27 = vor.u32 1.1754944e-38, %v990_v26  ;;  %v3847_v44 = vor.u32 %v4561_v42, %v3846_v41 }
 0x1a2   :  { %v4741_v47 = vpop.eup %4740 }
 0x1a3   :  { %v934_v19 = vmul.f32 %v4741_v47, %v932_v36  ;;  %vm939_vm15 = vweird.f32 %v4741_v47  ;;  %1549 = vmatpush.bf16.msrb.mxu0 %v3847_v44  ;;  %v4548_v44 = vld [vmem:[#allocation11 + $0x8c] sm:$0xf] }
 0x1a4   :  { %v4743_v60 = vpop.eup %4742  ;;  %vm940_vm2 = vmor %vm938_vm1, %vm939_vm15  ;;  %3223 = vperm.xlu1 %4715, %v1689_v10   ;;  %vm989_vm1 = vcmp.eq.f32.partialorder %v988_v63, 8.507059e+37  ;;  %v4558_v10 = vld [vmem:[#allocation11 + $0xd4] sm:$0xf0] }
 0x1a5   :  { %v935_v61 = vsub.f32 1.0, %v934_v19  ;;  %v4745_v1 = vpop.eup %4744  ;;  %v956_v3 = vmul.f32 %v4743_v60, %v954_v45  ;;  %vm961_vm3 = vweird.f32 %v4743_v60  ;;  %v3848_v45 = vld [vmem:[#allocation11 + $0xf0] sm:$0xf0]  ;;  %v4560_v19 = vld [vmem:[#allocation11 + $0xec] sm:$0xf] }
 0x1a6   :  { %v980_v54 = vmul.f32 %v4745_v1, %v5201_v46  ;;  %vm962_vm7 = vmor %vm960_vm6, %vm961_vm3  ;;  %v4747_v18 = vpop.eup %4746  ;;  %vm985_vm13 = vweird.f32 %v4745_v1  ;;  %v3854_v46 = vld [vmem:[#allocation11 + $0xe8] sm:$0xf] }
 0x1a7   :  { %v936_v52 = vmul.f32 %v4741_v47, %v935_v61  ;;  %v957_v8 = vsub.f32 1.0, %v956_v3  ;;  %vm986_vm15 = vmor %vm984_vm14, %vm985_vm13  ;;  %v4557_v3 = vld [vmem:[#allocation11 + $0xcc] sm:$0xf0] }
 0x1a8   :  { %v981_v32 = vsub.f32 1.0, %v980_v54  ;;  %v3832_v54 = vld [vmem:[#allocation11 + $0xd0] sm:$0xf0] }
 0x1a9   :  { %v937_v12 = vadd.f32 %v4741_v47, %v936_v52  ;;  %v958_v37 = vmul.f32 %v4743_v60, %v957_v8  ;;  %v4555_v52 = vld [vmem:[#allocation11 + $0xc4] sm:$0xf] }
 0x1aa   :  { %v982_v22 = vmul.f32 %v4745_v1, %v981_v32  ;;  %v3835_v8 = vor.u32 %v4555_v52, %v3832_v54  ;;  %v4551_v32 = vld [vmem:[#allocation11 + $0xa4] sm:$0xf] }
 0x1ab   :  { %v941_v55 = vsel %vm940_vm2, %v4741_v47, %v937_v12  ;;  %v959_v33 = vadd.f32 %v4743_v60, %v958_v37  ;;  %v3851_v47 = vor.u32 %v4559_v43, %v3848_v45  ;;  %v4556_v12 = vld [vmem:[#allocation11 + $0xcc] sm:$0xf]  ;;  %v3839_v37 = vor.u32 %v4558_v10, %v3838_v7  ;;  %v4550_v43 = vld [vmem:[#allocation11 + $0x94] sm:$0xf0]  ;;  %v3808_v45 = vld [vmem:[#allocation11 + $0x98] sm:$0xf0] }
 0x1ac   :  { %v946_v16 = vsel %vm943_vm4, %v945_v14, %v941_v55  ;;  %v983_v25 = vadd.f32 %v4745_v1, %v982_v22  ;;  %3220 = vperm.xlu1 %4715, %v5206_v49   ;;  %v3843_v58 = vor.u32 %v4556_v12, %v3840_v13  ;;  %v3814_v55 = vld [vmem:[#allocation11 + $0xa0] sm:$0xf]  ;;  %v4553_v14 = vld [vmem:[#allocation11 + $0xac] sm:$0xf0]  ;;  %v4552_v22 = vld [vmem:[#allocation11 + $0xac] sm:$0xf] }
 0x1ad   :  { %v963_v50 = vsel %vm962_vm7, %v4743_v60, %v959_v33  ;;  %v995_v34 = vmul.f32 %v4747_v18, %v946_v16  ;;  %v3856_v60 = vld [vmem:[#allocation11 + $0xf8] sm:$0xf0]  ;;  %1562 = vmatpush.bf16.msrb.mxu1 %v3851_v47  ;;  %v3815_v33 = vor.u32 %v4553_v14, %v3814_v55  ;;  %v3816_v16 = vld [vmem:[#allocation11 + $0xb0] sm:$0xf0]  ;;  %v3811_v47 = vor.u32 %v4548_v44, %v3808_v45  ;;  %v4544_v13 = vld [vmem:[#allocation11 + $0x6c] sm:$0xf] }
 0x1ae   :  { %v968_v21 = vsel %vm965_vm10, %v967_v51, %v963_v50  ;;  %v987_v9 = vsel %vm986_vm15, %v4745_v1, %v983_v25  ;;  %v3859_v61 = vor.u32 %v4560_v19, %v3856_v60  ;;  %v3822_v51 = vld [vmem:[#allocation11 + $0xa8] sm:$0xf]  ;;  %v4554_v50 = vld [vmem:[#allocation11 + $0xb4] sm:$0xf0]  ;;  %v3782_v19 = vld [vmem:[#allocation11 + $0x60] sm:$0xf] }
 0x1af   :  { %v994_v5 = vmul.f32 %v968_v21, %v669_v20  ;;  %v992_v29 = vsel %vm989_vm1, %v991_v27, %v987_v9  ;;  %v3823_v21 = vor.u32 %v4554_v50, %v3822_v51  ;;  %v4545_v60 = vld [vmem:[#allocation11 + $0x6c] sm:$0xf0]  ;;  %v3768_v50 = vld [vmem:[#allocation11 + $0x50] sm:$0xf0] }
 0x1b0   :  { %1588 = vmatpush.bf16.msra.mxu3 %v3859_v61  ;;  %v4543_v61 = vld [vmem:[#allocation11 + $0x64] sm:$0xf] }
 0x1b1   :  { %v996_v24 = vadd.f32 %v995_v34, %v994_v5  ;;  %1563 = vmatpush.bf16.msrb.mxu1 %v3835_v8  ;;  %v3824_v34 = vld [vmem:[#allocation11 + $0xb8] sm:$0xf0] }
 0x1b2   :  { %v3827_v25 = vor.u32 %v4552_v22, %v3824_v34  ;;  %v4540_v34 = vld [vmem:[#allocation11 + $0x4c] sm:$0xf] }
 0x1b3   :  { %4748 = vtanh.f32 %v996_v24  ;;  %v5224_v2 = vsel %vm1009_vm12, %v996_v24, %v669_v20  ;;  %v3819_v20 = vor.u32 %v4551_v32, %v3816_v16  ;;  %v3766_v32 = vld [vmem:[#allocation11 + $0x40] sm:$0xf]  ;;  %v4539_v16 = vld [vmem:[#allocation11 + $0x44] sm:$0xf] }
 0x1b4   :  { %3226 = vperm.xlu1 %4715, %v5211_v31   ;;  %v3830_v31 = vld [vmem:[#allocation11 + $0xc0] sm:$0xf]  ;;  %1589 = vmatpush.bf16.msra.mxu3 %v3843_v58 }
 0x1b5   :  { %v3831_v53 = vor.u32 %v4557_v3, %v3830_v31  ;;  %1564 = vmatpush.bf16.msrb.mxu1 %v3819_v20  ;;  %v3790_v31 = vld [vmem:[#allocation11 + $0x68] sm:$0xf]  ;;  %v4546_v3 = vld [vmem:[#allocation11 + $0x74] sm:$0xf0] }
 0x1b6   :  { %v3791_v12 = vor.u32 %v4546_v3, %v3790_v31  ;;  %v4542_v20 = vld [vmem:[#allocation11 + $0x54] sm:$0xf0] }
 0x1b7   :  { %1550 = vmatpush.bf16.msrb.mxu0 %v3831_v53 }
 0x1b8   :  { %1590 = vmatpush.bf16.msra.mxu3 %v3827_v25  ;;  %v4537_v25 = vld [vmem:[#allocation11 + $0x2c] sm:$0xf0] }
 0x1b9   :  { %v4749_v28 = vpop.eup %4748 }
 0x1ba   :  { %v998_v35 = vmul.f32 %v4749_v28, %v992_v29  ;;  %v3798_v28 = vld [vmem:[#allocation11 + $0x80] sm:$0xf]  ;;  %v4549_v29 = vld [vmem:[#allocation11 + $0x8c] sm:$0xf0] }
 0x1bb   :  { %1551 = vmatpush.bf16.msrb.mxu0 %v3815_v33  ;;  %v4541_v33 = vld [vmem:[#allocation11 + $0x4c] sm:$0xf0] }
 0x1bc   :  { %v999_v36 = vpack.c.bf16 %v998_v35, %v998_v35  ;;  %v5231_v38 = vsel %vm1009_vm12, %v998_v35, %v5188_v17  ;;  %v4562_v17 = vld [vmem:[#allocation11 + $0xf4] sm:$0xf0]  ;;  %v3799_v35 = vor.u32 %v4549_v29, %v3798_v28  ;;  %1591 = vmatpush.bf16.msra.mxu3 %v3811_v47  ;;  %v3767_v51 = vor.u32 %v4541_v33, %v3766_v32  ;;  %v4531_v47 = vld [vmem:[#allocation11 + $0x4] sm:$0xf] }
 0x1bd   :  { %v1014_v39 = vpack.c.bf16 %v5231_v38, %v5231_v38  ;;  %v3855_v49 = vor.u32 %v4562_v17, %v3854_v46  ;;  %v4538_v28 = vld [vmem:[#allocation11 + $0x34] sm:$0xf0] }
 0x1be   :  { %1001 = vst [vmem:[#allocation5 + $0x1] sm:$0x1] %v999_v36  ;;  %v4547_v36 = vld [vmem:[#allocation11 + $0x84] sm:$0xf] }
 0x1bf   :  { %1215 = vmatmul.bf16.vlgmr.msra.gmra.mxu0 %v1014_v39  ;;  %1228 = vmatmul.bf16.vlgmr.msra.gmra.mxu1 %v1014_v39 }
 0x1c0   :  { %1241 = vmatmul.bf16.vlgmr.msrb.gmra.mxu2 %v1014_v39  ;;  %1254 = vmatmul.bf16.vlgmr.msrb.gmra.mxu3 %v1014_v39  ;;  %v3800_v39 = vld [vmem:[#allocation11 + $0x90] sm:$0xf0] }
 0x1c1   :  { %1575 = vmatpush.bf16.msra.mxu2 %v3855_v49  ;;  %v3803_v42 = vor.u32 %v4547_v36, %v3800_v39  ;;  %1552 = vmatpush.bf16.msrb.mxu0 %v3799_v35  ;;  %v4536_v39 = vld [vmem:[#allocation11 + $0x2c] sm:$0xf] }
 0x1c3   :  { %1565 = vmatpush.bf16.msrb.mxu1 %v3803_v42 }
 0x1c5   :  { %v3067_v30 = vld [vmem:[#allocation5 + $0x1] sm:$0x1]  ;;  %1576 = vmatpush.bf16.msra.mxu2 %v3839_v37  ;;  %v3792_v37 = vld [vmem:[#allocation11 + $0x78] sm:$0xf0] }
 0x1c6   :  { %3098 = vst [vmem:[#allocation1 + $0x1] ss:$9 sm:$0xff] %v3067_v30  ;;  %v3806_v30 = vld [vmem:[#allocation11 + $0x88] sm:$0xf]  ;;  %v3795_v14 = vor.u32 %v4544_v13, %v3792_v37 }
 0x1c7   :  { %v3807_v17 = vor.u32 %v4550_v43, %v3806_v30  ;;  %v3760_v30 = vld [vmem:[#allocation11 + $0x38] sm:$0xf0] }
 0x1c8   :  { %1592 = vmatpush.bf16.msra.mxu3 %v3795_v14 }
 0x1c9   :  { %1577 = vmatpush.bf16.msra.mxu2 %v3823_v21  ;;  %v3771_v21 = vor.u32 %v4539_v16, %v3768_v50 }
 0x1cd   :  { %1578 = vmatpush.bf16.msra.mxu2 %v3807_v17  ;;  %v4533_v17 = vld [vmem:[#allocation11 + $0xc] sm:$0xf0] }
 0x1d1   :  { %1579 = vmatpush.bf16.msra.mxu2 %v3791_v12 }
 0x23c   :  { %v1216_v0 = vpop.f32.mrf.mxu0  ;;  %v1229_v1 = vpop.f32.mrf.mxu1 }
 0x23d   :  { %v1263_v18 = vrot.slane %v1229_v1, 6  ;;  %v3784_v1 = vld [vmem:[#allocation11 + $0x70] sm:$0xf0] }
 0x23e   :  { %v3787_v10 = vor.u32 %v4543_v61, %v3784_v1  ;;  %v4534_v61 = vld [vmem:[#allocation11 + $0x14] sm:$0xf0]  ;;  %v3744_v1 = vld [vmem:[#allocation11 + $0x18] sm:$0xf0] }
 0x23f   :  { %v1266_v41 = vsel %vm275_vm5, %v1216_v0, %v1263_v18  ;;  %v3783_v0 = vor.u32 %v4545_v60, %v3782_v19  ;;  %v3774_v18 = vld [vmem:[#allocation11 + $0x48] sm:$0xf]  ;;  %v3736_v19 = vld [vmem:[#allocation11 + $0x10] sm:$0xf0] }
 0x240   :  { %1566 = vmatpush.bf16.msrb.mxu1 %v3787_v10  ;;  %v3775_v22 = vor.u32 %v4542_v20, %v3774_v18  ;;  %v3742_v60 = vld [vmem:[#allocation11 + $0x8] sm:$0xf]  ;;  %v3739_v3 = vor.u32 %v4531_v47, %v3736_v19  ;;  %v4593_v47 = vld [vmem:[#allocation11 + $0xec] sm:$0xf0]  ;;  %v4591_v19 = vld [vmem:[#allocation11 + $0xe4] sm:$0xf] }
 0x241   :  { %1553 = vmatpush.bf16.msrb.mxu0 %v3783_v0  ;;  %v4532_v0 = vld [vmem:[#allocation11 + $0xc] sm:$0xf] }
 0x242   :  { %1580 = vmatpush.bf16.msra.mxu2 %v3775_v22 }
 0x243   :  { %v1242_v5 = vpop.f32.mrf.mxu2  ;;  %v1255_v24 = vpop.f32.mrf.mxu3 }
 0x244   :  { %v1264_v26 = vrot.slane %v1242_v5, 4  ;;  %v1265_v63 = vrot.slane %v1255_v24, 2  ;;  %v1218_v9 = vpop.f32.mrf.mxu0  ;;  %v1231_v27 = vpop.f32.mrf.mxu1  ;;  %v3776_v5 = vld [vmem:[#allocation11 + $0x58] sm:$0xf0]  ;;  %v3750_v24 = vld [vmem:[#allocation11 + $0x20] sm:$0xf]  ;;  %1567 = vmatpush.bf16.msrb.mxu1 %v3771_v21 }
 0x245   :  { %1554 = vmatpush.bf16.msrb.mxu0 %v3767_v51  ;;  %v3752_v9 = vld [vmem:[#allocation11 + $0x30] sm:$0xf0]  ;;  %v3758_v27 = vld [vmem:[#allocation11 + $0x28] sm:$0xf] }
 0x246   :  { %v1267_v6 = vsel %vm277_vm8, %v1264_v26, %v1265_v63  ;;  %v4535_v26 = vld [vmem:[#allocation11 + $0x24] sm:$0xf]  ;;  %v3751_v63 = vor.u32 %v4537_v25, %v3750_v24  ;;  %v3759_v36 = vor.u32 %v4538_v28, %v3758_v27 }
 0x247   :  { %v1268_v46 = vsel %vm279_vm9, %v1266_v41, %v1267_v6  ;;  %v3755_v35 = vor.u32 %v4535_v26, %v3752_v9  ;;  %v3763_v6 = vor.u32 %v4536_v39, %v3760_v30 }
 0x248   :  { %v5240_v49 = vadd.f32 %v1268_v46, %v291_v23  ;;  %v3779_v23 = vor.u32 %v4540_v34, %v3776_v5  ;;  %1581 = vmatpush.bf16.msra.mxu2 %v3759_v36  ;;  %v3734_v46 = vld [vmem:[#allocation11] sm:$0xf] }
 0x249   :  { %1555 = vmatpush.bf16.msrb.mxu0 %v3751_v63  ;;  %1568 = vmatpush.bf16.msrb.mxu1 %v3755_v35  ;;  %v3735_v31 = vor.u32 %v4533_v17, %v3734_v46  ;;  %v1350_v63 = vpop.permute.xlu1 %1349  ;;  %v3978_v17 = vld [vmem:[#allocation11 + $0xe0] sm:$0xf] }
 0x24a   :  { %v3728_v52 = vmul.f32 -1.442695, %v5240_v49  ;;  %v1291_v53 = vrot.slane %v5240_v49, 2  ;;  %v1315_v54 = vrot.slane %v5240_v49, 6  ;;  %1593 = vmatpush.bf16.msra.mxu3 %v3779_v23  ;;  %v1312_v10 = vrot.slane %v5240_v49, 4 }
 0x24b   :  { %v1244_v7 = vpop.f32.mrf.mxu2  ;;  %v1257_v8 = vpop.f32.mrf.mxu3  ;;  %vm1351_vm14 = vcmp.eq.s32.totalorder %v1350_v63, 1 }
 0x24c   :  { %4750 = vpow2.f32 %v3728_v52  ;;  %v3729_v58 = vmul.f32 -1.442695, %v1291_v53  ;;  %v3730_v55 = vmul.f32 -1.442695, %v1315_v54  ;;  %v3743_v53 = vor.u32 %v4534_v61, %v3742_v60  ;;  %v3980_v61 = vld [vmem:[#allocation11 + $0xf0] sm:$0xf0] }
 0x24d   :  { %v3747_v54 = vor.u32 %v4532_v0, %v3744_v1  ;;  %1556 = vmatpush.bf16.msrb.mxu0 %v3735_v31  ;;  %1569 = vmatpush.bf16.msrb.mxu1 %v3739_v3  ;;  %v3979_v60 = vor.u32 %v4593_v47, %v3978_v17  ;;  %v3986_v0 = vld [vmem:[#allocation11 + $0xe8] sm:$0xf]  ;;  %v4594_v1 = vld [vmem:[#allocation11 + $0xf4] sm:$0xf0]  ;;  %v3983_v31 = vor.u32 %v4591_v19, %v3980_v61  ;;  %v4592_v3 = vld [vmem:[#allocation11 + $0xec] sm:$0xf] }
 0x24e   :  { %4752 = vpow2.f32 %v3729_v58  ;;  %1594 = vmatpush.bf16.msra.mxu3 %v3763_v6  ;;  %1582 = vmatpush.bf16.msra.mxu2 %v3743_v53  ;;  %v4582_v47 = vld [vmem:[#allocation11 + $0x94] sm:$0xf0]  ;;  %v4580_v19 = vld [vmem:[#allocation11 + $0x8c] sm:$0xf] }
 0x24f   :  { %4754 = vpow2.f32 %v3730_v55 }
 0x251   :  { %1891 = vmatpush.bf16.msra.mxu0 %v3979_v60  ;;  %1904 = vmatpush.bf16.msra.mxu1 %v3983_v31  ;;  %v3940_v60 = vld [vmem:[#allocation11 + $0x98] sm:$0xf0]  ;;  %v3914_v31 = vld [vmem:[#allocation11 + $0x60] sm:$0xf] }
 0x252   :  { %v4751_v29 = vpop.eup %4750  ;;  %1595 = vmatpush.bf16.msra.mxu3 %v3747_v54 }
 0x253   :  { %v1274_v41 = vadd.f32 1.0, %v4751_v29 }
 0x254   :  { %v4753_v42 = vpop.eup %4752 }
 0x255   :  { %v4755_v43 = vpop.eup %4754  ;;  %4756 = vrcp.f32 %v1274_v41  ;;  %v1296_v44 = vadd.f32 1.0, %v4753_v42  ;;  %v1286_v58 = vand.u32 2147483648, %v1274_v41  ;;  %v1284_v32 = vand.u32 2147483647, %v1274_v41 }
 0x256   :  { %v5245_v45 = vadd.f32 1.0, %v4755_v43  ;;  %vm1280_vm3 = vweird.f32 %v1274_v41 }
 0x257   :  { %4758 = vrcp.f32 %v1296_v44  ;;  %v1308_v16 = vand.u32 2147483648, %v1296_v44  ;;  %v1306_v18 = vand.u32 2147483647, %v1296_v44  ;;  %v1287_v49 = vor.u32 1.1754944e-38, %v1286_v58  ;;  %v3970_v58 = vld [vmem:[#allocation11 + $0xc8] sm:$0xf] }
 0x258   :  { %4760 = vrcp.f32 %v5245_v45  ;;  %vm1285_vm7 = vcmp.eq.f32.partialorder %v1284_v32, 8.507059e+37  ;;  %vm1302_vm10 = vweird.f32 %v1296_v44  ;;  %v1332_v35 = vand.u32 2147483648, %v5245_v45  ;;  %v4588_v32 = vld [vmem:[#allocation11 + $0xcc] sm:$0xf] }
 0x259   :  { %4762 = vtanh.f32 %v1312_v10  ;;  %v1309_v5 = vor.u32 1.1754944e-38, %v1308_v16  ;;  %vm1307_vm13 = vcmp.eq.f32.partialorder %v1306_v18, 8.507059e+37  ;;  %vm1326_vm1 = vweird.f32 %v5245_v45  ;;  %v4589_v10 = vld [vmem:[#allocation11 + $0xcc] sm:$0xf0] }
 0x25a   :  { %v1330_v39 = vand.u32 2147483647, %v5245_v45  ;;  %v4585_v18 = vld [vmem:[#allocation11 + $0xac] sm:$0xf0] }
 0x25b   :  { %v4757_v52 = vpop.eup %4756 }
 0x25c   :  { %v1276_v7 = vmul.f32 %v4757_v52, %v1274_v41  ;;  %vm1281_vm2 = vweird.f32 %v4757_v52  ;;  %v1333_v41 = vor.u32 1.1754944e-38, %v1332_v35 }
 0x25d   :  { %v4759_v8 = vpop.eup %4758  ;;  %vm1282_vm6 = vmor %vm1280_vm3, %vm1281_vm2  ;;  %vm1331_vm3 = vcmp.eq.f32.partialorder %v1330_v39, 8.507059e+37 }
 0x25e   :  { %v4761_v12 = vpop.eup %4760  ;;  %v1277_v13 = vsub.f32 1.0, %v1276_v7  ;;  %v1298_v37 = vmul.f32 %v4759_v8, %v1296_v44  ;;  %vm1303_vm4 = vweird.f32 %v4759_v8 }
 0x25f   :  { %v1322_v55 = vmul.f32 %v4761_v12, %v5245_v45  ;;  %vm1304_vm12 = vmor %vm1302_vm10, %vm1303_vm4  ;;  %v4763_v24 = vpop.eup %4762  ;;  %vm1327_vm15 = vweird.f32 %v4761_v12 }
 0x260   :  { %v1278_v14 = vmul.f32 %v4757_v52, %v1277_v13  ;;  %v1299_v33 = vsub.f32 1.0, %v1298_v37  ;;  %vm1328_vm2 = vmor %vm1326_vm1, %vm1327_vm15  ;;  %v3964_v37 = vld [vmem:[#allocation11 + $0xd0] sm:$0xf0] }
 0x261   :  { %v1323_v20 = vsub.f32 1.0, %v1322_v55 }
 0x262   :  { %v1279_v51 = vadd.f32 %v4757_v52, %v1278_v14  ;;  %v1300_v50 = vmul.f32 %v4759_v8, %v1299_v33  ;;  %v4590_v14 = vld [vmem:[#allocation11 + $0xd4] sm:$0xf0]  ;;  %v3972_v33 = vld [vmem:[#allocation11 + $0xd8] sm:$0xf0] }
 0x263   :  { %v1324_v26 = vmul.f32 %v4761_v12, %v1323_v20  ;;  %v3971_v16 = vor.u32 %v4590_v14, %v3970_v58  ;;  %v3898_v58 = vld [vmem:[#allocation11 + $0x40] sm:$0xf] }
 0x264   :  { %v1283_v21 = vsel %vm1282_vm6, %v4757_v52, %v1279_v51  ;;  %v1301_v22 = vadd.f32 %v4759_v8, %v1300_v50  ;;  %v3988_v52 = vld [vmem:[#allocation11 + $0xf8] sm:$0xf0]  ;;  %v3975_v51 = vor.u32 %v4588_v32, %v3972_v33  ;;  %v3946_v50 = vld [vmem:[#allocation11 + $0xa0] sm:$0xf] }
 0x265   :  { %v1288_v34 = vsel %vm1285_vm7, %v1287_v49, %v1283_v21  ;;  %v1325_v29 = vadd.f32 %v4761_v12, %v1324_v26  ;;  %v3991_v53 = vor.u32 %v4592_v3, %v3988_v52  ;;  %v4583_v49 = vld [vmem:[#allocation11 + $0xa4] sm:$0xf]  ;;  %v3947_v20 = vor.u32 %v4585_v18, %v3946_v50  ;;  %v3948_v21 = vld [vmem:[#allocation11 + $0xb0] sm:$0xf0]  ;;  %v3956_v26 = vld [vmem:[#allocation11 + $0xb8] sm:$0xf0] }
 0x266   :  { %v1305_v23 = vsel %vm1304_vm12, %v4759_v8, %v1301_v22  ;;  %v1337_v27 = vmul.f32 %v4763_v24, %v1288_v34  ;;  %v3962_v8 = vld [vmem:[#allocation11 + $0xc0] sm:$0xf]  ;;  %v3954_v22 = vld [vmem:[#allocation11 + $0xa8] sm:$0xf]  ;;  %v4586_v34 = vld [vmem:[#allocation11 + $0xb4] sm:$0xf0] }
 0x267   :  { %v1310_v25 = vsel %vm1307_vm13, %v1309_v5, %v1305_v23  ;;  %v1329_v30 = vsel %vm1328_vm2, %v4761_v12, %v1325_v29  ;;  %v4587_v12 = vld [vmem:[#allocation11 + $0xc4] sm:$0xf]  ;;  %1930 = vmatpush.bf16.msrb.mxu3 %v3991_v53  ;;  %v3963_v13 = vor.u32 %v4589_v10, %v3962_v8  ;;  %v3951_v23 = vor.u32 %v4583_v49, %v3948_v21  ;;  %v4578_v8 = vld [vmem:[#allocation11 + $0x74] sm:$0xf0]  ;;  %v4573_v50 = vld [vmem:[#allocation11 + $0x4c] sm:$0xf0] }
 0x268   :  { %v1336_v9 = vmul.f32 %v1310_v25, %v5224_v2  ;;  %v1334_v42 = vsel %vm1331_vm3, %v1333_v41, %v1329_v30  ;;  %v3967_v55 = vor.u32 %v4587_v12, %v3964_v37  ;;  %v3955_v24 = vor.u32 %v4586_v34, %v3954_v22  ;;  %v4584_v25 = vld [vmem:[#allocation11 + $0xac] sm:$0xf]  ;;  %v3930_v41 = vld [vmem:[#allocation11 + $0x80] sm:$0xf]  ;;  %v4575_v3 = vld [vmem:[#allocation11 + $0x64] sm:$0xf] }
 0x269   :  { %1892 = vmatpush.bf16.msra.mxu0 %v3963_v13  ;;  %v4576_v13 = vld [vmem:[#allocation11 + $0x6c] sm:$0xf]  ;;  %v3924_v37 = vld [vmem:[#allocation11 + $0x78] sm:$0xf0]  ;;  %v4571_v18 = vld [vmem:[#allocation11 + $0x44] sm:$0xf]  ;;  %v3899_v22 = vor.u32 %v4573_v50, %v3898_v58 }
 0x26a   :  { %v1338_v28 = vadd.f32 %v1337_v27, %v1336_v9  ;;  %1905 = vmatpush.bf16.msra.mxu1 %v3967_v55  ;;  %v295_v9 = vrot.slane %v5128_v11, 6  ;;  %v3900_v49 = vld [vmem:[#allocation11 + $0x50] sm:$0xf0]  ;;  %v3906_v34 = vld [vmem:[#allocation11 + $0x48] sm:$0xf] }
 0x26b   :  { %1931 = vmatpush.bf16.msrb.mxu3 %v3975_v51  ;;  %v3927_v51 = vor.u32 %v4576_v13, %v3924_v37 }
 0x26c   :  { %4764 = vtanh.f32 %v1338_v28  ;;  %v5254_v36 = vsel %vm1351_vm14, %v1338_v28, %v5224_v2  ;;  %v3959_v28 = vor.u32 %v4584_v25, %v3956_v26  ;;  %v3908_v25 = vld [vmem:[#allocation11 + $0x58] sm:$0xf0] }
 0x26d   :  { %1893 = vmatpush.bf16.msra.mxu0 %v3947_v20 }
 0x26e   :  { %1906 = vmatpush.bf16.msra.mxu1 %v3951_v23  ;;  %v4574_v23 = vld [vmem:[#allocation11 + $0x54] sm:$0xf0] }
 0x26f   :  { %1932 = vmatpush.bf16.msrb.mxu3 %v3959_v28  ;;  %v3907_v26 = vor.u32 %v4574_v23, %v3906_v34  ;;  %v4567_v28 = vld [vmem:[#allocation11 + $0x24] sm:$0xf] }
 0x272   :  { %v4765_v6 = vpop.eup %4764 }
 0x273   :  { %v1340_v43 = vmul.f32 %v4765_v6, %v1334_v42  ;;  %v4581_v6 = vld [vmem:[#allocation11 + $0x8c] sm:$0xf0] }
 0x274   :  { %v3931_v42 = vor.u32 %v4581_v6, %v3930_v41  ;;  %v4568_v6 = vld [vmem:[#allocation11 + $0x2c] sm:$0xf] }
 0x275   :  { %v1341_v44 = vpack.c.bf16 %v1340_v43, %v1340_v43  ;;  %v5260_v46 = vsel %vm1351_vm14, %v1340_v43, %v5231_v38  ;;  %v3987_v38 = vor.u32 %v4594_v1, %v3986_v0  ;;  %v4579_v43 = vld [vmem:[#allocation11 + $0x84] sm:$0xf]  ;;  %v3943_v1 = vor.u32 %v4580_v19, %v3940_v60  ;;  %v3874_v19 = vld [vmem:[#allocation11 + $0x8] sm:$0xf]  ;;  %v4566_v60 = vld [vmem:[#allocation11 + $0x14] sm:$0xf0] }
 0x276   :  { %v1356_v2 = vpack.c.bf16 %v5260_v46, %v5260_v46  ;;  %1894 = vmatpush.bf16.msra.mxu0 %v3931_v42  ;;  %v3892_v42 = vld [vmem:[#allocation11 + $0x38] sm:$0xf0] }
 0x277   :  { %1343 = vst [vmem:[#allocation5 + $0x2] sm:$0x1] %v1341_v44  ;;  %1917 = vmatpush.bf16.msrb.mxu2 %v3987_v38  ;;  %v3932_v44 = vld [vmem:[#allocation11 + $0x90] sm:$0xf0]  ;;  %v4577_v38 = vld [vmem:[#allocation11 + $0x6c] sm:$0xf0]  ;;  %1933 = vmatpush.bf16.msrb.mxu3 %v3943_v1 }
 0x278   :  { %1557 = vmatmul.bf16.vlgmr.msrb.gmra.mxu0 %v1356_v2  ;;  %1570 = vmatmul.bf16.vlgmr.msrb.gmra.mxu1 %v1356_v2  ;;  %v3935_v17 = vor.u32 %v4579_v43, %v3932_v44  ;;  %v3915_v53 = vor.u32 %v4577_v38, %v3914_v31  ;;  %v3866_v43 = vld [vmem:[#allocation11] sm:$0xf]  ;;  %v3876_v31 = vld [vmem:[#allocation11 + $0x18] sm:$0xf0] }
 0x279   :  { %1583 = vmatmul.bf16.vlgmr.msra.gmra.mxu2 %v1356_v2  ;;  %1596 = vmatmul.bf16.vlgmr.msra.gmra.mxu3 %v1356_v2  ;;  %v3938_v2 = vld [vmem:[#allocation11 + $0x88] sm:$0xf] }
 0x27a   :  { %v3939_v0 = vor.u32 %v4582_v47, %v3938_v2  ;;  %1907 = vmatpush.bf16.msra.mxu1 %v3935_v17  ;;  %1895 = vmatpush.bf16.msra.mxu0 %v3915_v53  ;;  %v3895_v2 = vor.u32 %v4568_v6, %v3892_v42  ;;  %v3868_v17 = vld [vmem:[#allocation11 + $0x10] sm:$0xf0] }
 0x27b   :  { %1918 = vmatpush.bf16.msrb.mxu2 %v3971_v16  ;;  %1934 = vmatpush.bf16.msrb.mxu3 %v3927_v51 }
 0x27e   :  { %v3068_v45 = vld [vmem:[#allocation5 + $0x2] sm:$0x1]  ;;  %1896 = vmatpush.bf16.msra.mxu0 %v3899_v22 }
 0x27f   :  { %3101 = vst [vmem:[#allocation1 + $0x2] ss:$9 sm:$0xff] %v3068_v45  ;;  %1919 = vmatpush.bf16.msrb.mxu2 %v3955_v24  ;;  %v4572_v24 = vld [vmem:[#allocation11 + $0x4c] sm:$0xf] }
 0x283   :  { %1920 = vmatpush.bf16.msrb.mxu2 %v3939_v0 }
 0x2f5   :  { %v1558_v54 = vpop.f32.mrf.mxu0  ;;  %v1571_v7 = vpop.f32.mrf.mxu1 }
 0x2f6   :  { %v1605_v5 = vrot.slane %v1571_v7, 6  ;;  %v3916_v7 = vld [vmem:[#allocation11 + $0x70] sm:$0xf0] }
 0x2f7   :  { %v3919_v10 = vor.u32 %v4575_v3, %v3916_v7  ;;  %v3875_v7 = vor.u32 %v4566_v60, %v3874_v19 }
 0x2f8   :  { %v1608_v45 = vsel %vm275_vm5, %v1558_v54, %v1605_v5  ;;  %v3922_v54 = vld [vmem:[#allocation11 + $0x68] sm:$0xf]  ;;  %v3903_v5 = vor.u32 %v4571_v18, %v3900_v49 }
 0x2f9   :  { %v3923_v12 = vor.u32 %v4578_v8, %v3922_v54  ;;  %1908 = vmatpush.bf16.msra.mxu1 %v3919_v10 }
 0x2fb   :  { %1921 = vmatpush.bf16.msrb.mxu2 %v3923_v12  ;;  %v4846_v12 = vld [vmem:[%s5412_s1] sm:$0x3] }
 0x2fc   :  { %v1584_v63 = vpop.f32.mrf.mxu2  ;;  %v1597_v27 = vpop.f32.mrf.mxu3  ;;  %vm4127_vm4 = vcmp.gt.s32.totalorder %v4846_v12, 5  ;;  %vm4391_vm6 = vcmp.gt.s32.totalorder %v4846_v12, 7 }
 0x2fd   :  { %v1606_v29 = vrot.slane %v1584_v63, 4  ;;  %v1607_v35 = vrot.slane %v1597_v27, 2  ;;  %v1560_v39 = vpop.f32.mrf.mxu0  ;;  %v1573_v30 = vpop.f32.mrf.mxu1  ;;  %v3911_v63 = vor.u32 %v4572_v24, %v3908_v25  ;;  %v4569_v27 = vld [vmem:[#allocation11 + $0x2c] sm:$0xf0]  ;;  %1909 = vmatpush.bf16.msra.mxu1 %v3903_v5  ;;  %v2373_v37 = vsel %vm4127_vm4, 1, %v4986_v62 }
 0x2fe   :  { %v3890_v39 = vld [vmem:[#allocation11 + $0x28] sm:$0xf]  ;;  %v4570_v30 = vld [vmem:[#allocation11 + $0x34] sm:$0xf0]  ;;  %2375 = vperm.xlu2 %4716, %v2373_v37  }
 0x2ff   :  { %v1609_v11 = vsel %vm277_vm8, %v1606_v29, %v1607_v35  ;;  %v3884_v35 = vld [vmem:[#allocation11 + $0x30] sm:$0xf0]  ;;  %1922 = vmatpush.bf16.msrb.mxu2 %v3907_v26  ;;  %1935 = vmatpush.bf16.msrb.mxu3 %v3911_v63  ;;  %v3891_v44 = vor.u32 %v4570_v30, %v3890_v39  ;;  %v1692_v30 = vpop.permute.xlu1 %1691 }
 0x300   :  { %v1610_v61 = vsel %vm279_vm9, %v1608_v45, %v1609_v11  ;;  %v3887_v41 = vor.u32 %v4567_v28, %v3884_v35  ;;  %v4565_v45 = vld [vmem:[#allocation11 + $0xc] sm:$0xf0]  ;;  %v4563_v11 = vld [vmem:[#allocation11 + $0x4] sm:$0xf]  ;;  %vm1693_vm3 = vcmp.eq.s32.totalorder %v1692_v30, 1 }
 0x301   :  { %v5268_v52 = vadd.f32 %v1610_v61, %v295_v9  ;;  %v3882_v9 = vld [vmem:[#allocation11 + $0x20] sm:$0xf]  ;;  %v4564_v61 = vld [vmem:[#allocation11 + $0xc] sm:$0xf]  ;;  %v3867_v1 = vor.u32 %v4565_v45, %v3866_v43  ;;  %v3871_v3 = vor.u32 %v4563_v11, %v3868_v17 }
 0x302   :  { %v3883_v29 = vor.u32 %v4569_v27, %v3882_v9  ;;  %1910 = vmatpush.bf16.msra.mxu1 %v3887_v41  ;;  %v3879_v54 = vor.u32 %v4564_v61, %v3876_v31  ;;  %v4623_v31 = vld [vmem:[#allocation11 + $0xe4] sm:$0xf] }
 0x303   :  { %v3860_v55 = vmul.f32 -1.442695, %v5268_v52  ;;  %v1633_v14 = vrot.slane %v5268_v52, 2  ;;  %v1657_v32 = vrot.slane %v5268_v52, 6  ;;  %1923 = vmatpush.bf16.msrb.mxu2 %v3891_v44  ;;  %1936 = vmatpush.bf16.msrb.mxu3 %v3895_v2 }
 0x304   :  { %v1586_v33 = vpop.f32.mrf.mxu2  ;;  %v1599_v16 = vpop.f32.mrf.mxu3  ;;  %1897 = vmatpush.bf16.msra.mxu0 %v3883_v29 }
 0x305   :  { %4766 = vpow2.f32 %v3860_v55  ;;  %v3861_v20 = vmul.f32 -1.442695, %v1633_v14  ;;  %v3862_v21 = vmul.f32 -1.442695, %v1657_v32  ;;  %v1654_v32 = vrot.slane %v5268_v52, 4 }
 0x306   :  { %1911 = vmatpush.bf16.msra.mxu1 %v3871_v3  ;;  %v4112_v3 = vld [vmem:[#allocation11 + $0xf0] sm:$0xf0] }
 0x307   :  { %4768 = vpow2.f32 %v3861_v20  ;;  %1924 = vmatpush.bf16.msrb.mxu2 %v3875_v7  ;;  %1937 = vmatpush.bf16.msrb.mxu3 %v3879_v54  ;;  %v4626_v7 = vld [vmem:[#allocation11 + $0xf4] sm:$0xf0]  ;;  %v4115_v54 = vor.u32 %v4623_v31, %v4112_v3 }
 0x308   :  { %4770 = vpow2.f32 %v3862_v21  ;;  %1898 = vmatpush.bf16.msra.mxu0 %v3867_v1  ;;  %v3057_v21 = vsel %vm4391_vm6, 1, %v4986_v62  ;;  %v4625_v1 = vld [vmem:[#allocation11 + $0xec] sm:$0xf0] }
 0x309   :  { %3235 = vperm.xlu2 %4716, %v3057_v21  }
 0x30a   :  { %2246 = vmatpush.bf16.msrb.mxu1 %v4115_v54  ;;  %v4609_v54 = vld [vmem:[#allocation11 + $0x6c] sm:$0xf0] }
 0x30b   :  { %v4767_v47 = vpop.eup %4766 }
 0x30c   :  { %v1616_v0 = vadd.f32 1.0, %v4767_v47 }
 0x30d   :  { %v4769_v38 = vpop.eup %4768 }
 0x30e   :  { %v4771_v53 = vpop.eup %4770  ;;  %4772 = vrcp.f32 %v1616_v0  ;;  %v1638_v8 = vadd.f32 1.0, %v4769_v38  ;;  %v1628_v50 = vand.u32 2147483648, %v1616_v0  ;;  %v1626_v49 = vand.u32 2147483647, %v1616_v0 }
 0x30f   :  { %v5273_v10 = vadd.f32 1.0, %v4771_v53  ;;  %vm1622_vm10 = vweird.f32 %v1616_v0  ;;  %v4118_v53 = vld [vmem:[#allocation11 + $0xe8] sm:$0xf] }
 0x310   :  { %4774 = vrcp.f32 %v1638_v8  ;;  %v1650_v34 = vand.u32 2147483648, %v1638_v8  ;;  %v1648_v52 = vand.u32 2147483647, %v1638_v8  ;;  %v1629_v24 = vor.u32 1.1754944e-38, %v1628_v50  ;;  %v4622_v50 = vld [vmem:[#allocation11 + $0xd4] sm:$0xf0] }
 0x311   :  { %4776 = vrcp.f32 %v5273_v10  ;;  %vm1627_vm14 = vcmp.eq.f32.partialorder %v1626_v49, 8.507059e+37  ;;  %vm1644_vm15 = vweird.f32 %v1638_v8  ;;  %3229 = vperm.xlu2 %4716, %v2373_v37   ;;  %v1674_v42 = vand.u32 2147483648, %v5273_v10  ;;  %v4104_v49 = vld [vmem:[#allocation11 + $0xd8] sm:$0xf0] }
 0x312   :  { %4778 = vtanh.f32 %v1654_v32  ;;  %v1651_v9 = vor.u32 1.1754944e-38, %v1650_v34  ;;  %vm1649_vm2 = vcmp.eq.f32.partialorder %v1648_v52, 8.507059e+37  ;;  %vm1668_vm6 = vweird.f32 %v5273_v10  ;;  %v4617_v34 = vld [vmem:[#allocation11 + $0xac] sm:$0xf0] }
 0x313   :  { %v1672_v44 = vand.u32 2147483647, %v5273_v10  ;;  %v1675_v45 = vor.u32 1.1754944e-38, %v1674_v42  ;;  %v4062_v42 = vld [vmem:[#allocation11 + $0x80] sm:$0xf] }
 0x314   :  { %v4773_v13 = vpop.eup %4772 }
 0x315   :  { %v1618_v58 = vmul.f32 %v4773_v13, %v1616_v0  ;;  %vm1623_vm7 = vweird.f32 %v4773_v13  ;;  %v4110_v0 = vld [vmem:[#allocation11 + $0xe0] sm:$0xf] }
 0x316   :  { %v4775_v55 = vpop.eup %4774  ;;  %vm1624_vm12 = vmor %vm1622_vm10, %vm1623_vm7  ;;  %vm1673_vm10 = vcmp.eq.f32.partialorder %v1672_v44, 8.507059e+37  ;;  %v4111_v38 = vor.u32 %v4625_v1, %v4110_v0  ;;  %v4613_v44 = vld [vmem:[#allocation11 + $0x8c] sm:$0xf0]  ;;  %v4612_v0 = vld [vmem:[#allocation11 + $0x8c] sm:$0xf] }
 0x317   :  { %v1619_v14 = vsub.f32 1.0, %v1618_v58  ;;  %v4777_v33 = vpop.eup %4776  ;;  %v1640_v16 = vmul.f32 %v4775_v55, %v1638_v8  ;;  %vm1645_vm13 = vweird.f32 %v4775_v55  ;;  %v4624_v8 = vld [vmem:[#allocation11 + $0xec] sm:$0xf]  ;;  %v4094_v58 = vld [vmem:[#allocation11 + $0xc0] sm:$0xf] }
 0x318   :  { %v1664_v18 = vmul.f32 %v4777_v33, %v5273_v10  ;;  %vm1646_vm1 = vmor %vm1644_vm15, %vm1645_vm13  ;;  %v4779_v62 = vpop.eup %4778  ;;  %vm1669_vm4 = vweird.f32 %v4777_v33  ;;  %v4120_v10 = vld [vmem:[#allocation11 + $0xf8] sm:$0xf0]  ;;  %2233 = vmatpush.bf16.msrb.mxu0 %v4111_v38 }
 0x319   :  { %v1620_v51 = vmul.f32 %v4773_v13, %v1619_v14  ;;  %v1641_v20 = vsub.f32 1.0, %v1640_v16  ;;  %vm1670_vm7 = vmor %vm1668_vm6, %vm1669_vm4  ;;  %3059 = vperm.xlu2 %4716, %v3057_v21   ;;  %v4123_v12 = vor.u32 %v4624_v8, %v4120_v10  ;;  %v4619_v14 = vld [vmem:[#allocation11 + $0xc4] sm:$0xf]  ;;  %v4102_v16 = vld [vmem:[#allocation11 + $0xc8] sm:$0xf] }
 0x31a   :  { %v1665_v25 = vsub.f32 1.0, %v1664_v18  ;;  %v4620_v18 = vld [vmem:[#allocation11 + $0xcc] sm:$0xf]  ;;  %v4072_v1 = vld [vmem:[#allocation11 + $0x98] sm:$0xf0] }
 0x31b   :  { %v1621_v22 = vadd.f32 %v4773_v13, %v1620_v51  ;;  %v1642_v5 = vmul.f32 %v4775_v55, %v1641_v20  ;;  %2272 = vmatpush.bf16.msra.mxu3 %v4123_v12  ;;  %v4103_v20 = vor.u32 %v4622_v50, %v4102_v16  ;;  %v4107_v21 = vor.u32 %v4620_v18, %v4104_v49  ;;  %v4048_v10 = vld [vmem:[#allocation11 + $0x70] sm:$0xf0]  ;;  %v4054_v12 = vld [vmem:[#allocation11 + $0x68] sm:$0xf]  ;;  %v4608_v16 = vld [vmem:[#allocation11 + $0x6c] sm:$0xf] }
 0x31c   :  { %v1666_v29 = vmul.f32 %v4777_v33, %v1665_v25  ;;  %v4618_v25 = vld [vmem:[#allocation11 + $0xb4] sm:$0xf0]  ;;  %v4075_v3 = vor.u32 %v4612_v0, %v4072_v1  ;;  %v4597_v0 = vld [vmem:[#allocation11 + $0xc] sm:$0xf0]  ;;  %v4595_v1 = vld [vmem:[#allocation11 + $0x4] sm:$0xf] }
 0x31d   :  { %v1625_v23 = vsel %vm1624_vm12, %v4773_v13, %v1621_v22  ;;  %v1643_v26 = vadd.f32 %v4775_v55, %v1642_v5  ;;  %v4078_v22 = vld [vmem:[#allocation11 + $0xa0] sm:$0xf]  ;;  %v4615_v5 = vld [vmem:[#allocation11 + $0xa4] sm:$0xf] }
 0x31e   :  { %v1630_v63 = vsel %vm1627_vm14, %v1629_v24, %v1625_v23  ;;  %v1667_v6 = vadd.f32 %v4777_v33, %v1666_v29  ;;  %v4079_v52 = vor.u32 %v4617_v34, %v4078_v22  ;;  %v4080_v23 = vld [vmem:[#allocation11 + $0xb0] sm:$0xf0]  ;;  %v4086_v24 = vld [vmem:[#allocation11 + $0xa8] sm:$0xf]  ;;  %v4603_v22 = vld [vmem:[#allocation11 + $0x44] sm:$0xf] }
 0x31f   :  { %v1647_v27 = vsel %vm1646_vm1, %v4775_v55, %v1643_v26  ;;  %v1679_v35 = vmul.f32 %v4779_v62, %v1630_v63  ;;  %v4621_v55 = vld [vmem:[#allocation11 + $0xcc] sm:$0xf0]  ;;  %2273 = vmatpush.bf16.msra.mxu3 %v4107_v21  ;;  %v4083_v63 = vor.u32 %v4615_v5, %v4080_v23  ;;  %v4088_v62 = vld [vmem:[#allocation11 + $0xb8] sm:$0xf0]  ;;  %v4032_v5 = vld [vmem:[#allocation11 + $0x50] sm:$0xf0] }
 0x320   :  { %v1652_v28 = vsel %vm1649_vm2, %v1651_v9, %v1647_v27  ;;  %v1671_v2 = vsel %vm1670_vm7, %v4777_v33, %v1667_v6  ;;  %v4095_v32 = vor.u32 %v4621_v55, %v4094_v58  ;;  %v4096_v33 = vld [vmem:[#allocation11 + $0xd0] sm:$0xf0]  ;;  %v4087_v9 = vor.u32 %v4618_v25, %v4086_v24  ;;  %v4616_v27 = vld [vmem:[#allocation11 + $0xac] sm:$0xf]  ;;  %v4605_v21 = vld [vmem:[#allocation11 + $0x4c] sm:$0xf0] }
 0x321   :  { %v1678_v39 = vmul.f32 %v1652_v28, %v5254_v36  ;;  %v1676_v17 = vsel %vm1673_vm10, %v1675_v45, %v1671_v2  ;;  %v4099_v51 = vor.u32 %v4619_v14, %v4096_v33  ;;  %v4063_v2 = vor.u32 %v4613_v44, %v4062_v42  ;;  %v4611_v45 = vld [vmem:[#allocation11 + $0x84] sm:$0xf]  ;;  %v4606_v23 = vld [vmem:[#allocation11 + $0x54] sm:$0xf0]  ;;  %v4600_v44 = vld [vmem:[#allocation11 + $0x2c] sm:$0xf] }
 0x322   :  { %2234 = vmatpush.bf16.msrb.mxu0 %v4095_v32  ;;  %v4035_v24 = vor.u32 %v4603_v22, %v4032_v5 }
 0x323   :  { %v1680_v41 = vadd.f32 %v1679_v35, %v1678_v39  ;;  %2247 = vmatpush.bf16.msrb.mxu1 %v4099_v51  ;;  %v4091_v35 = vor.u32 %v4616_v27, %v4088_v62  ;;  %v4056_v51 = vld [vmem:[#allocation11 + $0x78] sm:$0xf0]  ;;  %v4014_v27 = vld [vmem:[#allocation11 + $0x20] sm:$0xf]  ;;  %v4601_v62 = vld [vmem:[#allocation11 + $0x2c] sm:$0xf0] }
 0x324   :  { %v4059_v49 = vor.u32 %v4608_v16, %v4056_v51 }
 0x325   :  { %4780 = vtanh.f32 %v1680_v41  ;;  %v5287_v43 = vsel %vm1693_vm3, %v1680_v41, %v5254_v36  ;;  %2274 = vmatpush.bf16.msra.mxu3 %v4091_v35  ;;  %v4016_v35 = vld [vmem:[#allocation11 + $0x30] sm:$0xf0] }
 0x326   :  { %2235 = vmatpush.bf16.msrb.mxu0 %v4079_v52  ;;  %v4038_v52 = vld [vmem:[#allocation11 + $0x48] sm:$0xf] }
 0x327   :  { %2248 = vmatpush.bf16.msrb.mxu1 %v4083_v63  ;;  %v4039_v25 = vor.u32 %v4606_v23, %v4038_v52  ;;  %v4040_v63 = vld [vmem:[#allocation11 + $0x58] sm:$0xf0] }
 0x329   :  { %2275 = vmatpush.bf16.msra.mxu3 %v4075_v3  ;;  %v4598_v3 = vld [vmem:[#allocation11 + $0x14] sm:$0xf0] }
 0x32a   :  { %2236 = vmatpush.bf16.msrb.mxu0 %v4063_v2  ;;  %v4024_v2 = vld [vmem:[#allocation11 + $0x38] sm:$0xf0] }
 0x32b   :  { %v4781_v11 = vpop.eup %4780 }
 0x32c   :  { %v1682_v47 = vmul.f32 %v4781_v11, %v1676_v17  ;;  %v4064_v11 = vld [vmem:[#allocation11 + $0x90] sm:$0xf0]  ;;  %v4070_v17 = vld [vmem:[#allocation11 + $0x88] sm:$0xf] }
 0x32d   :  { %2276 = vmatpush.bf16.msra.mxu3 %v4059_v49 }
 0x32e   :  { %v1683_v19 = vpack.c.bf16 %v1682_v47, %v1682_v47  ;;  %v5293_v60 = vsel %vm1693_vm3, %v1682_v47, %v5260_v46  ;;  %v4119_v46 = vor.u32 %v4626_v7, %v4118_v53  ;;  %v4046_v7 = vld [vmem:[#allocation11 + $0x60] sm:$0xf] }
 0x32f   :  { %v1698_v36 = vpack.c.bf16 %v5293_v60, %v5293_v60  ;;  %v4047_v8 = vor.u32 %v4609_v54, %v4046_v7  ;;  %v4596_v7 = vld [vmem:[#allocation11 + $0xc] sm:$0xf]  ;;  %v4008_v54 = vld [vmem:[#allocation11 + $0x18] sm:$0xf0] }
 0x330   :  { %1685 = vst [vmem:[#allocation5 + $0x3] sm:$0x1] %v1683_v19  ;;  %2259 = vmatpush.bf16.msra.mxu2 %v4119_v46  ;;  %v4607_v46 = vld [vmem:[#allocation11 + $0x64] sm:$0xf] }
 0x331   :  { %1899 = vmatmul.bf16.vlgmr.msra.gmra.mxu0 %v1698_v36  ;;  %1912 = vmatmul.bf16.vlgmr.msra.gmra.mxu1 %v1698_v36 }
 0x332   :  { %1925 = vmatmul.bf16.vlgmr.msrb.gmra.mxu2 %v1698_v36  ;;  %1938 = vmatmul.bf16.vlgmr.msrb.gmra.mxu3 %v1698_v36  ;;  %v4067_v36 = vor.u32 %v4611_v45, %v4064_v11  ;;  %v4027_v11 = vor.u32 %v4600_v44, %v4024_v2 }
 0x333   :  { %2237 = vmatpush.bf16.msrb.mxu0 %v4047_v8 }
 0x334   :  { %2260 = vmatpush.bf16.msra.mxu2 %v4103_v20  ;;  %2249 = vmatpush.bf16.msrb.mxu1 %v4067_v36  ;;  %v4030_v20 = vld [vmem:[#allocation11 + $0x40] sm:$0xf] }
 0x335   :  { %v4031_v34 = vor.u32 %v4605_v21, %v4030_v20 }
 0x337   :  { %v3069_v61 = vld [vmem:[#allocation5 + $0x3] sm:$0x1]  ;;  %2238 = vmatpush.bf16.msrb.mxu0 %v4031_v34 }
 0x338   :  { %3104 = vst [vmem:[#allocation1 + $0x3] ss:$9 sm:$0xff] %v3069_v61  ;;  %2261 = vmatpush.bf16.msra.mxu2 %v4087_v9  ;;  %v4614_v61 = vld [vmem:[#allocation11 + $0x94] sm:$0xf0] }
 0x339   :  { %v4071_v38 = vor.u32 %v4614_v61, %v4070_v17  ;;  %v3998_v61 = vld [vmem:[#allocation11] sm:$0xf] }
 0x33c   :  { %2262 = vmatpush.bf16.msra.mxu2 %v4071_v38  ;;  %v4006_v38 = vld [vmem:[#allocation11 + $0x8] sm:$0xf] }
 0x3ae   :  { %v1900_v13 = vpop.f32.mrf.mxu0  ;;  %v1913_v37 = vpop.f32.mrf.mxu1 }
 0x3af   :  { %v1947_v26 = vrot.slane %v1913_v37, 6 }
 0x3b1   :  { %v1950_v47 = vsel %vm275_vm5, %v1900_v13, %v1947_v26  ;;  %v4610_v13 = vld [vmem:[#allocation11 + $0x74] sm:$0xf0]  ;;  %v4604_v26 = vld [vmem:[#allocation11 + $0x4c] sm:$0xf] }
 0x3b2   :  { %v4055_v33 = vor.u32 %v4610_v13, %v4054_v12  ;;  %v4043_v9 = vor.u32 %v4604_v26, %v4040_v63  ;;  %v4007_v12 = vor.u32 %v4598_v3, %v4006_v38  ;;  %v4011_v13 = vor.u32 %v4596_v7, %v4008_v54  ;;  %v4658_v38 = vld [vmem:[#allocation11 + $0xf4] sm:$0xf0]  ;;  %v4656_v7 = vld [vmem:[#allocation11 + $0xec] sm:$0xf]  ;;  %v4252_v54 = vld [vmem:[#allocation11 + $0xf8] sm:$0xf0] }
 0x3b4   :  { %2263 = vmatpush.bf16.msra.mxu2 %v4055_v33  ;;  %2277 = vmatpush.bf16.msra.mxu3 %v4043_v9 }
 0x3b5   :  { %v1926_v28 = vpop.f32.mrf.mxu2  ;;  %v1939_v29 = vpop.f32.mrf.mxu3 }
 0x3b6   :  { %v1948_v39 = vrot.slane %v1926_v28, 4  ;;  %v1949_v30 = vrot.slane %v1939_v29, 2  ;;  %v1902_v41 = vpop.f32.mrf.mxu0  ;;  %v1915_v6 = vpop.f32.mrf.mxu1  ;;  %v4599_v28 = vld [vmem:[#allocation11 + $0x24] sm:$0xf]  ;;  %v4015_v29 = vor.u32 %v4601_v62, %v4014_v27 }
 0x3b7   :  { %v4019_v6 = vor.u32 %v4599_v28, %v4016_v35  ;;  %v2034_v27 = vpop.permute.xlu2 %2033 }
 0x3b8   :  { %v1951_v19 = vsel %vm277_vm8, %v1948_v39, %v1949_v30  ;;  %2264 = vmatpush.bf16.msra.mxu2 %v4039_v25  ;;  %v4022_v39 = vld [vmem:[#allocation11 + $0x28] sm:$0xf]  ;;  %v4602_v30 = vld [vmem:[#allocation11 + $0x34] sm:$0xf0]  ;;  %2239 = vmatpush.bf16.msrb.mxu0 %v4015_v29  ;;  %vm2035_vm6 = vcmp.eq.s32.totalorder %v2034_v27, 1 }
 0x3b9   :  { %v1952_v31 = vsel %vm279_vm9, %v1950_v47, %v1951_v19  ;;  %v4023_v42 = vor.u32 %v4602_v30, %v4022_v39  ;;  %2278 = vmatpush.bf16.msra.mxu3 %v4027_v11 }
 0x3ba   :  { %v5301_v53 = vadd.f32 %v1952_v31, %v5140_v56  ;;  %v4051_v56 = vor.u32 %v4607_v46, %v4048_v10  ;;  %v4000_v31 = vld [vmem:[#allocation11 + $0x10] sm:$0xf0]  ;;  %v3999_v46 = vor.u32 %v4597_v0, %v3998_v61  ;;  %v4655_v61 = vld [vmem:[#allocation11 + $0xe4] sm:$0xf] }
 0x3bb   :  { %v4003_v8 = vor.u32 %v4595_v1, %v4000_v31  ;;  %v4244_v1 = vld [vmem:[#allocation11 + $0xf0] sm:$0xf0]  ;;  %v4250_v31 = vld [vmem:[#allocation11 + $0xe8] sm:$0xf] }
 0x3bc   :  { %v3992_v37 = vmul.f32 -1.442695, %v5301_v53  ;;  %v1975_v58 = vrot.slane %v5301_v53, 2  ;;  %v1999_v55 = vrot.slane %v5301_v53, 6  ;;  %2250 = vmatpush.bf16.msrb.mxu1 %v4051_v56  ;;  %2265 = vmatpush.bf16.msra.mxu2 %v4023_v42  ;;  %v4247_v3 = vor.u32 %v4655_v61, %v4244_v1  ;;  %v4178_v1 = vld [vmem:[#allocation11 + $0x60] sm:$0xf] }
 0x3bd   :  { %v1928_v14 = vpop.f32.mrf.mxu2  ;;  %v1941_v32 = vpop.f32.mrf.mxu3  ;;  %2240 = vmatpush.bf16.msrb.mxu0 %v3999_v46  ;;  %2279 = vmatpush.bf16.msra.mxu3 %v4011_v13  ;;  %v4255_v46 = vor.u32 %v4656_v7, %v4252_v54  ;;  %v4653_v13 = vld [vmem:[#allocation11 + $0xcc] sm:$0xf0]  ;;  %v4180_v7 = vld [vmem:[#allocation11 + $0x70] sm:$0xf0]  ;;  %v4186_v54 = vld [vmem:[#allocation11 + $0x68] sm:$0xf] }
 0x3be   :  { %4782 = vpow2.f32 %v3992_v37  ;;  %v3993_v50 = vmul.f32 -1.442695, %v1975_v58  ;;  %v3994_v18 = vmul.f32 -1.442695, %v1999_v55  ;;  %v1996_v55 = vrot.slane %v5301_v53, 4 }
 0x3c0   :  { %4784 = vpow2.f32 %v3993_v50  ;;  %2251 = vmatpush.bf16.msrb.mxu1 %v4035_v24  ;;  %2266 = vmatpush.bf16.msra.mxu2 %v4007_v12  ;;  %v4226_v12 = vld [vmem:[#allocation11 + $0xc0] sm:$0xf] }
 0x3c1   :  { %4786 = vpow2.f32 %v3994_v18  ;;  %2614 = vmatpush.bf16.msrb.mxu3 %v4255_v46  ;;  %v4642_v46 = vld [vmem:[#allocation11 + $0x74] sm:$0xf0] }
 0x3c4   :  { %v4783_v41 = vpop.eup %4782  ;;  %2252 = vmatpush.bf16.msrb.mxu1 %v4019_v6 }
 0x3c5   :  { %v1958_v45 = vadd.f32 1.0, %v4783_v41 }
 0x3c6   :  { %v4785_v17 = vpop.eup %4784 }
 0x3c7   :  { %v4787_v47 = vpop.eup %4786  ;;  %4788 = vrcp.f32 %v1958_v45  ;;  %v1980_v19 = vadd.f32 1.0, %v4785_v17  ;;  %v1970_v33 = vand.u32 2147483648, %v1958_v45  ;;  %v1968_v50 = vand.u32 2147483647, %v1958_v45 }
 0x3c8   :  { %v5306_v36 = vadd.f32 1.0, %v4787_v47  ;;  %2253 = vmatpush.bf16.msrb.mxu1 %v4003_v8  ;;  %vm1964_vm13 = vweird.f32 %v1958_v45 }
 0x3c9   :  { %4790 = vrcp.f32 %v1980_v19  ;;  %v1992_v49 = vand.u32 2147483648, %v1980_v19  ;;  %v1990_v22 = vand.u32 2147483647, %v1980_v19  ;;  %v1971_v53 = vor.u32 1.1754944e-38, %v1970_v33  ;;  %v4652_v33 = vld [vmem:[#allocation11 + $0xcc] sm:$0xf] }
 0x3ca   :  { %4792 = vrcp.f32 %v5306_v36  ;;  %vm1969_vm1 = vcmp.eq.f32.partialorder %v1968_v50, 8.507059e+37  ;;  %vm1986_vm2 = vweird.f32 %v1980_v19  ;;  %v2016_v39 = vand.u32 2147483648, %v5306_v36 }
 0x3cb   :  { %4794 = vtanh.f32 %v1996_v55  ;;  %v1993_v24 = vor.u32 1.1754944e-38, %v1992_v49  ;;  %vm1991_vm4 = vcmp.eq.f32.partialorder %v1990_v22, 8.507059e+37  ;;  %vm2010_vm10 = vweird.f32 %v5306_v36  ;;  %v4228_v55 = vld [vmem:[#allocation11 + $0xd0] sm:$0xf0]  ;;  %v4649_v49 = vld [vmem:[#allocation11 + $0xac] sm:$0xf0] }
 0x3cc   :  { %v2014_v41 = vand.u32 2147483647, %v5306_v36  ;;  %v2017_v42 = vor.u32 1.1754944e-38, %v2016_v39  ;;  %2588 = vmatpush.bf16.msra.mxu1 %v4247_v3  ;;  %v4212_v22 = vld [vmem:[#allocation11 + $0xb0] sm:$0xf0] }
 0x3cd   :  { %v4789_v10 = vpop.eup %4788  ;;  %v4194_v39 = vld [vmem:[#allocation11 + $0x80] sm:$0xf] }
 0x3ce   :  { %v1960_v37 = vmul.f32 %v4789_v10, %v1958_v45  ;;  %vm1965_vm12 = vweird.f32 %v4789_v10 }
 0x3cf   :  { %v4791_v58 = vpop.eup %4790  ;;  %vm1966_vm15 = vmor %vm1964_vm13, %vm1965_vm12  ;;  %vm2015_vm13 = vcmp.eq.f32.partialorder %v2014_v41, 8.507059e+37  ;;  %v4645_v41 = vld [vmem:[#allocation11 + $0x8c] sm:$0xf0] }
 0x3d0   :  { %v4793_v14 = vpop.eup %4792  ;;  %v1961_v32 = vsub.f32 1.0, %v1960_v37  ;;  %v1982_v56 = vmul.f32 %v4791_v58, %v1980_v19  ;;  %vm1987_vm14 = vweird.f32 %v4791_v58  ;;  %v4242_v19 = vld [vmem:[#allocation11 + $0xe0] sm:$0xf]  ;;  %v4651_v37 = vld [vmem:[#allocation11 + $0xc4] sm:$0xf] }
 0x3d1   :  { %v2006_v16 = vmul.f32 %v4793_v14, %v5306_v36  ;;  %vm1988_vm3 = vmor %vm1986_vm2, %vm1987_vm14  ;;  %v4795_v26 = vpop.eup %4794  ;;  %vm2011_vm7 = vweird.f32 %v4793_v14  ;;  %v4657_v36 = vld [vmem:[#allocation11 + $0xec] sm:$0xf0] }
 0x3d2   :  { %v1962_v51 = vmul.f32 %v4789_v10, %v1961_v32  ;;  %v1983_v18 = vsub.f32 1.0, %v1982_v56  ;;  %vm2012_vm12 = vmor %vm2010_vm10, %vm2011_vm7  ;;  %v4243_v0 = vor.u32 %v4657_v36, %v4242_v19  ;;  %v4231_v32 = vor.u32 %v4651_v37, %v4228_v55  ;;  %v4654_v56 = vld [vmem:[#allocation11 + $0xd4] sm:$0xf0]  ;;  %v4204_v19 = vld [vmem:[#allocation11 + $0x98] sm:$0xf0] }
 0x3d3   :  { %v2007_v34 = vsub.f32 1.0, %v2006_v16  ;;  %v4236_v16 = vld [vmem:[#allocation11 + $0xd8] sm:$0xf0]  ;;  %v4162_v37 = vld [vmem:[#allocation11 + $0x40] sm:$0xf] }
 0x3d4   :  { %v1963_v20 = vadd.f32 %v4789_v10, %v1962_v51  ;;  %v1984_v21 = vmul.f32 %v4791_v58, %v1983_v18  ;;  %2575 = vmatpush.bf16.msra.mxu0 %v4243_v0  ;;  %v4239_v50 = vor.u32 %v4652_v33, %v4236_v16  ;;  %2589 = vmatpush.bf16.msra.mxu1 %v4231_v32  ;;  %v4210_v18 = vld [vmem:[#allocation11 + $0xa0] sm:$0xf]  ;;  %v4637_v16 = vld [vmem:[#allocation11 + $0x4c] sm:$0xf0] }
 0x3d5   :  { %v2008_v9 = vmul.f32 %v4793_v14, %v2007_v34  ;;  %v4650_v34 = vld [vmem:[#allocation11 + $0xb4] sm:$0xf0] }
 0x3d6   :  { %v1967_v5 = vsel %vm1966_vm15, %v4789_v10, %v1963_v20  ;;  %v1985_v52 = vadd.f32 %v4791_v58, %v1984_v21  ;;  %v4647_v20 = vld [vmem:[#allocation11 + $0xa4] sm:$0xf]  ;;  %2615 = vmatpush.bf16.msrb.mxu3 %v4239_v50  ;;  %v4211_v21 = vor.u32 %v4649_v49, %v4210_v18  ;;  %v4164_v50 = vld [vmem:[#allocation11 + $0x50] sm:$0xf0] }
 0x3d7   :  { %v1972_v23 = vsel %vm1969_vm1, %v1971_v53, %v1967_v5  ;;  %v2009_v35 = vadd.f32 %v4793_v14, %v2008_v9  ;;  %v4218_v53 = vld [vmem:[#allocation11 + $0xa8] sm:$0xf] }
 0x3d8   :  { %v1989_v25 = vsel %vm1988_vm3, %v4791_v58, %v1985_v52  ;;  %v2021_v28 = vmul.f32 %v4795_v26, %v1972_v23  ;;  %v4227_v58 = vor.u32 %v4653_v13, %v4226_v12  ;;  %v4215_v52 = vor.u32 %v4647_v20, %v4212_v22  ;;  %v4640_v12 = vld [vmem:[#allocation11 + $0x6c] sm:$0xf]  ;;  %v4188_v13 = vld [vmem:[#allocation11 + $0x78] sm:$0xf0] }
 0x3d9   :  { %v1994_v63 = vsel %vm1991_vm4, %v1993_v24, %v1989_v25  ;;  %v2013_v6 = vsel %vm2012_vm12, %v4793_v14, %v2009_v35  ;;  %v4234_v14 = vld [vmem:[#allocation11 + $0xc8] sm:$0xf]  ;;  %v4219_v23 = vor.u32 %v4650_v34, %v4218_v53  ;;  %v4648_v24 = vld [vmem:[#allocation11 + $0xac] sm:$0xf]  ;;  %v4220_v25 = vld [vmem:[#allocation11 + $0xb8] sm:$0xf0]  ;;  %v4191_v33 = vor.u32 %v4640_v12, %v4188_v13 }
 0x3da   :  { %v2020_v62 = vmul.f32 %v1994_v63, %v5287_v43  ;;  %v2018_v2 = vsel %vm2015_vm13, %v2017_v42, %v2013_v6  ;;  %2576 = vmatpush.bf16.msra.mxu0 %v4227_v58  ;;  %v4235_v51 = vor.u32 %v4654_v56, %v4234_v14  ;;  %v302_v63 = vrot.slane %v5143_v57, 2  ;;  %2590 = vmatpush.bf16.msra.mxu1 %v4215_v52  ;;  %v4643_v42 = vld [vmem:[#allocation11 + $0x84] sm:$0xf]  ;;  %v4638_v53 = vld [vmem:[#allocation11 + $0x54] sm:$0xf0] }
 0x3db   :  { %v4223_v27 = vor.u32 %v4648_v24, %v4220_v25  ;;  %v4195_v6 = vor.u32 %v4645_v41, %v4194_v39  ;;  %v4163_v20 = vor.u32 %v4637_v16, %v4162_v37  ;;  %v4636_v34 = vld [vmem:[#allocation11 + $0x4c] sm:$0xf]  ;;  %v4146_v24 = vld [vmem:[#allocation11 + $0x20] sm:$0xf]  ;;  %v4633_v25 = vld [vmem:[#allocation11 + $0x2c] sm:$0xf0] }
 0x3dc   :  { %v2022_v29 = vadd.f32 %v2021_v28, %v2020_v62  ;;  %v4130_v39 = vld [vmem:[#allocation11] sm:$0xf] }
 0x3dd   :  { %2616 = vmatpush.bf16.msrb.mxu3 %v4223_v27  ;;  %v4154_v27 = vld [vmem:[#allocation11 + $0x28] sm:$0xf] }
 0x3de   :  { %4796 = vtanh.f32 %v2022_v29  ;;  %v5315_v30 = vsel %vm2035_vm6, %v2022_v29, %v5287_v43  ;;  %2577 = vmatpush.bf16.msra.mxu0 %v4211_v21  ;;  %v4170_v21 = vld [vmem:[#allocation11 + $0x48] sm:$0xf] }
 0x3df   :  { %v4171_v52 = vor.u32 %v4638_v53, %v4170_v21 }
 0x3e2   :  { %2578 = vmatpush.bf16.msra.mxu0 %v4195_v6 }
 0x3e4   :  { %v4797_v44 = vpop.eup %4796 }
 0x3e5   :  { %v2024_v45 = vmul.f32 %v4797_v44, %v2018_v2  ;;  %v4196_v44 = vld [vmem:[#allocation11 + $0x90] sm:$0xf0]  ;;  %v4202_v2 = vld [vmem:[#allocation11 + $0x88] sm:$0xf] }
 0x3e7   :  { %v2025_v11 = vpack.c.bf16 %v2024_v45, %v2024_v45  ;;  %v5321_v17 = vsel %vm2035_vm6, %v2024_v45, %v5293_v60  ;;  %v4251_v60 = vor.u32 %v4658_v38, %v4250_v31  ;;  %v4641_v31 = vld [vmem:[#allocation11 + $0x6c] sm:$0xf0]  ;;  %v4639_v38 = vld [vmem:[#allocation11 + $0x64] sm:$0xf] }
 0x3e8   :  { %v2040_v43 = vpack.c.bf16 %v5321_v17, %v5321_v17 }
 0x3e9   :  { %2027 = vst [vmem:[#allocation5 + $0x4] sm:$0x1] %v2025_v11  ;;  %2601 = vmatpush.bf16.msrb.mxu2 %v4251_v60  ;;  %v4199_v11 = vor.u32 %v4643_v42, %v4196_v44  ;;  %v4179_v60 = vor.u32 %v4641_v31, %v4178_v1  ;;  %v4629_v42 = vld [vmem:[#allocation11 + $0xc] sm:$0xf0]  ;;  %v4627_v44 = vld [vmem:[#allocation11 + $0x4] sm:$0xf] }
 0x3ea   :  { %2241 = vmatmul.bf16.vlgmr.msrb.gmra.mxu0 %v2040_v43  ;;  %2254 = vmatmul.bf16.vlgmr.msrb.gmra.mxu1 %v2040_v43 }
 0x3eb   :  { %2267 = vmatmul.bf16.vlgmr.msra.gmra.mxu2 %v2040_v43  ;;  %2280 = vmatmul.bf16.vlgmr.msra.gmra.mxu3 %v2040_v43  ;;  %v4646_v43 = vld [vmem:[#allocation11 + $0x94] sm:$0xf0] }
 0x3ec   :  { %v4203_v61 = vor.u32 %v4646_v43, %v4202_v2  ;;  %2591 = vmatpush.bf16.msra.mxu1 %v4199_v11  ;;  %2579 = vmatpush.bf16.msra.mxu0 %v4179_v60  ;;  %v4132_v2 = vld [vmem:[#allocation11 + $0x10] sm:$0xf0]  ;;  %v4630_v11 = vld [vmem:[#allocation11 + $0x14] sm:$0xf0]  ;;  %v4628_v43 = vld [vmem:[#allocation11 + $0xc] sm:$0xf] }
 0x3ed   :  { %2602 = vmatpush.bf16.msrb.mxu2 %v4235_v51  ;;  %v4635_v51 = vld [vmem:[#allocation11 + $0x44] sm:$0xf] }
 0x3ee   :  { %v4167_v22 = vor.u32 %v4635_v51, %v4164_v50 }
 0x3f0   :  { %v3070_v47 = vld [vmem:[#allocation5 + $0x4] sm:$0x1]  ;;  %2580 = vmatpush.bf16.msra.mxu0 %v4163_v20 }
 0x3f1   :  { %3107 = vst [vmem:[#allocation1 + $0x4] ss:$9 sm:$0xff] %v3070_v47  ;;  %2603 = vmatpush.bf16.msrb.mxu2 %v4219_v23  ;;  %v4644_v47 = vld [vmem:[#allocation11 + $0x8c] sm:$0xf] }
 0x3f2   :  { %v4207_v0 = vor.u32 %v4644_v47, %v4204_v19  ;;  %v4131_v19 = vor.u32 %v4629_v42, %v4130_v39 }
 0x3f4   :  { %2617 = vmatpush.bf16.msrb.mxu3 %v4207_v0  ;;  %v4135_v0 = vor.u32 %v4627_v44, %v4132_v2  ;;  %v4374_v2 = vld [vmem:[#allocation11 + $0xe0] sm:$0xf] }
 0x3f5   :  { %2604 = vmatpush.bf16.msrb.mxu2 %v4203_v61 }
 0x3f8   :  { %2618 = vmatpush.bf16.msrb.mxu3 %v4191_v33 }
 0x467   :  { %v2242_v8 = vpop.f32.mrf.mxu0  ;;  %v2255_v10 = vpop.f32.mrf.mxu1 }
 0x468   :  { %v2289_v5 = vrot.slane %v2255_v10, 6  ;;  %v4187_v10 = vor.u32 %v4642_v46, %v4186_v54 }
 0x46a   :  { %v2292_v45 = vsel %vm275_vm5, %v2242_v8, %v2289_v5  ;;  %v4183_v8 = vor.u32 %v4639_v38, %v4180_v7  ;;  %2605 = vmatpush.bf16.msrb.mxu2 %v4187_v10  ;;  %v4172_v5 = vld [vmem:[#allocation11 + $0x58] sm:$0xf0] }
 0x46b   :  { %v4175_v23 = vor.u32 %v4636_v34, %v4172_v5 }
 0x46c   :  { %2592 = vmatpush.bf16.msra.mxu1 %v4183_v8 }
 0x46d   :  { %2619 = vmatpush.bf16.msrb.mxu3 %v4175_v23 }
 0x46e   :  { %v2268_v26 = vpop.f32.mrf.mxu2  ;;  %v2281_v9 = vpop.f32.mrf.mxu3  ;;  %2606 = vmatpush.bf16.msrb.mxu2 %v4171_v52 }
 0x46f   :  { %v2290_v62 = vrot.slane %v2268_v26, 4  ;;  %v2291_v28 = vrot.slane %v2281_v9, 2  ;;  %v2244_v29 = vpop.f32.mrf.mxu0  ;;  %v2257_v35 = vpop.f32.mrf.mxu1  ;;  %v4631_v26 = vld [vmem:[#allocation11 + $0x24] sm:$0xf]  ;;  %v4148_v9 = vld [vmem:[#allocation11 + $0x30] sm:$0xf0] }
 0x470   :  { %2593 = vmatpush.bf16.msra.mxu1 %v4167_v22  ;;  %v4632_v29 = vld [vmem:[#allocation11 + $0x2c] sm:$0xf]  ;;  %v4156_v35 = vld [vmem:[#allocation11 + $0x38] sm:$0xf0] }
 0x471   :  { %v2293_v57 = vsel %vm277_vm8, %v2290_v62, %v2291_v28  ;;  %v4634_v62 = vld [vmem:[#allocation11 + $0x34] sm:$0xf0]  ;;  %v4151_v28 = vor.u32 %v4631_v26, %v4148_v9  ;;  %v4159_v6 = vor.u32 %v4632_v29, %v4156_v35 }
 0x472   :  { %v2294_v36 = vsel %vm279_vm9, %v2292_v45, %v2293_v57  ;;  %v4155_v41 = vor.u32 %v4634_v62, %v4154_v27  ;;  %v4138_v57 = vld [vmem:[#allocation11 + $0x8] sm:$0xf] }
 0x473   :  { %v5329_v3 = vadd.f32 %v2294_v36, %v302_v63  ;;  %v4147_v63 = vor.u32 %v4633_v25, %v4146_v24  ;;  %v4140_v36 = vld [vmem:[#allocation11 + $0x18] sm:$0xf0]  ;;  %2620 = vmatpush.bf16.msrb.mxu3 %v4159_v6  ;;  %v4139_v31 = vor.u32 %v4630_v11, %v4138_v57  ;;  %v2376_v25 = vpop.permute.xlu2 %2375  ;;  %v4687_v57 = vld [vmem:[#allocation11 + $0xe4] sm:$0xf] }
 0x474   :  { %2594 = vmatpush.bf16.msra.mxu1 %v4151_v28  ;;  %2607 = vmatpush.bf16.msrb.mxu2 %v4155_v41  ;;  %v4143_v38 = vor.u32 %v4628_v43, %v4140_v36  ;;  %vm2377_vm10 = vcmp.eq.s32.totalorder %v2376_v25, 1  ;;  %v4376_v43 = vld [vmem:[#allocation11 + $0xf0] sm:$0xf0] }
 0x475   :  { %v4124_v58 = vmul.f32 -1.442695, %v5329_v3  ;;  %v2317_v55 = vrot.slane %v5329_v3, 2  ;;  %v2341_v14 = vrot.slane %v5329_v3, 6  ;;  %2581 = vmatpush.bf16.msra.mxu0 %v4147_v63  ;;  %v2338_v12 = vrot.slane %v5329_v3, 4 }
 0x476   :  { %v2270_v32 = vpop.f32.mrf.mxu2  ;;  %v2283_v56 = vpop.f32.mrf.mxu3  ;;  %v4379_v36 = vor.u32 %v4687_v57, %v4376_v43  ;;  %v4673_v43 = vld [vmem:[#allocation11 + $0x6c] sm:$0xf0] }
 0x477   :  { %4798 = vpow2.f32 %v4124_v58  ;;  %v4125_v18 = vmul.f32 -1.442695, %v2317_v55  ;;  %v4126_v49 = vmul.f32 -1.442695, %v2341_v14  ;;  %2621 = vmatpush.bf16.msrb.mxu3 %v4143_v38 }
 0x478   :  { %2595 = vmatpush.bf16.msra.mxu1 %v4135_v0  ;;  %2608 = vmatpush.bf16.msrb.mxu2 %v4139_v31  ;;  %v4384_v0 = vld [vmem:[#allocation11 + $0xf8] sm:$0xf0] }
 0x479   :  { %4800 = vpow2.f32 %v4125_v18  ;;  %2582 = vmatpush.bf16.msra.mxu0 %v4131_v19  ;;  %v4690_v19 = vld [vmem:[#allocation11 + $0xf4] sm:$0xf0] }
 0x47a   :  { %4802 = vpow2.f32 %v4126_v49 }
 0x47c   :  { %2930 = vmatpush.bf16.msrb.mxu1 %v4379_v36 }
 0x47d   :  { %v4799_v45 = vpop.eup %4798 }
 0x47e   :  { %v2300_v47 = vadd.f32 1.0, %v4799_v45  ;;  %v4689_v45 = vld [vmem:[#allocation11 + $0xec] sm:$0xf0] }
 0x47f   :  { %v4801_v61 = vpop.eup %4800  ;;  %v4375_v11 = vor.u32 %v4689_v45, %v4374_v2 }
 0x480   :  { %v4803_v1 = vpop.eup %4802  ;;  %4804 = vrcp.f32 %v2300_v47  ;;  %v2322_v60 = vadd.f32 1.0, %v4801_v61  ;;  %v2312_v55 = vand.u32 2147483648, %v2300_v47  ;;  %v2310_v32 = vand.u32 2147483647, %v2300_v47  ;;  %v4688_v61 = vld [vmem:[#allocation11 + $0xec] sm:$0xf] }
 0x481   :  { %v2346_v7 = vadd.f32 1.0, %v4803_v1  ;;  %vm2306_vm15 = vweird.f32 %v2300_v47  ;;  %2917 = vmatpush.bf16.msrb.mxu0 %v4375_v11  ;;  %v4387_v1 = vor.u32 %v4688_v61, %v4384_v0  ;;  %v4310_v11 = vld [vmem:[#allocation11 + $0x60] sm:$0xf]  ;;  %v4318_v61 = vld [vmem:[#allocation11 + $0x68] sm:$0xf] }
 0x482   :  { %4806 = vrcp.f32 %v2322_v60  ;;  %v2334_v16 = vand.u32 2147483648, %v2322_v60  ;;  %v2332_v50 = vand.u32 2147483647, %v2322_v60  ;;  %v2313_v49 = vor.u32 1.1754944e-38, %v2312_v55  ;;  %v4674_v0 = vld [vmem:[#allocation11 + $0x74] sm:$0xf0] }
 0x483   :  { %4808 = vrcp.f32 %v2346_v7  ;;  %vm2311_vm3 = vcmp.eq.f32.partialorder %v2310_v32, 8.507059e+37  ;;  %vm2328_vm4 = vweird.f32 %v2322_v60  ;;  %v2358_v9 = vand.u32 2147483648, %v2346_v7  ;;  %2956 = vmatpush.bf16.msra.mxu3 %v4387_v1  ;;  %v4342_v32 = vld [vmem:[#allocation11 + $0xa0] sm:$0xf] }
 0x484   :  { %4810 = vtanh.f32 %v2338_v12  ;;  %v2335_v22 = vor.u32 1.1754944e-38, %v2334_v16  ;;  %vm2333_vm7 = vcmp.eq.f32.partialorder %v2332_v50, 8.507059e+37  ;;  %vm2352_vm13 = vweird.f32 %v2346_v7  ;;  %v4350_v50 = vld [vmem:[#allocation11 + $0xa8] sm:$0xf] }
 0x485   :  { %v2356_v62 = vand.u32 2147483647, %v2346_v7  ;;  %v2359_v29 = vor.u32 1.1754944e-38, %v2358_v9  ;;  %v4677_v9 = vld [vmem:[#allocation11 + $0x8c] sm:$0xf0]  ;;  %v4311_v36 = vor.u32 %v4673_v43, %v4310_v11 }
 0x486   :  { %v4805_v54 = vpop.eup %4804 }
 0x487   :  { %v2302_v46 = vmul.f32 %v4805_v54, %v2300_v47  ;;  %vm2307_vm14 = vweird.f32 %v4805_v54  ;;  %v4382_v47 = vld [vmem:[#allocation11 + $0xe8] sm:$0xf] }
 0x488   :  { %v4807_v8 = vpop.eup %4806  ;;  %vm2308_vm1 = vmor %vm2306_vm15, %vm2307_vm14  ;;  %vm2357_vm15 = vcmp.eq.f32.partialorder %v2356_v62, 8.507059e+37 }
 0x489   :  { %v2303_v10 = vsub.f32 1.0, %v2302_v46  ;;  %v4809_v13 = vpop.eup %4808  ;;  %v2324_v37 = vmul.f32 %v4807_v8, %v2322_v60  ;;  %vm2329_vm2 = vweird.f32 %v4807_v8  ;;  %v4358_v60 = vld [vmem:[#allocation11 + $0xc0] sm:$0xf] }
 0x48a   :  { %v2348_v14 = vmul.f32 %v4809_v13, %v2346_v7  ;;  %vm2330_vm6 = vmor %vm2328_vm4, %vm2329_vm2  ;;  %v4811_v34 = vpop.eup %4810  ;;  %vm2353_vm12 = vweird.f32 %v4809_v13  ;;  %v4685_v7 = vld [vmem:[#allocation11 + $0xcc] sm:$0xf0] }
 0x48b   :  { %v2304_v58 = vmul.f32 %v4805_v54, %v2303_v10  ;;  %v2325_v56 = vsub.f32 1.0, %v2324_v37  ;;  %vm2354_vm14 = vmor %vm2352_vm13, %vm2353_vm12  ;;  %v4359_v46 = vor.u32 %v4685_v7, %v4358_v60  ;;  %v4366_v10 = vld [vmem:[#allocation11 + $0xc8] sm:$0xf]  ;;  %v4684_v37 = vld [vmem:[#allocation11 + $0xcc] sm:$0xf] }
 0x48c   :  { %v2349_v20 = vsub.f32 1.0, %v2348_v14  ;;  %v4320_v60 = vld [vmem:[#allocation11 + $0x78] sm:$0xf0]  ;;  %v4294_v7 = vld [vmem:[#allocation11 + $0x40] sm:$0xf] }
 0x48d   :  { %v2305_v33 = vadd.f32 %v4805_v54, %v2304_v58  ;;  %v2326_v51 = vmul.f32 %v4807_v8, %v2325_v56  ;;  %v4368_v58 = vld [vmem:[#allocation11 + $0xd8] sm:$0xf0]  ;;  %2918 = vmatpush.bf16.msrb.mxu0 %v4359_v46  ;;  %v4681_v56 = vld [vmem:[#allocation11 + $0xac] sm:$0xf0] }
 0x48e   :  { %v2350_v52 = vmul.f32 %v4809_v13, %v2349_v20  ;;  %v4371_v14 = vor.u32 %v4684_v37, %v4368_v58  ;;  %v4343_v16 = vor.u32 %v4681_v56, %v4342_v32  ;;  %v4669_v37 = vld [vmem:[#allocation11 + $0x4c] sm:$0xf0]  ;;  %v4667_v58 = vld [vmem:[#allocation11 + $0x44] sm:$0xf] }
 0x48f   :  { %v2309_v18 = vsel %vm2308_vm1, %v4805_v54, %v2305_v33  ;;  %v2327_v3 = vadd.f32 %v4807_v8, %v2326_v51  ;;  %v4683_v54 = vld [vmem:[#allocation11 + $0xc4] sm:$0xf]  ;;  %v4344_v51 = vld [vmem:[#allocation11 + $0xb0] sm:$0xf0]  ;;  %v4295_v56 = vor.u32 %v4669_v37, %v4294_v7 }
 0x490   :  { %v2314_v21 = vsel %vm2311_vm3, %v2313_v49, %v2309_v18  ;;  %v2351_v63 = vadd.f32 %v4809_v13, %v2350_v52  ;;  %v4679_v33 = vld [vmem:[#allocation11 + $0xa4] sm:$0xf]  ;;  %2957 = vmatpush.bf16.msra.mxu3 %v4371_v14  ;;  %v4682_v18 = vld [vmem:[#allocation11 + $0xb4] sm:$0xf0] }
 0x491   :  { %v2331_v53 = vsel %vm2330_vm6, %v4807_v8, %v2327_v3  ;;  %v2363_v23 = vmul.f32 %v4811_v34, %v2314_v21  ;;  %v4360_v8 = vld [vmem:[#allocation11 + $0xd0] sm:$0xf0]  ;;  %v4347_v20 = vor.u32 %v4679_v33, %v4344_v51  ;;  %v4351_v3 = vor.u32 %v4682_v18, %v4350_v50  ;;  %v4680_v21 = vld [vmem:[#allocation11 + $0xac] sm:$0xf]  ;;  %2919 = vmatpush.bf16.msrb.mxu0 %v4343_v16  ;;  %v4302_v33 = vld [vmem:[#allocation11 + $0x48] sm:$0xf] }
 0x492   :  { %v2336_v5 = vsel %vm2333_vm7, %v2335_v22, %v2331_v53  ;;  %v2355_v28 = vsel %vm2354_vm14, %v4809_v13, %v2351_v63  ;;  %v4363_v12 = vor.u32 %v4683_v54, %v4360_v8  ;;  %v4686_v13 = vld [vmem:[#allocation11 + $0xd4] sm:$0xf0]  ;;  %v4352_v22 = vld [vmem:[#allocation11 + $0xb8] sm:$0xf0]  ;;  %v306_v34 = vrot.slane %v5146_v59, 4 }
 0x493   :  { %v2362_v24 = vmul.f32 %v2336_v5, %v5315_v30  ;;  %v2360_v39 = vsel %vm2357_vm15, %v2359_v29, %v2355_v28  ;;  %v4367_v55 = vor.u32 %v4686_v13, %v4366_v10  ;;  %v4355_v52 = vor.u32 %v4680_v21, %v4352_v22  ;;  %v4326_v63 = vld [vmem:[#allocation11 + $0x80] sm:$0xf]  ;;  %v4675_v28 = vld [vmem:[#allocation11 + $0x84] sm:$0xf]  ;;  %v4328_v29 = vld [vmem:[#allocation11 + $0x90] sm:$0xf0] }
 0x494   :  { %2931 = vmatpush.bf16.msrb.mxu1 %v4363_v12  ;;  %v4327_v62 = vor.u32 %v4677_v9, %v4326_v63  ;;  %v4670_v51 = vld [vmem:[#allocation11 + $0x54] sm:$0xf0]  ;;  %v4668_v50 = vld [vmem:[#allocation11 + $0x4c] sm:$0xf]  ;;  %v4304_v18 = vld [vmem:[#allocation11 + $0x58] sm:$0xf0] }
 0x495   :  { %v2364_v26 = vadd.f32 %v2363_v23, %v2362_v24  ;;  %2958 = vmatpush.bf16.msra.mxu3 %v4355_v52  ;;  %v4665_v21 = vld [vmem:[#allocation11 + $0x2c] sm:$0xf0]  ;;  %v4663_v22 = vld [vmem:[#allocation11 + $0x24] sm:$0xf]  ;;  %v4666_v52 = vld [vmem:[#allocation11 + $0x34] sm:$0xf0] }
 0x496   :  { %2920 = vmatpush.bf16.msrb.mxu0 %v4327_v62  ;;  %v4661_v62 = vld [vmem:[#allocation11 + $0xc] sm:$0xf0] }
 0x497   :  { %4812 = vtanh.f32 %v2364_v26  ;;  %v5338_v27 = vsel %vm2377_vm10, %v2364_v26, %v5315_v30 }
 0x498   :  { %2932 = vmatpush.bf16.msrb.mxu1 %v4347_v20  ;;  %v4307_v20 = vor.u32 %v4668_v50, %v4304_v18 }
 0x49a   :  { %2921 = vmatpush.bf16.msrb.mxu0 %v4311_v36 }
 0x49d   :  { %v4813_v35 = vpop.eup %4812 }
 0x49e   :  { %v2366_v41 = vmul.f32 %v4813_v35, %v2360_v39  ;;  %v4334_v35 = vld [vmem:[#allocation11 + $0x88] sm:$0xf]  ;;  %2922 = vmatpush.bf16.msrb.mxu0 %v4295_v56 }
 0x4a0   :  { %v2367_v6 = vpack.c.bf16 %v2366_v41, %v2366_v41  ;;  %v5342_v42 = vsel %vm2377_vm10, %v2366_v41, %v5321_v17  ;;  %v4383_v17 = vor.u32 %v4690_v19, %v4382_v47  ;;  %v4331_v41 = vor.u32 %v4675_v28, %v4328_v29  ;;  %v4671_v47 = vld [vmem:[#allocation11 + $0x64] sm:$0xf]  ;;  %v4264_v29 = vld [vmem:[#allocation11 + $0x10] sm:$0xf0] }
 0x4a1   :  { %v2382_v44 = vpack.c.bf16 %v5342_v42, %v5342_v42  ;;  %v4659_v28 = vld [vmem:[#allocation11 + $0x4] sm:$0xf] }
 0x4a2   :  { %2369 = vst [vmem:[#allocation5 + $0x5] sm:$0x1] %v2367_v6  ;;  %2943 = vmatpush.bf16.msra.mxu2 %v4383_v17  ;;  %v4678_v6 = vld [vmem:[#allocation11 + $0x94] sm:$0xf0]  ;;  %2933 = vmatpush.bf16.msrb.mxu1 %v4331_v41  ;;  %v4312_v17 = vld [vmem:[#allocation11 + $0x70] sm:$0xf0] }
 0x4a3   :  { %2583 = vmatmul.bf16.vlgmr.msra.gmra.mxu0 %v2382_v44  ;;  %2596 = vmatmul.bf16.vlgmr.msra.gmra.mxu1 %v2382_v44  ;;  %v4335_v45 = vor.u32 %v4678_v6, %v4334_v35  ;;  %v4315_v1 = vor.u32 %v4671_v47, %v4312_v17  ;;  %v4660_v41 = vld [vmem:[#allocation11 + $0xc] sm:$0xf] }
 0x4a4   :  { %2609 = vmatmul.bf16.vlgmr.msrb.gmra.mxu2 %v2382_v44  ;;  %2622 = vmatmul.bf16.vlgmr.msrb.gmra.mxu3 %v2382_v44  ;;  %v4676_v44 = vld [vmem:[#allocation11 + $0x8c] sm:$0xf] }
 0x4a6   :  { %2944 = vmatpush.bf16.msra.mxu2 %v4367_v55  ;;  %v4296_v55 = vld [vmem:[#allocation11 + $0x50] sm:$0xf0]  ;;  %2934 = vmatpush.bf16.msrb.mxu1 %v4315_v1 }
 0x4a7   :  { %v4299_v16 = vor.u32 %v4667_v58, %v4296_v55 }
 0x4a9   :  { %v3071_v30 = vld [vmem:[#allocation5 + $0x5] sm:$0x1] }
 0x4aa   :  { %3110 = vst [vmem:[#allocation1 + $0x5] ss:$9 sm:$0xff] %v3071_v30  ;;  %2945 = vmatpush.bf16.msra.mxu2 %v4351_v3  ;;  %v4336_v30 = vld [vmem:[#allocation11 + $0x98] sm:$0xf0]  ;;  %v4278_v3 = vld [vmem:[#allocation11 + $0x20] sm:$0xf]  ;;  %2935 = vmatpush.bf16.msrb.mxu1 %v4299_v16 }
 0x4ab   :  { %v4339_v57 = vor.u32 %v4676_v44, %v4336_v30  ;;  %v4272_v30 = vld [vmem:[#allocation11 + $0x18] sm:$0xf0] }
 0x4ac   :  { %v4275_v43 = vor.u32 %v4660_v41, %v4272_v30 }
 0x4ad   :  { %2959 = vmatpush.bf16.msra.mxu3 %v4339_v57 }
 0x4ae   :  { %2946 = vmatpush.bf16.msra.mxu2 %v4335_v45  ;;  %v4267_v45 = vor.u32 %v4659_v28, %v4264_v29 }
 0x520   :  { %v2584_v31 = vpop.f32.mrf.mxu0  ;;  %v2597_v38 = vpop.f32.mrf.mxu1 }
 0x521   :  { %v2631_v49 = vrot.slane %v2597_v38, 6  ;;  %v4672_v38 = vld [vmem:[#allocation11 + $0x6c] sm:$0xf] }
 0x522   :  { %v4323_v13 = vor.u32 %v4672_v38, %v4320_v60 }
 0x523   :  { %v2634_v39 = vsel %vm275_vm5, %v2584_v31, %v2631_v49  ;;  %v4319_v31 = vor.u32 %v4674_v0, %v4318_v61  ;;  %v4303_v49 = vor.u32 %v4670_v51, %v4302_v33 }
 0x524   :  { %2960 = vmatpush.bf16.msra.mxu3 %v4323_v13 }
 0x525   :  { %2947 = vmatpush.bf16.msra.mxu2 %v4319_v31 }
 0x527   :  { %v2610_v53 = vpop.f32.mrf.mxu2  ;;  %v2623_v5 = vpop.f32.mrf.mxu3 }
 0x528   :  { %v2632_v23 = vrot.slane %v2610_v53, 4  ;;  %v2633_v24 = vrot.slane %v2623_v5, 2  ;;  %v2586_v25 = vpop.f32.mrf.mxu0  ;;  %v2599_v26 = vpop.f32.mrf.mxu1  ;;  %v4279_v53 = vor.u32 %v4665_v21, %v4278_v3  ;;  %v4286_v5 = vld [vmem:[#allocation11 + $0x28] sm:$0xf]  ;;  %2961 = vmatpush.bf16.msra.mxu3 %v4307_v20 }
 0x529   :  { %v4288_v25 = vld [vmem:[#allocation11 + $0x38] sm:$0xf0]  ;;  %v4262_v26 = vld [vmem:[#allocation11] sm:$0xf]  ;;  %2948 = vmatpush.bf16.msra.mxu2 %v4303_v49  ;;  %v4287_v63 = vor.u32 %v4666_v52, %v4286_v5  ;;  %v2718_v3 = vpop.permute.xlu0 %2717 }
 0x52a   :  { %v2635_v59 = vsel %vm277_vm8, %v2632_v23, %v2633_v24  ;;  %v4664_v24 = vld [vmem:[#allocation11 + $0x2c] sm:$0xf]  ;;  %2923 = vmatpush.bf16.msrb.mxu0 %v4279_v53  ;;  %v4263_v44 = vor.u32 %v4661_v62, %v4262_v26  ;;  %vm2719_vm13 = vcmp.eq.s32.totalorder %v2718_v3, 1 }
 0x52b   :  { %v2636_v2 = vsel %vm279_vm9, %v2634_v39, %v2635_v59  ;;  %v4291_v9 = vor.u32 %v4664_v24, %v4288_v25  ;;  %v4270_v39 = vld [vmem:[#allocation11 + $0x8] sm:$0xf]  ;;  %v4662_v59 = vld [vmem:[#allocation11 + $0x14] sm:$0xf0] }
 0x52c   :  { %v5350_v19 = vadd.f32 %v2636_v2, %v306_v34  ;;  %v4280_v34 = vld [vmem:[#allocation11 + $0x30] sm:$0xf0]  ;;  %v4271_v11 = vor.u32 %v4662_v59, %v4270_v39 }
 0x52d   :  { %v4283_v23 = vor.u32 %v4663_v22, %v4280_v34  ;;  %2949 = vmatpush.bf16.msra.mxu2 %v4287_v63  ;;  %2962 = vmatpush.bf16.msra.mxu3 %v4291_v9 }
 0x52e   :  { %v4256_v54 = vmul.f32 -1.442695, %v5350_v19  ;;  %v2659_v46 = vrot.slane %v5350_v19, 2  ;;  %v2683_v8 = vrot.slane %v5350_v19, 6  ;;  %2924 = vmatpush.bf16.msrb.mxu0 %v4263_v44  ;;  %v2680_v31 = vrot.slane %v5350_v19, 4 }
 0x52f   :  { %v2612_v10 = vpop.f32.mrf.mxu2  ;;  %v2625_v12 = vpop.f32.mrf.mxu3  ;;  %2936 = vmatpush.bf16.msrb.mxu1 %v4283_v23 }
 0x530   :  { %4814 = vpow2.f32 %v4256_v54  ;;  %v4257_v14 = vmul.f32 -1.442695, %v2659_v46  ;;  %v4258_v32 = vmul.f32 -1.442695, %v2683_v8 }
 0x531   :  { %2950 = vmatpush.bf16.msra.mxu2 %v4271_v11  ;;  %2963 = vmatpush.bf16.msra.mxu3 %v4275_v43  ;;  %v4698_v43 = vld [vmem:[#allocation12 + $0x38] sm:$0xff] }
 0x532   :  { %4816 = vpow2.f32 %v4257_v14  ;;  %3167 = vmatpush.bf16.msra.mxu0 %v4698_v43 }
 0x533   :  { %4818 = vpow2.f32 %v4258_v32  ;;  %2937 = vmatpush.bf16.msrb.mxu1 %v4267_v45 }
 0x536   :  { %v4815_v35 = vpop.eup %4814 }
 0x537   :  { %v2642_v6 = vadd.f32 1.0, %v4815_v35 }
 0x538   :  { %v4817_v2 = vpop.eup %4816 }
 0x539   :  { %v4819_v57 = vpop.eup %4818  ;;  %4820 = vrcp.f32 %v2642_v6  ;;  %v2664_v47 = vadd.f32 1.0, %v4817_v2  ;;  %v2654_v54 = vand.u32 2147483648, %v2642_v6  ;;  %v2652_v8 = vand.u32 2147483647, %v2642_v6 }
 0x53a   :  { %v2688_v36 = vadd.f32 1.0, %v4819_v57  ;;  %vm2648_vm2 = vweird.f32 %v2642_v6  ;;  %v310_v2 = vrot.slane %v5150_v4, 6  ;;  %v4696_v4 = vld [vmem:[#allocation12 + $0x28] sm:$0xff] }
 0x53b   :  { %4822 = vrcp.f32 %v2664_v47  ;;  %v2676_v13 = vand.u32 2147483648, %v2664_v47  ;;  %v2674_v58 = vand.u32 2147483647, %v2664_v47  ;;  %v2655_v14 = vor.u32 1.1754944e-38, %v2654_v54 }
 0x53c   :  { %4824 = vrcp.f32 %v2688_v36  ;;  %vm2653_vm6 = vcmp.eq.f32.partialorder %v2652_v8, 8.507059e+37  ;;  %vm2670_vm7 = vweird.f32 %v2664_v47  ;;  %v2700_v53 = vand.u32 2147483648, %v2688_v36 }
 0x53d   :  { %4826 = vtanh.f32 %v2680_v31  ;;  %v2677_v33 = vor.u32 1.1754944e-38, %v2676_v13  ;;  %vm2675_vm12 = vcmp.eq.f32.partialorder %v2674_v58, 8.507059e+37  ;;  %vm2694_vm15 = vweird.f32 %v2688_v36  ;;  %v4693_v58 = vld [vmem:[#allocation12 + $0x10] sm:$0xff] }
 0x53e   :  { %v2698_v5 = vand.u32 2147483647, %v2688_v36  ;;  %v2701_v23 = vor.u32 1.1754944e-38, %v2700_v53 }
 0x53f   :  { %v4821_v17 = vpop.eup %4820 }
 0x540   :  { %v2644_v61 = vmul.f32 %v4821_v17, %v2642_v6  ;;  %vm2649_vm1 = vweird.f32 %v4821_v17 }
 0x541   :  { %v4823_v0 = vpop.eup %4822  ;;  %vm2650_vm3 = vmor %vm2648_vm2, %vm2649_vm1  ;;  %vm2699_vm2 = vcmp.eq.f32.partialorder %v2698_v5, 8.507059e+37  ;;  %v4691_v5 = vld [vmem:[#allocation12] sm:$0xff] }
 0x542   :  { %v2645_v1 = vsub.f32 1.0, %v2644_v61  ;;  %v4825_v38 = vpop.eup %4824  ;;  %v2666_v60 = vmul.f32 %v4823_v0, %v2664_v47  ;;  %vm2671_vm4 = vweird.f32 %v4823_v0 }
 0x543   :  { %v2690_v46 = vmul.f32 %v4825_v38, %v2688_v36  ;;  %vm2672_vm10 = vmor %vm2670_vm7, %vm2671_vm4  ;;  %v4827_v51 = vpop.eup %4826  ;;  %vm2695_vm14 = vweird.f32 %v4825_v38 }
 0x544   :  { %v2646_v7 = vmul.f32 %v4821_v17, %v2645_v1  ;;  %v2667_v10 = vsub.f32 1.0, %v2666_v60  ;;  %vm2696_vm1 = vmor %vm2694_vm15, %vm2695_vm14 }
 0x545   :  { %v2691_v32 = vsub.f32 1.0, %v2690_v46  ;;  %v4695_v46 = vld [vmem:[#allocation12 + $0x20] sm:$0xff] }
 0x546   :  { %v2647_v12 = vadd.f32 %v4821_v17, %v2646_v7  ;;  %v2668_v37 = vmul.f32 %v4823_v0, %v2667_v10  ;;  %v5371_v10 = vpop.permute.xlu2 %3235 }
 0x547   :  { %v2692_v18 = vmul.f32 %v4825_v38, %v2691_v32 }
 0x548   :  { %v2651_v55 = vsel %vm2650_vm3, %v4821_v17, %v2647_v12  ;;  %v2669_v19 = vadd.f32 %v4823_v0, %v2668_v37  ;;  %v4694_v37 = vld [vmem:[#allocation12 + $0x18] sm:$0xff] }
 0x549   :  { %v2656_v56 = vsel %vm2653_vm6, %v2655_v14, %v2651_v55  ;;  %v2693_v22 = vadd.f32 %v4825_v38, %v2692_v18 }
 0x54a   :  { %v2673_v16 = vsel %vm2672_vm10, %v4823_v0, %v2669_v19  ;;  %v2705_v49 = vmul.f32 %v4827_v51, %v2656_v56 }
 0x54b   :  { %v2678_v50 = vsel %vm2675_vm12, %v2677_v33, %v2673_v16  ;;  %v2697_v52 = vsel %vm2696_vm1, %v4825_v38, %v2693_v22  ;;  %v4697_v38 = vld [vmem:[#allocation12 + $0x30] sm:$0xff]  ;;  %v4692_v33 = vld [vmem:[#allocation12 + $0x8] sm:$0xff] }
 0x54c   :  { %v2704_v20 = vmul.f32 %v2678_v50, %v5338_v27  ;;  %v2702_v25 = vsel %vm2699_vm2, %v2701_v23, %v2697_v52  ;;  %3168 = vmatpush.bf16.msra.mxu0 %v4697_v38  ;;  %v3218_v38 = vpop.permute.xlu0 %3217 }
 0x54e   :  { %v2706_v21 = vadd.f32 %v2705_v49, %v2704_v20  ;;  %v5376_v51 = vpop.permute.xlu2 %3229 }
 0x550   :  { %4828 = vtanh.f32 %v2706_v21  ;;  %v5359_v34 = vsel %vm2719_vm13, %v2706_v21, %v5338_v27  ;;  %3169 = vmatpush.bf16.msra.mxu0 %v4696_v4 }
 0x554   :  { %3170 = vmatpush.bf16.msra.mxu0 %v4695_v46 }
 0x556   :  { %v4829_v24 = vpop.eup %4828 }
 0x557   :  { %v2708_v26 = vmul.f32 %v4829_v24, %v2702_v25 }
 0x558   :  { %3171 = vmatpush.bf16.msra.mxu0 %v4694_v37 }
 0x559   :  { %v2709_v63 = vpack.c.bf16 %v2708_v26, %v2708_v26  ;;  %v5363_v9 = vsel %vm2719_vm13, %v2708_v26, %v5342_v42 }
 0x55a   :  { %v2724_v62 = vpack.c.bf16 %v5363_v9, %v5363_v9 }
 0x55b   :  { %2711 = vst [vmem:[#allocation5 + $0x6] sm:$0x1] %v2709_v63 }
 0x55c   :  { %2925 = vmatmul.bf16.vlgmr.msrb.gmra.mxu0 %v2724_v62  ;;  %2938 = vmatmul.bf16.vlgmr.msrb.gmra.mxu1 %v2724_v62 }
 0x55d   :  { %2951 = vmatmul.bf16.vlgmr.msra.gmra.mxu2 %v2724_v62  ;;  %2964 = vmatmul.bf16.vlgmr.msra.gmra.mxu3 %v2724_v62 }
 0x55e   :  { %3172 = vmatpush.bf16.msra.mxu0 %v4693_v58 }
 0x562   :  { %v3072_v27 = vld [vmem:[#allocation5 + $0x6] sm:$0x1]  ;;  %3173 = vmatpush.bf16.msra.mxu0 %v4692_v33 }
 0x563   :  { %3113 = vst [vmem:[#allocation1 + $0x6] ss:$9 sm:$0xff] %v3072_v27 }
 0x566   :  { %3174 = vmatpush.bf16.msra.mxu0 %v4691_v5 }
 0x5d9   :  { %v2926_v28 = vpop.f32.mrf.mxu0  ;;  %v2939_v29 = vpop.f32.mrf.mxu1 }
 0x5da   :  { %v2973_v35 = vrot.slane %v2939_v29, 6 }
 0x5dc   :  { %v2976_v30 = vsel %vm275_vm5, %v2926_v28, %v2973_v35 }
 0x5e0   :  { %v2952_v39 = vpop.f32.mrf.mxu2  ;;  %v2965_v59 = vpop.f32.mrf.mxu3 }
 0x5e1   :  { %v2974_v41 = vrot.slane %v2952_v39, 4  ;;  %v2975_v6 = vrot.slane %v2965_v59, 2  ;;  %v2928_v44 = vpop.f32.mrf.mxu0  ;;  %v2941_v42 = vpop.f32.mrf.mxu1 }
 0x5e2   :  { %v3060_v59 = vpop.permute.xlu2 %3059 }
 0x5e3   :  { %v2977_v45 = vsel %vm277_vm8, %v2974_v41, %v2975_v6  ;;  %vm3061_vm12 = vcmp.eq.s32.totalorder %v3060_v59, 1 }
 0x5e4   :  { %v2978_v57 = vsel %vm279_vm9, %v2976_v30, %v2977_v45 }
 0x5e5   :  { %v2980_v11 = vadd.f32 %v2978_v57, %v310_v2 }
 0x5e7   :  { %v4388_v47 = vmul.f32 -1.442695, %v2980_v11  ;;  %v3001_v36 = vrot.slane %v2980_v11, 2  ;;  %v3025_v17 = vrot.slane %v2980_v11, 6  ;;  %v3022_v56 = vrot.slane %v2980_v11, 4 }
 0x5e8   :  { %v2954_v61 = vpop.f32.mrf.mxu2  ;;  %v2967_v0 = vpop.f32.mrf.mxu3 }
 0x5e9   :  { %4830 = vpow2.f32 %v4388_v47  ;;  %v4389_v1 = vmul.f32 -1.442695, %v3001_v36  ;;  %v4390_v31 = vmul.f32 -1.442695, %v3025_v17 }
 0x5eb   :  { %4832 = vpow2.f32 %v4389_v1  ;;  %v3224_v1 = vpop.permute.xlu1 %3223 }
 0x5ec   :  { %4834 = vpow2.f32 %v4390_v31  ;;  %v4717_v31 = vld [vmem:[%s5417_s6] ss:$0 sm:$0xff]  ;;  %vm3239_vm2 = vcmp.eq.s32.totalorder %v3224_v1, 1  ;;  %s4987_s6 = smov [#allocation14]  }
 0x5ed   :  { %s3299_s27 = sshll.u32 %s4987_s6, 4  ;;  %s3300_s27 = int_to_ptr.vmem [resolvable:$true] %s3299_s27 }
 0x5ef   :  { %v4831_v60 = vpop.eup %4830 }
 0x5f0   :  { %v2984_v7 = vadd.f32 1.0, %v4831_v60 }
 0x5f1   :  { %v4833_v54 = vpop.eup %4832 }
 0x5f2   :  { %v4835_v8 = vpop.eup %4834  ;;  %4836 = vrcp.f32 %v2984_v7  ;;  %v3006_v12 = vadd.f32 1.0, %v4833_v54  ;;  %v2996_v49 = vand.u32 2147483648, %v2984_v7  ;;  %v2994_v3 = vand.u32 2147483647, %v2984_v7 }
 0x5f3   :  { %v5373_v13 = vadd.f32 1.0, %v4835_v8  ;;  %vm2990_vm8 = vweird.f32 %v2984_v7  ;;  %v3221_v60 = vpop.permute.xlu1 %3220 }
 0x5f4   :  { %4838 = vrcp.f32 %v3006_v12  ;;  %v3018_v53 = vand.u32 2147483648, %v3006_v12  ;;  %v3016_v23 = vand.u32 2147483647, %v3006_v12  ;;  %v2997_v25 = vor.u32 1.1754944e-38, %v2996_v49 }
 0x5f5   :  { %4840 = vrcp.f32 %v5373_v13  ;;  %vm2995_vm4 = vcmp.eq.f32.partialorder %v2994_v3, 8.507059e+37  ;;  %vm3012_vm6 = vweird.f32 %v3006_v12  ;;  %v3042_v30 = vand.u32 2147483648, %v5373_v13 }
 0x5f6   :  { %4842 = vtanh.f32 %v3022_v56  ;;  %v3019_v27 = vor.u32 1.1754944e-38, %v3018_v53  ;;  %vm3017_vm10 = vcmp.eq.f32.partialorder %v3016_v23, 8.507059e+37  ;;  %vm3036_vm14 = vweird.f32 %v5373_v13 }
 0x5f7   :  { %v3040_v45 = vand.u32 2147483647, %v5373_v13  ;;  %v3043_v11 = vor.u32 1.1754944e-38, %v3042_v30 }
 0x5f8   :  { %v4837_v55 = vpop.eup %4836 }
 0x5f9   :  { %v2986_v14 = vmul.f32 %v4837_v55, %v2984_v7  ;;  %vm2991_vm5 = vweird.f32 %v4837_v55  ;;  %vm3041_vm1 = vcmp.eq.f32.partialorder %v3040_v45, 8.507059e+37 }
 0x5fa   :  { %v4839_v32 = vpop.eup %4838  ;;  %vm2992_vm9 = vmor %vm2990_vm8, %vm2991_vm5  ;;  %vm3238_vm5 = vcmp.eq.s32.totalorder %v3221_v60, 1  ;;  %vm3237_vm8 = vcmp.eq.s32.totalorder %v3218_v38, 1 }
 0x5fb   :  { %v2987_v19 = vsub.f32 1.0, %v2986_v14  ;;  %v4841_v16 = vpop.eup %4840  ;;  %v3008_v50 = vmul.f32 %v4839_v32, %v3006_v12  ;;  %vm3013_vm3 = vweird.f32 %v4839_v32 }
 0x5fc   :  { %v3032_v20 = vmul.f32 %v4841_v16, %v5373_v13  ;;  %vm3014_vm7 = vmor %vm3012_vm6, %vm3013_vm3  ;;  %v4843_v29 = vpop.eup %4842  ;;  %vm3037_vm13 = vweird.f32 %v4841_v16  ;;  %vm3243_vm3 = vcmp.eq.s32.totalorder %v5371_v10, 1 }
 0x5fd   :  { %v2988_v18 = vmul.f32 %v4837_v55, %v2987_v19  ;;  %v3009_v21 = vsub.f32 1.0, %v3008_v50  ;;  %vm3038_vm15 = vmor %vm3036_vm14, %vm3037_vm13  ;;  %v3227_v50 = vpop.permute.xlu1 %3226 }
 0x5fe   :  { %v3033_v26 = vsub.f32 1.0, %v3032_v20 }
 0x5ff   :  { %v2989_v22 = vadd.f32 %v4837_v55, %v2988_v18  ;;  %v3010_v52 = vmul.f32 %v4839_v32, %v3009_v21 }
 0x600   :  { %v3034_v39 = vmul.f32 %v4841_v16, %v3033_v26 }
 0x601   :  { %v2993_v24 = vsel %vm2992_vm9, %v4837_v55, %v2989_v22  ;;  %v3011_v63 = vadd.f32 %v4839_v32, %v3010_v52 }
 0x602   :  { %v2998_v62 = vsel %vm2995_vm4, %v2997_v25, %v2993_v24  ;;  %v3035_v42 = vadd.f32 %v4841_v16, %v3034_v39  ;;  %vm3240_vm4 = vcmp.eq.s32.totalorder %v3227_v50, 1 }
 0x603   :  { %v3015_v28 = vsel %vm3014_vm7, %v4839_v32, %v3011_v63  ;;  %v3047_v6 = vmul.f32 %v4843_v29, %v2998_v62  ;;  %v3233_v32 = vpop.permute.xlu0 %3232 }
 0x604   :  { %v3020_v35 = vsel %vm3017_vm10, %v3019_v27, %v3015_v28  ;;  %v3039_v57 = vsel %vm3038_vm15, %v4841_v16, %v3035_v42  ;;  %vm3242_vm9 = vcmp.eq.s32.totalorder %v3233_v32, 1 }
 0x605   :  { %v3046_v41 = vmul.f32 %v3020_v35, %v5359_v34  ;;  %v3044_v47 = vsel %vm3041_vm1, %v3043_v11, %v3039_v57 }
 0x607   :  { %v3048_v44 = vadd.f32 %v3047_v6, %v3046_v41 }
 0x609   :  { %4844 = vtanh.f32 %v3048_v44  ;;  %v3063_v2 = vsel %vm3061_vm12, %v3048_v44, %v5359_v34 }
 0x60a   :  { %3065 = vst [vmem:[#allocation3] sm:$0x3] %v3063_v2 }
 0x60f   :  { %v4845_v43 = vpop.eup %4844 }
 0x610   :  { %v3050_v36 = vmul.f32 %v4845_v43, %v3044_v47 }
 0x612   :  { %v3051_v17 = vpack.c.bf16 %v3050_v36, %v3050_v36  ;;  %v3062_v61 = vsel %vm3061_vm12, %v3050_v36, %v5363_v9 }
 0x613   :  { %3064 = vst [vmem:[#allocation2] sm:$0x3] %v3062_v61 }
 0x614   :  { %3053 = vst [vmem:[#allocation5 + $0x7] sm:$0x1] %v3051_v17 }
 0x61b   :  { %v3073_v0 = vld [vmem:[#allocation5 + $0x7] sm:$0x1] }
 0x61c   :  { %3116 = vst [vmem:[#allocation1 + $0x7] ss:$9 sm:$0xff] %v3073_v0 }
 0x623   :  { %v3117_v34 = vld [vmem:[#allocation1] sm:$0xff] }
 0x624   :  { %3175 = vmatmul.bf16.vlgmr.msra.gmra.mxu0 %v3117_v34 }
 0x6a1   :  { %v3176_v4 = vpop.f32.mrf.mxu0 }
 0x6a2   :  { %v3177_v7 = vadd.f32 %v4717_v31, %v3176_v4 }
 0x6a4   :  { %v3183_v54 = vrot.slane %v3177_v7, 2  ;;  %v3184_v46 = vrot.slane %v3177_v7, 4  ;;  %v3185_v8 = vrot.slane %v3177_v7, 6  ;;  %v3244_v19 = vsel %vm667_vm11, %v3177_v7, %v4717_v31 }
 0x6a5   :  { %vm3241_vm11 = vcmp.eq.s32.totalorder %v5376_v51, 1 }
 0x6a6   :  { %v3246_v9 = vsel %vm3238_vm5, %v3184_v46, %v4717_v31  ;;  %v3247_v12 = vsel %vm3239_vm2, %v3185_v8, %v4717_v31  ;;  %v3245_v58 = vsel %vm3237_vm8, %v3183_v54, %v4717_v31 }
 0x6a7   :  { %v3252_v13 = vrot.slane %v3246_v9, 4  ;;  %v3259_v37 = vrot.slane %v3247_v12, 4 }
 0x6a9   :  { %v3260_v55 = vsel %vm111_vm0, %v3259_v37, %v3245_v58  ;;  %v3178_v14 = vpop.f32.mrf.mxu0  ;;  %v3254_v16 = vsel %vm111_vm0, %v3252_v13, %v3244_v19 }
 0x6aa   :  { %v3264_v56 = vperm.slane %v3260_v55, %v5042_v40  ;;  %v3179_v33 = vadd.f32 %v4717_v31, %v3178_v14  ;;  %v3258_v21 = vperm.slane %v3254_v16, %v5042_v40 }
 0x6ac   :  { %v3277_v18 = vrot.slane %v3264_v56, 4  ;;  %v3186_v49 = vrot.slane %v3179_v33, 2  ;;  %v3187_v20 = vrot.slane %v3179_v33, 4  ;;  %v3188_v3 = vrot.slane %v3179_v33, 6 }
 0x6ad   :  { %v3248_v23 = vsel %vm3240_vm4, %v3179_v33, %v4717_v31 }
 0x6ae   :  { %v3250_v22 = vsel %vm3242_vm9, %v3187_v20, %v4717_v31  ;;  %v3251_v53 = vsel %vm3243_vm3, %v3188_v3, %v4717_v31  ;;  %v3278_v52 = vsel %vm111_vm0, %v3277_v18, %v3258_v21  ;;  %v3249_v24 = vsel %vm3241_vm11, %v3186_v49, %v4717_v31 }
 0x6af   :  { %v3265_v15 = vrot.slane %v3250_v22, 4  ;;  %v3271_v5 = vrot.slane %v3251_v53, 4  ;;  %v3282_v10 = vperm.slane %v3278_v52, %v5044_v48 }
 0x6b1   :  { %v3266_v25 = vsel %vm111_vm0, %v3265_v15, %v3248_v23  ;;  %v3272_v26 = vsel %vm111_vm0, %v3271_v5, %v3249_v24  ;;  %v3291_v29 = vrot.slane %v3282_v10, 4 }
 0x6b2   :  { %v3276_v63 = vperm.slane %v3272_v26, %v5042_v40  ;;  %v3270_v62 = vperm.slane %v3266_v25, %v5042_v40 }
 0x6b4   :  { %v3283_v27 = vrot.slane %v3276_v63, 4 }
 0x6b6   :  { %v3284_v28 = vsel %vm111_vm0, %v3283_v27, %v3270_v62 }
 0x6b7   :  { %v3288_v51 = vperm.slane %v3284_v28, %v5044_v48 }
 0x6b9   :  { %v3289_v35 = vrot.slane %v3288_v51, 4  ;;  %v3292_v39 = vsel %vm111_vm0, %v3288_v51, %v3291_v29 }
 0x6ba   :  { %3294 = vst [vmem:[#allocation14 + $0x8] sm:$0xff] %v3292_v39 }
 0x6bb   :  { %v3290_v40 = vsel %vm111_vm0, %v3289_v35, %v3282_v10 }
 0x6bc   :  { %3293 = vst [vmem:[#allocation14] sm:$0xff] %v3290_v40 }
 0x6bd   :  { %3307 = dma.vmem_to_hbm [thread:$0]  %s3300_s27, 256, %s3302_s30, [#allocation8], %s4988_s8, %s4988_s8, %s4989_s9  }
 0x6be   :  { %4973 = dma.done.wait [#allocation8], 256  }
 0x6bf   :  { %4974 = vsyncadd [#allocation8], 4294967040 }
 0x6c0   :  { %3312 = vsyncpa [#allocation7], 1 }
 0x6c1   :  { %3313 = vsyncpa [#allocation10], 1 }
 0x6c2   :  { %3314 = vsyncpa [#allocation13], 1 }
 0x6c3   :  { %3315 = vsyncpa [#allocation8], 1 }

// kernel: tpu_custom_call.1
= control target key start
LH: loop header
LB: loop body
LE: loop exit
PB: predicated region body
PF: predicated region fallthrough
CT: control target
= control target key end

     0   :  { %12 = vsyncpa [#allocation7], 0  ;;  %s5411_s0 = inlined_call_operand.hbm [shape: bf16[2,8,16], index: 0, kind: input, shape index: {}]   ;;  %s5412_s1 = inlined_call_operand.vmem [shape: s32[2,1], index: 1, kind: input, shape index: {}]   ;;  %s5413_s2 = inlined_call_operand.hbm [shape: bf16[16,512], index: 2, kind: input, shape index: {}]   ;;  %s5414_s3 = inlined_call_operand.hbm [shape: bf16[128,512], index: 3, kind: input, shape index: {}]   ;;  %s5415_s4 = inlined_call_operand.vmem [shape: f32[1,512], index: 4, kind: input, shape index: {}]   ;;  %s5416_s5 = inlined_call_operand.hbm [shape: bf16[128,128], index: 5, kind: input, shape index: {}]   ;;  %s5417_s6 = inlined_call_operand.vmem [shape: f32[1,128], index: 6, kind: input, shape index: {}]   ;;  %s5418_s7 = inlined_call_operand.hbm [shape: f32[2,8,128], index: 7, kind: output, shape index: {}]  }
   0x1   :  { %13 = vsyncpa [#allocation10], 0 }
   0x2   :  { %14 = vsyncpa [#allocation13], 0  ;;  %s35_s26 = sshll.u32 %s5413_s2, 4  ;;  %s36_s26 = int_to_ptr.hbm [resolvable:$true] %s35_s26 }
   0x3   :  { %15 = vsyncpa [#allocation8], 0  ;;  %s4975_s27 = smov [#allocation9]   ;;  %s20_s8 = sshll.u32 %s5411_s0, 4  ;;  %s21_s8 = int_to_ptr.hbm [resolvable:$true] %s20_s8 }
   0x4   :  { %s37_s28 = sshll.u32 %s4975_s27, 4  ;;  %s4976_s9 = smov 256   ;;  %s38_s28 = int_to_ptr.vmem [resolvable:$true] %s37_s28 }
   0x5   :  { %s4977_s10 = smov 16   ;;  %s4978_s11 = smov [#allocation6]  }
   0x6   :  { %43 = dma.hbm_to_vmem [thread:$0]  %s36_s26, 512, %s38_s28, [#allocation10], %s4976_s9, %s4976_s9, %s4977_s10  }
   0x7   :  { %s22_s12 = sshll.u32 %s4978_s11, 4  ;;  %s4979_s13 = smov 64   ;;  %s23_s12 = int_to_ptr.vmem [resolvable:$true] %s22_s12 }
   0x8   :  { %s4980_s14 = smov 4   ;;  %s48_s16 = sshll.u32 %s5414_s3, 4  ;;  %s49_s16 = int_to_ptr.hbm [resolvable:$true] %s48_s16 }
   0x9   :  { %28 = dma.hbm_to_vmem [thread:$0]  %s21_s8, 128, %s23_s12, [#allocation7], %s4979_s13, %s4979_s13, %s4980_s14  }
   0xa   :  { %s4981_s17 = smov [#allocation11]   ;;  %s63_s20 = sshll.u32 %s5416_s5, 4  ;;  %s64_s20 = int_to_ptr.hbm [resolvable:$true] %s63_s20 }
   0xb   :  { %s50_s18 = sshll.u32 %s4981_s17, 4  ;;  %s4982_s21 = smov [#allocation12]   ;;  %s51_s18 = int_to_ptr.vmem [resolvable:$true] %s50_s18 }
   0xc   :  { %56 = dma.hbm_to_vmem [thread:$0]  %s49_s16, 4096, %s51_s18, [#allocation10], %s4976_s9, %s4976_s9, %s4977_s10  }
   0xd   :  { %s65_s22 = sshll.u32 %s4982_s21, 4  ;;  %s66_s22 = int_to_ptr.vmem [resolvable:$true] %s65_s22 }
   0xe   :  { %71 = dma.hbm_to_vmem [thread:$0]  %s64_s20, 1024, %s66_s22, [#allocation13], %s4979_s13, %s4979_s13, %s4980_s14  }
   0xf   :  { %4967 = dma.done.wait [#allocation7], 128  }
  0x10   :  { %4968 = vsyncadd [#allocation7], 4294967168 }
  0x11   :  { %4969 = dma.done.wait [#allocation10], 4608  }
  0x12   :  { %4970 = vsyncadd [#allocation10], 4294962688 }
  0x13   :  { %4971 = dma.done.wait [#allocation13], 1024  }
  0x14   :  { %4972 = vsyncadd [#allocation13], 4294966272  ;;  %v3326_v0 = vld [vmem:[#allocation9 + $0x8] sm:$0xf]  ;;  %v4434_v1 = vld [vmem:[#allocation9 + $0x14] sm:$0xf0] }
  0x15   :  { %v4432_v2 = vld [vmem:[#allocation9 + $0xc] sm:$0xf]  ;;  %v3327_v3 = vor.u32 %v4434_v1, %v3326_v0  ;;  %v3328_v4 = vld [vmem:[#allocation9 + $0x18] sm:$0xf0]  ;;  %v3458_v5 = vld [vmem:[#allocation11 + $0xe8] sm:$0xf] }
  0x16   :  { %v4466_v6 = vld [vmem:[#allocation11 + $0xf4] sm:$0xf0]  ;;  %v3331_v7 = vor.u32 %v4432_v2, %v3328_v4  ;;  %v4464_v9 = vld [vmem:[#allocation11 + $0xec] sm:$0xf]  ;;  %v3460_v10 = vld [vmem:[#allocation11 + $0xf8] sm:$0xf0] }
  0x17   :  { %v3459_v8 = vor.u32 %v4466_v6, %v3458_v5  ;;  %v3442_v11 = vld [vmem:[#allocation11 + $0xc8] sm:$0xf]  ;;  %240 = vmatpush.bf16.msra.mxu2 %v3327_v3  ;;  %v3463_v12 = vor.u32 %v4464_v9, %v3460_v10  ;;  %v4462_v13 = vld [vmem:[#allocation11 + $0xd4] sm:$0xf0]  ;;  %v4460_v14 = vld [vmem:[#allocation11 + $0xcc] sm:$0xf] }
  0x18   :  { %v3444_v15 = vld [vmem:[#allocation11 + $0xd8] sm:$0xf0]  ;;  %254 = vmatpush.bf16.msra.mxu3 %v3331_v7  ;;  %v3443_v16 = vor.u32 %v4462_v13, %v3442_v11  ;;  %v3450_v17 = vld [vmem:[#allocation11 + $0xe0] sm:$0xf]  ;;  %v4465_v18 = vld [vmem:[#allocation11 + $0xec] sm:$0xf0] }
  0x19   :  { %v3426_v19 = vld [vmem:[#allocation11 + $0xa8] sm:$0xf]  ;;  %v4983_v20 = vmov 1983009808   ;;  %v3447_v22 = vor.u32 %v4460_v14, %v3444_v15  ;;  %v3451_v23 = vor.u32 %v4465_v18, %v3450_v17  ;;  %v4458_v24 = vld [vmem:[#allocation11 + $0xb4] sm:$0xf0] }
  0x1a   :  { %v107_v21 = vunpack.c.l.s4 %v4983_v20  ;;  %v4456_v25 = vld [vmem:[#allocation11 + $0xac] sm:$0xf]  ;;  %v3428_v26 = vld [vmem:[#allocation11 + $0xb8] sm:$0xf0]  ;;  %v3318_v27 = vld [vmem:[#allocation9] sm:$0xf]  ;;  %v3427_v35 = vor.u32 %v4458_v24, %v3426_v19 }
  0x1b   :  { %551 = vmatpush.bf16.msrb.mxu2 %v3459_v8  ;;  %v4433_v28 = vld [vmem:[#allocation9 + $0xc] sm:$0xf0]  ;;  %v3434_v29 = vld [vmem:[#allocation11 + $0xc0] sm:$0xf]  ;;  %v4984_v30 = vmov 1934713408   ;;  %525 = vmatpush.bf16.msra.mxu0 %v3451_v23  ;;  %v3431_v41 = vor.u32 %v4456_v25, %v3428_v26 }
  0x1c   :  { %564 = vmatpush.bf16.msrb.mxu3 %v3463_v12  ;;  %v114_v31 = vunpack.c.l.s4 %v4984_v30  ;;  %v3319_v32 = vor.u32 %v4433_v28, %v3318_v27  ;;  %v4461_v33 = vld [vmem:[#allocation11 + $0xcc] sm:$0xf0]  ;;  %v3410_v34 = vld [vmem:[#allocation11 + $0x88] sm:$0xf]  ;;  %v4454_v37 = vld [vmem:[#allocation11 + $0x94] sm:$0xf0]  ;;  %v5042_v40 = vunpack.c.0.s8 %v107_v21 }
  0x1d   :  { %v3435_v36 = vor.u32 %v4461_v33, %v3434_v29  ;;  %v4452_v38 = vld [vmem:[#allocation11 + $0x8c] sm:$0xf]  ;;  %v97_v39 = vld [vmem:[#allocation6] sm:$0xf]  ;;  %v98_v42 = vld [vmem:[#allocation6 + $0x4] sm:$0xf]  ;;  %v3411_v53 = vor.u32 %v4454_v37, %v3410_v34 }
  0x1e   :  { %212 = vmatpush.bf16.msra.mxu1 %v3319_v32  ;;  %v102_v43 = vshrl.u32 %v97_v39, 16  ;;  %v4431_v44 = vld [vmem:[#allocation9 + $0x4] sm:$0xf]  ;;  %v3412_v45 = vld [vmem:[#allocation11 + $0x98] sm:$0xf0]  ;;  %v101_v46 = vpack.i.b16 %v98_v42, %v97_v39  ;;  %v103_v47 = vshrl.u32 %v98_v42, 16  ;;  %v5044_v48 = vunpack.c.0.s8 %v114_v31 }
  0x1f   :  { %552 = vmatpush.bf16.msrb.mxu2 %v3443_v16  ;;  %v3320_v49 = vld [vmem:[#allocation9 + $0x10] sm:$0xf0]  ;;  %526 = vmatpush.bf16.msra.mxu0 %v3435_v36  ;;  %v3418_v51 = vld [vmem:[#allocation11 + $0xa0] sm:$0xf]  ;;  %v4457_v52 = vld [vmem:[#allocation11 + $0xac] sm:$0xf0]  ;;  %v3415_v59 = vor.u32 %v4452_v38, %v3412_v45 }
  0x20   :  { %565 = vmatpush.bf16.msrb.mxu3 %v3447_v22  ;;  %v3323_v50 = vor.u32 %v4431_v44, %v3320_v49  ;;  %v104_v54 = vpack.i.b16 %v103_v47, %v102_v43  ;;  %v109_v55 = vperm.slane %v101_v46, %v5042_v40  ;;  %v3419_v56 = vor.u32 %v4457_v52, %v3418_v51  ;;  %v3394_v57 = vld [vmem:[#allocation11 + $0x68] sm:$0xf]  ;;  %v4450_v58 = vld [vmem:[#allocation11 + $0x74] sm:$0xf0]  ;;  %v4448_v60 = vld [vmem:[#allocation11 + $0x6c] sm:$0xf] }
  0x21   :  { %vm111_vm0 = vcmask 1047556   ;;  %v3396_v61 = vld [vmem:[#allocation11 + $0x78] sm:$0xf0]  ;;  %v3402_v1 = vld [vmem:[#allocation11 + $0x80] sm:$0xf]  ;;  %v3395_v3 = vor.u32 %v4450_v58, %v3394_v57  ;;  %v4985_v45 = vmov 0.0  }
  0x22   :  { %226 = vmatpush.bf16.msrb.mxu1 %v3323_v50  ;;  %v110_v62 = vrot.slane %v109_v55, 4  ;;  %v116_v63 = vperm.slane %v109_v55, %v5044_v48  ;;  %v129_v0 = vperm.slane %v104_v54, %v5042_v40  ;;  %v4453_v2 = vld [vmem:[#allocation11 + $0x8c] sm:$0xf0]  ;;  %v3378_v5 = vld [vmem:[#allocation11 + $0x48] sm:$0xf]  ;;  %v3399_v11 = vor.u32 %v4448_v60, %v3396_v61  ;;  %s3301_s30 = sshll.u32 %s5418_s7, 4  ;;  %s3302_s30 = int_to_ptr.hbm [resolvable:$true] %s3301_s30 }
  0x23   :  { %553 = vmatpush.bf16.msrb.mxu2 %v3427_v35  ;;  %527 = vmatpush.bf16.msra.mxu0 %v3419_v56  ;;  %v3403_v4 = vor.u32 %v4453_v2, %v3402_v1  ;;  %v4446_v12 = vld [vmem:[#allocation11 + $0x54] sm:$0xf0]  ;;  %v4444_v13 = vld [vmem:[#allocation11 + $0x4c] sm:$0xf]  ;;  %v3380_v14 = vld [vmem:[#allocation11 + $0x58] sm:$0xf0] }
  0x24   :  { %566 = vmatpush.bf16.msrb.mxu3 %v3431_v41  ;;  %v112_v6 = vsel %vm111_vm0, 0, %v110_v62  ;;  %v121_v7 = vrot.slane %v116_v63, 4  ;;  %v130_v8 = vrot.slane %v129_v0, 4  ;;  %v135_v9 = vperm.slane %v129_v0, %v5044_v48  ;;  %159 = vst [vmem:[#allocation1] ss:$9 sm:$0xff] %v116_v63  ;;  %s4988_s8 = smov 128  }
  0x25   :  { %v120_v10 = vperm.slane %v112_v6, %v5044_v48  ;;  %v3386_v20 = vld [vmem:[#allocation11 + $0x60] sm:$0xf]  ;;  %v3379_v22 = vor.u32 %v4446_v12, %v3378_v5  ;;  %v4449_v23 = vld [vmem:[#allocation11 + $0x6c] sm:$0xf0]  ;;  %v3383_v26 = vor.u32 %v4444_v13, %v3380_v14  ;;  %v3362_v28 = vld [vmem:[#allocation11 + $0x28] sm:$0xf] }
  0x26   :  { %v122_v15 = vsel %vm111_vm0, 0, %v121_v7  ;;  %v131_v16 = vsel %vm111_vm0, 0, %v130_v8  ;;  %v140_v17 = vrot.slane %v135_v9, 4  ;;  %162 = vst [vmem:[#allocation1 + $0x1] ss:$9 sm:$0xff] %v135_v9  ;;  %v3387_v27 = vor.u32 %v4449_v23, %v3386_v20  ;;  %s4989_s9 = smov 8  }
  0x27   :  { %554 = vmatpush.bf16.msrb.mxu2 %v3411_v53  ;;  %v123_v18 = vrot.slane %v120_v10, 4  ;;  %v139_v19 = vperm.slane %v131_v16, %v5044_v48  ;;  %165 = vst [vmem:[#allocation1 + $0x2] ss:$9 sm:$0xff] %v122_v15  ;;  %528 = vmatpush.bf16.msra.mxu0 %v3403_v4  ;;  %v4442_v29 = vld [vmem:[#allocation11 + $0x34] sm:$0xf0]  ;;  %vm202_vm1 = vcmask 130048  }
  0x28   :  { %567 = vmatpush.bf16.msrb.mxu3 %v3415_v59  ;;  %v141_v21 = vsel %vm111_vm0, 0, %v140_v17  ;;  %171 = vst [vmem:[#allocation1 + $0x4] ss:$9 sm:$0xff] %v120_v10  ;;  %v4440_v30 = vld [vmem:[#allocation11 + $0x2c] sm:$0xf]  ;;  %v3363_v33 = vor.u32 %v4442_v29, %v3362_v28  ;;  %v4986_v62 = vmov 0  }
  0x29   :  { %v124_v24 = vsel %vm111_vm0, 0, %v123_v18  ;;  %v142_v25 = vrot.slane %v139_v19, 4  ;;  %168 = vst [vmem:[#allocation1 + $0x3] ss:$9 sm:$0xff] %v141_v21  ;;  %v3364_v32 = vld [vmem:[#allocation11 + $0x38] sm:$0xf0]  ;;  %4714 = vset.pattern.permute.xlu0 %v4986_v62  ;;  %4715 = vset.pattern.permute.xlu1 %v4986_v62 }
  0x2a   :  { %174 = vst [vmem:[#allocation1 + $0x5] ss:$9 sm:$0xff] %v139_v19  ;;  %v4463_v34 = vld [vmem:[#allocation11 + $0xe4] sm:$0xf]  ;;  %v3367_v35 = vor.u32 %v4440_v30, %v3364_v32  ;;  %v3370_v36 = vld [vmem:[#allocation11 + $0x40] sm:$0xf]  ;;  %4716 = vset.pattern.permute.xlu2 %v4986_v62 }
  0x2b   :  { %555 = vmatpush.bf16.msrb.mxu2 %v3395_v3  ;;  %v143_v31 = vsel %vm111_vm0, 0, %v142_v25  ;;  %177 = vst [vmem:[#allocation1 + $0x6] ss:$9 sm:$0xff] %v124_v24  ;;  %529 = vmatpush.bf16.msra.mxu0 %v3387_v27  ;;  %v4445_v37 = vld [vmem:[#allocation11 + $0x4c] sm:$0xf0]  ;;  %vm275_vm5 = vcmask 1041408  }
  0x2c   :  { %568 = vmatpush.bf16.msrb.mxu3 %v3399_v11  ;;  %180 = vst [vmem:[#allocation1 + $0x7] ss:$9 sm:$0xff] %v143_v31  ;;  %v3452_v38 = vld [vmem:[#allocation11 + $0xf0] sm:$0xf0]  ;;  %v3371_v39 = vor.u32 %v4445_v37, %v3370_v36  ;;  %v3346_v41 = vld [vmem:[#allocation11 + $0x8] sm:$0xf] }
  0x2d   :  { %v4438_v42 = vld [vmem:[#allocation11 + $0x14] sm:$0xf0]  ;;  %v4436_v43 = vld [vmem:[#allocation11 + $0xc] sm:$0xf]  ;;  %v3348_v44 = vld [vmem:[#allocation11 + $0x18] sm:$0xf0]  ;;  %v3455_v49 = vor.u32 %v4463_v34, %v3452_v38 }
  0x2e   :  { %95 = vst [vmem:[#allocation2] sm:$0x3] %v4985_v45  ;;  %v3354_v46 = vld [vmem:[#allocation11 + $0x20] sm:$0xf]  ;;  %v4441_v47 = vld [vmem:[#allocation11 + $0x2c] sm:$0xf0]  ;;  %v3347_v52 = vor.u32 %v4438_v42, %v3346_v41  ;;  %v3351_v53 = vor.u32 %v4436_v43, %v3348_v44 }
  0x2f   :  { %556 = vmatpush.bf16.msrb.mxu2 %v3379_v22  ;;  %530 = vmatpush.bf16.msra.mxu0 %v3371_v39  ;;  %96 = vst [vmem:[#allocation3] sm:$0x3] %v4985_v45  ;;  %v4459_v50 = vld [vmem:[#allocation11 + $0xc4] sm:$0xf]  ;;  %v3436_v51 = vld [vmem:[#allocation11 + $0xd0] sm:$0xf0]  ;;  %v3355_v55 = vor.u32 %v4441_v47, %v3354_v46 }
  0x30   :  { %569 = vmatpush.bf16.msrb.mxu3 %v3383_v26  ;;  %v3338_v56 = vld [vmem:[#allocation11] sm:$0xf]  ;;  %v4437_v57 = vld [vmem:[#allocation11 + $0xc] sm:$0xf0]  ;;  %v5063_v58 = vld [vmem:[%s5412_s1] sm:$0x3]  ;;  %v3439_v59 = vor.u32 %v4459_v50, %v3436_v51 }
  0x31   :  { %vm3467_vm2 = vcmp.gt.s32.totalorder %v5063_v58, 0  ;;  %v4455_v60 = vld [vmem:[#allocation11 + $0xa4] sm:$0xf]  ;;  %v3420_v61 = vld [vmem:[#allocation11 + $0xb0] sm:$0xf0]  ;;  %v3339_v0 = vor.u32 %v4437_v57, %v3338_v56  ;;  %vm3599_vm3 = vcmp.gt.s32.totalorder %v5063_v58, 1 }
  0x32   :  { %v663_v63 = vsel %vm3467_vm2, 1, %v4986_v62  ;;  %v3423_v1 = vor.u32 %v4455_v60, %v3420_v61  ;;  %v4451_v3 = vld [vmem:[#allocation11 + $0x84] sm:$0xf]  ;;  %v3404_v4 = vld [vmem:[#allocation11 + $0x90] sm:$0xf0]  ;;  %v1005_v7 = vsel %vm3599_vm3, 1, %v4986_v62 }
  0x33   :  { %557 = vmatpush.bf16.msrb.mxu2 %v3363_v33  ;;  %v181_v54 = vld [vmem:[#allocation1] sm:$0xff]  ;;  %531 = vmatpush.bf16.msra.mxu0 %v3355_v55  ;;  %v3407_v6 = vor.u32 %v4451_v3, %v3404_v4  ;;  %v3388_v9 = vld [vmem:[#allocation11 + $0x70] sm:$0xf0]  ;;  %vm4259_vm4 = vcmp.gt.s32.totalorder %v5063_v58, 6  ;;  %vm281_vm6 = vcmask 1043458   ;;  %vm283_vm7 = vcmask 1045504  }
  0x34   :  { %570 = vmatpush.bf16.msrb.mxu3 %v3367_v35  ;;  %3332 = vmatmul.msk.bf16.vlgmr.msra.gmra.mxu1 %vm202_vm1, %v181_v54  ;;  %v4447_v8 = vld [vmem:[#allocation11 + $0x64] sm:$0xf]  ;;  %v3372_v12 = vld [vmem:[#allocation11 + $0x50] sm:$0xf0]  ;;  %v2715_v14 = vsel %vm4259_vm4, 1, %v4986_v62  ;;  %vm277_vm8 = vcmask 1045508  }
  0x35   :  { %3334 = vmatmul.msk.bf16.vlgmr.msra.gmra.mxu2 %vm202_vm1, %v181_v54  ;;  %538 = vmatpush.bf16.msra.mxu1 %v3455_v49  ;;  %v5070_v2 = vld [vmem:[#allocation2] sm:$0x3]  ;;  %v3391_v10 = vor.u32 %v4447_v8, %v3388_v9  ;;  %v4443_v11 = vld [vmem:[#allocation11 + $0x44] sm:$0xf]  ;;  %v3356_v16 = vld [vmem:[#allocation11 + $0x30] sm:$0xf0] }
  0x36   :  { %3335 = vmatmul.msk.bf16.vlgmr.msra.gmra.mxu3 %vm202_vm1, %v181_v54  ;;  %665 = vperm.xlu0 %4714, %v663_v63   ;;  %v332_v5 = vpack.c.bf16 %v5070_v2, %v5070_v2  ;;  %v3375_v13 = vor.u32 %v4443_v11, %v3372_v12  ;;  %v4439_v15 = vld [vmem:[#allocation11 + $0x24] sm:$0xf]  ;;  %v3340_v19 = vld [vmem:[#allocation11 + $0x10] sm:$0xf0]  ;;  %vm279_vm9 = vcmask 1043456   ;;  %vm285_vm10 = vcmask 1045506  }
  0x37   :  { %558 = vmatpush.bf16.msrb.mxu2 %v3347_v52  ;;  %532 = vmatpush.bf16.msra.mxu0 %v3339_v0  ;;  %v3359_v17 = vor.u32 %v4439_v15, %v3356_v16  ;;  %v4435_v18 = vld [vmem:[#allocation11 + $0x4] sm:$0xf]  ;;  %v3582_v60 = vld [vmem:[#allocation11 + $0xe0] sm:$0xf]  ;;  %v4497_v61 = vld [vmem:[#allocation11 + $0xec] sm:$0xf0] }
  0x38   :  { %571 = vmatpush.bf16.msrb.mxu3 %v3351_v53  ;;  %v3343_v20 = vor.u32 %v4435_v18, %v3340_v19  ;;  %v148_v22 = vld [vmem:[%s5415_s4] sm:$0xf]  ;;  %v3583_v0 = vor.u32 %v4497_v61, %v3582_v60  ;;  %v3584_v3 = vld [vmem:[#allocation11 + $0xf0] sm:$0xf0]  ;;  %v3590_v4 = vld [vmem:[#allocation11 + $0xe8] sm:$0xf] }
  0x39   :  { %539 = vmatpush.bf16.msra.mxu1 %v3439_v59  ;;  %v152_v23 = vperm.slane %v148_v22, 2  ;;  %v153_v24 = vperm.slane %v148_v22, 3  ;;  %v150_v26 = vperm.slane %v148_v22, 0  ;;  %v151_v38 = vperm.slane %v148_v22, 1  ;;  %v4498_v9 = vld [vmem:[#allocation11 + $0xf4] sm:$0xf0] }
  0x3a   :  { %533 = vmatmul.bf16.vlgmr.msra.gmra.mxu0 %v332_v5  ;;  %v4493_v18 = vld [vmem:[#allocation11 + $0xcc] sm:$0xf0]  ;;  %v4491_v19 = vld [vmem:[#allocation11 + $0xc4] sm:$0xf]  ;;  %v3574_v22 = vld [vmem:[#allocation11 + $0xc8] sm:$0xf] }
  0x3b   :  { %865 = vmatpush.bf16.msrb.mxu0 %v3583_v0  ;;  %v3560_v0 = vld [vmem:[#allocation11 + $0xb8] sm:$0xf0] }
  0x3d   :  { %540 = vmatpush.bf16.msra.mxu1 %v3423_v1  ;;  %v4495_v1 = vld [vmem:[#allocation11 + $0xe4] sm:$0xf] }
  0x3e   :  { %1007 = vperm.xlu0 %4714, %v1005_v7   ;;  %v3587_v8 = vor.u32 %v4495_v1, %v3584_v3 }
  0x41   :  { %541 = vmatpush.bf16.msra.mxu1 %v3407_v6 }
  0x44   :  { %3333 = vmatmul.msk.bf16.vlgmr.msrb.gmra.mxu1 %vm202_vm1, %v181_v54 }
  0x45   :  { %559 = vmatmul.bf16.vlgmr.msrb.gmra.mxu2 %v332_v5  ;;  %542 = vmatpush.bf16.msra.mxu1 %v3391_v10  ;;  %v4496_v10 = vld [vmem:[#allocation11 + $0xec] sm:$0xf] }
  0x46   :  { %572 = vmatmul.bf16.vlgmr.msrb.gmra.mxu3 %v332_v5  ;;  %2717 = vperm.xlu0 %4714, %v2715_v14  }
  0x49   :  { %543 = vmatpush.bf16.msra.mxu1 %v3375_v13  ;;  %v3591_v13 = vor.u32 %v4498_v9, %v3590_v4  ;;  %v4485_v9 = vld [vmem:[#allocation11 + $0x8c] sm:$0xf0] }
  0x4b   :  { %891 = vmatpush.bf16.msra.mxu2 %v3591_v13  ;;  %v3536_v13 = vld [vmem:[#allocation11 + $0x90] sm:$0xf0] }
  0x4d   :  { %544 = vmatpush.bf16.msra.mxu1 %v3359_v17  ;;  %v3566_v17 = vld [vmem:[#allocation11 + $0xc0] sm:$0xf] }
  0x4e   :  { %3217 = vperm.xlu0 %4714, %v1005_v7  }
  0x51   :  { %545 = vmatpush.bf16.msra.mxu1 %v3343_v20  ;;  %v3567_v20 = vor.u32 %v4493_v18, %v3566_v17 }
  0x53   :  { %866 = vmatpush.bf16.msrb.mxu0 %v3567_v20  ;;  %v3518_v20 = vld [vmem:[#allocation11 + $0x60] sm:$0xf] }
  0x54   :  { %546 = vmatmul.bf16.vlgmr.msra.gmra.mxu1 %v332_v5 }
  0x55   :  { %878 = vmatpush.bf16.msrb.mxu1 %v3587_v8  ;;  %v3534_v8 = vld [vmem:[#allocation11 + $0x80] sm:$0xf] }
  0x56   :  { %3232 = vperm.xlu0 %4714, %v2715_v14   ;;  %v3592_v14 = vld [vmem:[#allocation11 + $0xf8] sm:$0xf0] }
  0x57   :  { %v3595_v16 = vor.u32 %v4496_v10, %v3592_v14  ;;  %v3535_v10 = vor.u32 %v4485_v9, %v3534_v8  ;;  %v4474_v8 = vld [vmem:[#allocation11 + $0x34] sm:$0xf0] }
  0x59   :  { %904 = vmatpush.bf16.msra.mxu3 %v3595_v16  ;;  %v3544_v16 = vld [vmem:[#allocation11 + $0x98] sm:$0xf0] }
  0xb1   :  { %v214_v21 = vpop.f32.mrf.mxu1 }
  0xb2   :  { %v5100_v50 = vadd.f32 %v214_v21, %v150_v26  ;;  %v3568_v21 = vld [vmem:[#allocation11 + $0xd0] sm:$0xf0] }
  0xb7   :  { %v5089_v34 = vpop.f32.mrf.mxu0 }
  0xb8   :  { %v242_v25 = vpop.f32.mrf.mxu2 }
  0xb9   :  { %v243_v27 = vadd.f32 %v242_v25, %v152_v23  ;;  %v256_v28 = vpop.f32.mrf.mxu3  ;;  %v216_v29 = vpop.f32.mrf.mxu1  ;;  %v3571_v25 = vor.u32 %v4491_v19, %v3568_v21  ;;  %v4481_v21 = vld [vmem:[#allocation11 + $0x6c] sm:$0xf0] }
  0xba   :  { %v257_v30 = vadd.f32 %v256_v28, %v153_v24  ;;  %v5083_v31 = vadd.f32 %v216_v29, %v150_v26  ;;  %v3576_v28 = vld [vmem:[#allocation11 + $0xd8] sm:$0xf0] }
  0xbb   :  { %v5085_v32 = vrot.slane %v243_v27, 4  ;;  %v4492_v27 = vld [vmem:[#allocation11 + $0xcc] sm:$0xf]  ;;  %879 = vmatpush.bf16.msrb.mxu1 %v3571_v25  ;;  %v4482_v25 = vld [vmem:[#allocation11 + $0x74] sm:$0xf0] }
  0xbc   :  { %v5087_v33 = vrot.slane %v257_v30, 2 }
  0xbe   :  { %v284_v35 = vsel %vm283_vm7, %v5087_v33, %v5085_v32  ;;  %v289_v36 = vsel %vm275_vm5, %v5085_v32, %v5087_v33  ;;  %v293_v37 = vsel %vm281_vm6, %v5085_v32, %v5087_v33 }
  0xbf   :  { %v536_v49 = vpop.f32.mrf.mxu0 }
  0xc0   :  { %v244_v39 = vpop.f32.mrf.mxu2  ;;  %v4490_v49 = vld [vmem:[#allocation11 + $0xb4] sm:$0xf0] }
  0xc1   :  { %v245_v41 = vadd.f32 %v244_v39, %v152_v23  ;;  %v258_v42 = vpop.f32.mrf.mxu3  ;;  %v228_v43 = vpop.f32.mrf.mxu1  ;;  %v4494_v23 = vld [vmem:[#allocation11 + $0xd4] sm:$0xf0] }
  0xc2   :  { %v259_v44 = vadd.f32 %v258_v42, %v153_v24  ;;  %v229_v45 = vadd.f32 %v228_v43, %v151_v38  ;;  %v3575_v26 = vor.u32 %v4494_v23, %v3574_v22  ;;  %v4489_v42 = vld [vmem:[#allocation11 + $0xac] sm:$0xf0]  ;;  %v4487_v43 = vld [vmem:[#allocation11 + $0xa4] sm:$0xf]  ;;  %v3520_v23 = vld [vmem:[#allocation11 + $0x70] sm:$0xf0] }
  0xc3   :  { %v273_v46 = vrot.slane %v245_v41, 4  ;;  %v3550_v41 = vld [vmem:[#allocation11 + $0xa0] sm:$0xf]  ;;  %v4479_v22 = vld [vmem:[#allocation11 + $0x64] sm:$0xf] }
  0xc4   :  { %v274_v47 = vrot.slane %v259_v44, 2  ;;  %v5102_v51 = vrot.slane %v229_v45, 6  ;;  %892 = vmatpush.bf16.msra.mxu2 %v3575_v26  ;;  %v3551_v45 = vor.u32 %v4489_v42, %v3550_v41  ;;  %v3502_v42 = vld [vmem:[#allocation11 + $0x40] sm:$0xf] }
  0xc6   :  { %v297_v52 = vsel %vm277_vm8, %v273_v46, %v274_v47  ;;  %v300_v53 = vsel %vm283_vm7, %v274_v47, %v273_v46  ;;  %v304_v54 = vsel %vm275_vm5, %v273_v46, %v274_v47  ;;  %v5108_v55 = vsel %vm281_vm6, %v273_v46, %v274_v47  ;;  %v3552_v46 = vld [vmem:[#allocation11 + $0xb0] sm:$0xf0]  ;;  %v3558_v47 = vld [vmem:[#allocation11 + $0xa8] sm:$0xf]  ;;  %867 = vmatpush.bf16.msrb.mxu0 %v3551_v45 }
  0xc7   :  { %v282_v56 = vsel %vm281_vm6, %v5100_v50, %v5102_v51  ;;  %v288_v57 = vsel %vm277_vm8, %v5100_v50, %v5102_v51  ;;  %v292_v59 = vsel %vm283_vm7, %v5102_v51, %v5100_v50  ;;  %v3555_v60 = vor.u32 %v4487_v43, %v3552_v46  ;;  %v4477_v43 = vld [vmem:[#allocation11 + $0x4c] sm:$0xf0]  ;;  %v3504_v46 = vld [vmem:[#allocation11 + $0x50] sm:$0xf0] }
  0xc8   :  { %v5119_v63 = vpop.f32.mrf.mxu2  ;;  %v5122_v5 = vsel %vm285_vm10, %v282_v56, %v284_v35  ;;  %v5125_v6 = vsel %vm279_vm9, %v289_v36, %v288_v57  ;;  %v5128_v11 = vsel %vm285_vm10, %v293_v37, %v292_v59  ;;  %v3579_v35 = vor.u32 %v4492_v27, %v3576_v28 }
  0xc9   :  { %v573_v7 = vpop.f32.mrf.mxu3  ;;  %v230_v12 = vpop.f32.mrf.mxu1  ;;  %v582_v29 = vrot.slane %v5119_v63, 4  ;;  %v3559_v61 = vor.u32 %v4490_v49, %v3558_v47  ;;  %v4488_v63 = vld [vmem:[#allocation11 + $0xac] sm:$0xf]  ;;  %880 = vmatpush.bf16.msrb.mxu1 %v3555_v60  ;;  %v3503_v45 = vor.u32 %v4477_v43, %v3502_v42  ;;  %v3510_v47 = vld [vmem:[#allocation11 + $0x48] sm:$0xf] }
  0xca   :  { %v231_v15 = vadd.f32 %v230_v12, %v151_v38  ;;  %v583_v30 = vrot.slane %v573_v7, 2  ;;  %905 = vmatpush.bf16.msra.mxu3 %v3579_v35  ;;  %v3563_v3 = vor.u32 %v4488_v63, %v3560_v0  ;;  %v4483_v12 = vld [vmem:[#allocation11 + $0x84] sm:$0xf]  ;;  %868 = vmatpush.bf16.msrb.mxu0 %v3535_v10  ;;  %v4478_v49 = vld [vmem:[#allocation11 + $0x54] sm:$0xf0] }
  0xcb   :  { %893 = vmatpush.bf16.msra.mxu2 %v3559_v61  ;;  %v3511_v60 = vor.u32 %v4478_v49, %v3510_v47  ;;  %v4476_v61 = vld [vmem:[#allocation11 + $0x4c] sm:$0xf]  ;;  %v3512_v63 = vld [vmem:[#allocation11 + $0x58] sm:$0xf0] }
  0xcc   :  { %v272_v24 = vrot.slane %v231_v15, 6  ;;  %v4484_v15 = vld [vmem:[#allocation11 + $0x8c] sm:$0xf]  ;;  %v3515_v0 = vor.u32 %v4476_v61, %v3512_v63 }
  0xcd   :  { %v3547_v18 = vor.u32 %v4484_v15, %v3544_v16  ;;  %v5173_v63 = vld [vmem:[#allocation3] sm:$0x3] }
  0xce   :  { %v296_v36 = vsel %vm275_vm5, %v5083_v31, %v272_v24  ;;  %v299_v37 = vsel %vm281_vm6, %v5083_v31, %v272_v24  ;;  %v303_v38 = vsel %vm277_vm8, %v5083_v31, %v272_v24  ;;  %v307_v39 = vsel %vm283_vm7, %v272_v24, %v5083_v31  ;;  %906 = vmatpush.bf16.msra.mxu3 %v3563_v3  ;;  %v3526_v24 = vld [vmem:[#allocation11 + $0x68] sm:$0xf]  ;;  %v4473_v3 = vld [vmem:[#allocation11 + $0x2c] sm:$0xf0] }
  0xcf   :  { %v5140_v56 = vsel %vm279_vm9, %v296_v36, %v297_v52  ;;  %v5143_v57 = vsel %vm285_vm10, %v299_v37, %v300_v53  ;;  %v5146_v59 = vsel %vm279_vm9, %v304_v54, %v303_v38  ;;  %v5150_v4 = vsel %vm285_vm10, %v5108_v55, %v307_v39  ;;  %v3542_v55 = vld [vmem:[#allocation11 + $0x88] sm:$0xf]  ;;  %v4480_v36 = vld [vmem:[#allocation11 + $0x6c] sm:$0xf]  ;;  %v3528_v37 = vld [vmem:[#allocation11 + $0x78] sm:$0xf0] }
  0xd0   :  { %v562_v44 = vpop.f32.mrf.mxu2  ;;  %v278_v52 = vsel %vm277_vm8, %v5085_v32, %v5087_v33  ;;  %v276_v53 = vsel %vm275_vm5, %v5100_v50, %v5102_v51  ;;  %v585_v54 = vsel %vm277_vm8, %v582_v29, %v583_v30  ;;  %v3539_v32 = vor.u32 %v4483_v12, %v3536_v13  ;;  %v4486_v33 = vld [vmem:[#allocation11 + $0x94] sm:$0xf0]  ;;  %v4472_v13 = vld [vmem:[#allocation11 + $0x2c] sm:$0xf] }
  0xd1   :  { %v575_v31 = vpop.f32.mrf.mxu3  ;;  %v547_v1 = vpop.f32.mrf.mxu1  ;;  %v280_v50 = vsel %vm279_vm9, %v276_v53, %v278_v52  ;;  %v3543_v17 = vor.u32 %v4486_v33, %v3542_v55  ;;  %v3523_v30 = vor.u32 %v4479_v22, %v3520_v23  ;;  %v3527_v35 = vor.u32 %v4482_v25, %v3526_v24  ;;  %v4475_v44 = vld [vmem:[#allocation11 + $0x44] sm:$0xf]  ;;  %v3496_v55 = vld [vmem:[#allocation11 + $0x38] sm:$0xf0]  ;;  %v4470_v22 = vld [vmem:[#allocation11 + $0x14] sm:$0xf0] }
  0xd2   :  { %v581_v7 = vrot.slane %v547_v1, 6  ;;  %881 = vmatpush.bf16.msrb.mxu1 %v3539_v32  ;;  %907 = vmatpush.bf16.msra.mxu3 %v3547_v18  ;;  %v3531_v41 = vor.u32 %v4480_v36, %v3528_v37  ;;  %v3507_v31 = vor.u32 %v4475_v44, %v3504_v46  ;;  %v3486_v1 = vld [vmem:[#allocation11 + $0x20] sm:$0xf]  ;;  %v4471_v52 = vld [vmem:[#allocation11 + $0x24] sm:$0xf]  ;;  %v3499_v32 = vor.u32 %v4472_v13, %v3496_v55 }
  0xd3   :  { %894 = vmatpush.bf16.msra.mxu2 %v3543_v17  ;;  %v3487_v53 = vor.u32 %v4473_v3, %v3486_v1  ;;  %v4469_v17 = vld [vmem:[#allocation11 + $0xc] sm:$0xf0]  ;;  %v4467_v18 = vld [vmem:[#allocation11 + $0x4] sm:$0xf]  ;;  %v3480_v23 = vld [vmem:[#allocation11 + $0x18] sm:$0xf0] }
  0xd4   :  { %v584_v14 = vsel %vm275_vm5, %v5089_v34, %v581_v7  ;;  %v3519_v34 = vor.u32 %v4481_v21, %v3518_v20  ;;  %v3494_v7 = vld [vmem:[#allocation11 + $0x28] sm:$0xf]  ;;  %v3472_v20 = vld [vmem:[#allocation11 + $0x10] sm:$0xf0] }
  0xd5   :  { %v586_v51 = vsel %vm279_vm9, %v584_v14, %v585_v54  ;;  %v3488_v54 = vld [vmem:[#allocation11 + $0x30] sm:$0xf0]  ;;  %v3495_v12 = vor.u32 %v4474_v8, %v3494_v7  ;;  %v3478_v21 = vld [vmem:[#allocation11 + $0x8] sm:$0xf]  ;;  %v3475_v25 = vor.u32 %v4467_v18, %v3472_v20  ;;  %v3714_v20 = vld [vmem:[#allocation11 + $0xe0] sm:$0xf] }
  0xd6   :  { %v5163_v19 = vadd.f32 %v586_v51, %v280_v50  ;;  %869 = vmatpush.bf16.msrb.mxu0 %v3519_v34  ;;  %882 = vmatpush.bf16.msrb.mxu1 %v3523_v30  ;;  %v3491_v10 = vor.u32 %v4471_v52, %v3488_v54  ;;  %v3470_v51 = vld [vmem:[#allocation11] sm:$0xf]  ;;  %v4468_v34 = vld [vmem:[#allocation11 + $0xc] sm:$0xf] }
  0xd7   :  { %895 = vmatpush.bf16.msra.mxu2 %v3527_v35  ;;  %908 = vmatpush.bf16.msra.mxu3 %v3531_v41  ;;  %v3471_v24 = vor.u32 %v4469_v17, %v3470_v51 }
  0xd8   :  { %v3464_v26 = vmul.f32 -1.442695, %v5163_v19  ;;  %v609_v27 = vrot.slane %v5163_v19, 2  ;;  %v633_v28 = vrot.slane %v5163_v19, 6  ;;  %v630_v35 = vrot.slane %v5163_v19, 4 }
  0xd9   :  { %v549_v29 = vpop.f32.mrf.mxu1 }
  0xda   :  { %4718 = vpow2.f32 %v3464_v26  ;;  %v3465_v38 = vmul.f32 -1.442695, %v609_v27  ;;  %v3466_v39 = vmul.f32 -1.442695, %v633_v28  ;;  %870 = vmatpush.bf16.msrb.mxu0 %v3503_v45  ;;  %883 = vmatpush.bf16.msrb.mxu1 %v3507_v31  ;;  %v3479_v27 = vor.u32 %v4470_v22, %v3478_v21  ;;  %v4529_v21 = vld [vmem:[#allocation11 + $0xec] sm:$0xf0] }
  0xdb   :  { %896 = vmatpush.bf16.msra.mxu2 %v3511_v60  ;;  %909 = vmatpush.bf16.msra.mxu3 %v3515_v0  ;;  %v3483_v28 = vor.u32 %v4468_v34, %v3480_v23  ;;  %v4527_v22 = vld [vmem:[#allocation11 + $0xe4] sm:$0xf]  ;;  %v3715_v34 = vor.u32 %v4529_v21, %v3714_v20  ;;  %v3716_v23 = vld [vmem:[#allocation11 + $0xf0] sm:$0xf0] }
  0xdc   :  { %4720 = vpow2.f32 %v3465_v38  ;;  %v4515_v20 = vld [vmem:[#allocation11 + $0x84] sm:$0xf]  ;;  %v3668_v21 = vld [vmem:[#allocation11 + $0x90] sm:$0xf0] }
  0xdd   :  { %4722 = vpow2.f32 %v3466_v39 }
  0xde   :  { %871 = vmatpush.bf16.msrb.mxu0 %v3487_v53  ;;  %884 = vmatpush.bf16.msrb.mxu1 %v3491_v10 }
  0xdf   :  { %897 = vmatpush.bf16.msra.mxu2 %v3495_v12  ;;  %910 = vmatpush.bf16.msra.mxu3 %v3499_v32 }
  0xe0   :  { %v4719_v9 = vpop.eup %4718 }
  0xe1   :  { %v592_v14 = vadd.f32 1.0, %v4719_v9 }
  0xe2   :  { %v4721_v33 = vpop.eup %4720  ;;  %872 = vmatpush.bf16.msrb.mxu0 %v3471_v24  ;;  %885 = vmatpush.bf16.msrb.mxu1 %v3475_v25  ;;  %v3722_v24 = vld [vmem:[#allocation11 + $0xe8] sm:$0xf]  ;;  %v4530_v25 = vld [vmem:[#allocation11 + $0xf4] sm:$0xf0] }
  0xe3   :  { %v4723_v15 = vpop.eup %4722  ;;  %4724 = vrcp.f32 %v592_v14  ;;  %v614_v16 = vadd.f32 1.0, %v4721_v33  ;;  %898 = vmatpush.bf16.msra.mxu2 %v3479_v27  ;;  %911 = vmatpush.bf16.msra.mxu3 %v3483_v28  ;;  %v604_v39 = vand.u32 2147483648, %v592_v14  ;;  %v602_v43 = vand.u32 2147483647, %v592_v14  ;;  %v4528_v27 = vld [vmem:[#allocation11 + $0xec] sm:$0xf] }
  0xe4   :  { %v5168_v50 = vadd.f32 1.0, %v4723_v15  ;;  %vm598_vm12 = vweird.f32 %v592_v14  ;;  %v5182_v15 = vpop.permute.xlu0 %665  ;;  %v3724_v28 = vld [vmem:[#allocation11 + $0xf8] sm:$0xf0] }
  0xe5   :  { %4726 = vrcp.f32 %v614_v16  ;;  %v626_v45 = vand.u32 2147483648, %v614_v16  ;;  %v624_v49 = vand.u32 2147483647, %v614_v16  ;;  %v605_v19 = vor.u32 1.1754944e-38, %v604_v39 }
  0xe6   :  { %4728 = vrcp.f32 %v5168_v50  ;;  %vm603_vm15 = vcmp.eq.f32.partialorder %v602_v43, 8.507059e+37  ;;  %vm620_vm1 = vweird.f32 %v614_v16  ;;  %v650_v12 = vand.u32 2147483648, %v5168_v50  ;;  %1207 = vmatpush.bf16.msra.mxu0 %v3715_v34 }
  0xe7   :  { %4730 = vtanh.f32 %v630_v35  ;;  %v627_v1 = vor.u32 1.1754944e-38, %v626_v45  ;;  %vm625_vm3 = vcmp.eq.f32.partialorder %v624_v49, 8.507059e+37  ;;  %vm644_vm6 = vweird.f32 %v5168_v50  ;;  %v4524_v45 = vld [vmem:[#allocation11 + $0xcc] sm:$0xf] }
  0xe8   :  { %v648_v13 = vand.u32 2147483647, %v5168_v50 }
  0xe9   :  { %v4725_v26 = vpop.eup %4724 }
  0xea   :  { %v594_v29 = vmul.f32 %v4725_v26, %v592_v14  ;;  %vm599_vm11 = vweird.f32 %v4725_v26  ;;  %v651_v14 = vor.u32 1.1754944e-38, %v650_v12  ;;  %vm649_vm10 = vcmp.eq.f32.partialorder %v648_v13, 8.507059e+37 }
  0xeb   :  { %v4727_v30 = vpop.eup %4726  ;;  %vm600_vm14 = vmor %vm598_vm12, %vm599_vm11  ;;  %vm667_vm11 = vcmp.eq.s32.totalorder %v5182_v15, 1  ;;  %v287_v12 = vrot.slane %v5122_v5, 2  ;;  %vm3731_vm12 = vcmp.gt.s32.totalorder %v5063_v58, 2 }
  0xec   :  { %v4729_v36 = vpop.eup %4728  ;;  %v595_v37 = vsub.f32 1.0, %v594_v29  ;;  %v616_v38 = vmul.f32 %v4727_v30, %v614_v16  ;;  %vm621_vm13 = vweird.f32 %v4727_v30  ;;  %v3727_v29 = vor.u32 %v4528_v27, %v3724_v28 }
  0xed   :  { %v640_v41 = vmul.f32 %v4729_v36, %v5168_v50  ;;  %vm622_vm2 = vmor %vm620_vm1, %vm621_vm13  ;;  %v4731_v52 = vpop.eup %4730  ;;  %vm645_vm4 = vweird.f32 %v4729_v36  ;;  %vm3995_vm13 = vcmp.gt.s32.totalorder %v5063_v58, 4 }
  0xee   :  { %v596_v42 = vmul.f32 %v4725_v26, %v595_v37  ;;  %v617_v44 = vsub.f32 1.0, %v616_v38  ;;  %vm646_vm7 = vmor %vm644_vm6, %vm645_vm4  ;;  %v4525_v37 = vld [vmem:[#allocation11 + $0xcc] sm:$0xf0]  ;;  %v4523_v38 = vld [vmem:[#allocation11 + $0xc4] sm:$0xf]  ;;  %1246 = vmatpush.bf16.msrb.mxu3 %v3727_v29 }
  0xef   :  { %v641_v31 = vsub.f32 1.0, %v640_v41  ;;  %v3700_v41 = vld [vmem:[#allocation11 + $0xd0] sm:$0xf0]  ;;  %v3650_v29 = vld [vmem:[#allocation11 + $0x60] sm:$0xf] }
  0xf0   :  { %v597_v46 = vadd.f32 %v4725_v26, %v596_v42  ;;  %v618_v47 = vmul.f32 %v4727_v30, %v617_v44  ;;  %v3706_v42 = vld [vmem:[#allocation11 + $0xc8] sm:$0xf]  ;;  %v3703_v43 = vor.u32 %v4523_v38, %v3700_v41  ;;  %v4526_v44 = vld [vmem:[#allocation11 + $0xd4] sm:$0xf0] }
  0xf1   :  { %v642_v54 = vmul.f32 %v4729_v36, %v641_v31  ;;  %v4521_v31 = vld [vmem:[#allocation11 + $0xac] sm:$0xf0]  ;;  %v4514_v41 = vld [vmem:[#allocation11 + $0x74] sm:$0xf0] }
  0xf2   :  { %v601_v60 = vsel %vm600_vm14, %v4725_v26, %v597_v46  ;;  %v619_v61 = vadd.f32 %v4727_v30, %v618_v47  ;;  %v3719_v26 = vor.u32 %v4527_v22, %v3716_v23  ;;  %v3708_v46 = vld [vmem:[#allocation11 + $0xd8] sm:$0xf0]  ;;  %v3707_v47 = vor.u32 %v4526_v44, %v3706_v42  ;;  %v3674_v22 = vld [vmem:[#allocation11 + $0x88] sm:$0xf]  ;;  %v4512_v44 = vld [vmem:[#allocation11 + $0x6c] sm:$0xf] }
  0xf3   :  { %v606_v0 = vsel %vm603_vm15, %v605_v19, %v601_v60  ;;  %v643_v10 = vadd.f32 %v4729_v36, %v642_v54  ;;  %v3711_v49 = vor.u32 %v4524_v45, %v3708_v46  ;;  %v3682_v19 = vld [vmem:[#allocation11 + $0xa0] sm:$0xf]  ;;  %v4519_v60 = vld [vmem:[#allocation11 + $0xa4] sm:$0xf]  ;;  %v3671_v23 = vor.u32 %v4515_v20, %v3668_v21  ;;  %v3660_v45 = vld [vmem:[#allocation11 + $0x78] sm:$0xf0] }
  0xf4   :  { %v623_v3 = vsel %vm622_vm2, %v4727_v30, %v619_v61  ;;  %v655_v8 = vmul.f32 %v4731_v52, %v606_v0  ;;  %1220 = vmatpush.bf16.msra.mxu1 %v3719_v26  ;;  %v3683_v61 = vor.u32 %v4521_v31, %v3682_v19  ;;  %v3684_v0 = vld [vmem:[#allocation11 + $0xb0] sm:$0xf0]  ;;  %v3676_v26 = vld [vmem:[#allocation11 + $0x98] sm:$0xf0]  ;;  %v3634_v46 = vld [vmem:[#allocation11 + $0x40] sm:$0xf] }
  0xf5   :  { %v628_v53 = vsel %vm625_vm3, %v627_v1, %v623_v3  ;;  %v647_v55 = vsel %vm646_vm7, %v4729_v36, %v643_v10  ;;  %v3698_v36 = vld [vmem:[#allocation11 + $0xc0] sm:$0xf]  ;;  %1247 = vmatpush.bf16.msrb.mxu3 %v3711_v49  ;;  %v3690_v1 = vld [vmem:[#allocation11 + $0xa8] sm:$0xf]  ;;  %v4522_v3 = vld [vmem:[#allocation11 + $0xb4] sm:$0xf0] }
  0xf6   :  { %v654_v7 = vmul.f32 %v628_v53, %v5173_v63  ;;  %v652_v33 = vsel %vm649_vm10, %v651_v14, %v647_v55  ;;  %v3699_v39 = vor.u32 %v4525_v37, %v3698_v36  ;;  %v3687_v53 = vor.u32 %v4519_v60, %v3684_v0  ;;  %v4511_v36 = vld [vmem:[#allocation11 + $0x64] sm:$0xf]  ;;  %v4509_v0 = vld [vmem:[#allocation11 + $0x4c] sm:$0xf0]  ;;  %v4506_v20 = vld [vmem:[#allocation11 + $0x34] sm:$0xf0] }
  0xf7   :  { %v3691_v54 = vor.u32 %v4522_v3, %v3690_v1  ;;  %v4507_v1 = vld [vmem:[#allocation11 + $0x44] sm:$0xf]  ;;  %v3636_v3 = vld [vmem:[#allocation11 + $0x50] sm:$0xf0]  ;;  %vm3863_vm14 = vcmp.gt.s32.totalorder %v5063_v58, 3 }
  0xf8   :  { %v5176_v9 = vadd.f32 %v655_v8, %v654_v7  ;;  %1208 = vmatpush.bf16.msra.mxu0 %v3699_v39  ;;  %1221 = vmatpush.bf16.msra.mxu1 %v3703_v43  ;;  %v4520_v7 = vld [vmem:[#allocation11 + $0xac] sm:$0xf]  ;;  %v3692_v8 = vld [vmem:[#allocation11 + $0xb8] sm:$0xf0]  ;;  %v3652_v39 = vld [vmem:[#allocation11 + $0x70] sm:$0xf0] }
  0xf9   :  { %v3695_v55 = vor.u32 %v4520_v7, %v3692_v8  ;;  %v3655_v42 = vor.u32 %v4511_v36, %v3652_v39  ;;  %v3642_v7 = vld [vmem:[#allocation11 + $0x48] sm:$0xf]  ;;  %v3639_v8 = vor.u32 %v4507_v1, %v3636_v3  ;;  %v3612_v39 = vld [vmem:[#allocation11 + $0x18] sm:$0xf0] }
  0xfa   :  { %4732 = vtanh.f32 %v5176_v9 }
  0xfb   :  { %1248 = vmatpush.bf16.msrb.mxu3 %v3695_v55 }
  0xfc   :  { %1209 = vmatpush.bf16.msra.mxu0 %v3683_v61  ;;  %1222 = vmatpush.bf16.msra.mxu1 %v3687_v53  ;;  %v3663_v61 = vor.u32 %v4512_v44, %v3660_v45 }
 0x100   :  { %v4733_v32 = vpop.eup %4732  ;;  %1223 = vmatpush.bf16.msra.mxu1 %v3671_v23 }
 0x101   :  { %v658_v16 = vmul.f32 %v4733_v32, %v652_v33 }
 0x103   :  { %v659_v51 = vpack.c.bf16 %v658_v16, %v658_v16  ;;  %v5188_v17 = vsel %vm667_vm11, %v658_v16, %v5070_v2  ;;  %v3723_v2 = vor.u32 %v4530_v25, %v3722_v24  ;;  %v4518_v24 = vld [vmem:[#allocation11 + $0x94] sm:$0xf0]  ;;  %v4516_v25 = vld [vmem:[#allocation11 + $0x8c] sm:$0xf] }
 0x104   :  { %v672_v50 = vpack.c.bf16 %v5188_v17, %v5188_v17  ;;  %v3675_v27 = vor.u32 %v4518_v24, %v3674_v22  ;;  %v3679_v28 = vor.u32 %v4516_v25, %v3676_v26  ;;  %1224 = vmatpush.bf16.msra.mxu1 %v3655_v42  ;;  %v4504_v22 = vld [vmem:[#allocation11 + $0x2c] sm:$0xf]  ;;  %v4501_v25 = vld [vmem:[#allocation11 + $0xc] sm:$0xf0]  ;;  %v4499_v26 = vld [vmem:[#allocation11 + $0x4] sm:$0xf] }
 0x105   :  { %660 = vst [vmem:[#allocation5] sm:$0x1] %v659_v51  ;;  %1233 = vmatpush.bf16.msrb.mxu2 %v3723_v2  ;;  %v3666_v51 = vld [vmem:[#allocation11 + $0x80] sm:$0xf] }
 0x106   :  { %873 = vmatmul.bf16.vlgmr.msrb.gmra.mxu0 %v672_v50  ;;  %886 = vmatmul.bf16.vlgmr.msrb.gmra.mxu1 %v672_v50 }
 0x107   :  { %899 = vmatmul.bf16.vlgmr.msra.gmra.mxu2 %v672_v50  ;;  %912 = vmatmul.bf16.vlgmr.msra.gmra.mxu3 %v672_v50  ;;  %v4517_v50 = vld [vmem:[#allocation11 + $0x8c] sm:$0xf0] }
 0x108   :  { %1249 = vmatpush.bf16.msrb.mxu3 %v3679_v28  ;;  %1225 = vmatpush.bf16.msra.mxu1 %v3639_v8  ;;  %v3610_v28 = vld [vmem:[#allocation11 + $0x8] sm:$0xf] }
 0x109   :  { %1234 = vmatpush.bf16.msrb.mxu2 %v3707_v47 }
 0x10c   :  { %v3066_v18 = vld [vmem:[#allocation5] sm:$0x1]  ;;  %1250 = vmatpush.bf16.msrb.mxu3 %v3663_v61 }
 0x10d   :  { %3095 = vst [vmem:[#allocation1] ss:$9 sm:$0xff] %v3066_v18  ;;  %1235 = vmatpush.bf16.msrb.mxu2 %v3691_v54  ;;  %v3667_v18 = vor.u32 %v4517_v50, %v3666_v51  ;;  %v3635_v54 = vor.u32 %v4509_v0, %v3634_v46  ;;  %v3620_v50 = vld [vmem:[#allocation11 + $0x30] sm:$0xf0] }
 0x10f   :  { %1210 = vmatpush.bf16.msra.mxu0 %v3667_v18  ;;  %v3626_v18 = vld [vmem:[#allocation11 + $0x28] sm:$0xf] }
 0x110   :  { %v3627_v23 = vor.u32 %v4506_v20, %v3626_v18  ;;  %v669_v20 = vsel %vm667_vm11, %v5176_v9, %v5173_v63 }
 0x111   :  { %1236 = vmatpush.bf16.msrb.mxu2 %v3675_v27 }
 0x183   :  { %v874_v30 = vpop.f32.mrf.mxu0  ;;  %v887_v35 = vpop.f32.mrf.mxu1 }
 0x184   :  { %v921_v52 = vrot.slane %v887_v35, 6  ;;  %v4513_v35 = vld [vmem:[#allocation11 + $0x6c] sm:$0xf0] }
 0x185   :  { %v3651_v38 = vor.u32 %v4513_v35, %v3650_v29  ;;  %v4502_v29 = vld [vmem:[#allocation11 + $0x14] sm:$0xf0]  ;;  %v4500_v35 = vld [vmem:[#allocation11 + $0xc] sm:$0xf] }
 0x186   :  { %v924_v34 = vsel %vm275_vm5, %v874_v30, %v921_v52  ;;  %v3658_v30 = vld [vmem:[#allocation11 + $0x68] sm:$0xf]  ;;  %v3615_v44 = vor.u32 %v4500_v35, %v3612_v39 }
 0x187   :  { %v3659_v43 = vor.u32 %v4514_v41, %v3658_v30  ;;  %1211 = vmatpush.bf16.msra.mxu0 %v3651_v38 }
 0x189   :  { %1237 = vmatpush.bf16.msrb.mxu2 %v3659_v43  ;;  %v3611_v43 = vor.u32 %v4502_v29, %v3610_v28 }
 0x18a   :  { %v900_v10 = vpop.f32.mrf.mxu2  ;;  %v913_v13 = vpop.f32.mrf.mxu3 }
 0x18b   :  { %v922_v14 = vrot.slane %v900_v10, 4  ;;  %v923_v32 = vrot.slane %v913_v13, 2  ;;  %v876_v33 = vpop.f32.mrf.mxu0  ;;  %v889_v16 = vpop.f32.mrf.mxu1  ;;  %v4510_v10 = vld [vmem:[#allocation11 + $0x54] sm:$0xf0]  ;;  %v3644_v13 = vld [vmem:[#allocation11 + $0x58] sm:$0xf0]  ;;  %1212 = vmatpush.bf16.msra.mxu0 %v3635_v54 }
 0x18c   :  { %v3643_v55 = vor.u32 %v4510_v10, %v3642_v7  ;;  %v4505_v33 = vld [vmem:[#allocation11 + $0x2c] sm:$0xf0]  ;;  %v4503_v16 = vld [vmem:[#allocation11 + $0x24] sm:$0xf]  ;;  %v1689_v10 = vsel %vm3863_vm14, 1, %v4986_v62 }
 0x18d   :  { %v925_v5 = vsel %vm277_vm8, %v922_v14, %v923_v32  ;;  %v3618_v32 = vld [vmem:[#allocation11 + $0x20] sm:$0xf]  ;;  %v3623_v21 = vor.u32 %v4503_v16, %v3620_v50 }
 0x18e   :  { %v926_v2 = vsel %vm279_vm9, %v924_v34, %v925_v5  ;;  %v3619_v51 = vor.u32 %v4505_v33, %v3618_v32  ;;  %v3628_v34 = vld [vmem:[#allocation11 + $0x38] sm:$0xf0]  ;;  %v3602_v5 = vld [vmem:[#allocation11] sm:$0xf]  ;;  %1238 = vmatpush.bf16.msrb.mxu2 %v3643_v55 }
 0x18f   :  { %v5196_v37 = vadd.f32 %v926_v2, %v287_v12  ;;  %v4508_v12 = vld [vmem:[#allocation11 + $0x4c] sm:$0xf]  ;;  %v3631_v24 = vor.u32 %v4504_v22, %v3628_v34  ;;  %v3604_v2 = vld [vmem:[#allocation11 + $0x10] sm:$0xf0]  ;;  %v3603_v38 = vor.u32 %v4501_v25, %v3602_v5  ;;  %1226 = vmatpush.bf16.msra.mxu1 %v3623_v21 }
 0x190   :  { %v3647_v14 = vor.u32 %v4508_v12, %v3644_v13  ;;  %1213 = vmatpush.bf16.msra.mxu0 %v3619_v51  ;;  %v3607_v41 = vor.u32 %v4499_v26, %v3604_v2 }
 0x191   :  { %v3596_v47 = vmul.f32 -1.442695, %v5196_v37  ;;  %v949_v49 = vrot.slane %v5196_v37, 2  ;;  %v973_v19 = vrot.slane %v5196_v37, 6  ;;  %v970_v0 = vrot.slane %v5196_v37, 4 }
 0x192   :  { %v902_v31 = vpop.f32.mrf.mxu2  ;;  %v915_v60 = vpop.f32.mrf.mxu3  ;;  %1251 = vmatpush.bf16.msrb.mxu3 %v3647_v14  ;;  %1239 = vmatpush.bf16.msrb.mxu2 %v3627_v23 }
 0x193   :  { %4734 = vpow2.f32 %v3596_v47  ;;  %v3597_v52 = vmul.f32 -1.442695, %v949_v49  ;;  %v3598_v53 = vmul.f32 -1.442695, %v973_v19  ;;  %1227 = vmatpush.bf16.msra.mxu1 %v3607_v41  ;;  %v5206_v49 = vsel %vm3731_vm12, 1, %v4986_v62  ;;  %v1008_v23 = vpop.permute.xlu0 %1007 }
 0x194   :  { %1214 = vmatpush.bf16.msra.mxu0 %v3603_v38  ;;  %1349 = vperm.xlu1 %4715, %v5206_v49   ;;  %v5211_v31 = vsel %vm3995_vm13, 1, %v4986_v62  ;;  %vm1009_vm12 = vcmp.eq.s32.totalorder %v1008_v23, 1  ;;  %v3846_v41 = vld [vmem:[#allocation11 + $0xe0] sm:$0xf]  ;;  %v291_v23 = vrot.slane %v5125_v6, 4 }
 0x195   :  { %4736 = vpow2.f32 %v3597_v52  ;;  %2033 = vperm.xlu2 %4716, %v5211_v31  }
 0x196   :  { %4738 = vpow2.f32 %v3598_v53  ;;  %1252 = vmatpush.bf16.msrb.mxu3 %v3631_v24  ;;  %1240 = vmatpush.bf16.msrb.mxu2 %v3611_v43  ;;  %v4559_v43 = vld [vmem:[#allocation11 + $0xe4] sm:$0xf] }
 0x199   :  { %v4735_v27 = vpop.eup %4734 }
 0x19a   :  { %v932_v36 = vadd.f32 1.0, %v4735_v27  ;;  %1253 = vmatpush.bf16.msrb.mxu3 %v3615_v44 }
 0x19b   :  { %v4737_v30 = vpop.eup %4736 }
 0x19c   :  { %v4739_v42 = vpop.eup %4738  ;;  %4740 = vrcp.f32 %v932_v36  ;;  %v954_v45 = vadd.f32 1.0, %v4737_v30  ;;  %v944_v53 = vand.u32 2147483648, %v932_v36  ;;  %v942_v7 = vand.u32 2147483647, %v932_v36  ;;  %1691 = vperm.xlu1 %4715, %v1689_v10  }
 0x19d   :  { %v5201_v46 = vadd.f32 1.0, %v4739_v42  ;;  %vm938_vm1 = vweird.f32 %v932_v36  ;;  %v4561_v42 = vld [vmem:[#allocation11 + $0xec] sm:$0xf0] }
 0x19e   :  { %4742 = vrcp.f32 %v954_v45  ;;  %v966_v13 = vand.u32 2147483648, %v954_v45  ;;  %v964_v58 = vand.u32 2147483647, %v954_v45  ;;  %v945_v14 = vor.u32 1.1754944e-38, %v944_v53 }
 0x19f   :  { %4744 = vrcp.f32 %v5201_v46  ;;  %vm943_vm4 = vcmp.eq.f32.partialorder %v942_v7, 8.507059e+37  ;;  %vm960_vm6 = vweird.f32 %v954_v45  ;;  %v990_v26 = vand.u32 2147483648, %v5201_v46  ;;  %v3838_v7 = vld [vmem:[#allocation11 + $0xc8] sm:$0xf] }
 0x1a0   :  { %4746 = vtanh.f32 %v970_v0  ;;  %v967_v51 = vor.u32 1.1754944e-38, %v966_v13  ;;  %vm965_vm10 = vcmp.eq.f32.partialorder %v964_v58, 8.507059e+37  ;;  %vm984_vm14 = vweird.f32 %v5201_v46  ;;  %v3840_v13 = vld [vmem:[#allocation11 + $0xd8] sm:$0xf0] }
 0x1a1   :  { %v988_v63 = vand.u32 2147483647, %v5201_v46  ;;  %v991_v27 = vor.u32 1.1754944e-38, %v990_v26  ;;  %v3847_v44 = vor.u32 %v4561_v42, %v3846_v41 }
 0x1a2   :  { %v4741_v47 = vpop.eup %4740 }
 0x1a3   :  { %v934_v19 = vmul.f32 %v4741_v47, %v932_v36  ;;  %vm939_vm15 = vweird.f32 %v4741_v47  ;;  %1549 = vmatpush.bf16.msrb.mxu0 %v3847_v44  ;;  %v4548_v44 = vld [vmem:[#allocation11 + $0x8c] sm:$0xf] }
 0x1a4   :  { %v4743_v60 = vpop.eup %4742  ;;  %vm940_vm2 = vmor %vm938_vm1, %vm939_vm15  ;;  %3223 = vperm.xlu1 %4715, %v1689_v10   ;;  %vm989_vm1 = vcmp.eq.f32.partialorder %v988_v63, 8.507059e+37  ;;  %v4558_v10 = vld [vmem:[#allocation11 + $0xd4] sm:$0xf0] }
 0x1a5   :  { %v935_v61 = vsub.f32 1.0, %v934_v19  ;;  %v4745_v1 = vpop.eup %4744  ;;  %v956_v3 = vmul.f32 %v4743_v60, %v954_v45  ;;  %vm961_vm3 = vweird.f32 %v4743_v60  ;;  %v3848_v45 = vld [vmem:[#allocation11 + $0xf0] sm:$0xf0]  ;;  %v4560_v19 = vld [vmem:[#allocation11 + $0xec] sm:$0xf] }
 0x1a6   :  { %v980_v54 = vmul.f32 %v4745_v1, %v5201_v46  ;;  %vm962_vm7 = vmor %vm960_vm6, %vm961_vm3  ;;  %v4747_v18 = vpop.eup %4746  ;;  %vm985_vm13 = vweird.f32 %v4745_v1  ;;  %v3854_v46 = vld [vmem:[#allocation11 + $0xe8] sm:$0xf] }
 0x1a7   :  { %v936_v52 = vmul.f32 %v4741_v47, %v935_v61  ;;  %v957_v8 = vsub.f32 1.0, %v956_v3  ;;  %vm986_vm15 = vmor %vm984_vm14, %vm985_vm13  ;;  %v4557_v3 = vld [vmem:[#allocation11 + $0xcc] sm:$0xf0] }
 0x1a8   :  { %v981_v32 = vsub.f32 1.0, %v980_v54  ;;  %v3832_v54 = vld [vmem:[#allocation11 + $0xd0] sm:$0xf0] }
 0x1a9   :  { %v937_v12 = vadd.f32 %v4741_v47, %v936_v52  ;;  %v958_v37 = vmul.f32 %v4743_v60, %v957_v8  ;;  %v4555_v52 = vld [vmem:[#allocation11 + $0xc4] sm:$0xf] }
 0x1aa   :  { %v982_v22 = vmul.f32 %v4745_v1, %v981_v32  ;;  %v3835_v8 = vor.u32 %v4555_v52, %v3832_v54  ;;  %v4551_v32 = vld [vmem:[#allocation11 + $0xa4] sm:$0xf] }
 0x1ab   :  { %v941_v55 = vsel %vm940_vm2, %v4741_v47, %v937_v12  ;;  %v959_v33 = vadd.f32 %v4743_v60, %v958_v37  ;;  %v3851_v47 = vor.u32 %v4559_v43, %v3848_v45  ;;  %v4556_v12 = vld [vmem:[#allocation11 + $0xcc] sm:$0xf]  ;;  %v3839_v37 = vor.u32 %v4558_v10, %v3838_v7  ;;  %v4550_v43 = vld [vmem:[#allocation11 + $0x94] sm:$0xf0]  ;;  %v3808_v45 = vld [vmem:[#allocation11 + $0x98] sm:$0xf0] }
 0x1ac   :  { %v946_v16 = vsel %vm943_vm4, %v945_v14, %v941_v55  ;;  %v983_v25 = vadd.f32 %v4745_v1, %v982_v22  ;;  %3220 = vperm.xlu1 %4715, %v5206_v49   ;;  %v3843_v58 = vor.u32 %v4556_v12, %v3840_v13  ;;  %v3814_v55 = vld [vmem:[#allocation11 + $0xa0] sm:$0xf]  ;;  %v4553_v14 = vld [vmem:[#allocation11 + $0xac] sm:$0xf0]  ;;  %v4552_v22 = vld [vmem:[#allocation11 + $0xac] sm:$0xf] }
 0x1ad   :  { %v963_v50 = vsel %vm962_vm7, %v4743_v60, %v959_v33  ;;  %v995_v34 = vmul.f32 %v4747_v18, %v946_v16  ;;  %v3856_v60 = vld [vmem:[#allocation11 + $0xf8] sm:$0xf0]  ;;  %1562 = vmatpush.bf16.msrb.mxu1 %v3851_v47  ;;  %v3815_v33 = vor.u32 %v4553_v14, %v3814_v55  ;;  %v3816_v16 = vld [vmem:[#allocation11 + $0xb0] sm:$0xf0]  ;;  %v3811_v47 = vor.u32 %v4548_v44, %v3808_v45  ;;  %v4544_v13 = vld [vmem:[#allocation11 + $0x6c] sm:$0xf] }
 0x1ae   :  { %v968_v21 = vsel %vm965_vm10, %v967_v51, %v963_v50  ;;  %v987_v9 = vsel %vm986_vm15, %v4745_v1, %v983_v25  ;;  %v3859_v61 = vor.u32 %v4560_v19, %v3856_v60  ;;  %v3822_v51 = vld [vmem:[#allocation11 + $0xa8] sm:$0xf]  ;;  %v4554_v50 = vld [vmem:[#allocation11 + $0xb4] sm:$0xf0]  ;;  %v3782_v19 = vld [vmem:[#allocation11 + $0x60] sm:$0xf] }
 0x1af   :  { %v994_v5 = vmul.f32 %v968_v21, %v669_v20  ;;  %v992_v29 = vsel %vm989_vm1, %v991_v27, %v987_v9  ;;  %v3823_v21 = vor.u32 %v4554_v50, %v3822_v51  ;;  %v4545_v60 = vld [vmem:[#allocation11 + $0x6c] sm:$0xf0]  ;;  %v3768_v50 = vld [vmem:[#allocation11 + $0x50] sm:$0xf0] }
 0x1b0   :  { %1588 = vmatpush.bf16.msra.mxu3 %v3859_v61  ;;  %v4543_v61 = vld [vmem:[#allocation11 + $0x64] sm:$0xf] }
 0x1b1   :  { %v996_v24 = vadd.f32 %v995_v34, %v994_v5  ;;  %1563 = vmatpush.bf16.msrb.mxu1 %v3835_v8  ;;  %v3824_v34 = vld [vmem:[#allocation11 + $0xb8] sm:$0xf0] }
 0x1b2   :  { %v3827_v25 = vor.u32 %v4552_v22, %v3824_v34  ;;  %v4540_v34 = vld [vmem:[#allocation11 + $0x4c] sm:$0xf] }
 0x1b3   :  { %4748 = vtanh.f32 %v996_v24  ;;  %v5224_v2 = vsel %vm1009_vm12, %v996_v24, %v669_v20  ;;  %v3819_v20 = vor.u32 %v4551_v32, %v3816_v16  ;;  %v3766_v32 = vld [vmem:[#allocation11 + $0x40] sm:$0xf]  ;;  %v4539_v16 = vld [vmem:[#allocation11 + $0x44] sm:$0xf] }
 0x1b4   :  { %3226 = vperm.xlu1 %4715, %v5211_v31   ;;  %v3830_v31 = vld [vmem:[#allocation11 + $0xc0] sm:$0xf]  ;;  %1589 = vmatpush.bf16.msra.mxu3 %v3843_v58 }
 0x1b5   :  { %v3831_v53 = vor.u32 %v4557_v3, %v3830_v31  ;;  %1564 = vmatpush.bf16.msrb.mxu1 %v3819_v20  ;;  %v3790_v31 = vld [vmem:[#allocation11 + $0x68] sm:$0xf]  ;;  %v4546_v3 = vld [vmem:[#allocation11 + $0x74] sm:$0xf0] }
 0x1b6   :  { %v3791_v12 = vor.u32 %v4546_v3, %v3790_v31  ;;  %v4542_v20 = vld [vmem:[#allocation11 + $0x54] sm:$0xf0] }
 0x1b7   :  { %1550 = vmatpush.bf16.msrb.mxu0 %v3831_v53 }
 0x1b8   :  { %1590 = vmatpush.bf16.msra.mxu3 %v3827_v25  ;;  %v4537_v25 = vld [vmem:[#allocation11 + $0x2c] sm:$0xf0] }
 0x1b9   :  { %v4749_v28 = vpop.eup %4748 }
 0x1ba   :  { %v998_v35 = vmul.f32 %v4749_v28, %v992_v29  ;;  %v3798_v28 = vld [vmem:[#allocation11 + $0x80] sm:$0xf]  ;;  %v4549_v29 = vld [vmem:[#allocation11 + $0x8c] sm:$0xf0] }
 0x1bb   :  { %1551 = vmatpush.bf16.msrb.mxu0 %v3815_v33  ;;  %v4541_v33 = vld [vmem:[#allocation11 + $0x4c] sm:$0xf0] }
 0x1bc   :  { %v999_v36 = vpack.c.bf16 %v998_v35, %v998_v35  ;;  %v5231_v38 = vsel %vm1009_vm12, %v998_v35, %v5188_v17  ;;  %v4562_v17 = vld [vmem:[#allocation11 + $0xf4] sm:$0xf0]  ;;  %v3799_v35 = vor.u32 %v4549_v29, %v3798_v28  ;;  %1591 = vmatpush.bf16.msra.mxu3 %v3811_v47  ;;  %v3767_v51 = vor.u32 %v4541_v33, %v3766_v32  ;;  %v4531_v47 = vld [vmem:[#allocation11 + $0x4] sm:$0xf] }
 0x1bd   :  { %v1014_v39 = vpack.c.bf16 %v5231_v38, %v5231_v38  ;;  %v3855_v49 = vor.u32 %v4562_v17, %v3854_v46  ;;  %v4538_v28 = vld [vmem:[#allocation11 + $0x34] sm:$0xf0] }
 0x1be   :  { %1001 = vst [vmem:[#allocation5 + $0x1] sm:$0x1] %v999_v36  ;;  %v4547_v36 = vld [vmem:[#allocation11 + $0x84] sm:$0xf] }
 0x1bf   :  { %1215 = vmatmul.bf16.vlgmr.msra.gmra.mxu0 %v1014_v39  ;;  %1228 = vmatmul.bf16.vlgmr.msra.gmra.mxu1 %v1014_v39 }
 0x1c0   :  { %1241 = vmatmul.bf16.vlgmr.msrb.gmra.mxu2 %v1014_v39  ;;  %1254 = vmatmul.bf16.vlgmr.msrb.gmra.mxu3 %v1014_v39  ;;  %v3800_v39 = vld [vmem:[#allocation11 + $0x90] sm:$0xf0] }
 0x1c1   :  { %1575 = vmatpush.bf16.msra.mxu2 %v3855_v49  ;;  %v3803_v42 = vor.u32 %v4547_v36, %v3800_v39  ;;  %1552 = vmatpush.bf16.msrb.mxu0 %v3799_v35  ;;  %v4536_v39 = vld [vmem:[#allocation11 + $0x2c] sm:$0xf] }
 0x1c3   :  { %1565 = vmatpush.bf16.msrb.mxu1 %v3803_v42 }
 0x1c5   :  { %v3067_v30 = vld [vmem:[#allocation5 + $0x1] sm:$0x1]  ;;  %1576 = vmatpush.bf16.msra.mxu2 %v3839_v37  ;;  %v3792_v37 = vld [vmem:[#allocation11 + $0x78] sm:$0xf0] }
 0x1c6   :  { %3098 = vst [vmem:[#allocation1 + $0x1] ss:$9 sm:$0xff] %v3067_v30  ;;  %v3806_v30 = vld [vmem:[#allocation11 + $0x88] sm:$0xf]  ;;  %v3795_v14 = vor.u32 %v4544_v13, %v3792_v37 }
 0x1c7   :  { %v3807_v17 = vor.u32 %v4550_v43, %v3806_v30  ;;  %v3760_v30 = vld [vmem:[#allocation11 + $0x38] sm:$0xf0] }
 0x1c8   :  { %1592 = vmatpush.bf16.msra.mxu3 %v3795_v14 }
 0x1c9   :  { %1577 = vmatpush.bf16.msra.mxu2 %v3823_v21  ;;  %v3771_v21 = vor.u32 %v4539_v16, %v3768_v50 }
 0x1cd   :  { %1578 = vmatpush.bf16.msra.mxu2 %v3807_v17  ;;  %v4533_v17 = vld [vmem:[#allocation11 + $0xc] sm:$0xf0] }
 0x1d1   :  { %1579 = vmatpush.bf16.msra.mxu2 %v3791_v12 }
 0x23c   :  { %v1216_v0 = vpop.f32.mrf.mxu0  ;;  %v1229_v1 = vpop.f32.mrf.mxu1 }
 0x23d   :  { %v1263_v18 = vrot.slane %v1229_v1, 6  ;;  %v3784_v1 = vld [vmem:[#allocation11 + $0x70] sm:$0xf0] }
 0x23e   :  { %v3787_v10 = vor.u32 %v4543_v61, %v3784_v1  ;;  %v4534_v61 = vld [vmem:[#allocation11 + $0x14] sm:$0xf0]  ;;  %v3744_v1 = vld [vmem:[#allocation11 + $0x18] sm:$0xf0] }
 0x23f   :  { %v1266_v41 = vsel %vm275_vm5, %v1216_v0, %v1263_v18  ;;  %v3783_v0 = vor.u32 %v4545_v60, %v3782_v19  ;;  %v3774_v18 = vld [vmem:[#allocation11 + $0x48] sm:$0xf]  ;;  %v3736_v19 = vld [vmem:[#allocation11 + $0x10] sm:$0xf0] }
 0x240   :  { %1566 = vmatpush.bf16.msrb.mxu1 %v3787_v10  ;;  %v3775_v22 = vor.u32 %v4542_v20, %v3774_v18  ;;  %v3742_v60 = vld [vmem:[#allocation11 + $0x8] sm:$0xf]  ;;  %v3739_v3 = vor.u32 %v4531_v47, %v3736_v19  ;;  %v4593_v47 = vld [vmem:[#allocation11 + $0xec] sm:$0xf0]  ;;  %v4591_v19 = vld [vmem:[#allocation11 + $0xe4] sm:$0xf] }
 0x241   :  { %1553 = vmatpush.bf16.msrb.mxu0 %v3783_v0  ;;  %v4532_v0 = vld [vmem:[#allocation11 + $0xc] sm:$0xf] }
 0x242   :  { %1580 = vmatpush.bf16.msra.mxu2 %v3775_v22 }
 0x243   :  { %v1242_v5 = vpop.f32.mrf.mxu2  ;;  %v1255_v24 = vpop.f32.mrf.mxu3 }
 0x244   :  { %v1264_v26 = vrot.slane %v1242_v5, 4  ;;  %v1265_v63 = vrot.slane %v1255_v24, 2  ;;  %v1218_v9 = vpop.f32.mrf.mxu0  ;;  %v1231_v27 = vpop.f32.mrf.mxu1  ;;  %v3776_v5 = vld [vmem:[#allocation11 + $0x58] sm:$0xf0]  ;;  %v3750_v24 = vld [vmem:[#allocation11 + $0x20] sm:$0xf]  ;;  %1567 = vmatpush.bf16.msrb.mxu1 %v3771_v21 }
 0x245   :  { %1554 = vmatpush.bf16.msrb.mxu0 %v3767_v51  ;;  %v3752_v9 = vld [vmem:[#allocation11 + $0x30] sm:$0xf0]  ;;  %v3758_v27 = vld [vmem:[#allocation11 + $0x28] sm:$0xf] }
 0x246   :  { %v1267_v6 = vsel %vm277_vm8, %v1264_v26, %v1265_v63  ;;  %v4535_v26 = vld [vmem:[#allocation11 + $0x24] sm:$0xf]  ;;  %v3751_v63 = vor.u32 %v4537_v25, %v3750_v24  ;;  %v3759_v36 = vor.u32 %v4538_v28, %v3758_v27 }
 0x247   :  { %v1268_v46 = vsel %vm279_vm9, %v1266_v41, %v1267_v6  ;;  %v3755_v35 = vor.u32 %v4535_v26, %v3752_v9  ;;  %v3763_v6 = vor.u32 %v4536_v39, %v3760_v30 }
 0x248   :  { %v5240_v49 = vadd.f32 %v1268_v46, %v291_v23  ;;  %v3779_v23 = vor.u32 %v4540_v34, %v3776_v5  ;;  %1581 = vmatpush.bf16.msra.mxu2 %v3759_v36  ;;  %v3734_v46 = vld [vmem:[#allocation11] sm:$0xf] }
 0x249   :  { %1555 = vmatpush.bf16.msrb.mxu0 %v3751_v63  ;;  %1568 = vmatpush.bf16.msrb.mxu1 %v3755_v35  ;;  %v3735_v31 = vor.u32 %v4533_v17, %v3734_v46  ;;  %v1350_v63 = vpop.permute.xlu1 %1349  ;;  %v3978_v17 = vld [vmem:[#allocation11 + $0xe0] sm:$0xf] }
 0x24a   :  { %v3728_v52 = vmul.f32 -1.442695, %v5240_v49  ;;  %v1291_v53 = vrot.slane %v5240_v49, 2  ;;  %v1315_v54 = vrot.slane %v5240_v49, 6  ;;  %1593 = vmatpush.bf16.msra.mxu3 %v3779_v23  ;;  %v1312_v10 = vrot.slane %v5240_v49, 4 }
 0x24b   :  { %v1244_v7 = vpop.f32.mrf.mxu2  ;;  %v1257_v8 = vpop.f32.mrf.mxu3  ;;  %vm1351_vm14 = vcmp.eq.s32.totalorder %v1350_v63, 1 }
 0x24c   :  { %4750 = vpow2.f32 %v3728_v52  ;;  %v3729_v58 = vmul.f32 -1.442695, %v1291_v53  ;;  %v3730_v55 = vmul.f32 -1.442695, %v1315_v54  ;;  %v3743_v53 = vor.u32 %v4534_v61, %v3742_v60  ;;  %v3980_v61 = vld [vmem:[#allocation11 + $0xf0] sm:$0xf0] }
 0x24d   :  { %v3747_v54 = vor.u32 %v4532_v0, %v3744_v1  ;;  %1556 = vmatpush.bf16.msrb.mxu0 %v3735_v31  ;;  %1569 = vmatpush.bf16.msrb.mxu1 %v3739_v3  ;;  %v3979_v60 = vor.u32 %v4593_v47, %v3978_v17  ;;  %v3986_v0 = vld [vmem:[#allocation11 + $0xe8] sm:$0xf]  ;;  %v4594_v1 = vld [vmem:[#allocation11 + $0xf4] sm:$0xf0]  ;;  %v3983_v31 = vor.u32 %v4591_v19, %v3980_v61  ;;  %v4592_v3 = vld [vmem:[#allocation11 + $0xec] sm:$0xf] }
 0x24e   :  { %4752 = vpow2.f32 %v3729_v58  ;;  %1594 = vmatpush.bf16.msra.mxu3 %v3763_v6  ;;  %1582 = vmatpush.bf16.msra.mxu2 %v3743_v53  ;;  %v4582_v47 = vld [vmem:[#allocation11 + $0x94] sm:$0xf0]  ;;  %v4580_v19 = vld [vmem:[#allocation11 + $0x8c] sm:$0xf] }
 0x24f   :  { %4754 = vpow2.f32 %v3730_v55 }
 0x251   :  { %1891 = vmatpush.bf16.msra.mxu0 %v3979_v60  ;;  %1904 = vmatpush.bf16.msra.mxu1 %v3983_v31  ;;  %v3940_v60 = vld [vmem:[#allocation11 + $0x98] sm:$0xf0]  ;;  %v3914_v31 = vld [vmem:[#allocation11 + $0x60] sm:$0xf] }
 0x252   :  { %v4751_v29 = vpop.eup %4750  ;;  %1595 = vmatpush.bf16.msra.mxu3 %v3747_v54 }
 0x253   :  { %v1274_v41 = vadd.f32 1.0, %v4751_v29 }
 0x254   :  { %v4753_v42 = vpop.eup %4752 }
 0x255   :  { %v4755_v43 = vpop.eup %4754  ;;  %4756 = vrcp.f32 %v1274_v41  ;;  %v1296_v44 = vadd.f32 1.0, %v4753_v42  ;;  %v1286_v58 = vand.u32 2147483648, %v1274_v41  ;;  %v1284_v32 = vand.u32 2147483647, %v1274_v41 }
 0x256   :  { %v5245_v45 = vadd.f32 1.0, %v4755_v43  ;;  %vm1280_vm3 = vweird.f32 %v1274_v41 }
 0x257   :  { %4758 = vrcp.f32 %v1296_v44  ;;  %v1308_v16 = vand.u32 2147483648, %v1296_v44  ;;  %v1306_v18 = vand.u32 2147483647, %v1296_v44  ;;  %v1287_v49 = vor.u32 1.1754944e-38, %v1286_v58  ;;  %v3970_v58 = vld [vmem:[#allocation11 + $0xc8] sm:$0xf] }
 0x258   :  { %4760 = vrcp.f32 %v5245_v45  ;;  %vm1285_vm7 = vcmp.eq.f32.partialorder %v1284_v32, 8.507059e+37  ;;  %vm1302_vm10 = vweird.f32 %v1296_v44  ;;  %v1332_v35 = vand.u32 2147483648, %v5245_v45  ;;  %v4588_v32 = vld [vmem:[#allocation11 + $0xcc] sm:$0xf] }
 0x259   :  { %4762 = vtanh.f32 %v1312_v10  ;;  %v1309_v5 = vor.u32 1.1754944e-38, %v1308_v16  ;;  %vm1307_vm13 = vcmp.eq.f32.partialorder %v1306_v18, 8.507059e+37  ;;  %vm1326_vm1 = vweird.f32 %v5245_v45  ;;  %v4589_v10 = vld [vmem:[#allocation11 + $0xcc] sm:$0xf0] }
 0x25a   :  { %v1330_v39 = vand.u32 2147483647, %v5245_v45  ;;  %v4585_v18 = vld [vmem:[#allocation11 + $0xac] sm:$0xf0] }
 0x25b   :  { %v4757_v52 = vpop.eup %4756 }
 0x25c   :  { %v1276_v7 = vmul.f32 %v4757_v52, %v1274_v41  ;;  %vm1281_vm2 = vweird.f32 %v4757_v52  ;;  %v1333_v41 = vor.u32 1.1754944e-38, %v1332_v35 }
 0x25d   :  { %v4759_v8 = vpop.eup %4758  ;;  %vm1282_vm6 = vmor %vm1280_vm3, %vm1281_vm2  ;;  %vm1331_vm3 = vcmp.eq.f32.partialorder %v1330_v39, 8.507059e+37 }
 0x25e   :  { %v4761_v12 = vpop.eup %4760  ;;  %v1277_v13 = vsub.f32 1.0, %v1276_v7  ;;  %v1298_v37 = vmul.f32 %v4759_v8, %v1296_v44  ;;  %vm1303_vm4 = vweird.f32 %v4759_v8 }
 0x25f   :  { %v1322_v55 = vmul.f32 %v4761_v12, %v5245_v45  ;;  %vm1304_vm12 = vmor %vm1302_vm10, %vm1303_vm4  ;;  %v4763_v24 = vpop.eup %4762  ;;  %vm1327_vm15 = vweird.f32 %v4761_v12 }
 0x260   :  { %v1278_v14 = vmul.f32 %v4757_v52, %v1277_v13  ;;  %v1299_v33 = vsub.f32 1.0, %v1298_v37  ;;  %vm1328_vm2 = vmor %vm1326_vm1, %vm1327_vm15  ;;  %v3964_v37 = vld [vmem:[#allocation11 + $0xd0] sm:$0xf0] }
 0x261   :  { %v1323_v20 = vsub.f32 1.0, %v1322_v55 }
 0x262   :  { %v1279_v51 = vadd.f32 %v4757_v52, %v1278_v14  ;;  %v1300_v50 = vmul.f32 %v4759_v8, %v1299_v33  ;;  %v4590_v14 = vld [vmem:[#allocation11 + $0xd4] sm:$0xf0]  ;;  %v3972_v33 = vld [vmem:[#allocation11 + $0xd8] sm:$0xf0] }
 0x263   :  { %v1324_v26 = vmul.f32 %v4761_v12, %v1323_v20  ;;  %v3971_v16 = vor.u32 %v4590_v14, %v3970_v58  ;;  %v3898_v58 = vld [vmem:[#allocation11 + $0x40] sm:$0xf] }
 0x264   :  { %v1283_v21 = vsel %vm1282_vm6, %v4757_v52, %v1279_v51  ;;  %v1301_v22 = vadd.f32 %v4759_v8, %v1300_v50  ;;  %v3988_v52 = vld [vmem:[#allocation11 + $0xf8] sm:$0xf0]  ;;  %v3975_v51 = vor.u32 %v4588_v32, %v3972_v33  ;;  %v3946_v50 = vld [vmem:[#allocation11 + $0xa0] sm:$0xf] }
 0x265   :  { %v1288_v34 = vsel %vm1285_vm7, %v1287_v49, %v1283_v21  ;;  %v1325_v29 = vadd.f32 %v4761_v12, %v1324_v26  ;;  %v3991_v53 = vor.u32 %v4592_v3, %v3988_v52  ;;  %v4583_v49 = vld [vmem:[#allocation11 + $0xa4] sm:$0xf]  ;;  %v3947_v20 = vor.u32 %v4585_v18, %v3946_v50  ;;  %v3948_v21 = vld [vmem:[#allocation11 + $0xb0] sm:$0xf0]  ;;  %v3956_v26 = vld [vmem:[#allocation11 + $0xb8] sm:$0xf0] }
 0x266   :  { %v1305_v23 = vsel %vm1304_vm12, %v4759_v8, %v1301_v22  ;;  %v1337_v27 = vmul.f32 %v4763_v24, %v1288_v34  ;;  %v3962_v8 = vld [vmem:[#allocation11 + $0xc0] sm:$0xf]  ;;  %v3954_v22 = vld [vmem:[#allocation11 + $0xa8] sm:$0xf]  ;;  %v4586_v34 = vld [vmem:[#allocation11 + $0xb4] sm:$0xf0] }
 0x267   :  { %v1310_v25 = vsel %vm1307_vm13, %v1309_v5, %v1305_v23  ;;  %v1329_v30 = vsel %vm1328_vm2, %v4761_v12, %v1325_v29  ;;  %v4587_v12 = vld [vmem:[#allocation11 + $0xc4] sm:$0xf]  ;;  %1930 = vmatpush.bf16.msrb.mxu3 %v3991_v53  ;;  %v3963_v13 = vor.u32 %v4589_v10, %v3962_v8  ;;  %v3951_v23 = vor.u32 %v4583_v49, %v3948_v21  ;;  %v4578_v8 = vld [vmem:[#allocation11 + $0x74] sm:$0xf0]  ;;  %v4573_v50 = vld [vmem:[#allocation11 + $0x4c] sm:$0xf0] }
 0x268   :  { %v1336_v9 = vmul.f32 %v1310_v25, %v5224_v2  ;;  %v1334_v42 = vsel %vm1331_vm3, %v1333_v41, %v1329_v30  ;;  %v3967_v55 = vor.u32 %v4587_v12, %v3964_v37  ;;  %v3955_v24 = vor.u32 %v4586_v34, %v3954_v22  ;;  %v4584_v25 = vld [vmem:[#allocation11 + $0xac] sm:$0xf]  ;;  %v3930_v41 = vld [vmem:[#allocation11 + $0x80] sm:$0xf]  ;;  %v4575_v3 = vld [vmem:[#allocation11 + $0x64] sm:$0xf] }
 0x269   :  { %1892 = vmatpush.bf16.msra.mxu0 %v3963_v13  ;;  %v4576_v13 = vld [vmem:[#allocation11 + $0x6c] sm:$0xf]  ;;  %v3924_v37 = vld [vmem:[#allocation11 + $0x78] sm:$0xf0]  ;;  %v4571_v18 = vld [vmem:[#allocation11 + $0x44] sm:$0xf]  ;;  %v3899_v22 = vor.u32 %v4573_v50, %v3898_v58 }
 0x26a   :  { %v1338_v28 = vadd.f32 %v1337_v27, %v1336_v9  ;;  %1905 = vmatpush.bf16.msra.mxu1 %v3967_v55  ;;  %v295_v9 = vrot.slane %v5128_v11, 6  ;;  %v3900_v49 = vld [vmem:[#allocation11 + $0x50] sm:$0xf0]  ;;  %v3906_v34 = vld [vmem:[#allocation11 + $0x48] sm:$0xf] }
 0x26b   :  { %1931 = vmatpush.bf16.msrb.mxu3 %v3975_v51  ;;  %v3927_v51 = vor.u32 %v4576_v13, %v3924_v37 }
 0x26c   :  { %4764 = vtanh.f32 %v1338_v28  ;;  %v5254_v36 = vsel %vm1351_vm14, %v1338_v28, %v5224_v2  ;;  %v3959_v28 = vor.u32 %v4584_v25, %v3956_v26  ;;  %v3908_v25 = vld [vmem:[#allocation11 + $0x58] sm:$0xf0] }
 0x26d   :  { %1893 = vmatpush.bf16.msra.mxu0 %v3947_v20 }
 0x26e   :  { %1906 = vmatpush.bf16.msra.mxu1 %v3951_v23  ;;  %v4574_v23 = vld [vmem:[#allocation11 + $0x54] sm:$0xf0] }
 0x26f   :  { %1932 = vmatpush.bf16.msrb.mxu3 %v3959_v28  ;;  %v3907_v26 = vor.u32 %v4574_v23, %v3906_v34  ;;  %v4567_v28 = vld [vmem:[#allocation11 + $0x24] sm:$0xf] }
 0x272   :  { %v4765_v6 = vpop.eup %4764 }
 0x273   :  { %v1340_v43 = vmul.f32 %v4765_v6, %v1334_v42  ;;  %v4581_v6 = vld [vmem:[#allocation11 + $0x8c] sm:$0xf0] }
 0x274   :  { %v3931_v42 = vor.u32 %v4581_v6, %v3930_v41  ;;  %v4568_v6 = vld [vmem:[#allocation11 + $0x2c] sm:$0xf] }
 0x275   :  { %v1341_v44 = vpack.c.bf16 %v1340_v43, %v1340_v43  ;;  %v5260_v46 = vsel %vm1351_vm14, %v1340_v43, %v5231_v38  ;;  %v3987_v38 = vor.u32 %v4594_v1, %v3986_v0  ;;  %v4579_v43 = vld [vmem:[#allocation11 + $0x84] sm:$0xf]  ;;  %v3943_v1 = vor.u32 %v4580_v19, %v3940_v60  ;;  %v3874_v19 = vld [vmem:[#allocation11 + $0x8] sm:$0xf]  ;;  %v4566_v60 = vld [vmem:[#allocation11 + $0x14] sm:$0xf0] }
 0x276   :  { %v1356_v2 = vpack.c.bf16 %v5260_v46, %v5260_v46  ;;  %1894 = vmatpush.bf16.msra.mxu0 %v3931_v42  ;;  %v3892_v42 = vld [vmem:[#allocation11 + $0x38] sm:$0xf0] }
 0x277   :  { %1343 = vst [vmem:[#allocation5 + $0x2] sm:$0x1] %v1341_v44  ;;  %1917 = vmatpush.bf16.msrb.mxu2 %v3987_v38  ;;  %v3932_v44 = vld [vmem:[#allocation11 + $0x90] sm:$0xf0]  ;;  %v4577_v38 = vld [vmem:[#allocation11 + $0x6c] sm:$0xf0]  ;;  %1933 = vmatpush.bf16.msrb.mxu3 %v3943_v1 }
 0x278   :  { %1557 = vmatmul.bf16.vlgmr.msrb.gmra.mxu0 %v1356_v2  ;;  %1570 = vmatmul.bf16.vlgmr.msrb.gmra.mxu1 %v1356_v2  ;;  %v3935_v17 = vor.u32 %v4579_v43, %v3932_v44  ;;  %v3915_v53 = vor.u32 %v4577_v38, %v3914_v31  ;;  %v3866_v43 = vld [vmem:[#allocation11] sm:$0xf]  ;;  %v3876_v31 = vld [vmem:[#allocation11 + $0x18] sm:$0xf0] }
 0x279   :  { %1583 = vmatmul.bf16.vlgmr.msra.gmra.mxu2 %v1356_v2  ;;  %1596 = vmatmul.bf16.vlgmr.msra.gmra.mxu3 %v1356_v2  ;;  %v3938_v2 = vld [vmem:[#allocation11 + $0x88] sm:$0xf] }
 0x27a   :  { %v3939_v0 = vor.u32 %v4582_v47, %v3938_v2  ;;  %1907 = vmatpush.bf16.msra.mxu1 %v3935_v17  ;;  %1895 = vmatpush.bf16.msra.mxu0 %v3915_v53  ;;  %v3895_v2 = vor.u32 %v4568_v6, %v3892_v42  ;;  %v3868_v17 = vld [vmem:[#allocation11 + $0x10] sm:$0xf0] }
 0x27b   :  { %1918 = vmatpush.bf16.msrb.mxu2 %v3971_v16  ;;  %1934 = vmatpush.bf16.msrb.mxu3 %v3927_v51 }
 0x27e   :  { %v3068_v45 = vld [vmem:[#allocation5 + $0x2] sm:$0x1]  ;;  %1896 = vmatpush.bf16.msra.mxu0 %v3899_v22 }
 0x27f   :  { %3101 = vst [vmem:[#allocation1 + $0x2] ss:$9 sm:$0xff] %v3068_v45  ;;  %1919 = vmatpush.bf16.msrb.mxu2 %v3955_v24  ;;  %v4572_v24 = vld [vmem:[#allocation11 + $0x4c] sm:$0xf] }
 0x283   :  { %1920 = vmatpush.bf16.msrb.mxu2 %v3939_v0 }
 0x2f5   :  { %v1558_v54 = vpop.f32.mrf.mxu0  ;;  %v1571_v7 = vpop.f32.mrf.mxu1 }
 0x2f6   :  { %v1605_v5 = vrot.slane %v1571_v7, 6  ;;  %v3916_v7 = vld [vmem:[#allocation11 + $0x70] sm:$0xf0] }
 0x2f7   :  { %v3919_v10 = vor.u32 %v4575_v3, %v3916_v7  ;;  %v3875_v7 = vor.u32 %v4566_v60, %v3874_v19 }
 0x2f8   :  { %v1608_v45 = vsel %vm275_vm5, %v1558_v54, %v1605_v5  ;;  %v3922_v54 = vld [vmem:[#allocation11 + $0x68] sm:$0xf]  ;;  %v3903_v5 = vor.u32 %v4571_v18, %v3900_v49 }
 0x2f9   :  { %v3923_v12 = vor.u32 %v4578_v8, %v3922_v54  ;;  %1908 = vmatpush.bf16.msra.mxu1 %v3919_v10 }
 0x2fb   :  { %1921 = vmatpush.bf16.msrb.mxu2 %v3923_v12  ;;  %v4846_v12 = vld [vmem:[%s5412_s1] sm:$0x3] }
 0x2fc   :  { %v1584_v63 = vpop.f32.mrf.mxu2  ;;  %v1597_v27 = vpop.f32.mrf.mxu3  ;;  %vm4127_vm4 = vcmp.gt.s32.totalorder %v4846_v12, 5  ;;  %vm4391_vm6 = vcmp.gt.s32.totalorder %v4846_v12, 7 }
 0x2fd   :  { %v1606_v29 = vrot.slane %v1584_v63, 4  ;;  %v1607_v35 = vrot.slane %v1597_v27, 2  ;;  %v1560_v39 = vpop.f32.mrf.mxu0  ;;  %v1573_v30 = vpop.f32.mrf.mxu1  ;;  %v3911_v63 = vor.u32 %v4572_v24, %v3908_v25  ;;  %v4569_v27 = vld [vmem:[#allocation11 + $0x2c] sm:$0xf0]  ;;  %1909 = vmatpush.bf16.msra.mxu1 %v3903_v5  ;;  %v2373_v37 = vsel %vm4127_vm4, 1, %v4986_v62 }
 0x2fe   :  { %v3890_v39 = vld [vmem:[#allocation11 + $0x28] sm:$0xf]  ;;  %v4570_v30 = vld [vmem:[#allocation11 + $0x34] sm:$0xf0]  ;;  %2375 = vperm.xlu2 %4716, %v2373_v37  }
 0x2ff   :  { %v1609_v11 = vsel %vm277_vm8, %v1606_v29, %v1607_v35  ;;  %v3884_v35 = vld [vmem:[#allocation11 + $0x30] sm:$0xf0]  ;;  %1922 = vmatpush.bf16.msrb.mxu2 %v3907_v26  ;;  %1935 = vmatpush.bf16.msrb.mxu3 %v3911_v63  ;;  %v3891_v44 = vor.u32 %v4570_v30, %v3890_v39  ;;  %v1692_v30 = vpop.permute.xlu1 %1691 }
 0x300   :  { %v1610_v61 = vsel %vm279_vm9, %v1608_v45, %v1609_v11  ;;  %v3887_v41 = vor.u32 %v4567_v28, %v3884_v35  ;;  %v4565_v45 = vld [vmem:[#allocation11 + $0xc] sm:$0xf0]  ;;  %v4563_v11 = vld [vmem:[#allocation11 + $0x4] sm:$0xf]  ;;  %vm1693_vm3 = vcmp.eq.s32.totalorder %v1692_v30, 1 }
 0x301   :  { %v5268_v52 = vadd.f32 %v1610_v61, %v295_v9  ;;  %v3882_v9 = vld [vmem:[#allocation11 + $0x20] sm:$0xf]  ;;  %v4564_v61 = vld [vmem:[#allocation11 + $0xc] sm:$0xf]  ;;  %v3867_v1 = vor.u32 %v4565_v45, %v3866_v43  ;;  %v3871_v3 = vor.u32 %v4563_v11, %v3868_v17 }
 0x302   :  { %v3883_v29 = vor.u32 %v4569_v27, %v3882_v9  ;;  %1910 = vmatpush.bf16.msra.mxu1 %v3887_v41  ;;  %v3879_v54 = vor.u32 %v4564_v61, %v3876_v31  ;;  %v4623_v31 = vld [vmem:[#allocation11 + $0xe4] sm:$0xf] }
 0x303   :  { %v3860_v55 = vmul.f32 -1.442695, %v5268_v52  ;;  %v1633_v14 = vrot.slane %v5268_v52, 2  ;;  %v1657_v32 = vrot.slane %v5268_v52, 6  ;;  %1923 = vmatpush.bf16.msrb.mxu2 %v3891_v44  ;;  %1936 = vmatpush.bf16.msrb.mxu3 %v3895_v2 }
 0x304   :  { %v1586_v33 = vpop.f32.mrf.mxu2  ;;  %v1599_v16 = vpop.f32.mrf.mxu3  ;;  %1897 = vmatpush.bf16.msra.mxu0 %v3883_v29 }
 0x305   :  { %4766 = vpow2.f32 %v3860_v55  ;;  %v3861_v20 = vmul.f32 -1.442695, %v1633_v14  ;;  %v3862_v21 = vmul.f32 -1.442695, %v1657_v32  ;;  %v1654_v32 = vrot.slane %v5268_v52, 4 }
 0x306   :  { %1911 = vmatpush.bf16.msra.mxu1 %v3871_v3  ;;  %v4112_v3 = vld [vmem:[#allocation11 + $0xf0] sm:$0xf0] }
 0x307   :  { %4768 = vpow2.f32 %v3861_v20  ;;  %1924 = vmatpush.bf16.msrb.mxu2 %v3875_v7  ;;  %1937 = vmatpush.bf16.msrb.mxu3 %v3879_v54  ;;  %v4626_v7 = vld [vmem:[#allocation11 + $0xf4] sm:$0xf0]  ;;  %v4115_v54 = vor.u32 %v4623_v31, %v4112_v3 }
 0x308   :  { %4770 = vpow2.f32 %v3862_v21  ;;  %1898 = vmatpush.bf16.msra.mxu0 %v3867_v1  ;;  %v3057_v21 = vsel %vm4391_vm6, 1, %v4986_v62  ;;  %v4625_v1 = vld [vmem:[#allocation11 + $0xec] sm:$0xf0] }
 0x309   :  { %3235 = vperm.xlu2 %4716, %v3057_v21  }
 0x30a   :  { %2246 = vmatpush.bf16.msrb.mxu1 %v4115_v54  ;;  %v4609_v54 = vld [vmem:[#allocation11 + $0x6c] sm:$0xf0] }
 0x30b   :  { %v4767_v47 = vpop.eup %4766 }
 0x30c   :  { %v1616_v0 = vadd.f32 1.0, %v4767_v47 }
 0x30d   :  { %v4769_v38 = vpop.eup %4768 }
 0x30e   :  { %v4771_v53 = vpop.eup %4770  ;;  %4772 = vrcp.f32 %v1616_v0  ;;  %v1638_v8 = vadd.f32 1.0, %v4769_v38  ;;  %v1628_v50 = vand.u32 2147483648, %v1616_v0  ;;  %v1626_v49 = vand.u32 2147483647, %v1616_v0 }
 0x30f   :  { %v5273_v10 = vadd.f32 1.0, %v4771_v53  ;;  %vm1622_vm10 = vweird.f32 %v1616_v0  ;;  %v4118_v53 = vld [vmem:[#allocation11 + $0xe8] sm:$0xf] }
 0x310   :  { %4774 = vrcp.f32 %v1638_v8  ;;  %v1650_v34 = vand.u32 2147483648, %v1638_v8  ;;  %v1648_v52 = vand.u32 2147483647, %v1638_v8  ;;  %v1629_v24 = vor.u32 1.1754944e-38, %v1628_v50  ;;  %v4622_v50 = vld [vmem:[#allocation11 + $0xd4] sm:$0xf0] }
 0x311   :  { %4776 = vrcp.f32 %v5273_v10  ;;  %vm1627_vm14 = vcmp.eq.f32.partialorder %v1626_v49, 8.507059e+37  ;;  %vm1644_vm15 = vweird.f32 %v1638_v8  ;;  %3229 = vperm.xlu2 %4716, %v2373_v37   ;;  %v1674_v42 = vand.u32 2147483648, %v5273_v10  ;;  %v4104_v49 = vld [vmem:[#allocation11 + $0xd8] sm:$0xf0] }
 0x312   :  { %4778 = vtanh.f32 %v1654_v32  ;;  %v1651_v9 = vor.u32 1.1754944e-38, %v1650_v34  ;;  %vm1649_vm2 = vcmp.eq.f32.partialorder %v1648_v52, 8.507059e+37  ;;  %vm1668_vm6 = vweird.f32 %v5273_v10  ;;  %v4617_v34 = vld [vmem:[#allocation11 + $0xac] sm:$0xf0] }
 0x313   :  { %v1672_v44 = vand.u32 2147483647, %v5273_v10  ;;  %v1675_v45 = vor.u32 1.1754944e-38, %v1674_v42  ;;  %v4062_v42 = vld [vmem:[#allocation11 + $0x80] sm:$0xf] }
 0x314   :  { %v4773_v13 = vpop.eup %4772 }
 0x315   :  { %v1618_v58 = vmul.f32 %v4773_v13, %v1616_v0  ;;  %vm1623_vm7 = vweird.f32 %v4773_v13  ;;  %v4110_v0 = vld [vmem:[#allocation11 + $0xe0] sm:$0xf] }
 0x316   :  { %v4775_v55 = vpop.eup %4774  ;;  %vm1624_vm12 = vmor %vm1622_vm10, %vm1623_vm7  ;;  %vm1673_vm10 = vcmp.eq.f32.partialorder %v1672_v44, 8.507059e+37  ;;  %v4111_v38 = vor.u32 %v4625_v1, %v4110_v0  ;;  %v4613_v44 = vld [vmem:[#allocation11 + $0x8c] sm:$0xf0]  ;;  %v4612_v0 = vld [vmem:[#allocation11 + $0x8c] sm:$0xf] }
 0x317   :  { %v1619_v14 = vsub.f32 1.0, %v1618_v58  ;;  %v4777_v33 = vpop.eup %4776  ;;  %v1640_v16 = vmul.f32 %v4775_v55, %v1638_v8  ;;  %vm1645_vm13 = vweird.f32 %v4775_v55  ;;  %v4624_v8 = vld [vmem:[#allocation11 + $0xec] sm:$0xf]  ;;  %v4094_v58 = vld [vmem:[#allocation11 + $0xc0] sm:$0xf] }
 0x318   :  { %v1664_v18 = vmul.f32 %v4777_v33, %v5273_v10  ;;  %vm1646_vm1 = vmor %vm1644_vm15, %vm1645_vm13  ;;  %v4779_v62 = vpop.eup %4778  ;;  %vm1669_vm4 = vweird.f32 %v4777_v33  ;;  %v4120_v10 = vld [vmem:[#allocation11 + $0xf8] sm:$0xf0]  ;;  %2233 = vmatpush.bf16.msrb.mxu0 %v4111_v38 }
 0x319   :  { %v1620_v51 = vmul.f32 %v4773_v13, %v1619_v14  ;;  %v1641_v20 = vsub.f32 1.0, %v1640_v16  ;;  %vm1670_vm7 = vmor %vm1668_vm6, %vm1669_vm4  ;;  %3059 = vperm.xlu2 %4716, %v3057_v21   ;;  %v4123_v12 = vor.u32 %v4624_v8, %v4120_v10  ;;  %v4619_v14 = vld [vmem:[#allocation11 + $0xc4] sm:$0xf]  ;;  %v4102_v16 = vld [vmem:[#allocation11 + $0xc8] sm:$0xf] }
 0x31a   :  { %v1665_v25 = vsub.f32 1.0, %v1664_v18  ;;  %v4620_v18 = vld [vmem:[#allocation11 + $0xcc] sm:$0xf]  ;;  %v4072_v1 = vld [vmem:[#allocation11 + $0x98] sm:$0xf0] }
 0x31b   :  { %v1621_v22 = vadd.f32 %v4773_v13, %v1620_v51  ;;  %v1642_v5 = vmul.f32 %v4775_v55, %v1641_v20  ;;  %2272 = vmatpush.bf16.msra.mxu3 %v4123_v12  ;;  %v4103_v20 = vor.u32 %v4622_v50, %v4102_v16  ;;  %v4107_v21 = vor.u32 %v4620_v18, %v4104_v49  ;;  %v4048_v10 = vld [vmem:[#allocation11 + $0x70] sm:$0xf0]  ;;  %v4054_v12 = vld [vmem:[#allocation11 + $0x68] sm:$0xf]  ;;  %v4608_v16 = vld [vmem:[#allocation11 + $0x6c] sm:$0xf] }
 0x31c   :  { %v1666_v29 = vmul.f32 %v4777_v33, %v1665_v25  ;;  %v4618_v25 = vld [vmem:[#allocation11 + $0xb4] sm:$0xf0]  ;;  %v4075_v3 = vor.u32 %v4612_v0, %v4072_v1  ;;  %v4597_v0 = vld [vmem:[#allocation11 + $0xc] sm:$0xf0]  ;;  %v4595_v1 = vld [vmem:[#allocation11 + $0x4] sm:$0xf] }
 0x31d   :  { %v1625_v23 = vsel %vm1624_vm12, %v4773_v13, %v1621_v22  ;;  %v1643_v26 = vadd.f32 %v4775_v55, %v1642_v5  ;;  %v4078_v22 = vld [vmem:[#allocation11 + $0xa0] sm:$0xf]  ;;  %v4615_v5 = vld [vmem:[#allocation11 + $0xa4] sm:$0xf] }
 0x31e   :  { %v1630_v63 = vsel %vm1627_vm14, %v1629_v24, %v1625_v23  ;;  %v1667_v6 = vadd.f32 %v4777_v33, %v1666_v29  ;;  %v4079_v52 = vor.u32 %v4617_v34, %v4078_v22  ;;  %v4080_v23 = vld [vmem:[#allocation11 + $0xb0] sm:$0xf0]  ;;  %v4086_v24 = vld [vmem:[#allocation11 + $0xa8] sm:$0xf]  ;;  %v4603_v22 = vld [vmem:[#allocation11 + $0x44] sm:$0xf] }
 0x31f   :  { %v1647_v27 = vsel %vm1646_vm1, %v4775_v55, %v1643_v26  ;;  %v1679_v35 = vmul.f32 %v4779_v62, %v1630_v63  ;;  %v4621_v55 = vld [vmem:[#allocation11 + $0xcc] sm:$0xf0]  ;;  %2273 = vmatpush.bf16.msra.mxu3 %v4107_v21  ;;  %v4083_v63 = vor.u32 %v4615_v5, %v4080_v23  ;;  %v4088_v62 = vld [vmem:[#allocation11 + $0xb8] sm:$0xf0]  ;;  %v4032_v5 = vld [vmem:[#allocation11 + $0x50] sm:$0xf0] }
 0x320   :  { %v1652_v28 = vsel %vm1649_vm2, %v1651_v9, %v1647_v27  ;;  %v1671_v2 = vsel %vm1670_vm7, %v4777_v33, %v1667_v6  ;;  %v4095_v32 = vor.u32 %v4621_v55, %v4094_v58  ;;  %v4096_v33 = vld [vmem:[#allocation11 + $0xd0] sm:$0xf0]  ;;  %v4087_v9 = vor.u32 %v4618_v25, %v4086_v24  ;;  %v4616_v27 = vld [vmem:[#allocation11 + $0xac] sm:$0xf]  ;;  %v4605_v21 = vld [vmem:[#allocation11 + $0x4c] sm:$0xf0] }
 0x321   :  { %v1678_v39 = vmul.f32 %v1652_v28, %v5254_v36  ;;  %v1676_v17 = vsel %vm1673_vm10, %v1675_v45, %v1671_v2  ;;  %v4099_v51 = vor.u32 %v4619_v14, %v4096_v33  ;;  %v4063_v2 = vor.u32 %v4613_v44, %v4062_v42  ;;  %v4611_v45 = vld [vmem:[#allocation11 + $0x84] sm:$0xf]  ;;  %v4606_v23 = vld [vmem:[#allocation11 + $0x54] sm:$0xf0]  ;;  %v4600_v44 = vld [vmem:[#allocation11 + $0x2c] sm:$0xf] }
 0x322   :  { %2234 = vmatpush.bf16.msrb.mxu0 %v4095_v32  ;;  %v4035_v24 = vor.u32 %v4603_v22, %v4032_v5 }
 0x323   :  { %v1680_v41 = vadd.f32 %v1679_v35, %v1678_v39  ;;  %2247 = vmatpush.bf16.msrb.mxu1 %v4099_v51  ;;  %v4091_v35 = vor.u32 %v4616_v27, %v4088_v62  ;;  %v4056_v51 = vld [vmem:[#allocation11 + $0x78] sm:$0xf0]  ;;  %v4014_v27 = vld [vmem:[#allocation11 + $0x20] sm:$0xf]  ;;  %v4601_v62 = vld [vmem:[#allocation11 + $0x2c] sm:$0xf0] }
 0x324   :  { %v4059_v49 = vor.u32 %v4608_v16, %v4056_v51 }
 0x325   :  { %4780 = vtanh.f32 %v1680_v41  ;;  %v5287_v43 = vsel %vm1693_vm3, %v1680_v41, %v5254_v36  ;;  %2274 = vmatpush.bf16.msra.mxu3 %v4091_v35  ;;  %v4016_v35 = vld [vmem:[#allocation11 + $0x30] sm:$0xf0] }
 0x326   :  { %2235 = vmatpush.bf16.msrb.mxu0 %v4079_v52  ;;  %v4038_v52 = vld [vmem:[#allocation11 + $0x48] sm:$0xf] }
 0x327   :  { %2248 = vmatpush.bf16.msrb.mxu1 %v4083_v63  ;;  %v4039_v25 = vor.u32 %v4606_v23, %v4038_v52  ;;  %v4040_v63 = vld [vmem:[#allocation11 + $0x58] sm:$0xf0] }
 0x329   :  { %2275 = vmatpush.bf16.msra.mxu3 %v4075_v3  ;;  %v4598_v3 = vld [vmem:[#allocation11 + $0x14] sm:$0xf0] }
 0x32a   :  { %2236 = vmatpush.bf16.msrb.mxu0 %v4063_v2  ;;  %v4024_v2 = vld [vmem:[#allocation11 + $0x38] sm:$0xf0] }
 0x32b   :  { %v4781_v11 = vpop.eup %4780 }
 0x32c   :  { %v1682_v47 = vmul.f32 %v4781_v11, %v1676_v17  ;;  %v4064_v11 = vld [vmem:[#allocation11 + $0x90] sm:$0xf0]  ;;  %v4070_v17 = vld [vmem:[#allocation11 + $0x88] sm:$0xf] }
 0x32d   :  { %2276 = vmatpush.bf16.msra.mxu3 %v4059_v49 }
 0x32e   :  { %v1683_v19 = vpack.c.bf16 %v1682_v47, %v1682_v47  ;;  %v5293_v60 = vsel %vm1693_vm3, %v1682_v47, %v5260_v46  ;;  %v4119_v46 = vor.u32 %v4626_v7, %v4118_v53  ;;  %v4046_v7 = vld [vmem:[#allocation11 + $0x60] sm:$0xf] }
 0x32f   :  { %v1698_v36 = vpack.c.bf16 %v5293_v60, %v5293_v60  ;;  %v4047_v8 = vor.u32 %v4609_v54, %v4046_v7  ;;  %v4596_v7 = vld [vmem:[#allocation11 + $0xc] sm:$0xf]  ;;  %v4008_v54 = vld [vmem:[#allocation11 + $0x18] sm:$0xf0] }
 0x330   :  { %1685 = vst [vmem:[#allocation5 + $0x3] sm:$0x1] %v1683_v19  ;;  %2259 = vmatpush.bf16.msra.mxu2 %v4119_v46  ;;  %v4607_v46 = vld [vmem:[#allocation11 + $0x64] sm:$0xf] }
 0x331   :  { %1899 = vmatmul.bf16.vlgmr.msra.gmra.mxu0 %v1698_v36  ;;  %1912 = vmatmul.bf16.vlgmr.msra.gmra.mxu1 %v1698_v36 }
 0x332   :  { %1925 = vmatmul.bf16.vlgmr.msrb.gmra.mxu2 %v1698_v36  ;;  %1938 = vmatmul.bf16.vlgmr.msrb.gmra.mxu3 %v1698_v36  ;;  %v4067_v36 = vor.u32 %v4611_v45, %v4064_v11  ;;  %v4027_v11 = vor.u32 %v4600_v44, %v4024_v2 }
 0x333   :  { %2237 = vmatpush.bf16.msrb.mxu0 %v4047_v8 }
 0x334   :  { %2260 = vmatpush.bf16.msra.mxu2 %v4103_v20  ;;  %2249 = vmatpush.bf16.msrb.mxu1 %v4067_v36  ;;  %v4030_v20 = vld [vmem:[#allocation11 + $0x40] sm:$0xf] }
 0x335   :  { %v4031_v34 = vor.u32 %v4605_v21, %v4030_v20 }
 0x337   :  { %v3069_v61 = vld [vmem:[#allocation5 + $0x3] sm:$0x1]  ;;  %2238 = vmatpush.bf16.msrb.mxu0 %v4031_v34 }
 0x338   :  { %3104 = vst [vmem:[#allocation1 + $0x3] ss:$9 sm:$0xff] %v3069_v61  ;;  %2261 = vmatpush.bf16.msra.mxu2 %v4087_v9  ;;  %v4614_v61 = vld [vmem:[#allocation11 + $0x94] sm:$0xf0] }
 0x339   :  { %v4071_v38 = vor.u32 %v4614_v61, %v4070_v17  ;;  %v3998_v61 = vld [vmem:[#allocation11] sm:$0xf] }
 0x33c   :  { %2262 = vmatpush.bf16.msra.mxu2 %v4071_v38  ;;  %v4006_v38 = vld [vmem:[#allocation11 + $0x8] sm:$0xf] }
 0x3ae   :  { %v1900_v13 = vpop.f32.mrf.mxu0  ;;  %v1913_v37 = vpop.f32.mrf.mxu1 }
 0x3af   :  { %v1947_v26 = vrot.slane %v1913_v37, 6 }
 0x3b1   :  { %v1950_v47 = vsel %vm275_vm5, %v1900_v13, %v1947_v26  ;;  %v4610_v13 = vld [vmem:[#allocation11 + $0x74] sm:$0xf0]  ;;  %v4604_v26 = vld [vmem:[#allocation11 + $0x4c] sm:$0xf] }
 0x3b2   :  { %v4055_v33 = vor.u32 %v4610_v13, %v4054_v12  ;;  %v4043_v9 = vor.u32 %v4604_v26, %v4040_v63  ;;  %v4007_v12 = vor.u32 %v4598_v3, %v4006_v38  ;;  %v4011_v13 = vor.u32 %v4596_v7, %v4008_v54  ;;  %v4658_v38 = vld [vmem:[#allocation11 + $0xf4] sm:$0xf0]  ;;  %v4656_v7 = vld [vmem:[#allocation11 + $0xec] sm:$0xf]  ;;  %v4252_v54 = vld [vmem:[#allocation11 + $0xf8] sm:$0xf0] }
 0x3b4   :  { %2263 = vmatpush.bf16.msra.mxu2 %v4055_v33  ;;  %2277 = vmatpush.bf16.msra.mxu3 %v4043_v9 }
 0x3b5   :  { %v1926_v28 = vpop.f32.mrf.mxu2  ;;  %v1939_v29 = vpop.f32.mrf.mxu3 }
 0x3b6   :  { %v1948_v39 = vrot.slane %v1926_v28, 4  ;;  %v1949_v30 = vrot.slane %v1939_v29, 2  ;;  %v1902_v41 = vpop.f32.mrf.mxu0  ;;  %v1915_v6 = vpop.f32.mrf.mxu1  ;;  %v4599_v28 = vld [vmem:[#allocation11 + $0x24] sm:$0xf]  ;;  %v4015_v29 = vor.u32 %v4601_v62, %v4014_v27 }
 0x3b7   :  { %v4019_v6 = vor.u32 %v4599_v28, %v4016_v35  ;;  %v2034_v27 = vpop.permute.xlu2 %2033 }
 0x3b8   :  { %v1951_v19 = vsel %vm277_vm8, %v1948_v39, %v1949_v30  ;;  %2264 = vmatpush.bf16.msra.mxu2 %v4039_v25  ;;  %v4022_v39 = vld [vmem:[#allocation11 + $0x28] sm:$0xf]  ;;  %v4602_v30 = vld [vmem:[#allocation11 + $0x34] sm:$0xf0]  ;;  %2239 = vmatpush.bf16.msrb.mxu0 %v4015_v29  ;;  %vm2035_vm6 = vcmp.eq.s32.totalorder %v2034_v27, 1 }
 0x3b9   :  { %v1952_v31 = vsel %vm279_vm9, %v1950_v47, %v1951_v19  ;;  %v4023_v42 = vor.u32 %v4602_v30, %v4022_v39  ;;  %2278 = vmatpush.bf16.msra.mxu3 %v4027_v11 }
 0x3ba   :  { %v5301_v53 = vadd.f32 %v1952_v31, %v5140_v56  ;;  %v4051_v56 = vor.u32 %v4607_v46, %v4048_v10  ;;  %v4000_v31 = vld [vmem:[#allocation11 + $0x10] sm:$0xf0]  ;;  %v3999_v46 = vor.u32 %v4597_v0, %v3998_v61  ;;  %v4655_v61 = vld [vmem:[#allocation11 + $0xe4] sm:$0xf] }
 0x3bb   :  { %v4003_v8 = vor.u32 %v4595_v1, %v4000_v31  ;;  %v4244_v1 = vld [vmem:[#allocation11 + $0xf0] sm:$0xf0]  ;;  %v4250_v31 = vld [vmem:[#allocation11 + $0xe8] sm:$0xf] }
 0x3bc   :  { %v3992_v37 = vmul.f32 -1.442695, %v5301_v53  ;;  %v1975_v58 = vrot.slane %v5301_v53, 2  ;;  %v1999_v55 = vrot.slane %v5301_v53, 6  ;;  %2250 = vmatpush.bf16.msrb.mxu1 %v4051_v56  ;;  %2265 = vmatpush.bf16.msra.mxu2 %v4023_v42  ;;  %v4247_v3 = vor.u32 %v4655_v61, %v4244_v1  ;;  %v4178_v1 = vld [vmem:[#allocation11 + $0x60] sm:$0xf] }
 0x3bd   :  { %v1928_v14 = vpop.f32.mrf.mxu2  ;;  %v1941_v32 = vpop.f32.mrf.mxu3  ;;  %2240 = vmatpush.bf16.msrb.mxu0 %v3999_v46  ;;  %2279 = vmatpush.bf16.msra.mxu3 %v4011_v13  ;;  %v4255_v46 = vor.u32 %v4656_v7, %v4252_v54  ;;  %v4653_v13 = vld [vmem:[#allocation11 + $0xcc] sm:$0xf0]  ;;  %v4180_v7 = vld [vmem:[#allocation11 + $0x70] sm:$0xf0]  ;;  %v4186_v54 = vld [vmem:[#allocation11 + $0x68] sm:$0xf] }
 0x3be   :  { %4782 = vpow2.f32 %v3992_v37  ;;  %v3993_v50 = vmul.f32 -1.442695, %v1975_v58  ;;  %v3994_v18 = vmul.f32 -1.442695, %v1999_v55  ;;  %v1996_v55 = vrot.slane %v5301_v53, 4 }
 0x3c0   :  { %4784 = vpow2.f32 %v3993_v50  ;;  %2251 = vmatpush.bf16.msrb.mxu1 %v4035_v24  ;;  %2266 = vmatpush.bf16.msra.mxu2 %v4007_v12  ;;  %v4226_v12 = vld [vmem:[#allocation11 + $0xc0] sm:$0xf] }
 0x3c1   :  { %4786 = vpow2.f32 %v3994_v18  ;;  %2614 = vmatpush.bf16.msrb.mxu3 %v4255_v46  ;;  %v4642_v46 = vld [vmem:[#allocation11 + $0x74] sm:$0xf0] }
 0x3c4   :  { %v4783_v41 = vpop.eup %4782  ;;  %2252 = vmatpush.bf16.msrb.mxu1 %v4019_v6 }
 0x3c5   :  { %v1958_v45 = vadd.f32 1.0, %v4783_v41 }
 0x3c6   :  { %v4785_v17 = vpop.eup %4784 }
 0x3c7   :  { %v4787_v47 = vpop.eup %4786  ;;  %4788 = vrcp.f32 %v1958_v45  ;;  %v1980_v19 = vadd.f32 1.0, %v4785_v17  ;;  %v1970_v33 = vand.u32 2147483648, %v1958_v45  ;;  %v1968_v50 = vand.u32 2147483647, %v1958_v45 }
 0x3c8   :  { %v5306_v36 = vadd.f32 1.0, %v4787_v47  ;;  %2253 = vmatpush.bf16.msrb.mxu1 %v4003_v8  ;;  %vm1964_vm13 = vweird.f32 %v1958_v45 }
 0x3c9   :  { %4790 = vrcp.f32 %v1980_v19  ;;  %v1992_v49 = vand.u32 2147483648, %v1980_v19  ;;  %v1990_v22 = vand.u32 2147483647, %v1980_v19  ;;  %v1971_v53 = vor.u32 1.1754944e-38, %v1970_v33  ;;  %v4652_v33 = vld [vmem:[#allocation11 + $0xcc] sm:$0xf] }
 0x3ca   :  { %4792 = vrcp.f32 %v5306_v36  ;;  %vm1969_vm1 = vcmp.eq.f32.partialorder %v1968_v50, 8.507059e+37  ;;  %vm1986_vm2 = vweird.f32 %v1980_v19  ;;  %v2016_v39 = vand.u32 2147483648, %v5306_v36 }
 0x3cb   :  { %4794 = vtanh.f32 %v1996_v55  ;;  %v1993_v24 = vor.u32 1.1754944e-38, %v1992_v49  ;;  %vm1991_vm4 = vcmp.eq.f32.partialorder %v1990_v22, 8.507059e+37  ;;  %vm2010_vm10 = vweird.f32 %v5306_v36  ;;  %v4228_v55 = vld [vmem:[#allocation11 + $0xd0] sm:$0xf0]  ;;  %v4649_v49 = vld [vmem:[#allocation11 + $0xac] sm:$0xf0] }
 0x3cc   :  { %v2014_v41 = vand.u32 2147483647, %v5306_v36  ;;  %v2017_v42 = vor.u32 1.1754944e-38, %v2016_v39  ;;  %2588 = vmatpush.bf16.msra.mxu1 %v4247_v3  ;;  %v4212_v22 = vld [vmem:[#allocation11 + $0xb0] sm:$0xf0] }
 0x3cd   :  { %v4789_v10 = vpop.eup %4788  ;;  %v4194_v39 = vld [vmem:[#allocation11 + $0x80] sm:$0xf] }
 0x3ce   :  { %v1960_v37 = vmul.f32 %v4789_v10, %v1958_v45  ;;  %vm1965_vm12 = vweird.f32 %v4789_v10 }
 0x3cf   :  { %v4791_v58 = vpop.eup %4790  ;;  %vm1966_vm15 = vmor %vm1964_vm13, %vm1965_vm12  ;;  %vm2015_vm13 = vcmp.eq.f32.partialorder %v2014_v41, 8.507059e+37  ;;  %v4645_v41 = vld [vmem:[#allocation11 + $0x8c] sm:$0xf0] }
 0x3d0   :  { %v4793_v14 = vpop.eup %4792  ;;  %v1961_v32 = vsub.f32 1.0, %v1960_v37  ;;  %v1982_v56 = vmul.f32 %v4791_v58, %v1980_v19  ;;  %vm1987_vm14 = vweird.f32 %v4791_v58  ;;  %v4242_v19 = vld [vmem:[#allocation11 + $0xe0] sm:$0xf]  ;;  %v4651_v37 = vld [vmem:[#allocation11 + $0xc4] sm:$0xf] }
 0x3d1   :  { %v2006_v16 = vmul.f32 %v4793_v14, %v5306_v36  ;;  %vm1988_vm3 = vmor %vm1986_vm2, %vm1987_vm14  ;;  %v4795_v26 = vpop.eup %4794  ;;  %vm2011_vm7 = vweird.f32 %v4793_v14  ;;  %v4657_v36 = vld [vmem:[#allocation11 + $0xec] sm:$0xf0] }
 0x3d2   :  { %v1962_v51 = vmul.f32 %v4789_v10, %v1961_v32  ;;  %v1983_v18 = vsub.f32 1.0, %v1982_v56  ;;  %vm2012_vm12 = vmor %vm2010_vm10, %vm2011_vm7  ;;  %v4243_v0 = vor.u32 %v4657_v36, %v4242_v19  ;;  %v4231_v32 = vor.u32 %v4651_v37, %v4228_v55  ;;  %v4654_v56 = vld [vmem:[#allocation11 + $0xd4] sm:$0xf0]  ;;  %v4204_v19 = vld [vmem:[#allocation11 + $0x98] sm:$0xf0] }
 0x3d3   :  { %v2007_v34 = vsub.f32 1.0, %v2006_v16  ;;  %v4236_v16 = vld [vmem:[#allocation11 + $0xd8] sm:$0xf0]  ;;  %v4162_v37 = vld [vmem:[#allocation11 + $0x40] sm:$0xf] }
 0x3d4   :  { %v1963_v20 = vadd.f32 %v4789_v10, %v1962_v51  ;;  %v1984_v21 = vmul.f32 %v4791_v58, %v1983_v18  ;;  %2575 = vmatpush.bf16.msra.mxu0 %v4243_v0  ;;  %v4239_v50 = vor.u32 %v4652_v33, %v4236_v16  ;;  %2589 = vmatpush.bf16.msra.mxu1 %v4231_v32  ;;  %v4210_v18 = vld [vmem:[#allocation11 + $0xa0] sm:$0xf]  ;;  %v4637_v16 = vld [vmem:[#allocation11 + $0x4c] sm:$0xf0] }
 0x3d5   :  { %v2008_v9 = vmul.f32 %v4793_v14, %v2007_v34  ;;  %v4650_v34 = vld [vmem:[#allocation11 + $0xb4] sm:$0xf0] }
 0x3d6   :  { %v1967_v5 = vsel %vm1966_vm15, %v4789_v10, %v1963_v20  ;;  %v1985_v52 = vadd.f32 %v4791_v58, %v1984_v21  ;;  %v4647_v20 = vld [vmem:[#allocation11 + $0xa4] sm:$0xf]  ;;  %2615 = vmatpush.bf16.msrb.mxu3 %v4239_v50  ;;  %v4211_v21 = vor.u32 %v4649_v49, %v4210_v18  ;;  %v4164_v50 = vld [vmem:[#allocation11 + $0x50] sm:$0xf0] }
 0x3d7   :  { %v1972_v23 = vsel %vm1969_vm1, %v1971_v53, %v1967_v5  ;;  %v2009_v35 = vadd.f32 %v4793_v14, %v2008_v9  ;;  %v4218_v53 = vld [vmem:[#allocation11 + $0xa8] sm:$0xf] }
 0x3d8   :  { %v1989_v25 = vsel %vm1988_vm3, %v4791_v58, %v1985_v52  ;;  %v2021_v28 = vmul.f32 %v4795_v26, %v1972_v23  ;;  %v4227_v58 = vor.u32 %v4653_v13, %v4226_v12  ;;  %v4215_v52 = vor.u32 %v4647_v20, %v4212_v22  ;;  %v4640_v12 = vld [vmem:[#allocation11 + $0x6c] sm:$0xf]  ;;  %v4188_v13 = vld [vmem:[#allocation11 + $0x78] sm:$0xf0] }
 0x3d9   :  { %v1994_v63 = vsel %vm1991_vm4, %v1993_v24, %v1989_v25  ;;  %v2013_v6 = vsel %vm2012_vm12, %v4793_v14, %v2009_v35  ;;  %v4234_v14 = vld [vmem:[#allocation11 + $0xc8] sm:$0xf]  ;;  %v4219_v23 = vor.u32 %v4650_v34, %v4218_v53  ;;  %v4648_v24 = vld [vmem:[#allocation11 + $0xac] sm:$0xf]  ;;  %v4220_v25 = vld [vmem:[#allocation11 + $0xb8] sm:$0xf0]  ;;  %v4191_v33 = vor.u32 %v4640_v12, %v4188_v13 }
 0x3da   :  { %v2020_v62 = vmul.f32 %v1994_v63, %v5287_v43  ;;  %v2018_v2 = vsel %vm2015_vm13, %v2017_v42, %v2013_v6  ;;  %2576 = vmatpush.bf16.msra.mxu0 %v4227_v58  ;;  %v4235_v51 = vor.u32 %v4654_v56, %v4234_v14  ;;  %v302_v63 = vrot.slane %v5143_v57, 2  ;;  %2590 = vmatpush.bf16.msra.mxu1 %v4215_v52  ;;  %v4643_v42 = vld [vmem:[#allocation11 + $0x84] sm:$0xf]  ;;  %v4638_v53 = vld [vmem:[#allocation11 + $0x54] sm:$0xf0] }
 0x3db   :  { %v4223_v27 = vor.u32 %v4648_v24, %v4220_v25  ;;  %v4195_v6 = vor.u32 %v4645_v41, %v4194_v39  ;;  %v4163_v20 = vor.u32 %v4637_v16, %v4162_v37  ;;  %v4636_v34 = vld [vmem:[#allocation11 + $0x4c] sm:$0xf]  ;;  %v4146_v24 = vld [vmem:[#allocation11 + $0x20] sm:$0xf]  ;;  %v4633_v25 = vld [vmem:[#allocation11 + $0x2c] sm:$0xf0] }
 0x3dc   :  { %v2022_v29 = vadd.f32 %v2021_v28, %v2020_v62  ;;  %v4130_v39 = vld [vmem:[#allocation11] sm:$0xf] }
 0x3dd   :  { %2616 = vmatpush.bf16.msrb.mxu3 %v4223_v27  ;;  %v4154_v27 = vld [vmem:[#allocation11 + $0x28] sm:$0xf] }
 0x3de   :  { %4796 = vtanh.f32 %v2022_v29  ;;  %v5315_v30 = vsel %vm2035_vm6, %v2022_v29, %v5287_v43  ;;  %2577 = vmatpush.bf16.msra.mxu0 %v4211_v21  ;;  %v4170_v21 = vld [vmem:[#allocation11 + $0x48] sm:$0xf] }
 0x3df   :  { %v4171_v52 = vor.u32 %v4638_v53, %v4170_v21 }
 0x3e2   :  { %2578 = vmatpush.bf16.msra.mxu0 %v4195_v6 }
 0x3e4   :  { %v4797_v44 = vpop.eup %4796 }
 0x3e5   :  { %v2024_v45 = vmul.f32 %v4797_v44, %v2018_v2  ;;  %v4196_v44 = vld [vmem:[#allocation11 + $0x90] sm:$0xf0]  ;;  %v4202_v2 = vld [vmem:[#allocation11 + $0x88] sm:$0xf] }
 0x3e7   :  { %v2025_v11 = vpack.c.bf16 %v2024_v45, %v2024_v45  ;;  %v5321_v17 = vsel %vm2035_vm6, %v2024_v45, %v5293_v60  ;;  %v4251_v60 = vor.u32 %v4658_v38, %v4250_v31  ;;  %v4641_v31 = vld [vmem:[#allocation11 + $0x6c] sm:$0xf0]  ;;  %v4639_v38 = vld [vmem:[#allocation11 + $0x64] sm:$0xf] }
 0x3e8   :  { %v2040_v43 = vpack.c.bf16 %v5321_v17, %v5321_v17 }
 0x3e9   :  { %2027 = vst [vmem:[#allocation5 + $0x4] sm:$0x1] %v2025_v11  ;;  %2601 = vmatpush.bf16.msrb.mxu2 %v4251_v60  ;;  %v4199_v11 = vor.u32 %v4643_v42, %v4196_v44  ;;  %v4179_v60 = vor.u32 %v4641_v31, %v4178_v1  ;;  %v4629_v42 = vld [vmem:[#allocation11 + $0xc] sm:$0xf0]  ;;  %v4627_v44 = vld [vmem:[#allocation11 + $0x4] sm:$0xf] }
 0x3ea   :  { %2241 = vmatmul.bf16.vlgmr.msrb.gmra.mxu0 %v2040_v43  ;;  %2254 = vmatmul.bf16.vlgmr.msrb.gmra.mxu1 %v2040_v43 }
 0x3eb   :  { %2267 = vmatmul.bf16.vlgmr.msra.gmra.mxu2 %v2040_v43  ;;  %2280 = vmatmul.bf16.vlgmr.msra.gmra.mxu3 %v2040_v43  ;;  %v4646_v43 = vld [vmem:[#allocation11 + $0x94] sm:$0xf0] }
 0x3ec   :  { %v4203_v61 = vor.u32 %v4646_v43, %v4202_v2  ;;  %2591 = vmatpush.bf16.msra.mxu1 %v4199_v11  ;;  %2579 = vmatpush.bf16.msra.mxu0 %v4179_v60  ;;  %v4132_v2 = vld [vmem:[#allocation11 + $0x10] sm:$0xf0]  ;;  %v4630_v11 = vld [vmem:[#allocation11 + $0x14] sm:$0xf0]  ;;  %v4628_v43 = vld [vmem:[#allocation11 + $0xc] sm:$0xf] }
 0x3ed   :  { %2602 = vmatpush.bf16.msrb.mxu2 %v4235_v51  ;;  %v4635_v51 = vld [vmem:[#allocation11 + $0x44] sm:$0xf] }
 0x3ee   :  { %v4167_v22 = vor.u32 %v4635_v51, %v4164_v50 }
 0x3f0   :  { %v3070_v47 = vld [vmem:[#allocation5 + $0x4] sm:$0x1]  ;;  %2580 = vmatpush.bf16.msra.mxu0 %v4163_v20 }
 0x3f1   :  { %3107 = vst [vmem:[#allocation1 + $0x4] ss:$9 sm:$0xff] %v3070_v47  ;;  %2603 = vmatpush.bf16.msrb.mxu2 %v4219_v23  ;;  %v4644_v47 = vld [vmem:[#allocation11 + $0x8c] sm:$0xf] }
 0x3f2   :  { %v4207_v0 = vor.u32 %v4644_v47, %v4204_v19  ;;  %v4131_v19 = vor.u32 %v4629_v42, %v4130_v39 }
 0x3f4   :  { %2617 = vmatpush.bf16.msrb.mxu3 %v4207_v0  ;;  %v4135_v0 = vor.u32 %v4627_v44, %v4132_v2  ;;  %v4374_v2 = vld [vmem:[#allocation11 + $0xe0] sm:$0xf] }
 0x3f5   :  { %2604 = vmatpush.bf16.msrb.mxu2 %v4203_v61 }
 0x3f8   :  { %2618 = vmatpush.bf16.msrb.mxu3 %v4191_v33 }
 0x467   :  { %v2242_v8 = vpop.f32.mrf.mxu0  ;;  %v2255_v10 = vpop.f32.mrf.mxu1 }
 0x468   :  { %v2289_v5 = vrot.slane %v2255_v10, 6  ;;  %v4187_v10 = vor.u32 %v4642_v46, %v4186_v54 }
 0x46a   :  { %v2292_v45 = vsel %vm275_vm5, %v2242_v8, %v2289_v5  ;;  %v4183_v8 = vor.u32 %v4639_v38, %v4180_v7  ;;  %2605 = vmatpush.bf16.msrb.mxu2 %v4187_v10  ;;  %v4172_v5 = vld [vmem:[#allocation11 + $0x58] sm:$0xf0] }
 0x46b   :  { %v4175_v23 = vor.u32 %v4636_v34, %v4172_v5 }
 0x46c   :  { %2592 = vmatpush.bf16.msra.mxu1 %v4183_v8 }
 0x46d   :  { %2619 = vmatpush.bf16.msrb.mxu3 %v4175_v23 }
 0x46e   :  { %v2268_v26 = vpop.f32.mrf.mxu2  ;;  %v2281_v9 = vpop.f32.mrf.mxu3  ;;  %2606 = vmatpush.bf16.msrb.mxu2 %v4171_v52 }
 0x46f   :  { %v2290_v62 = vrot.slane %v2268_v26, 4  ;;  %v2291_v28 = vrot.slane %v2281_v9, 2  ;;  %v2244_v29 = vpop.f32.mrf.mxu0  ;;  %v2257_v35 = vpop.f32.mrf.mxu1  ;;  %v4631_v26 = vld [vmem:[#allocation11 + $0x24] sm:$0xf]  ;;  %v4148_v9 = vld [vmem:[#allocation11 + $0x30] sm:$0xf0] }
 0x470   :  { %2593 = vmatpush.bf16.msra.mxu1 %v4167_v22  ;;  %v4632_v29 = vld [vmem:[#allocation11 + $0x2c] sm:$0xf]  ;;  %v4156_v35 = vld [vmem:[#allocation11 + $0x38] sm:$0xf0] }
 0x471   :  { %v2293_v57 = vsel %vm277_vm8, %v2290_v62, %v2291_v28  ;;  %v4634_v62 = vld [vmem:[#allocation11 + $0x34] sm:$0xf0]  ;;  %v4151_v28 = vor.u32 %v4631_v26, %v4148_v9  ;;  %v4159_v6 = vor.u32 %v4632_v29, %v4156_v35 }
 0x472   :  { %v2294_v36 = vsel %vm279_vm9, %v2292_v45, %v2293_v57  ;;  %v4155_v41 = vor.u32 %v4634_v62, %v4154_v27  ;;  %v4138_v57 = vld [vmem:[#allocation11 + $0x8] sm:$0xf] }
 0x473   :  { %v5329_v3 = vadd.f32 %v2294_v36, %v302_v63  ;;  %v4147_v63 = vor.u32 %v4633_v25, %v4146_v24  ;;  %v4140_v36 = vld [vmem:[#allocation11 + $0x18] sm:$0xf0]  ;;  %2620 = vmatpush.bf16.msrb.mxu3 %v4159_v6  ;;  %v4139_v31 = vor.u32 %v4630_v11, %v4138_v57  ;;  %v2376_v25 = vpop.permute.xlu2 %2375  ;;  %v4687_v57 = vld [vmem:[#allocation11 + $0xe4] sm:$0xf] }
 0x474   :  { %2594 = vmatpush.bf16.msra.mxu1 %v4151_v28  ;;  %2607 = vmatpush.bf16.msrb.mxu2 %v4155_v41  ;;  %v4143_v38 = vor.u32 %v4628_v43, %v4140_v36  ;;  %vm2377_vm10 = vcmp.eq.s32.totalorder %v2376_v25, 1  ;;  %v4376_v43 = vld [vmem:[#allocation11 + $0xf0] sm:$0xf0] }
 0x475   :  { %v4124_v58 = vmul.f32 -1.442695, %v5329_v3  ;;  %v2317_v55 = vrot.slane %v5329_v3, 2  ;;  %v2341_v14 = vrot.slane %v5329_v3, 6  ;;  %2581 = vmatpush.bf16.msra.mxu0 %v4147_v63  ;;  %v2338_v12 = vrot.slane %v5329_v3, 4 }
 0x476   :  { %v2270_v32 = vpop.f32.mrf.mxu2  ;;  %v2283_v56 = vpop.f32.mrf.mxu3  ;;  %v4379_v36 = vor.u32 %v4687_v57, %v4376_v43  ;;  %v4673_v43 = vld [vmem:[#allocation11 + $0x6c] sm:$0xf0] }
 0x477   :  { %4798 = vpow2.f32 %v4124_v58  ;;  %v4125_v18 = vmul.f32 -1.442695, %v2317_v55  ;;  %v4126_v49 = vmul.f32 -1.442695, %v2341_v14  ;;  %2621 = vmatpush.bf16.msrb.mxu3 %v4143_v38 }
 0x478   :  { %2595 = vmatpush.bf16.msra.mxu1 %v4135_v0  ;;  %2608 = vmatpush.bf16.msrb.mxu2 %v4139_v31  ;;  %v4384_v0 = vld [vmem:[#allocation11 + $0xf8] sm:$0xf0] }
 0x479   :  { %4800 = vpow2.f32 %v4125_v18  ;;  %2582 = vmatpush.bf16.msra.mxu0 %v4131_v19  ;;  %v4690_v19 = vld [vmem:[#allocation11 + $0xf4] sm:$0xf0] }
 0x47a   :  { %4802 = vpow2.f32 %v4126_v49 }
 0x47c   :  { %2930 = vmatpush.bf16.msrb.mxu1 %v4379_v36 }
 0x47d   :  { %v4799_v45 = vpop.eup %4798 }
 0x47e   :  { %v2300_v47 = vadd.f32 1.0, %v4799_v45  ;;  %v4689_v45 = vld [vmem:[#allocation11 + $0xec] sm:$0xf0] }
 0x47f   :  { %v4801_v61 = vpop.eup %4800  ;;  %v4375_v11 = vor.u32 %v4689_v45, %v4374_v2 }
 0x480   :  { %v4803_v1 = vpop.eup %4802  ;;  %4804 = vrcp.f32 %v2300_v47  ;;  %v2322_v60 = vadd.f32 1.0, %v4801_v61  ;;  %v2312_v55 = vand.u32 2147483648, %v2300_v47  ;;  %v2310_v32 = vand.u32 2147483647, %v2300_v47  ;;  %v4688_v61 = vld [vmem:[#allocation11 + $0xec] sm:$0xf] }
 0x481   :  { %v2346_v7 = vadd.f32 1.0, %v4803_v1  ;;  %vm2306_vm15 = vweird.f32 %v2300_v47  ;;  %2917 = vmatpush.bf16.msrb.mxu0 %v4375_v11  ;;  %v4387_v1 = vor.u32 %v4688_v61, %v4384_v0  ;;  %v4310_v11 = vld [vmem:[#allocation11 + $0x60] sm:$0xf]  ;;  %v4318_v61 = vld [vmem:[#allocation11 + $0x68] sm:$0xf] }
 0x482   :  { %4806 = vrcp.f32 %v2322_v60  ;;  %v2334_v16 = vand.u32 2147483648, %v2322_v60  ;;  %v2332_v50 = vand.u32 2147483647, %v2322_v60  ;;  %v2313_v49 = vor.u32 1.1754944e-38, %v2312_v55  ;;  %v4674_v0 = vld [vmem:[#allocation11 + $0x74] sm:$0xf0] }
 0x483   :  { %4808 = vrcp.f32 %v2346_v7  ;;  %vm2311_vm3 = vcmp.eq.f32.partialorder %v2310_v32, 8.507059e+37  ;;  %vm2328_vm4 = vweird.f32 %v2322_v60  ;;  %v2358_v9 = vand.u32 2147483648, %v2346_v7  ;;  %2956 = vmatpush.bf16.msra.mxu3 %v4387_v1  ;;  %v4342_v32 = vld [vmem:[#allocation11 + $0xa0] sm:$0xf] }
 0x484   :  { %4810 = vtanh.f32 %v2338_v12  ;;  %v2335_v22 = vor.u32 1.1754944e-38, %v2334_v16  ;;  %vm2333_vm7 = vcmp.eq.f32.partialorder %v2332_v50, 8.507059e+37  ;;  %vm2352_vm13 = vweird.f32 %v2346_v7  ;;  %v4350_v50 = vld [vmem:[#allocation11 + $0xa8] sm:$0xf] }
 0x485   :  { %v2356_v62 = vand.u32 2147483647, %v2346_v7  ;;  %v2359_v29 = vor.u32 1.1754944e-38, %v2358_v9  ;;  %v4677_v9 = vld [vmem:[#allocation11 + $0x8c] sm:$0xf0]  ;;  %v4311_v36 = vor.u32 %v4673_v43, %v4310_v11 }
 0x486   :  { %v4805_v54 = vpop.eup %4804 }
 0x487   :  { %v2302_v46 = vmul.f32 %v4805_v54, %v2300_v47  ;;  %vm2307_vm14 = vweird.f32 %v4805_v54  ;;  %v4382_v47 = vld [vmem:[#allocation11 + $0xe8] sm:$0xf] }
 0x488   :  { %v4807_v8 = vpop.eup %4806  ;;  %vm2308_vm1 = vmor %vm2306_vm15, %vm2307_vm14  ;;  %vm2357_vm15 = vcmp.eq.f32.partialorder %v2356_v62, 8.507059e+37 }
 0x489   :  { %v2303_v10 = vsub.f32 1.0, %v2302_v46  ;;  %v4809_v13 = vpop.eup %4808  ;;  %v2324_v37 = vmul.f32 %v4807_v8, %v2322_v60  ;;  %vm2329_vm2 = vweird.f32 %v4807_v8  ;;  %v4358_v60 = vld [vmem:[#allocation11 + $0xc0] sm:$0xf] }
 0x48a   :  { %v2348_v14 = vmul.f32 %v4809_v13, %v2346_v7  ;;  %vm2330_vm6 = vmor %vm2328_vm4, %vm2329_vm2  ;;  %v4811_v34 = vpop.eup %4810  ;;  %vm2353_vm12 = vweird.f32 %v4809_v13  ;;  %v4685_v7 = vld [vmem:[#allocation11 + $0xcc] sm:$0xf0] }
 0x48b   :  { %v2304_v58 = vmul.f32 %v4805_v54, %v2303_v10  ;;  %v2325_v56 = vsub.f32 1.0, %v2324_v37  ;;  %vm2354_vm14 = vmor %vm2352_vm13, %vm2353_vm12  ;;  %v4359_v46 = vor.u32 %v4685_v7, %v4358_v60  ;;  %v4366_v10 = vld [vmem:[#allocation11 + $0xc8] sm:$0xf]  ;;  %v4684_v37 = vld [vmem:[#allocation11 + $0xcc] sm:$0xf] }
 0x48c   :  { %v2349_v20 = vsub.f32 1.0, %v2348_v14  ;;  %v4320_v60 = vld [vmem:[#allocation11 + $0x78] sm:$0xf0]  ;;  %v4294_v7 = vld [vmem:[#allocation11 + $0x40] sm:$0xf] }
 0x48d   :  { %v2305_v33 = vadd.f32 %v4805_v54, %v2304_v58  ;;  %v2326_v51 = vmul.f32 %v4807_v8, %v2325_v56  ;;  %v4368_v58 = vld [vmem:[#allocation11 + $0xd8] sm:$0xf0]  ;;  %2918 = vmatpush.bf16.msrb.mxu0 %v4359_v46  ;;  %v4681_v56 = vld [vmem:[#allocation11 + $0xac] sm:$0xf0] }
 0x48e   :  { %v2350_v52 = vmul.f32 %v4809_v13, %v2349_v20  ;;  %v4371_v14 = vor.u32 %v4684_v37, %v4368_v58  ;;  %v4343_v16 = vor.u32 %v4681_v56, %v4342_v32  ;;  %v4669_v37 = vld [vmem:[#allocation11 + $0x4c] sm:$0xf0]  ;;  %v4667_v58 = vld [vmem:[#allocation11 + $0x44] sm:$0xf] }
 0x48f   :  { %v2309_v18 = vsel %vm2308_vm1, %v4805_v54, %v2305_v33  ;;  %v2327_v3 = vadd.f32 %v4807_v8, %v2326_v51  ;;  %v4683_v54 = vld [vmem:[#allocation11 + $0xc4] sm:$0xf]  ;;  %v4344_v51 = vld [vmem:[#allocation11 + $0xb0] sm:$0xf0]  ;;  %v4295_v56 = vor.u32 %v4669_v37, %v4294_v7 }
 0x490   :  { %v2314_v21 = vsel %vm2311_vm3, %v2313_v49, %v2309_v18  ;;  %v2351_v63 = vadd.f32 %v4809_v13, %v2350_v52  ;;  %v4679_v33 = vld [vmem:[#allocation11 + $0xa4] sm:$0xf]  ;;  %2957 = vmatpush.bf16.msra.mxu3 %v4371_v14  ;;  %v4682_v18 = vld [vmem:[#allocation11 + $0xb4] sm:$0xf0] }
 0x491   :  { %v2331_v53 = vsel %vm2330_vm6, %v4807_v8, %v2327_v3  ;;  %v2363_v23 = vmul.f32 %v4811_v34, %v2314_v21  ;;  %v4360_v8 = vld [vmem:[#allocation11 + $0xd0] sm:$0xf0]  ;;  %v4347_v20 = vor.u32 %v4679_v33, %v4344_v51  ;;  %v4351_v3 = vor.u32 %v4682_v18, %v4350_v50  ;;  %v4680_v21 = vld [vmem:[#allocation11 + $0xac] sm:$0xf]  ;;  %2919 = vmatpush.bf16.msrb.mxu0 %v4343_v16  ;;  %v4302_v33 = vld [vmem:[#allocation11 + $0x48] sm:$0xf] }
 0x492   :  { %v2336_v5 = vsel %vm2333_vm7, %v2335_v22, %v2331_v53  ;;  %v2355_v28 = vsel %vm2354_vm14, %v4809_v13, %v2351_v63  ;;  %v4363_v12 = vor.u32 %v4683_v54, %v4360_v8  ;;  %v4686_v13 = vld [vmem:[#allocation11 + $0xd4] sm:$0xf0]  ;;  %v4352_v22 = vld [vmem:[#allocation11 + $0xb8] sm:$0xf0]  ;;  %v306_v34 = vrot.slane %v5146_v59, 4 }
 0x493   :  { %v2362_v24 = vmul.f32 %v2336_v5, %v5315_v30  ;;  %v2360_v39 = vsel %vm2357_vm15, %v2359_v29, %v2355_v28  ;;  %v4367_v55 = vor.u32 %v4686_v13, %v4366_v10  ;;  %v4355_v52 = vor.u32 %v4680_v21, %v4352_v22  ;;  %v4326_v63 = vld [vmem:[#allocation11 + $0x80] sm:$0xf]  ;;  %v4675_v28 = vld [vmem:[#allocation11 + $0x84] sm:$0xf]  ;;  %v4328_v29 = vld [vmem:[#allocation11 + $0x90] sm:$0xf0] }
 0x494   :  { %2931 = vmatpush.bf16.msrb.mxu1 %v4363_v12  ;;  %v4327_v62 = vor.u32 %v4677_v9, %v4326_v63  ;;  %v4670_v51 = vld [vmem:[#allocation11 + $0x54] sm:$0xf0]  ;;  %v4668_v50 = vld [vmem:[#allocation11 + $0x4c] sm:$0xf]  ;;  %v4304_v18 = vld [vmem:[#allocation11 + $0x58] sm:$0xf0] }
 0x495   :  { %v2364_v26 = vadd.f32 %v2363_v23, %v2362_v24  ;;  %2958 = vmatpush.bf16.msra.mxu3 %v4355_v52  ;;  %v4665_v21 = vld [vmem:[#allocation11 + $0x2c] sm:$0xf0]  ;;  %v4663_v22 = vld [vmem:[#allocation11 + $0x24] sm:$0xf]  ;;  %v4666_v52 = vld [vmem:[#allocation11 + $0x34] sm:$0xf0] }
 0x496   :  { %2920 = vmatpush.bf16.msrb.mxu0 %v4327_v62  ;;  %v4661_v62 = vld [vmem:[#allocation11 + $0xc] sm:$0xf0] }
 0x497   :  { %4812 = vtanh.f32 %v2364_v26  ;;  %v5338_v27 = vsel %vm2377_vm10, %v2364_v26, %v5315_v30 }
 0x498   :  { %2932 = vmatpush.bf16.msrb.mxu1 %v4347_v20  ;;  %v4307_v20 = vor.u32 %v4668_v50, %v4304_v18 }
 0x49a   :  { %2921 = vmatpush.bf16.msrb.mxu0 %v4311_v36 }
 0x49d   :  { %v4813_v35 = vpop.eup %4812 }
 0x49e   :  { %v2366_v41 = vmul.f32 %v4813_v35, %v2360_v39  ;;  %v4334_v35 = vld [vmem:[#allocation11 + $0x88] sm:$0xf]  ;;  %2922 = vmatpush.bf16.msrb.mxu0 %v4295_v56 }
 0x4a0   :  { %v2367_v6 = vpack.c.bf16 %v2366_v41, %v2366_v41  ;;  %v5342_v42 = vsel %vm2377_vm10, %v2366_v41, %v5321_v17  ;;  %v4383_v17 = vor.u32 %v4690_v19, %v4382_v47  ;;  %v4331_v41 = vor.u32 %v4675_v28, %v4328_v29  ;;  %v4671_v47 = vld [vmem:[#allocation11 + $0x64] sm:$0xf]  ;;  %v4264_v29 = vld [vmem:[#allocation11 + $0x10] sm:$0xf0] }
 0x4a1   :  { %v2382_v44 = vpack.c.bf16 %v5342_v42, %v5342_v42  ;;  %v4659_v28 = vld [vmem:[#allocation11 + $0x4] sm:$0xf] }
 0x4a2   :  { %2369 = vst [vmem:[#allocation5 + $0x5] sm:$0x1] %v2367_v6  ;;  %2943 = vmatpush.bf16.msra.mxu2 %v4383_v17  ;;  %v4678_v6 = vld [vmem:[#allocation11 + $0x94] sm:$0xf0]  ;;  %2933 = vmatpush.bf16.msrb.mxu1 %v4331_v41  ;;  %v4312_v17 = vld [vmem:[#allocation11 + $0x70] sm:$0xf0] }
 0x4a3   :  { %2583 = vmatmul.bf16.vlgmr.msra.gmra.mxu0 %v2382_v44  ;;  %2596 = vmatmul.bf16.vlgmr.msra.gmra.mxu1 %v2382_v44  ;;  %v4335_v45 = vor.u32 %v4678_v6, %v4334_v35  ;;  %v4315_v1 = vor.u32 %v4671_v47, %v4312_v17  ;;  %v4660_v41 = vld [vmem:[#allocation11 + $0xc] sm:$0xf] }
 0x4a4   :  { %2609 = vmatmul.bf16.vlgmr.msrb.gmra.mxu2 %v2382_v44  ;;  %2622 = vmatmul.bf16.vlgmr.msrb.gmra.mxu3 %v2382_v44  ;;  %v4676_v44 = vld [vmem:[#allocation11 + $0x8c] sm:$0xf] }
 0x4a6   :  { %2944 = vmatpush.bf16.msra.mxu2 %v4367_v55  ;;  %v4296_v55 = vld [vmem:[#allocation11 + $0x50] sm:$0xf0]  ;;  %2934 = vmatpush.bf16.msrb.mxu1 %v4315_v1 }
 0x4a7   :  { %v4299_v16 = vor.u32 %v4667_v58, %v4296_v55 }
 0x4a9   :  { %v3071_v30 = vld [vmem:[#allocation5 + $0x5] sm:$0x1] }
 0x4aa   :  { %3110 = vst [vmem:[#allocation1 + $0x5] ss:$9 sm:$0xff] %v3071_v30  ;;  %2945 = vmatpush.bf16.msra.mxu2 %v4351_v3  ;;  %v4336_v30 = vld [vmem:[#allocation11 + $0x98] sm:$0xf0]  ;;  %v4278_v3 = vld [vmem:[#allocation11 + $0x20] sm:$0xf]  ;;  %2935 = vmatpush.bf16.msrb.mxu1 %v4299_v16 }
 0x4ab   :  { %v4339_v57 = vor.u32 %v4676_v44, %v4336_v30  ;;  %v4272_v30 = vld [vmem:[#allocation11 + $0x18] sm:$0xf0] }
 0x4ac   :  { %v4275_v43 = vor.u32 %v4660_v41, %v4272_v30 }
 0x4ad   :  { %2959 = vmatpush.bf16.msra.mxu3 %v4339_v57 }
 0x4ae   :  { %2946 = vmatpush.bf16.msra.mxu2 %v4335_v45  ;;  %v4267_v45 = vor.u32 %v4659_v28, %v4264_v29 }
 0x520   :  { %v2584_v31 = vpop.f32.mrf.mxu0  ;;  %v2597_v38 = vpop.f32.mrf.mxu1 }
 0x521   :  { %v2631_v49 = vrot.slane %v2597_v38, 6  ;;  %v4672_v38 = vld [vmem:[#allocation11 + $0x6c] sm:$0xf] }
 0x522   :  { %v4323_v13 = vor.u32 %v4672_v38, %v4320_v60 }
 0x523   :  { %v2634_v39 = vsel %vm275_vm5, %v2584_v31, %v2631_v49  ;;  %v4319_v31 = vor.u32 %v4674_v0, %v4318_v61  ;;  %v4303_v49 = vor.u32 %v4670_v51, %v4302_v33 }
 0x524   :  { %2960 = vmatpush.bf16.msra.mxu3 %v4323_v13 }
 0x525   :  { %2947 = vmatpush.bf16.msra.mxu2 %v4319_v31 }
 0x527   :  { %v2610_v53 = vpop.f32.mrf.mxu2  ;;  %v2623_v5 = vpop.f32.mrf.mxu3 }
 0x528   :  { %v2632_v23 = vrot.slane %v2610_v53, 4  ;;  %v2633_v24 = vrot.slane %v2623_v5, 2  ;;  %v2586_v25 = vpop.f32.mrf.mxu0  ;;  %v2599_v26 = vpop.f32.mrf.mxu1  ;;  %v4279_v53 = vor.u32 %v4665_v21, %v4278_v3  ;;  %v4286_v5 = vld [vmem:[#allocation11 + $0x28] sm:$0xf]  ;;  %2961 = vmatpush.bf16.msra.mxu3 %v4307_v20 }
 0x529   :  { %v4288_v25 = vld [vmem:[#allocation11 + $0x38] sm:$0xf0]  ;;  %v4262_v26 = vld [vmem:[#allocation11] sm:$0xf]  ;;  %2948 = vmatpush.bf16.msra.mxu2 %v4303_v49  ;;  %v4287_v63 = vor.u32 %v4666_v52, %v4286_v5  ;;  %v2718_v3 = vpop.permute.xlu0 %2717 }
 0x52a   :  { %v2635_v59 = vsel %vm277_vm8, %v2632_v23, %v2633_v24  ;;  %v4664_v24 = vld [vmem:[#allocation11 + $0x2c] sm:$0xf]  ;;  %2923 = vmatpush.bf16.msrb.mxu0 %v4279_v53  ;;  %v4263_v44 = vor.u32 %v4661_v62, %v4262_v26  ;;  %vm2719_vm13 = vcmp.eq.s32.totalorder %v2718_v3, 1 }
 0x52b   :  { %v2636_v2 = vsel %vm279_vm9, %v2634_v39, %v2635_v59  ;;  %v4291_v9 = vor.u32 %v4664_v24, %v4288_v25  ;;  %v4270_v39 = vld [vmem:[#allocation11 + $0x8] sm:$0xf]  ;;  %v4662_v59 = vld [vmem:[#allocation11 + $0x14] sm:$0xf0] }
 0x52c   :  { %v5350_v19 = vadd.f32 %v2636_v2, %v306_v34  ;;  %v4280_v34 = vld [vmem:[#allocation11 + $0x30] sm:$0xf0]  ;;  %v4271_v11 = vor.u32 %v4662_v59, %v4270_v39 }
 0x52d   :  { %v4283_v23 = vor.u32 %v4663_v22, %v4280_v34  ;;  %2949 = vmatpush.bf16.msra.mxu2 %v4287_v63  ;;  %2962 = vmatpush.bf16.msra.mxu3 %v4291_v9 }
 0x52e   :  { %v4256_v54 = vmul.f32 -1.442695, %v5350_v19  ;;  %v2659_v46 = vrot.slane %v5350_v19, 2  ;;  %v2683_v8 = vrot.slane %v5350_v19, 6  ;;  %2924 = vmatpush.bf16.msrb.mxu0 %v4263_v44  ;;  %v2680_v31 = vrot.slane %v5350_v19, 4 }
 0x52f   :  { %v2612_v10 = vpop.f32.mrf.mxu2  ;;  %v2625_v12 = vpop.f32.mrf.mxu3  ;;  %2936 = vmatpush.bf16.msrb.mxu1 %v4283_v23 }
 0x530   :  { %4814 = vpow2.f32 %v4256_v54  ;;  %v4257_v14 = vmul.f32 -1.442695, %v2659_v46  ;;  %v4258_v32 = vmul.f32 -1.442695, %v2683_v8 }
 0x531   :  { %2950 = vmatpush.bf16.msra.mxu2 %v4271_v11  ;;  %2963 = vmatpush.bf16.msra.mxu3 %v4275_v43  ;;  %v4698_v43 = vld [vmem:[#allocation12 + $0x38] sm:$0xff] }
 0x532   :  { %4816 = vpow2.f32 %v4257_v14  ;;  %3167 = vmatpush.bf16.msra.mxu0 %v4698_v43 }
 0x533   :  { %4818 = vpow2.f32 %v4258_v32  ;;  %2937 = vmatpush.bf16.msrb.mxu1 %v4267_v45 }
 0x536   :  { %v4815_v35 = vpop.eup %4814 }
 0x537   :  { %v2642_v6 = vadd.f32 1.0, %v4815_v35 }
 0x538   :  { %v4817_v2 = vpop.eup %4816 }
 0x539   :  { %v4819_v57 = vpop.eup %4818  ;;  %4820 = vrcp.f32 %v2642_v6  ;;  %v2664_v47 = vadd.f32 1.0, %v4817_v2  ;;  %v2654_v54 = vand.u32 2147483648, %v2642_v6  ;;  %v2652_v8 = vand.u32 2147483647, %v2642_v6 }
 0x53a   :  { %v2688_v36 = vadd.f32 1.0, %v4819_v57  ;;  %vm2648_vm2 = vweird.f32 %v2642_v6  ;;  %v310_v2 = vrot.slane %v5150_v4, 6  ;;  %v4696_v4 = vld [vmem:[#allocation12 + $0x28] sm:$0xff] }
 0x53b   :  { %4822 = vrcp.f32 %v2664_v47  ;;  %v2676_v13 = vand.u32 2147483648, %v2664_v47  ;;  %v2674_v58 = vand.u32 2147483647, %v2664_v47  ;;  %v2655_v14 = vor.u32 1.1754944e-38, %v2654_v54 }
 0x53c   :  { %4824 = vrcp.f32 %v2688_v36  ;;  %vm2653_vm6 = vcmp.eq.f32.partialorder %v2652_v8, 8.507059e+37  ;;  %vm2670_vm7 = vweird.f32 %v2664_v47  ;;  %v2700_v53 = vand.u32 2147483648, %v2688_v36 }
 0x53d   :  { %4826 = vtanh.f32 %v2680_v31  ;;  %v2677_v33 = vor.u32 1.1754944e-38, %v2676_v13  ;;  %vm2675_vm12 = vcmp.eq.f32.partialorder %v2674_v58, 8.507059e+37  ;;  %vm2694_vm15 = vweird.f32 %v2688_v36  ;;  %v4693_v58 = vld [vmem:[#allocation12 + $0x10] sm:$0xff] }
 0x53e   :  { %v2698_v5 = vand.u32 2147483647, %v2688_v36  ;;  %v2701_v23 = vor.u32 1.1754944e-38, %v2700_v53 }
 0x53f   :  { %v4821_v17 = vpop.eup %4820 }
 0x540   :  { %v2644_v61 = vmul.f32 %v4821_v17, %v2642_v6  ;;  %vm2649_vm1 = vweird.f32 %v4821_v17 }
 0x541   :  { %v4823_v0 = vpop.eup %4822  ;;  %vm2650_vm3 = vmor %vm2648_vm2, %vm2649_vm1  ;;  %vm2699_vm2 = vcmp.eq.f32.partialorder %v2698_v5, 8.507059e+37  ;;  %v4691_v5 = vld [vmem:[#allocation12] sm:$0xff] }
 0x542   :  { %v2645_v1 = vsub.f32 1.0, %v2644_v61  ;;  %v4825_v38 = vpop.eup %4824  ;;  %v2666_v60 = vmul.f32 %v4823_v0, %v2664_v47  ;;  %vm2671_vm4 = vweird.f32 %v4823_v0 }
 0x543   :  { %v2690_v46 = vmul.f32 %v4825_v38, %v2688_v36  ;;  %vm2672_vm10 = vmor %vm2670_vm7, %vm2671_vm4  ;;  %v4827_v51 = vpop.eup %4826  ;;  %vm2695_vm14 = vweird.f32 %v4825_v38 }
 0x544   :  { %v2646_v7 = vmul.f32 %v4821_v17, %v2645_v1  ;;  %v2667_v10 = vsub.f32 1.0, %v2666_v60  ;;  %vm2696_vm1 = vmor %vm2694_vm15, %vm2695_vm14 }
 0x545   :  { %v2691_v32 = vsub.f32 1.0, %v2690_v46  ;;  %v4695_v46 = vld [vmem:[#allocation12 + $0x20] sm:$0xff] }
 0x546   :  { %v2647_v12 = vadd.f32 %v4821_v17, %v2646_v7  ;;  %v2668_v37 = vmul.f32 %v4823_v0, %v2667_v10  ;;  %v5371_v10 = vpop.permute.xlu2 %3235 }
 0x547   :  { %v2692_v18 = vmul.f32 %v4825_v38, %v2691_v32 }
 0x548   :  { %v2651_v55 = vsel %vm2650_vm3, %v4821_v17, %v2647_v12  ;;  %v2669_v19 = vadd.f32 %v4823_v0, %v2668_v37  ;;  %v4694_v37 = vld [vmem:[#allocation12 + $0x18] sm:$0xff] }
 0x549   :  { %v2656_v56 = vsel %vm2653_vm6, %v2655_v14, %v2651_v55  ;;  %v2693_v22 = vadd.f32 %v4825_v38, %v2692_v18 }
 0x54a   :  { %v2673_v16 = vsel %vm2672_vm10, %v4823_v0, %v2669_v19  ;;  %v2705_v49 = vmul.f32 %v4827_v51, %v2656_v56 }
 0x54b   :  { %v2678_v50 = vsel %vm2675_vm12, %v2677_v33, %v2673_v16  ;;  %v2697_v52 = vsel %vm2696_vm1, %v4825_v38, %v2693_v22  ;;  %v4697_v38 = vld [vmem:[#allocation12 + $0x30] sm:$0xff]  ;;  %v4692_v33 = vld [vmem:[#allocation12 + $0x8] sm:$0xff] }
 0x54c   :  { %v2704_v20 = vmul.f32 %v2678_v50, %v5338_v27  ;;  %v2702_v25 = vsel %vm2699_vm2, %v2701_v23, %v2697_v52  ;;  %3168 = vmatpush.bf16.msra.mxu0 %v4697_v38  ;;  %v3218_v38 = vpop.permute.xlu0 %3217 }
 0x54e   :  { %v2706_v21 = vadd.f32 %v2705_v49, %v2704_v20  ;;  %v5376_v51 = vpop.permute.xlu2 %3229 }
 0x550   :  { %4828 = vtanh.f32 %v2706_v21  ;;  %v5359_v34 = vsel %vm2719_vm13, %v2706_v21, %v5338_v27  ;;  %3169 = vmatpush.bf16.msra.mxu0 %v4696_v4 }
 0x554   :  { %3170 = vmatpush.bf16.msra.mxu0 %v4695_v46 }
 0x556   :  { %v4829_v24 = vpop.eup %4828 }
 0x557   :  { %v2708_v26 = vmul.f32 %v4829_v24, %v2702_v25 }
 0x558   :  { %3171 = vmatpush.bf16.msra.mxu0 %v4694_v37 }
 0x559   :  { %v2709_v63 = vpack.c.bf16 %v2708_v26, %v2708_v26  ;;  %v5363_v9 = vsel %vm2719_vm13, %v2708_v26, %v5342_v42 }
 0x55a   :  { %v2724_v62 = vpack.c.bf16 %v5363_v9, %v5363_v9 }
 0x55b   :  { %2711 = vst [vmem:[#allocation5 + $0x6] sm:$0x1] %v2709_v63 }
 0x55c   :  { %2925 = vmatmul.bf16.vlgmr.msrb.gmra.mxu0 %v2724_v62  ;;  %2938 = vmatmul.bf16.vlgmr.msrb.gmra.mxu1 %v2724_v62 }
 0x55d   :  { %2951 = vmatmul.bf16.vlgmr.msra.gmra.mxu2 %v2724_v62  ;;  %2964 = vmatmul.bf16.vlgmr.msra.gmra.mxu3 %v2724_v62 }
 0x55e   :  { %3172 = vmatpush.bf16.msra.mxu0 %v4693_v58 }
 0x562   :  { %v3072_v27 = vld [vmem:[#allocation5 + $0x6] sm:$0x1]  ;;  %3173 = vmatpush.bf16.msra.mxu0 %v4692_v33 }
 0x563   :  { %3113 = vst [vmem:[#allocation1 + $0x6] ss:$9 sm:$0xff] %v3072_v27 }
 0x566   :  { %3174 = vmatpush.bf16.msra.mxu0 %v4691_v5 }
 0x5d9   :  { %v2926_v28 = vpop.f32.mrf.mxu0  ;;  %v2939_v29 = vpop.f32.mrf.mxu1 }
 0x5da   :  { %v2973_v35 = vrot.slane %v2939_v29, 6 }
 0x5dc   :  { %v2976_v30 = vsel %vm275_vm5, %v2926_v28, %v2973_v35 }
 0x5e0   :  { %v2952_v39 = vpop.f32.mrf.mxu2  ;;  %v2965_v59 = vpop.f32.mrf.mxu3 }
 0x5e1   :  { %v2974_v41 = vrot.slane %v2952_v39, 4  ;;  %v2975_v6 = vrot.slane %v2965_v59, 2  ;;  %v2928_v44 = vpop.f32.mrf.mxu0  ;;  %v2941_v42 = vpop.f32.mrf.mxu1 }
 0x5e2   :  { %v3060_v59 = vpop.permute.xlu2 %3059 }
 0x5e3   :  { %v2977_v45 = vsel %vm277_vm8, %v2974_v41, %v2975_v6  ;;  %vm3061_vm12 = vcmp.eq.s32.totalorder %v3060_v59, 1 }
 0x5e4   :  { %v2978_v57 = vsel %vm279_vm9, %v2976_v30, %v2977_v45 }
 0x5e5   :  { %v2980_v11 = vadd.f32 %v2978_v57, %v310_v2 }
 0x5e7   :  { %v4388_v47 = vmul.f32 -1.442695, %v2980_v11  ;;  %v3001_v36 = vrot.slane %v2980_v11, 2  ;;  %v3025_v17 = vrot.slane %v2980_v11, 6  ;;  %v3022_v56 = vrot.slane %v2980_v11, 4 }
 0x5e8   :  { %v2954_v61 = vpop.f32.mrf.mxu2  ;;  %v2967_v0 = vpop.f32.mrf.mxu3 }
 0x5e9   :  { %4830 = vpow2.f32 %v4388_v47  ;;  %v4389_v1 = vmul.f32 -1.442695, %v3001_v36  ;;  %v4390_v31 = vmul.f32 -1.442695, %v3025_v17 }
 0x5eb   :  { %4832 = vpow2.f32 %v4389_v1  ;;  %v3224_v1 = vpop.permute.xlu1 %3223 }
 0x5ec   :  { %4834 = vpow2.f32 %v4390_v31  ;;  %v4717_v31 = vld [vmem:[%s5417_s6] ss:$0 sm:$0xff]  ;;  %vm3239_vm2 = vcmp.eq.s32.totalorder %v3224_v1, 1  ;;  %s4987_s6 = smov [#allocation14]  }
 0x5ed   :  { %s3299_s27 = sshll.u32 %s4987_s6, 4  ;;  %s3300_s27 = int_to_ptr.vmem [resolvable:$true] %s3299_s27 }
 0x5ef   :  { %v4831_v60 = vpop.eup %4830 }
 0x5f0   :  { %v2984_v7 = vadd.f32 1.0, %v4831_v60 }
 0x5f1   :  { %v4833_v54 = vpop.eup %4832 }
 0x5f2   :  { %v4835_v8 = vpop.eup %4834  ;;  %4836 = vrcp.f32 %v2984_v7  ;;  %v3006_v12 = vadd.f32 1.0, %v4833_v54  ;;  %v2996_v49 = vand.u32 2147483648, %v2984_v7  ;;  %v2994_v3 = vand.u32 2147483647, %v2984_v7 }
 0x5f3   :  { %v5373_v13 = vadd.f32 1.0, %v4835_v8  ;;  %vm2990_vm8 = vweird.f32 %v2984_v7  ;;  %v3221_v60 = vpop.permute.xlu1 %3220 }
 0x5f4   :  { %4838 = vrcp.f32 %v3006_v12  ;;  %v3018_v53 = vand.u32 2147483648, %v3006_v12  ;;  %v3016_v23 = vand.u32 2147483647, %v3006_v12  ;;  %v2997_v25 = vor.u32 1.1754944e-38, %v2996_v49 }
 0x5f5   :  { %4840 = vrcp.f32 %v5373_v13  ;;  %vm2995_vm4 = vcmp.eq.f32.partialorder %v2994_v3, 8.507059e+37  ;;  %vm3012_vm6 = vweird.f32 %v3006_v12  ;;  %v3042_v30 = vand.u32 2147483648, %v5373_v13 }
 0x5f6   :  { %4842 = vtanh.f32 %v3022_v56  ;;  %v3019_v27 = vor.u32 1.1754944e-38, %v3018_v53  ;;  %vm3017_vm10 = vcmp.eq.f32.partialorder %v3016_v23, 8.507059e+37  ;;  %vm3036_vm14 = vweird.f32 %v5373_v13 }
 0x5f7   :  { %v3040_v45 = vand.u32 2147483647, %v5373_v13  ;;  %v3043_v11 = vor.u32 1.1754944e-38, %v3042_v30 }
 0x5f8   :  { %v4837_v55 = vpop.eup %4836 }
 0x5f9   :  { %v2986_v14 = vmul.f32 %v4837_v55, %v2984_v7  ;;  %vm2991_vm5 = vweird.f32 %v4837_v55  ;;  %vm3041_vm1 = vcmp.eq.f32.partialorder %v3040_v45, 8.507059e+37 }
 0x5fa   :  { %v4839_v32 = vpop.eup %4838  ;;  %vm2992_vm9 = vmor %vm2990_vm8, %vm2991_vm5  ;;  %vm3238_vm5 = vcmp.eq.s32.totalorder %v3221_v60, 1  ;;  %vm3237_vm8 = vcmp.eq.s32.totalorder %v3218_v38, 1 }
 0x5fb   :  { %v2987_v19 = vsub.f32 1.0, %v2986_v14  ;;  %v4841_v16 = vpop.eup %4840  ;;  %v3008_v50 = vmul.f32 %v4839_v32, %v3006_v12  ;;  %vm3013_vm3 = vweird.f32 %v4839_v32 }
 0x5fc   :  { %v3032_v20 = vmul.f32 %v4841_v16, %v5373_v13  ;;  %vm3014_vm7 = vmor %vm3012_vm6, %vm3013_vm3  ;;  %v4843_v29 = vpop.eup %4842  ;;  %vm3037_vm13 = vweird.f32 %v4841_v16  ;;  %vm3243_vm3 = vcmp.eq.s32.totalorder %v5371_v10, 1 }
 0x5fd   :  { %v2988_v18 = vmul.f32 %v4837_v55, %v2987_v19  ;;  %v3009_v21 = vsub.f32 1.0, %v3008_v50  ;;  %vm3038_vm15 = vmor %vm3036_vm14, %vm3037_vm13  ;;  %v3227_v50 = vpop.permute.xlu1 %3226 }
 0x5fe   :  { %v3033_v26 = vsub.f32 1.0, %v3032_v20 }
 0x5ff   :  { %v2989_v22 = vadd.f32 %v4837_v55, %v2988_v18  ;;  %v3010_v52 = vmul.f32 %v4839_v32, %v3009_v21 }
 0x600   :  { %v3034_v39 = vmul.f32 %v4841_v16, %v3033_v26 }
 0x601   :  { %v2993_v24 = vsel %vm2992_vm9, %v4837_v55, %v2989_v22  ;;  %v3011_v63 = vadd.f32 %v4839_v32, %v3010_v52 }
 0x602   :  { %v2998_v62 = vsel %vm2995_vm4, %v2997_v25, %v2993_v24  ;;  %v3035_v42 = vadd.f32 %v4841_v16, %v3034_v39  ;;  %vm3240_vm4 = vcmp.eq.s32.totalorder %v3227_v50, 1 }
 0x603   :  { %v3015_v28 = vsel %vm3014_vm7, %v4839_v32, %v3011_v63  ;;  %v3047_v6 = vmul.f32 %v4843_v29, %v2998_v62  ;;  %v3233_v32 = vpop.permute.xlu0 %3232 }
 0x604   :  { %v3020_v35 = vsel %vm3017_vm10, %v3019_v27, %v3015_v28  ;;  %v3039_v57 = vsel %vm3038_vm15, %v4841_v16, %v3035_v42  ;;  %vm3242_vm9 = vcmp.eq.s32.totalorder %v3233_v32, 1 }
 0x605   :  { %v3046_v41 = vmul.f32 %v3020_v35, %v5359_v34  ;;  %v3044_v47 = vsel %vm3041_vm1, %v3043_v11, %v3039_v57 }
 0x607   :  { %v3048_v44 = vadd.f32 %v3047_v6, %v3046_v41 }
 0x609   :  { %4844 = vtanh.f32 %v3048_v44  ;;  %v3063_v2 = vsel %vm3061_vm12, %v3048_v44, %v5359_v34 }
 0x60a   :  { %3065 = vst [vmem:[#allocation3] sm:$0x3] %v3063_v2 }
 0x60f   :  { %v4845_v43 = vpop.eup %4844 }
 0x610   :  { %v3050_v36 = vmul.f32 %v4845_v43, %v3044_v47 }
 0x612   :  { %v3051_v17 = vpack.c.bf16 %v3050_v36, %v3050_v36  ;;  %v3062_v61 = vsel %vm3061_vm12, %v3050_v36, %v5363_v9 }
 0x613   :  { %3064 = vst [vmem:[#allocation2] sm:$0x3] %v3062_v61 }
 0x614   :  { %3053 = vst [vmem:[#allocation5 + $0x7] sm:$0x1] %v3051_v17 }
 0x61b   :  { %v3073_v0 = vld [vmem:[#allocation5 + $0x7] sm:$0x1] }
 0x61c   :  { %3116 = vst [vmem:[#allocation1 + $0x7] ss:$9 sm:$0xff] %v3073_v0 }
 0x623   :  { %v3117_v34 = vld [vmem:[#allocation1] sm:$0xff] }
 0x624   :  { %3175 = vmatmul.bf16.vlgmr.msra.gmra.mxu0 %v3117_v34 }
 0x6a1   :  { %v3176_v4 = vpop.f32.mrf.mxu0 }
 0x6a2   :  { %v3177_v7 = vadd.f32 %v4717_v31, %v3176_v4 }
 0x6a4   :  { %v3183_v54 = vrot.slane %v3177_v7, 2  ;;  %v3184_v46 = vrot.slane %v3177_v7, 4  ;;  %v3185_v8 = vrot.slane %v3177_v7, 6  ;;  %v3244_v19 = vsel %vm667_vm11, %v3177_v7, %v4717_v31 }
 0x6a5   :  { %vm3241_vm11 = vcmp.eq.s32.totalorder %v5376_v51, 1 }
 0x6a6   :  { %v3246_v9 = vsel %vm3238_vm5, %v3184_v46, %v4717_v31  ;;  %v3247_v12 = vsel %vm3239_vm2, %v3185_v8, %v4717_v31  ;;  %v3245_v58 = vsel %vm3237_vm8, %v3183_v54, %v4717_v31 }
 0x6a7   :  { %v3252_v13 = vrot.slane %v3246_v9, 4  ;;  %v3259_v37 = vrot.slane %v3247_v12, 4 }
 0x6a9   :  { %v3260_v55 = vsel %vm111_vm0, %v3259_v37, %v3245_v58  ;;  %v3178_v14 = vpop.f32.mrf.mxu0  ;;  %v3254_v16 = vsel %vm111_vm0, %v3252_v13, %v3244_v19 }
 0x6aa   :  { %v3264_v56 = vperm.slane %v3260_v55, %v5042_v40  ;;  %v3179_v33 = vadd.f32 %v4717_v31, %v3178_v14  ;;  %v3258_v21 = vperm.slane %v3254_v16, %v5042_v40 }
 0x6ac   :  { %v3277_v18 = vrot.slane %v3264_v56, 4  ;;  %v3186_v49 = vrot.slane %v3179_v33, 2  ;;  %v3187_v20 = vrot.slane %v3179_v33, 4  ;;  %v3188_v3 = vrot.slane %v3179_v33, 6 }
 0x6ad   :  { %v3248_v23 = vsel %vm3240_vm4, %v3179_v33, %v4717_v31 }
 0x6ae   :  { %v3250_v22 = vsel %vm3242_vm9, %v3187_v20, %v4717_v31  ;;  %v3251_v53 = vsel %vm3243_vm3, %v3188_v3, %v4717_v31  ;;  %v3278_v52 = vsel %vm111_vm0, %v3277_v18, %v3258_v21  ;;  %v3249_v24 = vsel %vm3241_vm11, %v3186_v49, %v4717_v31 }
 0x6af   :  { %v3265_v15 = vrot.slane %v3250_v22, 4  ;;  %v3271_v5 = vrot.slane %v3251_v53, 4  ;;  %v3282_v10 = vperm.slane %v3278_v52, %v5044_v48 }
 0x6b1   :  { %v3266_v25 = vsel %vm111_vm0, %v3265_v15, %v3248_v23  ;;  %v3272_v26 = vsel %vm111_vm0, %v3271_v5, %v3249_v24  ;;  %v3291_v29 = vrot.slane %v3282_v10, 4 }
 0x6b2   :  { %v3276_v63 = vperm.slane %v3272_v26, %v5042_v40  ;;  %v3270_v62 = vperm.slane %v3266_v25, %v5042_v40 }
 0x6b4   :  { %v3283_v27 = vrot.slane %v3276_v63, 4 }
 0x6b6   :  { %v3284_v28 = vsel %vm111_vm0, %v3283_v27, %v3270_v62 }
 0x6b7   :  { %v3288_v51 = vperm.slane %v3284_v28, %v5044_v48 }
 0x6b9   :  { %v3289_v35 = vrot.slane %v3288_v51, 4  ;;  %v3292_v39 = vsel %vm111_vm0, %v3288_v51, %v3291_v29 }
 0x6ba   :  { %3294 = vst [vmem:[#allocation14 + $0x8] sm:$0xff] %v3292_v39 }
 0x6bb   :  { %v3290_v40 = vsel %vm111_vm0, %v3289_v35, %v3282_v10 }
 0x6bc   :  { %3293 = vst [vmem:[#allocation14] sm:$0xff] %v3290_v40 }
 0x6bd   :  { %3307 = dma.vmem_to_hbm [thread:$0]  %s3300_s27, 256, %s3302_s30, [#allocation8], %s4988_s8, %s4988_s8, %s4989_s9  }
 0x6be   :  { %4973 = dma.done.wait [#allocation8], 256  }
 0x6bf   :  { %4974 = vsyncadd [#allocation8], 4294967040 }
 0x6c0   :  { %3312 = vsyncpa [#allocation7], 1 }
 0x6c1   :  { %3313 = vsyncpa [#allocation10], 1 }
 0x6c2   :  { %3314 = vsyncpa [#allocation13], 1 }
 0x6c3   :  { %3315 = vsyncpa [#allocation8], 1 }

</bundles_post_ra>
